<compile_context>
chip_gen: v7x
topology: tpu7x:2x2x1
jax: 0.10.0
libtpu: 0.0.40
codegen_flags: <defaults>
</compile_context>

<pallas_src>
import jax
import jax.numpy as jnp
import numpy as np
from jax.experimental import pallas as pl
from jax.experimental.pallas import tpu as pltpu

MATMUL_DTYPE = jnp.bfloat16     # MXU-rated operand dtype; accumulation stays f32.


def _softplus(x):
    # matches torch.nn.Softplus(beta=1, threshold=20); clamp keeps exp finite.
    return jnp.where(x > 20.0, x, jnp.log1p(jnp.exp(jnp.minimum(x, 20.0))))


# ---------------------------------------------------------------------------
# One-time parameter preparation (hoisted out of the forward pass).
# ---------------------------------------------------------------------------
def _phase_conv_weight(w):
    """torch Conv2d weight (O, I, 3, 3) -> phase-space taps (3, 3, 4*O, 4*I).

    A full-res 3x3 conv (padding=1) on the 2x-upsampled grid equals a 9-tap
    low-res conv over phase channels k = (2a+b)*C + c, with
    ky = 2*di + (a'-a) + 1, kx = 2*dj + (b'-b) + 1.
    """
    w = np.asarray(w)
    O, I = w.shape[0], w.shape[1]
    wph = np.zeros((3, 3, 4 * O, 4 * I), np.float32)
    for a in range(2):
        for b in range(2):
            for ap in range(2):
                for bp in range(2):
                    for di in (-1, 0, 1):
                        for dj in (-1, 0, 1):
                            ky = 2 * di + (ap - a) + 1
                            kx = 2 * dj + (bp - b) + 1
                            if 0 <= ky <= 2 and 0 <= kx <= 2:
                                wph[di + 1, dj + 1,
                                    (2 * a + b) * O:(2 * a + b + 1) * O,
                                    (2 * ap + bp) * I:(2 * ap + bp + 1) * I] = \
                                    w[:, :, ky, kx]
    return wph


def prepare_params(params):
    """Re-layout + downcast the torch weights once (not per forward call)."""
    w_up, w1, w2 = params['w_up'], params['w1'], params['w2']
    cout = w_up.shape[1]
    # ConvTranspose2d(k=2,s=2): up[o,2i+a,2j+b] = sum_c w_up[c,o,a,b] * x[c,i,j]
    # -> pure (4*Cout, Cin) channel matmul in phase space.
    wup_ph = np.transpose(np.asarray(w_up), (2, 3, 1, 0)).reshape(4 * cout, -1)

    def conv_w(w):
        wph = _phase_conv_weight(w)                      # (3, 3, K, K)
        K = wph.shape[2]
        # (di, out, dj, in) -> (3, K, 3K): column taps folded into contraction.
        return jnp.asarray(wph.transpose(0, 2, 1, 3).reshape(3, K, 3 * K),
                           MATMUL_DTYPE)

    return {'wup_ph': jnp.asarray(wup_ph, MATMUL_DTYPE),
            'w1_ph': conv_w(w1),
            'w2_ph': conv_w(w2)}


# ---------------------------------------------------------------------------
# Fused forward
# ---------------------------------------------------------------------------
def unet_up_block_forward(x, bridge, prepped):
    """x: (N, Cin, H, W), bridge: (N, Cout, >=2H, >=2W) -> (N, Cout, 2H, 2W)."""
    wup_ph, w1_ph, w2_ph = prepped['wup_ph'], prepped['w1_ph'], prepped['w2_ph']
    N, Cin, H, W = x.shape
    Cout = wup_ph.shape[0] // 4
    K = 4 * Cout                              # phase channels of the conv block
    Hp, Wp = H + 2, W + 2                     # zero-padded low-res plane
    Wpad = ((Wp + 127) // 128) * 128          # lane-aligned padded row width
    M = N * Hp * Wpad                         # flattened padded spatial (lanes)
    G = Wpad                                  # leading margin  = one aligned row
    TRAIL = Wpad                              # trailing margin = one aligned row
    L = G + M + TRAIL
    Hu, Wu = 2 * H, 2 * W
    cdt = MATMUL_DTYPE

    # ---- input layout prep (cheap XLA glue on the inputs) -------------------
    pad4 = ((0, 0), (0, 0), (1, 1), (1, Wpad - W - 1))
    # x, channels-leading, zero-padded, flattened: (Cin, M), bf16
    x_pf = jnp.pad(jnp.transpose(x, (1, 0, 2, 3)), pad4).astype(cdt).reshape(Cin, M)
    # center-cropped bridge, space-to-depth (phases leading), padded: (K, M)
    dy0 = (bridge.shape[2] - Hu) // 2
    dx0 = (bridge.shape[3] - Wu) // 2
    crop = bridge[:, :, dy0:dy0 + Hu, dx0:dx0 + Wu]
    crop_ph = jnp.transpose(crop.reshape(N, Cout, H, 2, W, 2),
                            (3, 5, 1, 0, 2, 4)).reshape(K, N, H, W)
    crop_pf = jnp.pad(crop_ph, pad4).astype(cdt).reshape(K, M)
    # 0/1 interior mask (ring + row-pad columns are 0): (1, M) f32
    mask = jnp.pad(jnp.ones((1, N, H, W), jnp.float32), pad4).reshape(1, M)

    # ---- the single fused kernel --------------------------------------------
    def kernel(x_ref, crop_ref, mask_ref, wup_ref, w1_ref, w2_ref, o_ref, stk_ref):
        # Zero only the margin lanes, once; the interior is fully overwritten by
        # the three column-shift stores below before any read.
        stk_ref[:, 0:G + 1] = jnp.zeros((3 * K, G + 1), cdt)
        stk_ref[:, G + M - 1:L] = jnp.zeros((3 * K, TRAIL + 1), cdt)

        # ConvTranspose2d(k2,s2) == pure channel matmul in phase space; + skip.
        # x_pf / crop_pf have zero borders, so the sum is correctly zero-padded.
        up = jnp.dot(wup_ref[...], x_ref[...], preferred_element_type=jnp.float32)
        val0 = up + crop_ref[...].astype(jnp.float32)

        def conv3x3_softplus(w_ref, center_f32):
            cb = center_f32.astype(cdt)
            # Column-shifted copies (dj = -1 / 0 / +1) of the padded activation:
            # the single in-register value is stored at lane offsets G+1/G/G-1,
            # so every matmul read below is a lane-tile-aligned slice.
            stk_ref[0 * K:1 * K, G + 1:G + M + 1] = cb
            stk_ref[1 * K:2 * K, G:G + M] = cb
            stk_ref[2 * K:3 * K, G - 1:G + M - 1] = cb
            # 3 dots (contraction 3K) instead of 9 (contraction K): row taps are
            # +/-Wpad aligned slices, column taps live in the contraction dim.
            acc = jnp.dot(w_ref[0], stk_ref[:, G - Wpad:G - Wpad + M],
                          preferred_element_type=jnp.float32)
            acc += jnp.dot(w_ref[1], stk_ref[:, G:G + M],
                           preferred_element_type=jnp.float32)
            acc += jnp.dot(w_ref[2], stk_ref[:, G + Wpad:G + Wpad + M],
                           preferred_element_type=jnp.float32)
            return _softplus(acc)

        h1 = conv3x3_softplus(w1_ref, val0)
        # Re-pad for the 2nd conv: single multiply with the 0/1 mask (no select).
        h2 = conv3x3_softplus(w2_ref, h1 * mask_ref[...])
        # Wrapper crop discards the ring, so no final masking is needed.
        o_ref[...] = h2.astype(o_ref.dtype)

    out_pf = pl.pallas_call(
        kernel,
        out_shape=jax.ShapeDtypeStruct((K, M), jnp.float32),
        in_specs=[pl.BlockSpec(memory_space=pltpu.MemorySpace.VMEM)] * 6,
        out_specs=pl.BlockSpec(memory_space=pltpu.MemorySpace.VMEM),
        scratch_shapes=[pltpu.VMEM((3 * K, L), cdt)],
        compiler_params=pltpu.CompilerParams(vmem_limit_bytes=32 * 1024 * 1024),
    )(x_pf, crop_pf, mask, wup_ph, w1_ph, w2_ph)

    # ---- output unpack: drop padding, phase -> space, NCHW ------------------
    out = out_pf.reshape(2, 2, Cout, N, Hp, Wpad)[:, :, :, :, 1:H + 1, 1:W + 1]
    out = jnp.transpose(out, (3, 2, 4, 0, 5, 1)).reshape(N, Cout, Hu, Wu)
    return out


# ---------------------------------------------------------------------------
# Pure-JAX reference (NCHW f32, mirrors the PyTorch module exactly)
# ---------------------------------------------------------------------------
def reference_forward(x, bridge, params):
    w_up, w1, w2 = params['w_up'], params['w1'], params['w2']
    N, Cin, H, W = x.shape
    Cout = w_up.shape[1]
    # ConvTranspose2d(k=2,s=2): out[n,o,2i+a,2j+b] = sum_c x[n,c,i,j] w[c,o,a,b]
    contrib = jnp.einsum('ncij,coab->noiajb', x, w_up)
    up = contrib.reshape(N, Cout, 2 * H, 2 * W)
    Hu, Wu = 2 * H, 2 * W
    _, _, bh, bw = bridge.shape
    dy = (bh - Hu) // 2
    dx = (bw - Wu) // 2
    out = up + bridge[:, :, dy:dy + Hu, dx:dx + Wu]
    dn = ('NCHW', 'OIHW', 'NCHW')
    out = jax.lax.conv_general_dilated(out, w1, (1, 1), ((1, 1), (1, 1)),
                                       dimension_numbers=dn)
    out = _softplus(out)
    out = jax.lax.conv_general_dilated(out, w2, (1, 1), ((1, 1), (1, 1)),
                                       dimension_numbers=dn)
    out = _softplus(out)
    return out


if __name__ == "__main__":
    key = jax.random.PRNGKey(0)
    k1, k2, k3, k4, k5 = jax.random.split(key, 5)

    # UNetUpBlock(in_size=8, out_size=4, up_mode='upconv', padding=True,
    #             batch_norm=False, use_bias=False, skip_conn=True,
    #             activation=nn.Softplus)
    in_size, out_size = 8, 4
    N, H, W = 2, 16, 16                   # x: (N, 8, 16, 16); bridge is 2x spatial

    x = jax.random.normal(k1, (N, in_size, H, W), jnp.float32)
    bridge = jax.random.normal(k2, (N, out_size, 2 * H, 2 * W), jnp.float32)

    params = {
        # ConvTranspose2d weight: (in, out, 2, 2)
        'w_up': 0.1 * jax.random.normal(k3, (in_size, out_size, 2, 2), jnp.float32),
        # Conv2d weights: (out, in, 3, 3), bias=False
        'w1': 0.1 * jax.random.normal(k4, (out_size, out_size, 3, 3), jnp.float32),
        'w2': 0.1 * jax.random.normal(k5, (out_size, out_size, 3, 3), jnp.float32),
    }

    prepped = prepare_params(params)      # one-time weight re-layout (hoisted)

    fwd = jax.jit(unet_up_block_forward)
    out = jax.block_until_ready(fwd(x, bridge, prepped))

    ref = reference_forward(x, bridge, params)
    assert out.shape == (N, out_size, 2 * H, 2 * W), out.shape
    # bf16 matmul operands (per perf review) vs. f32 reference -> loosened tol;
    # accumulation stays f32 (preferred_element_type) which bounds the error.
    assert jnp.allclose(out, ref, atol=5e-2, rtol=5e-2), \
        float(jnp.max(jnp.abs(out - ref)))
    print("KERNEL_OK")
</pallas_src>

<mosaic_0001>
module attributes {stable_mosaic.version = 11 : i64} {
  func.func @kernel(%arg0: memref<8x4608xbf16, #tpu.memory_space<vmem>>, %arg1: memref<16x4608xbf16, #tpu.memory_space<vmem>>, %arg2: memref<1x4608xf32, #tpu.memory_space<vmem>>, %arg3: memref<16x8xbf16, #tpu.memory_space<vmem>>, %arg4: memref<3x16x48xbf16, #tpu.memory_space<vmem>>, %arg5: memref<3x16x48xbf16, #tpu.memory_space<vmem>>, %arg6: memref<16x4608xf32, #tpu.memory_space<vmem>>, %arg7: memref<48x4864xbf16, #tpu.memory_space<vmem>>) attributes {dimension_semantics = [], scalar_prefetch = 0 : i64, scratch_operands = 1 : i64, tpu.core_type = #tpu.core_type<tc>} {
    %cst = arith.constant 0.000000e+00 : bf16
    %0 = vector.broadcast %cst : bf16 to vector<48x129xbf16>
    %c0 = arith.constant 0 : index
    %c0_0 = arith.constant 0 : index
    %1 = vector.load %arg7[%c0, %c0_0] : memref<48x4864xbf16, #tpu.memory_space<vmem>>, vector<48x129xbf16>
    tpu.vector_store %arg7[%c0, %c0_0], %0 {strides = array<i32>} : memref<48x4864xbf16, #tpu.memory_space<vmem>>, vector<48x129xbf16>,
    %cst_1 = arith.constant 0.000000e+00 : bf16
    %2 = vector.broadcast %cst_1 : bf16 to vector<48x129xbf16>
    %c0_2 = arith.constant 0 : index
    %c4735 = arith.constant 4735 : index
    %3 = vector.load %arg7[%c0_2, %c4735] : memref<48x4864xbf16, #tpu.memory_space<vmem>>, vector<48x129xbf16>
    tpu.vector_store %arg7[%c0_2, %c4735], %2 {strides = array<i32>} : memref<48x4864xbf16, #tpu.memory_space<vmem>>, vector<48x129xbf16>,
    %c0_3 = arith.constant 0 : index
    %c0_4 = arith.constant 0 : index
    %4 = vector.load %arg3[%c0_3, %c0_4] : memref<16x8xbf16, #tpu.memory_space<vmem>>, vector<16x8xbf16>
    %c0_5 = arith.constant 0 : index
    %c0_6 = arith.constant 0 : index
    %5 = vector.load %arg0[%c0_5, %c0_6] : memref<8x4608xbf16, #tpu.memory_space<vmem>>, vector<8x4608xbf16>
    %cst_7 = arith.constant dense<0.000000e+00> : vector<16x4608xf32>
    %6 = tpu.matmul %4, %5, %cst_7 {dimension_numbers = #tpu.dot_dimension_numbers<[1], [0], [0], [1], [0, 0, 1, 1], [], []>} : vector<16x8xbf16>, vector<8x4608xbf16>, vector<16x4608xf32> -> vector<16x4608xf32>
    %c0_8 = arith.constant 0 : index
    %c0_9 = arith.constant 0 : index
    %7 = vector.load %arg1[%c0_8, %c0_9] : memref<16x4608xbf16, #tpu.memory_space<vmem>>, vector<16x4608xbf16>
    %8 = arith.extf %7 : vector<16x4608xbf16> to vector<16x4608xf32>
    %9 = arith.addf %6, %8 : vector<16x4608xf32>
    %10 = arith.truncf %9 : vector<16x4608xf32> to vector<16x4608xbf16>
    %c0_10 = arith.constant 0 : index
    %c129 = arith.constant 129 : index
    %11 = vector.load %arg7[%c0_10, %c129] : memref<48x4864xbf16, #tpu.memory_space<vmem>>, vector<16x4608xbf16>
    tpu.vector_store %arg7[%c0_10, %c129], %10 {strides = array<i32>} : memref<48x4864xbf16, #tpu.memory_space<vmem>>, vector<16x4608xbf16>,
    %c16 = arith.constant 16 : index
    %c128 = arith.constant 128 : index
    %12 = vector.load %arg7[%c16, %c128] : memref<48x4864xbf16, #tpu.memory_space<vmem>>, vector<16x4608xbf16>
    tpu.vector_store %arg7[%c16, %c128], %10 {strides = array<i32>} : memref<48x4864xbf16, #tpu.memory_space<vmem>>, vector<16x4608xbf16>,
    %c32 = arith.constant 32 : index
    %c127 = arith.constant 127 : index
    %13 = vector.load %arg7[%c32, %c127] : memref<48x4864xbf16, #tpu.memory_space<vmem>>, vector<16x4608xbf16>
    tpu.vector_store %arg7[%c32, %c127], %10 {strides = array<i32>} : memref<48x4864xbf16, #tpu.memory_space<vmem>>, vector<16x4608xbf16>,
    %c0_11 = arith.constant 0 : index
    %c0_12 = arith.constant 0 : index
    %c0_13 = arith.constant 0 : index
    %14 = vector.load %arg4[%c0_11, %c0_12, %c0_13] : memref<3x16x48xbf16, #tpu.memory_space<vmem>>, vector<1x16x48xbf16>
    %15 = vector.shape_cast %14 : vector<1x16x48xbf16> to vector<16x48xbf16>
    %c0_14 = arith.constant 0 : index
    %c0_15 = arith.constant 0 : index
    %16 = vector.load %arg7[%c0_14, %c0_15] : memref<48x4864xbf16, #tpu.memory_space<vmem>>, vector<48x4608xbf16>
    %cst_16 = arith.constant dense<0.000000e+00> : vector<16x4608xf32>
    %17 = tpu.matmul %15, %16, %cst_16 {dimension_numbers = #tpu.dot_dimension_numbers<[1], [0], [0], [1], [0, 0, 1, 1], [], []>} : vector<16x48xbf16>, vector<48x4608xbf16>, vector<16x4608xf32> -> vector<16x4608xf32>
    %c1 = arith.constant 1 : index
    %c0_17 = arith.constant 0 : index
    %c0_18 = arith.constant 0 : index
    %18 = vector.load %arg4[%c1, %c0_17, %c0_18] : memref<3x16x48xbf16, #tpu.memory_space<vmem>>, vector<1x16x48xbf16>
    %19 = vector.shape_cast %18 : vector<1x16x48xbf16> to vector<16x48xbf16>
    %c0_19 = arith.constant 0 : index
    %c128_20 = arith.constant 128 : index
    %20 = vector.load %arg7[%c0_19, %c128_20] : memref<48x4864xbf16, #tpu.memory_space<vmem>>, vector<48x4608xbf16>
    %cst_21 = arith.constant dense<0.000000e+00> : vector<16x4608xf32>
    %21 = tpu.matmul %19, %20, %cst_21 {dimension_numbers = #tpu.dot_dimension_numbers<[1], [0], [0], [1], [0, 0, 1, 1], [], []>} : vector<16x48xbf16>, vector<48x4608xbf16>, vector<16x4608xf32> -> vector<16x4608xf32>
    %22 = arith.addf %17, %21 : vector<16x4608xf32>
    %c2 = arith.constant 2 : index
    %c0_22 = arith.constant 0 : index
    %c0_23 = arith.constant 0 : index
    %23 = vector.load %arg4[%c2, %c0_22, %c0_23] : memref<3x16x48xbf16, #tpu.memory_space<vmem>>, vector<1x16x48xbf16>
    %24 = vector.shape_cast %23 : vector<1x16x48xbf16> to vector<16x48xbf16>
    %c0_24 = arith.constant 0 : index
    %c256 = arith.constant 256 : index
    %25 = vector.load %arg7[%c0_24, %c256] : memref<48x4864xbf16, #tpu.memory_space<vmem>>, vector<48x4608xbf16>
    %cst_25 = arith.constant dense<0.000000e+00> : vector<16x4608xf32>
    %26 = tpu.matmul %24, %25, %cst_25 {dimension_numbers = #tpu.dot_dimension_numbers<[1], [0], [0], [1], [0, 0, 1, 1], [], []>} : vector<16x48xbf16>, vector<48x4608xbf16>, vector<16x4608xf32> -> vector<16x4608xf32>
    %27 = arith.addf %22, %26 : vector<16x4608xf32>
    %cst_26 = arith.constant 2.000000e+01 : f32
    %28 = vector.broadcast %cst_26 : f32 to vector<16x4608xf32>
    %29 = arith.cmpf ogt, %27, %28 : vector<16x4608xf32>
    %cst_27 = arith.constant 2.000000e+01 : f32
    %30 = vector.broadcast %cst_27 : f32 to vector<16x4608xf32>
    %31 = arith.minimumf %27, %30 : vector<16x4608xf32>
    %32 = math.exp %31 : vector<16x4608xf32>
    %33 = math.log1p %32 : vector<16x4608xf32>
    %34 = arith.select %29, %27, %33 : vector<16x4608xi1>, vector<16x4608xf32>
    %c0_28 = arith.constant 0 : index
    %c0_29 = arith.constant 0 : index
    %35 = vector.load %arg2[%c0_28, %c0_29] : memref<1x4608xf32, #tpu.memory_space<vmem>>, vector<1x4608xf32>
    %36 = vector.broadcast %35 : vector<1x4608xf32> to vector<16x4608xf32>
    %37 = arith.mulf %34, %36 : vector<16x4608xf32>
    %38 = arith.truncf %37 : vector<16x4608xf32> to vector<16x4608xbf16>
    %c0_30 = arith.constant 0 : index
    %c129_31 = arith.constant 129 : index
    %39 = vector.load %arg7[%c0_30, %c129_31] : memref<48x4864xbf16, #tpu.memory_space<vmem>>, vector<16x4608xbf16>
    tpu.vector_store %arg7[%c0_30, %c129_31], %38 {strides = array<i32>} : memref<48x4864xbf16, #tpu.memory_space<vmem>>, vector<16x4608xbf16>,
    %c16_32 = arith.constant 16 : index
    %c128_33 = arith.constant 128 : index
    %40 = vector.load %arg7[%c16_32, %c128_33] : memref<48x4864xbf16, #tpu.memory_space<vmem>>, vector<16x4608xbf16>
    tpu.vector_store %arg7[%c16_32, %c128_33], %38 {strides = array<i32>} : memref<48x4864xbf16, #tpu.memory_space<vmem>>, vector<16x4608xbf16>,
    %c32_34 = arith.constant 32 : index
    %c127_35 = arith.constant 127 : index
    %41 = vector.load %arg7[%c32_34, %c127_35] : memref<48x4864xbf16, #tpu.memory_space<vmem>>, vector<16x4608xbf16>
    tpu.vector_store %arg7[%c32_34, %c127_35], %38 {strides = array<i32>} : memref<48x4864xbf16, #tpu.memory_space<vmem>>, vector<16x4608xbf16>,
    %c0_36 = arith.constant 0 : index
    %c0_37 = arith.constant 0 : index
    %c0_38 = arith.constant 0 : index
    %42 = vector.load %arg5[%c0_36, %c0_37, %c0_38] : memref<3x16x48xbf16, #tpu.memory_space<vmem>>, vector<1x16x48xbf16>
    %43 = vector.shape_cast %42 : vector<1x16x48xbf16> to vector<16x48xbf16>
    %c0_39 = arith.constant 0 : index
    %c0_40 = arith.constant 0 : index
    %44 = vector.load %arg7[%c0_39, %c0_40] : memref<48x4864xbf16, #tpu.memory_space<vmem>>, vector<48x4608xbf16>
    %cst_41 = arith.constant dense<0.000000e+00> : vector<16x4608xf32>
    %45 = tpu.matmul %43, %44, %cst_41 {dimension_numbers = #tpu.dot_dimension_numbers<[1], [0], [0], [1], [0, 0, 1, 1], [], []>} : vector<16x48xbf16>, vector<48x4608xbf16>, vector<16x4608xf32> -> vector<16x4608xf32>
    %c1_42 = arith.constant 1 : index
    %c0_43 = arith.constant 0 : index
    %c0_44 = arith.constant 0 : index
    %46 = vector.load %arg5[%c1_42, %c0_43, %c0_44] : memref<3x16x48xbf16, #tpu.memory_space<vmem>>, vector<1x16x48xbf16>
    %47 = vector.shape_cast %46 : vector<1x16x48xbf16> to vector<16x48xbf16>
    %c0_45 = arith.constant 0 : index
    %c128_46 = arith.constant 128 : index
    %48 = vector.load %arg7[%c0_45, %c128_46] : memref<48x4864xbf16, #tpu.memory_space<vmem>>, vector<48x4608xbf16>
    %cst_47 = arith.constant dense<0.000000e+00> : vector<16x4608xf32>
    %49 = tpu.matmul %47, %48, %cst_47 {dimension_numbers = #tpu.dot_dimension_numbers<[1], [0], [0], [1], [0, 0, 1, 1], [], []>} : vector<16x48xbf16>, vector<48x4608xbf16>, vector<16x4608xf32> -> vector<16x4608xf32>
    %50 = arith.addf %45, %49 : vector<16x4608xf32>
    %c2_48 = arith.constant 2 : index
    %c0_49 = arith.constant 0 : index
    %c0_50 = arith.constant 0 : index
    %51 = vector.load %arg5[%c2_48, %c0_49, %c0_50] : memref<3x16x48xbf16, #tpu.memory_space<vmem>>, vector<1x16x48xbf16>
    %52 = vector.shape_cast %51 : vector<1x16x48xbf16> to vector<16x48xbf16>
    %c0_51 = arith.constant 0 : index
    %c256_52 = arith.constant 256 : index
    %53 = vector.load %arg7[%c0_51, %c256_52] : memref<48x4864xbf16, #tpu.memory_space<vmem>>, vector<48x4608xbf16>
    %cst_53 = arith.constant dense<0.000000e+00> : vector<16x4608xf32>
    %54 = tpu.matmul %52, %53, %cst_53 {dimension_numbers = #tpu.dot_dimension_numbers<[1], [0], [0], [1], [0, 0, 1, 1], [], []>} : vector<16x48xbf16>, vector<48x4608xbf16>, vector<16x4608xf32> -> vector<16x4608xf32>
    %55 = arith.addf %50, %54 : vector<16x4608xf32>
    %cst_54 = arith.constant 2.000000e+01 : f32
    %56 = vector.broadcast %cst_54 : f32 to vector<16x4608xf32>
    %57 = arith.cmpf ogt, %55, %56 : vector<16x4608xf32>
    %cst_55 = arith.constant 2.000000e+01 : f32
    %58 = vector.broadcast %cst_55 : f32 to vector<16x4608xf32>
    %59 = arith.minimumf %55, %58 : vector<16x4608xf32>
    %60 = math.exp %59 : vector<16x4608xf32>
    %61 = math.log1p %60 : vector<16x4608xf32>
    %62 = arith.select %57, %55, %61 : vector<16x4608xi1>, vector<16x4608xf32>
    %c0_56 = arith.constant 0 : index
    %c0_57 = arith.constant 0 : index
    %63 = vector.load %arg6[%c0_56, %c0_57] : memref<16x4608xf32, #tpu.memory_space<vmem>>, vector<16x4608xf32>
    tpu.vector_store %arg6[%c0_56, %c0_57], %62 {strides = array<i32>} : memref<16x4608xf32, #tpu.memory_space<vmem>>, vector<16x4608xf32>,
    return
  }
}

</mosaic_0001>

<bundles_post_ra>
// kernel: unet_up_block_forward.1
= control target key start
LH: loop header
LB: loop body
LE: loop exit
PB: predicated region body
PF: predicated region fallthrough
CT: control target
= control target key end

     0   :  { %vm265_vm0 = vcmask 1043456   ;;  %v10891_v2 = vmov 0   ;;  %vm261_vm1 = vcmask 64512   ;;  %vm25_vm2 = vcmask 7168   ;;  %s10892_s24 = smov 1   ;;  %s10893_s29 = smov 127   ;;  %s15900_s0 = inlined_call_operand.vmem [shape: bf16[8,4608], index: 0, kind: input, shape index: {}]   ;;  %s15901_s3 = inlined_call_operand.vmem [shape: bf16[16,8], index: 3, kind: input, shape index: {}]   ;;  %s15902_s1 = inlined_call_operand.vmem [shape: bf16[16,4608], index: 1, kind: input, shape index: {}]   ;;  %s15903_s4 = inlined_call_operand.vmem [shape: bf16[3,16,48], index: 4, kind: input, shape index: {}]   ;;  %s15904_s2 = inlined_call_operand.vmem [shape: f32[1,4608], index: 2, kind: input, shape index: {}]   ;;  %s15905_s5 = inlined_call_operand.vmem [shape: bf16[3,16,48], index: 5, kind: input, shape index: {}]   ;;  %s15906_s6 = inlined_call_operand.vmem [shape: f32[16,4608], index: 6, kind: output, shape index: {}]  }
   0x1   :  { %v40_v0 = vld [vmem:[%s15900_s0] sm:$0xff]  ;;  %v41_v1 = vld [vmem:[%s15900_s0 + $0x8] sm:$0xff]  ;;  %406 = vmatprep.mubr.bf16.mxu0 %v10891_v2  ;;  %24 = vst [vmem:[#allocation2] sm:$0xff] %v10891_v2  ;;  %29 = vst [vmem:[#allocation2 + $0x260] sm:$0xff] %v10891_v2  ;;  %449 = vmatprep.mubr.bf16.mxu1 %v10891_v2  ;;  %vm31_vm3 = vcmask 1048568   ;;  %vm1365_vm4 = vcmask 1047560  }
   0x2   :  { %33 = vst [vmem:[#allocation2 + $0x128] sm:$0xff] %v10891_v2  ;;  %v9739_v3 = vcombine.high %v40_v0, %v40_v0  ;;  %v9741_v4 = vcombine.high %v41_v1, %v41_v1  ;;  %v9738_v5 = vcombine.low %v40_v0, %v40_v0  ;;  %v9740_v6 = vcombine.low %v41_v1, %v41_v1  ;;  %v42_v7 = vld [vmem:[%s15900_s0 + $0x10] sm:$0xff]  ;;  %v43_v10 = vld [vmem:[%s15900_s0 + $0x18] sm:$0xff]  ;;  %v10953_v13 = vld [vmem:[%s15901_s3] sm:$0xff]  }
   0x3   :  { %v9743_v8 = vcombine.high %v42_v7, %v42_v7  ;;  %v9742_v9 = vcombine.low %v42_v7, %v42_v7  ;;  %v9745_v14 = vcombine.high %v43_v10, %v43_v10  ;;  %v9744_v15 = vcombine.low %v43_v10, %v43_v10  ;;  %v44_v16 = vld [vmem:[%s15900_s0 + $0x20] sm:$0xff]  ;;  %v45_v17 = vld [vmem:[%s15900_s0 + $0x28] sm:$0xff]  ;;  %v46_v24 = vld [vmem:[%s15900_s0 + $0x30] sm:$0xff]  ;;  %28 = vst.msk [vmem:[#allocation2 + $0x138] sm:$0xff] %vm25_vm2, %v10891_v2 }
   0x4   :  { %9774 = vmatprep.subr.msk.bf16.mxu0 %vm265_vm0, %v9739_v3  ;;  %9776 = vmatprep.subr.msk.bf16.mxu1 %vm265_vm0, %v9741_v4  ;;  %v267_v11 = vsel %vm265_vm0, %v9738_v5, 0  ;;  %v273_v12 = vsel %vm265_vm0, %v9740_v6, 0  ;;  %v9747_v20 = vcombine.high %v44_v16, %v44_v16  ;;  %v9749_v21 = vcombine.high %v45_v17, %v45_v17  ;;  %v47_v25 = vld [vmem:[%s15900_s0 + $0x38] sm:$0xff]  ;;  %v48_v32 = vld [vmem:[%s15900_s0 + $0x40] sm:$0xff]  ;;  %v49_v33 = vld [vmem:[%s15900_s0 + $0x48] sm:$0xff]  ;;  %26 = vst.msk [vmem:[#allocation2 + $0x8] sm:$0xff] %vm25_vm2, %v10891_v2 }
   0x5   :  { %375 = vmatpush1.bf16.msra.mxu0 %v267_v11  ;;  %418 = vmatpush1.bf16.msra.mxu1 %v273_v12  ;;  %v279_v18 = vsel %vm265_vm0, %v9742_v9, 0  ;;  %v285_v19 = vsel %vm265_vm0, %v9744_v15, 0  ;;  %v9746_v22 = vcombine.low %v44_v16, %v44_v16  ;;  %v9748_v23 = vcombine.low %v45_v17, %v45_v17  ;;  %v50_v40 = vld [vmem:[%s15900_s0 + $0x50] sm:$0xff]  ;;  %v51_v41 = vld [vmem:[%s15900_s0 + $0x58] sm:$0xff]  ;;  %v52_v48 = vld [vmem:[%s15900_s0 + $0x60] sm:$0xff]  ;;  %30 = vst.msk [vmem:[#allocation2 + $0x268] sm:$0xff] %vm25_vm2, %v10891_v2 }
   0x6   :  { %9778 = vmatprep.subr.msk.bf16.mxu0 %vm265_vm0, %v9743_v8  ;;  %9780 = vmatprep.subr.msk.bf16.mxu1 %vm265_vm0, %v9745_v14  ;;  %v9751_v28 = vcombine.high %v46_v24, %v46_v24  ;;  %v9753_v29 = vcombine.high %v47_v25, %v47_v25  ;;  %v9750_v30 = vcombine.low %v46_v24, %v46_v24  ;;  %v53_v49 = vld [vmem:[%s15900_s0 + $0x68] sm:$0xff]  ;;  %v54_v56 = vld [vmem:[%s15900_s0 + $0x70] sm:$0xff]  ;;  %v55_v57 = vld [vmem:[%s15900_s0 + $0x78] sm:$0xff]  ;;  %vm1511_vm5 = vcmask 1039360  }
   0x7   :  { %v291_v26 = vsel %vm265_vm0, %v9746_v22, 0  ;;  %v297_v27 = vsel %vm265_vm0, %v9748_v23, 0  ;;  %v9752_v31 = vcombine.low %v47_v25, %v47_v25  ;;  %v9755_v36 = vcombine.high %v48_v32, %v48_v32  ;;  %v56_v0 = vld [vmem:[%s15900_s0 + $0x80] sm:$0xff]  ;;  %v57_v1 = vld [vmem:[%s15900_s0 + $0x88] sm:$0xff]  ;;  %v77_v14 = vld [vmem:[%s15902_s1 + $0x98] sm:$0xff]  ;;  %34 = vst.msk [vmem:[#allocation2 + $0x250] sm:$0xff] %vm31_vm3, %v10891_v2 }
   0x8   :  { %9775 = vmatmul.mubr.msk.bf16.vlgmr.msra.gmra.mrb[0].mxu0 %vm261_vm1, %v10953_v13  ;;  %9777 = vmatmul.mubr.msk.bf16.vlgmr.msra.gmra.mrb[0].mxu1 %vm261_vm1, %v10953_v13  ;;  %v303_v34 = vsel %vm265_vm0, %v9750_v30, 0  ;;  %v9757_v37 = vcombine.high %v49_v33, %v49_v33  ;;  %v9754_v38 = vcombine.low %v48_v32, %v48_v32  ;;  %v9756_v39 = vcombine.low %v49_v33, %v49_v33  ;;  %v58_v11 = vld [vmem:[%s15902_s1] sm:$0xff]  ;;  %v59_v12 = vld [vmem:[%s15902_s1 + $0x8] sm:$0xff] }
   0x9   :  { %461 = vmatpush1.bf16.msra.mxu0 %v279_v18  ;;  %492 = vmatprep.mubr.bf16.mxu0 %v10891_v2  ;;  %v309_v35 = vsel %vm265_vm0, %v9752_v31, 0  ;;  %v9759_v44 = vcombine.high %v50_v40, %v50_v40  ;;  %v9761_v45 = vcombine.high %v51_v41, %v51_v41  ;;  %v9758_v46 = vcombine.low %v50_v40, %v50_v40  ;;  %v60_v31 = vld [vmem:[%s15902_s1 + $0x10] sm:$0xff]  ;;  %v78_v40 = vld [vmem:[%s15902_s1 + $0xa0] sm:$0xff] }
   0xa   :  { %504 = vmatpush1.bf16.msra.mxu1 %v285_v19  ;;  %535 = vmatprep.mubr.bf16.mxu1 %v10891_v2  ;;  %v315_v42 = vsel %vm265_vm0, %v9754_v38, 0  ;;  %v321_v43 = vsel %vm265_vm0, %v9756_v39, 0  ;;  %v9760_v47 = vcombine.low %v51_v41, %v51_v41  ;;  %v9763_v52 = vcombine.high %v52_v48, %v52_v48  ;;  %36 = vst.msk [vmem:[#allocation2 + $0x380] sm:$0xff] %vm31_vm3, %v10891_v2  ;;  %v79_v41 = vld [vmem:[%s15902_s1 + $0xa8] sm:$0xff] }
   0xb   :  { %9782 = vmatprep.subr.msk.bf16.mxu0 %vm265_vm0, %v9747_v20  ;;  %9784 = vmatprep.subr.msk.bf16.mxu1 %vm265_vm0, %v9749_v21  ;;  %v327_v50 = vsel %vm265_vm0, %v9758_v46, 0  ;;  %v9765_v53 = vcombine.high %v53_v49, %v53_v49  ;;  %v9762_v54 = vcombine.low %v52_v48, %v52_v48  ;;  %v9764_v55 = vcombine.low %v53_v49, %v53_v49 }
   0xc   :  { %v333_v51 = vsel %vm265_vm0, %v9760_v47, 0  ;;  %v9767_v60 = vcombine.high %v54_v56, %v54_v56  ;;  %v9769_v61 = vcombine.high %v55_v57, %v55_v57  ;;  %v9766_v62 = vcombine.low %v54_v56, %v54_v56 }
   0xd   :  { %v339_v58 = vsel %vm265_vm0, %v9762_v54, 0  ;;  %v345_v59 = vsel %vm265_vm0, %v9764_v55, 0  ;;  %v9768_v63 = vcombine.low %v55_v57, %v55_v57  ;;  %v9771_v5 = vcombine.high %v56_v0, %v56_v0 }
   0xe   :  { %v351_v3 = vsel %vm265_vm0, %v9766_v62, 0  ;;  %v9773_v6 = vcombine.high %v57_v1, %v57_v1  ;;  %v9770_v7 = vcombine.low %v56_v0, %v56_v0  ;;  %v9772_v8 = vcombine.low %v57_v1, %v57_v1  ;;  %v62_v0 = vld [vmem:[%s15902_s1 + $0x20] sm:$0xff]  ;;  %v63_v1 = vld [vmem:[%s15902_s1 + $0x28] sm:$0xff] }
   0xf   :  { %v357_v4 = vsel %vm265_vm0, %v9768_v63, 0  ;;  %v94_v15 = vunpack.c.l.bf16 %v58_v11  ;;  %v95_v16 = vunpack.c.h.bf16 %v58_v11  ;;  %v96_v17 = vunpack.c.l.bf16 %v59_v12 }
  0x10   :  { %9779 = vmatmul.mubr.msk.bf16.vlgmr.msra.gmra.mrb[4].mxu0 %vm261_vm1, %v10953_v13  ;;  %9781 = vmatmul.mubr.msk.bf16.vlgmr.msra.gmra.mrb[4].mxu1 %vm261_vm1, %v10953_v13  ;;  %v363_v9 = vsel %vm265_vm0, %v9770_v7, 0  ;;  %v369_v10 = vsel %vm265_vm0, %v9772_v8, 0  ;;  %v132_v19 = vunpack.c.l.bf16 %v77_v14  ;;  %v97_v22 = vunpack.c.h.bf16 %v59_v12 }
  0x11   :  { %547 = vmatpush1.bf16.msra.mxu0 %v291_v26  ;;  %578 = vmatprep.mubr.bf16.mxu0 %v10891_v2  ;;  %v133_v24 = vunpack.c.h.bf16 %v77_v14  ;;  %v99_v48 = vunpack.c.h.bf16 %v60_v31  ;;  %v137_v55 = vunpack.c.h.bf16 %v79_v41  ;;  %v104_v14 = vunpack.c.l.bf16 %v63_v1 }
  0x12   :  { %590 = vmatpush1.bf16.msra.mxu1 %v297_v27  ;;  %621 = vmatprep.mubr.bf16.mxu1 %v10891_v2  ;;  %vm1743_vm6 = vcmask 392192  }
  0x13   :  { %9786 = vmatprep.subr.msk.bf16.mxu0 %vm265_vm0, %v9751_v28  ;;  %9788 = vmatprep.subr.msk.bf16.mxu1 %vm265_vm0, %v9753_v29 }
  0x18   :  { %9783 = vmatmul.mubr.msk.bf16.vlgmr.msra.gmra.mrb[8].mxu0 %vm261_vm1, %v10953_v13  ;;  %9785 = vmatmul.mubr.msk.bf16.vlgmr.msra.gmra.mrb[8].mxu1 %vm261_vm1, %v10953_v13 }
  0x19   :  { %633 = vmatpush1.bf16.msra.mxu0 %v303_v34  ;;  %664 = vmatprep.mubr.bf16.mxu0 %v10891_v2 }
  0x1a   :  { %676 = vmatpush1.bf16.msra.mxu1 %v309_v35  ;;  %707 = vmatprep.mubr.bf16.mxu1 %v10891_v2 }
  0x1b   :  { %9790 = vmatprep.subr.msk.bf16.mxu0 %vm265_vm0, %v9755_v36  ;;  %9792 = vmatprep.subr.msk.bf16.mxu1 %vm265_vm0, %v9757_v37 }
  0x20   :  { %9787 = vmatmul.mubr.msk.bf16.vlgmr.msra.gmra.mrb[12].mxu0 %vm261_vm1, %v10953_v13  ;;  %9789 = vmatmul.mubr.msk.bf16.vlgmr.msra.gmra.mrb[12].mxu1 %vm261_vm1, %v10953_v13 }
  0x21   :  { %719 = vmatpush1.bf16.msra.mxu0 %v315_v42  ;;  %750 = vmatprep.mubr.bf16.mxu0 %v10891_v2 }
  0x22   :  { %762 = vmatpush1.bf16.msra.mxu1 %v321_v43  ;;  %793 = vmatprep.mubr.bf16.mxu1 %v10891_v2 }
  0x23   :  { %9794 = vmatprep.subr.msk.bf16.mxu0 %vm265_vm0, %v9759_v44  ;;  %9796 = vmatprep.subr.msk.bf16.mxu1 %vm265_vm0, %v9761_v45  ;;  %v98_v44 = vunpack.c.l.bf16 %v60_v31 }
  0x28   :  { %9791 = vmatmul.mubr.msk.bf16.vlgmr.msra.gmra.mrb[16].mxu0 %vm261_vm1, %v10953_v13  ;;  %9793 = vmatmul.mubr.msk.bf16.vlgmr.msra.gmra.mrb[16].mxu1 %vm261_vm1, %v10953_v13 }
  0x29   :  { %805 = vmatpush1.bf16.msra.mxu0 %v327_v50  ;;  %836 = vmatprep.mubr.bf16.mxu0 %v10891_v2  ;;  %v134_v50 = vunpack.c.l.bf16 %v78_v40 }
  0x2a   :  { %848 = vmatpush1.bf16.msra.mxu1 %v333_v51  ;;  %879 = vmatprep.mubr.bf16.mxu1 %v10891_v2  ;;  %v136_v51 = vunpack.c.l.bf16 %v79_v41  ;;  %v83_v41 = vld [vmem:[%s15902_s1 + $0xc8] sm:$0xff] }
  0x2b   :  { %9798 = vmatprep.subr.msk.bf16.mxu0 %vm265_vm0, %v9763_v52  ;;  %9800 = vmatprep.subr.msk.bf16.mxu1 %vm265_vm0, %v9765_v53  ;;  %v135_v53 = vunpack.c.h.bf16 %v78_v40 }
  0x30   :  { %9795 = vmatmul.mubr.msk.bf16.vlgmr.msra.gmra.mrb[20].mxu0 %vm261_vm1, %v10953_v13  ;;  %9797 = vmatmul.mubr.msk.bf16.vlgmr.msra.gmra.mrb[20].mxu1 %vm261_vm1, %v10953_v13 }
  0x31   :  { %891 = vmatpush1.bf16.msra.mxu0 %v339_v58  ;;  %922 = vmatprep.mubr.bf16.mxu0 %v10891_v2 }
  0x32   :  { %934 = vmatpush1.bf16.msra.mxu1 %v345_v59  ;;  %965 = vmatprep.mubr.bf16.mxu1 %v10891_v2 }
  0x33   :  { %9802 = vmatprep.subr.msk.bf16.mxu0 %vm265_vm0, %v9767_v60  ;;  %9804 = vmatprep.subr.msk.bf16.mxu1 %vm265_vm0, %v9769_v61 }
  0x38   :  { %9799 = vmatmul.mubr.msk.bf16.vlgmr.msra.gmra.mrb[24].mxu0 %vm261_vm1, %v10953_v13  ;;  %9801 = vmatmul.mubr.msk.bf16.vlgmr.msra.gmra.mrb[24].mxu1 %vm261_vm1, %v10953_v13 }
  0x39   :  { %977 = vmatpush1.bf16.msra.mxu0 %v351_v3  ;;  %1008 = vmatprep.mubr.bf16.mxu0 %v10891_v2 }
  0x3a   :  { %1020 = vmatpush1.bf16.msra.mxu1 %v357_v4  ;;  %1051 = vmatprep.mubr.bf16.mxu1 %v10891_v2 }
  0x3b   :  { %9806 = vmatprep.subr.msk.bf16.mxu0 %vm265_vm0, %v9771_v5  ;;  %9808 = vmatprep.subr.msk.bf16.mxu1 %vm265_vm0, %v9773_v6 }
  0x40   :  { %9803 = vmatmul.mubr.msk.bf16.vlgmr.msra.gmra.mrb[28].mxu0 %vm261_vm1, %v10953_v13  ;;  %9805 = vmatmul.mubr.msk.bf16.vlgmr.msra.gmra.mrb[28].mxu1 %vm261_vm1, %v10953_v13 }
  0x41   :  { %1063 = vmatpush1.bf16.msra.mxu0 %v363_v9  ;;  %1094 = vmatprep.mubr.bf16.mxu0 %v10891_v2  ;;  %v80_v9 = vld [vmem:[%s15902_s1 + $0xb0] sm:$0xff] }
  0x42   :  { %1106 = vmatpush1.bf16.msra.mxu1 %v369_v10  ;;  %1137 = vmatprep.mubr.bf16.mxu1 %v10891_v2  ;;  %v81_v10 = vld [vmem:[%s15902_s1 + $0xb8] sm:$0xff] }
  0x48   :  { %9807 = vmatmul.mubr.msk.bf16.vlgmr.msra.gmra.mrb[32].mxu0 %vm261_vm1, %v10953_v13  ;;  %9809 = vmatmul.mubr.msk.bf16.vlgmr.msra.gmra.mrb[32].mxu1 %vm261_vm1, %v10953_v13  ;;  %v76_v13 = vld [vmem:[%s15902_s1 + $0x90] sm:$0xff] }
  0x49   :  { %1779 = vmatprep.mubr.bf16.mxu0 %v10891_v2  ;;  %1822 = vmatprep.mubr.bf16.mxu1 %v10891_v2  ;;  %v130_v18 = vunpack.c.l.bf16 %v76_v13  ;;  %v131_v23 = vunpack.c.h.bf16 %v76_v13  ;;  %v61_v2 = vld [vmem:[%s15902_s1 + $0x18] sm:$0xff]  ;;  %v102_v13 = vunpack.c.l.bf16 %v62_v0 }
  0x4a   :  { %v100_v45 = vunpack.c.l.bf16 %v61_v2  ;;  %v101_v49 = vunpack.c.h.bf16 %v61_v2 }
  0xdb   :  { %v408_v20 = vpop.f32.mrb[0].mxu0  ;;  %v451_v21 = vpop.f32.mrb[0].mxu1 }
  0xdc   :  { %v409_v25 = vadd.f32 %v408_v20, %v94_v15  ;;  %v410_v26 = vpop.f32.mrb[1].mxu0  ;;  %v453_v27 = vpop.f32.mrb[1].mxu1  ;;  %v452_v32 = vadd.f32 %v451_v21, %v96_v17  ;;  %v103_v17 = vunpack.c.h.bf16 %v62_v0  ;;  %v140_v20 = vunpack.c.l.bf16 %v81_v10 }
  0xdd   :  { %v411_v28 = vadd.f32 %v410_v26, %v95_v16  ;;  %v412_v29 = vpop.f32.mrb[2].mxu0  ;;  %v455_v30 = vpop.f32.mrb[2].mxu1  ;;  %v454_v37 = vadd.f32 %v453_v27, %v97_v22  ;;  %v139_v22 = vunpack.c.h.bf16 %v80_v9 }
  0xde   :  { %v413_v33 = vadd.f32 %v412_v29, %v130_v18  ;;  %v456_v34 = vadd.f32 %v455_v30, %v132_v19  ;;  %v414_v35 = vpop.f32.mrb[3].mxu0  ;;  %v457_v36 = vpop.f32.mrb[3].mxu1  ;;  %v105_v18 = vunpack.c.h.bf16 %v63_v1  ;;  %v138_v19 = vunpack.c.l.bf16 %v80_v9 }
  0xdf   :  { %v415_v38 = vadd.f32 %v414_v35, %v131_v23  ;;  %v458_v39 = vadd.f32 %v457_v36, %v133_v24  ;;  %v141_v24 = vunpack.c.h.bf16 %v81_v10 }
  0xe0   :  { %v11117_v42 = vpack.c.bf16 %v413_v33, %v409_v25  ;;  %v11119_v43 = vpack.c.bf16 %v456_v34, %v452_v32  ;;  %v64_v32 = vld [vmem:[%s15902_s1 + $0x30] sm:$0xff]  ;;  %v82_v33 = vld [vmem:[%s15902_s1 + $0xc0] sm:$0xff]  ;;  %v65_v34 = vld [vmem:[%s15902_s1 + $0x38] sm:$0xff] }
  0xe1   :  { %v11121_v46 = vpack.c.bf16 %v415_v38, %v411_v28  ;;  %v11123_v47 = vpack.c.bf16 %v458_v39, %v454_v37 }
  0xe2   :  { %1405 = vst [vmem:[#allocation2 + $0x148] sm:$0xff] %v11119_v43  ;;  %1224 = vrot.lane.b32.xlu1 %v11119_v43, %s10892_s24  ;;  %1220 = vrot.lane.b32.xlu0 %v11117_v42, %s10892_s24 }
  0xe3   :  { %1404 = vst [vmem:[#allocation2 + $0x140] sm:$0xff] %v11121_v46  ;;  %1406 = vst [vmem:[#allocation2 + $0x150] sm:$0xff] %v11123_v47  ;;  %v494_v52 = vpop.f32.mrb[4].mxu0  ;;  %v537_v54 = vpop.f32.mrb[4].mxu1 }
  0xe4   :  { %v495_v56 = vadd.f32 %v494_v52, %v98_v44  ;;  %v496_v57 = vpop.f32.mrb[5].mxu0  ;;  %v538_v58 = vadd.f32 %v537_v54, %v100_v45  ;;  %v539_v59 = vpop.f32.mrb[5].mxu1  ;;  %v107_v52 = vunpack.c.h.bf16 %v64_v32  ;;  %v142_v54 = vunpack.c.l.bf16 %v82_v33 }
  0xe5   :  { %v497_v60 = vadd.f32 %v496_v57, %v99_v48  ;;  %v498_v61 = vpop.f32.mrb[6].mxu0  ;;  %v540_v62 = vadd.f32 %v539_v59, %v101_v49  ;;  %v541_v63 = vpop.f32.mrb[6].mxu1  ;;  %v106_v48 = vunpack.c.l.bf16 %v64_v32  ;;  %v108_v49 = vunpack.c.l.bf16 %v65_v34 }
  0xe6   :  { %1443 = vrot.lane.b32.xlu1 %v11119_v43, %s10893_s29  ;;  %1439 = vrot.lane.b32.xlu0 %v11117_v42, %s10893_s29  ;;  %v499_v3 = vadd.f32 %v498_v61, %v134_v50  ;;  %v500_v4 = vpop.f32.mrb[7].mxu0  ;;  %v542_v5 = vadd.f32 %v541_v63, %v136_v51  ;;  %v543_v6 = vpop.f32.mrb[7].mxu1  ;;  %v143_v57 = vunpack.c.h.bf16 %v82_v33  ;;  %v145_v59 = vunpack.c.h.bf16 %v83_v41 }
  0xe7   :  { %v501_v7 = vadd.f32 %v500_v4, %v135_v53  ;;  %v544_v8 = vadd.f32 %v543_v6, %v137_v55  ;;  %v109_v53 = vunpack.c.h.bf16 %v65_v34  ;;  %v144_v55 = vunpack.c.l.bf16 %v83_v41  ;;  %v67_v6 = vld [vmem:[%s15902_s1 + $0x48] sm:$0xff]  ;;  %v69_v41 = vld [vmem:[%s15902_s1 + $0x58] sm:$0xff] }
  0xe8   :  { %v11148_v11 = vpack.c.bf16 %v499_v3, %v495_v56  ;;  %v11150_v12 = vpack.c.bf16 %v542_v5, %v538_v58  ;;  %v66_v5 = vld [vmem:[%s15902_s1 + $0x40] sm:$0xff] }
  0xe9   :  { %v11152_v15 = vpack.c.bf16 %v501_v7, %v497_v60  ;;  %v11154_v16 = vpack.c.bf16 %v544_v8, %v540_v62 }
  0xea   :  { %1226 = vrot.lane.b32.xlu1 %v11123_v47, %s10892_s24  ;;  %1407 = vst [vmem:[#allocation2 + $0x158] sm:$0xff] %v11148_v11  ;;  %1222 = vrot.lane.b32.xlu0 %v11121_v46, %s10892_s24  ;;  %1409 = vst [vmem:[#allocation2 + $0x168] sm:$0xff] %v11150_v12 }
  0xeb   :  { %1408 = vst [vmem:[#allocation2 + $0x160] sm:$0xff] %v11152_v15  ;;  %1410 = vst [vmem:[#allocation2 + $0x170] sm:$0xff] %v11154_v16  ;;  %v580_v21 = vpop.f32.mrb[8].mxu0  ;;  %v623_v23 = vpop.f32.mrb[8].mxu1 }
  0xec   :  { %v581_v25 = vadd.f32 %v580_v21, %v102_v13  ;;  %v582_v26 = vpop.f32.mrb[9].mxu0  ;;  %v624_v27 = vadd.f32 %v623_v23, %v104_v14  ;;  %v625_v28 = vpop.f32.mrb[9].mxu1  ;;  %v110_v21 = vunpack.c.l.bf16 %v66_v5 }
  0xed   :  { %v583_v29 = vadd.f32 %v582_v26, %v103_v17  ;;  %v584_v30 = vpop.f32.mrb[10].mxu0  ;;  %v626_v31 = vadd.f32 %v625_v28, %v105_v18  ;;  %v627_v2 = vpop.f32.mrb[10].mxu1  ;;  %v84_v17 = vld [vmem:[%s15902_s1 + $0xd0] sm:$0xff]  ;;  %v85_v18 = vld [vmem:[%s15902_s1 + $0xd8] sm:$0xff]  ;;  %v113_v26 = vunpack.c.h.bf16 %v67_v6 }
  0xee   :  { %1445 = vrot.lane.b32.xlu1 %v11123_v47, %s10893_s29  ;;  %1441 = vrot.lane.b32.xlu0 %v11121_v46, %s10893_s29  ;;  %v585_v35 = vadd.f32 %v584_v30, %v138_v19  ;;  %v586_v36 = vpop.f32.mrb[11].mxu0  ;;  %v628_v37 = vadd.f32 %v627_v2, %v140_v20  ;;  %v629_v38 = vpop.f32.mrb[11].mxu1  ;;  %v148_v28 = vunpack.c.l.bf16 %v85_v18  ;;  %v147_v30 = vunpack.c.h.bf16 %v84_v17 }
  0xef   :  { %v587_v39 = vadd.f32 %v586_v36, %v139_v22  ;;  %v630_v40 = vadd.f32 %v629_v38, %v141_v24  ;;  %v112_v22 = vunpack.c.l.bf16 %v67_v6  ;;  %v149_v2 = vunpack.c.h.bf16 %v85_v18 }
  0xf0   :  { %v11180_v44 = vpack.c.bf16 %v585_v35, %v581_v25  ;;  %v11182_v45 = vpack.c.bf16 %v628_v37, %v624_v27  ;;  %v111_v25 = vunpack.c.h.bf16 %v66_v5  ;;  %v146_v27 = vunpack.c.l.bf16 %v84_v17 }
  0xf1   :  { %v11184_v50 = vpack.c.bf16 %v587_v39, %v583_v29  ;;  %v11186_v51 = vpack.c.bf16 %v630_v40, %v626_v31  ;;  %v68_v40 = vld [vmem:[%s15902_s1 + $0x50] sm:$0xff] }
  0xf2   :  { %1228 = vrot.lane.b32.xlu1 %v11148_v11, %s10892_s24  ;;  %1447 = vrot.lane.b32.xlu0 %v11148_v11, %s10893_s29  ;;  %1411 = vst [vmem:[#allocation2 + $0x178] sm:$0xff] %v11180_v44  ;;  %1413 = vst [vmem:[#allocation2 + $0x188] sm:$0xff] %v11182_v45 }
  0xf3   :  { %1412 = vst [vmem:[#allocation2 + $0x180] sm:$0xff] %v11184_v50  ;;  %1414 = vst [vmem:[#allocation2 + $0x190] sm:$0xff] %v11186_v51  ;;  %v666_v56 = vpop.f32.mrb[12].mxu0  ;;  %v709_v58 = vpop.f32.mrb[12].mxu1 }
  0xf4   :  { %v667_v60 = vadd.f32 %v666_v56, %v106_v48  ;;  %v668_v61 = vpop.f32.mrb[13].mxu0  ;;  %v710_v62 = vadd.f32 %v709_v58, %v108_v49  ;;  %v711_v63 = vpop.f32.mrb[13].mxu1  ;;  %v86_v56 = vld [vmem:[%s15902_s1 + $0xe0] sm:$0xff] }
  0xf5   :  { %v669_v0 = vadd.f32 %v668_v61, %v107_v52  ;;  %v670_v1 = vpop.f32.mrb[14].mxu0  ;;  %v712_v3 = vadd.f32 %v711_v63, %v109_v53  ;;  %v713_v4 = vpop.f32.mrb[14].mxu1  ;;  %v116_v61 = vunpack.c.l.bf16 %v69_v41  ;;  %v151_v6 = vunpack.c.h.bf16 %v86_v56 }
  0xf6   :  { %1232 = vrot.lane.b32.xlu1 %v11150_v12, %s10892_s24  ;;  %1451 = vrot.lane.b32.xlu0 %v11150_v12, %s10893_s29  ;;  %v671_v7 = vadd.f32 %v670_v1, %v142_v54  ;;  %v672_v8 = vpop.f32.mrb[15].mxu0  ;;  %v714_v9 = vadd.f32 %v713_v4, %v144_v55  ;;  %v715_v10 = vpop.f32.mrb[15].mxu1  ;;  %v117_v1 = vunpack.c.h.bf16 %v69_v41 }
  0xf7   :  { %v673_v13 = vadd.f32 %v672_v8, %v143_v57  ;;  %v716_v14 = vadd.f32 %v715_v10, %v145_v59  ;;  %v87_v57 = vld [vmem:[%s15902_s1 + $0xe8] sm:$0xff] }
  0xf8   :  { %v11212_v19 = vpack.c.bf16 %v671_v7, %v667_v60  ;;  %v11214_v20 = vpack.c.bf16 %v714_v9, %v710_v62  ;;  %v114_v60 = vunpack.c.l.bf16 %v68_v40  ;;  %v152_v4 = vunpack.c.l.bf16 %v87_v57 }
  0xf9   :  { %v11216_v23 = vpack.c.bf16 %v673_v13, %v669_v0  ;;  %v11218_v24 = vpack.c.bf16 %v716_v14, %v712_v3  ;;  %v115_v0 = vunpack.c.h.bf16 %v68_v40  ;;  %v150_v3 = vunpack.c.l.bf16 %v86_v56 }
  0xfa   :  { %1449 = vrot.lane.b32.xlu1 %v11152_v15, %s10893_s29  ;;  %1230 = vrot.lane.b32.xlu0 %v11152_v15, %s10892_s24  ;;  %1415 = vst [vmem:[#allocation2 + $0x198] sm:$0xff] %v11212_v19  ;;  %1417 = vst [vmem:[#allocation2 + $0x1a8] sm:$0xff] %v11214_v20  ;;  %v153_v8 = vunpack.c.h.bf16 %v87_v57 }
  0xfb   :  { %1416 = vst [vmem:[#allocation2 + $0x1a0] sm:$0xff] %v11216_v23  ;;  %1418 = vst [vmem:[#allocation2 + $0x1b0] sm:$0xff] %v11218_v24  ;;  %v752_v29 = vpop.f32.mrb[16].mxu0  ;;  %v795_v31 = vpop.f32.mrb[16].mxu1 }
  0xfc   :  { %v753_v32 = vadd.f32 %v752_v29, %v110_v21  ;;  %v754_v33 = vpop.f32.mrb[17].mxu0  ;;  %v796_v34 = vadd.f32 %v795_v31, %v112_v22  ;;  %v797_v35 = vpop.f32.mrb[17].mxu1 }
  0xfd   :  { %v755_v36 = vadd.f32 %v754_v33, %v111_v25  ;;  %v756_v37 = vpop.f32.mrb[18].mxu0  ;;  %v798_v38 = vadd.f32 %v797_v35, %v113_v26  ;;  %v799_v39 = vpop.f32.mrb[18].mxu1  ;;  %v70_v25 = vld [vmem:[%s15902_s1 + $0x60] sm:$0xff]  ;;  %v71_v26 = vld [vmem:[%s15902_s1 + $0x68] sm:$0xff]  ;;  %v89_v33 = vld [vmem:[%s15902_s1 + $0xf8] sm:$0xff] }
  0xfe   :  { %1453 = vrot.lane.b32.xlu1 %v11154_v16, %s10893_s29  ;;  %1234 = vrot.lane.b32.xlu0 %v11154_v16, %s10892_s24  ;;  %v757_v48 = vadd.f32 %v756_v37, %v146_v27  ;;  %v758_v49 = vpop.f32.mrb[19].mxu0  ;;  %v800_v52 = vadd.f32 %v799_v39, %v148_v28  ;;  %v801_v53 = vpop.f32.mrb[19].mxu1  ;;  %v120_v37 = vunpack.c.l.bf16 %v71_v26  ;;  %v119_v40 = vunpack.c.h.bf16 %v70_v25 }
  0xff   :  { %v759_v54 = vadd.f32 %v758_v49, %v147_v30  ;;  %v802_v55 = vadd.f32 %v801_v53, %v149_v2  ;;  %v121_v41 = vunpack.c.h.bf16 %v71_v26  ;;  %v156_v49 = vunpack.c.l.bf16 %v89_v33 }
 0x100   :  { %v11244_v58 = vpack.c.bf16 %v757_v48, %v753_v32  ;;  %v11246_v59 = vpack.c.bf16 %v800_v52, %v796_v34  ;;  %v88_v32 = vld [vmem:[%s15902_s1 + $0xf0] sm:$0xff] }
 0x101   :  { %v11248_v62 = vpack.c.bf16 %v759_v54, %v755_v36  ;;  %v11250_v63 = vpack.c.bf16 %v802_v55, %v798_v38  ;;  %v118_v36 = vunpack.c.l.bf16 %v70_v25  ;;  %v154_v48 = vunpack.c.l.bf16 %v88_v32 }
 0x102   :  { %1236 = vrot.lane.b32.xlu1 %v11180_v44, %s10892_s24  ;;  %1455 = vrot.lane.b32.xlu0 %v11180_v44, %s10893_s29  ;;  %1419 = vst [vmem:[#allocation2 + $0x1b8] sm:$0xff] %v11244_v58  ;;  %1421 = vst [vmem:[#allocation2 + $0x1c8] sm:$0xff] %v11246_v59  ;;  %v155_v53 = vunpack.c.h.bf16 %v88_v32  ;;  %v157_v55 = vunpack.c.h.bf16 %v89_v33 }
 0x103   :  { %1420 = vst [vmem:[#allocation2 + $0x1c0] sm:$0xff] %v11248_v62  ;;  %1422 = vst [vmem:[#allocation2 + $0x1d0] sm:$0xff] %v11250_v63  ;;  %v838_v5 = vpop.f32.mrb[20].mxu0  ;;  %v881_v7 = vpop.f32.mrb[20].mxu1 }
 0x104   :  { %v839_v9 = vadd.f32 %v838_v5, %v114_v60  ;;  %v840_v10 = vpop.f32.mrb[21].mxu0  ;;  %v882_v13 = vadd.f32 %v881_v7, %v116_v61  ;;  %v883_v14 = vpop.f32.mrb[21].mxu1  ;;  %v72_v5 = vld [vmem:[%s15902_s1 + $0x70] sm:$0xff] }
 0x105   :  { %v841_v17 = vadd.f32 %v840_v10, %v115_v0  ;;  %v842_v18 = vpop.f32.mrb[22].mxu0  ;;  %v884_v21 = vadd.f32 %v883_v14, %v117_v1  ;;  %v885_v22 = vpop.f32.mrb[22].mxu1  ;;  %v122_v25 = vunpack.c.l.bf16 %v72_v5 }
 0x106   :  { %1240 = vrot.lane.b32.xlu1 %v11182_v45, %s10892_s24  ;;  %1459 = vrot.lane.b32.xlu0 %v11182_v45, %s10893_s29  ;;  %v843_v27 = vadd.f32 %v842_v18, %v150_v3  ;;  %v844_v28 = vpop.f32.mrb[23].mxu0  ;;  %v886_v29 = vadd.f32 %v885_v22, %v152_v4  ;;  %v887_v30 = vpop.f32.mrb[23].mxu1  ;;  %v91_v18 = vld [vmem:[%s15902_s1 + $0x108] sm:$0xff] }
 0x107   :  { %v845_v31 = vadd.f32 %v844_v28, %v151_v6  ;;  %v888_v2 = vadd.f32 %v887_v30, %v153_v8  ;;  %v73_v6 = vld [vmem:[%s15902_s1 + $0x78] sm:$0xff] }
 0x108   :  { %v11276_v34 = vpack.c.bf16 %v843_v27, %v839_v9  ;;  %v11278_v35 = vpack.c.bf16 %v886_v29, %v882_v13  ;;  %v124_v26 = vunpack.c.l.bf16 %v73_v6  ;;  %v123_v29 = vunpack.c.h.bf16 %v72_v5  ;;  %v92_v5 = vld [vmem:[%s15902_s1 + $0x110] sm:$0xff] }
 0x109   :  { %v11280_v38 = vpack.c.bf16 %v845_v31, %v841_v17  ;;  %v11282_v39 = vpack.c.bf16 %v888_v2, %v884_v21  ;;  %v90_v17 = vld [vmem:[%s15902_s1 + $0x100] sm:$0xff]  ;;  %v125_v30 = vunpack.c.h.bf16 %v73_v6  ;;  %v160_v2 = vunpack.c.l.bf16 %v91_v18  ;;  %v93_v6 = vld [vmem:[%s15902_s1 + $0x118] sm:$0xff] }
 0x10a   :  { %1457 = vrot.lane.b32.xlu1 %v11184_v50, %s10893_s29  ;;  %1238 = vrot.lane.b32.xlu0 %v11184_v50, %s10892_s24  ;;  %1423 = vst [vmem:[#allocation2 + $0x1d8] sm:$0xff] %v11276_v34  ;;  %1425 = vst [vmem:[#allocation2 + $0x1e8] sm:$0xff] %v11278_v35  ;;  %v158_v31 = vunpack.c.l.bf16 %v90_v17  ;;  %v159_v33 = vunpack.c.h.bf16 %v90_v17 }
 0x10b   :  { %1424 = vst [vmem:[#allocation2 + $0x1e0] sm:$0xff] %v11280_v38  ;;  %1426 = vst [vmem:[#allocation2 + $0x1f0] sm:$0xff] %v11282_v39  ;;  %v924_v52 = vpop.f32.mrb[24].mxu0  ;;  %v967_v54 = vpop.f32.mrb[24].mxu1 }
 0x10c   :  { %v925_v56 = vadd.f32 %v924_v52, %v118_v36  ;;  %v926_v57 = vpop.f32.mrb[25].mxu0  ;;  %v968_v60 = vadd.f32 %v967_v54, %v120_v37  ;;  %v969_v61 = vpop.f32.mrb[25].mxu1  ;;  %v161_v37 = vunpack.c.h.bf16 %v91_v18 }
 0x10d   :  { %v927_v0 = vadd.f32 %v926_v57, %v119_v40  ;;  %v928_v1 = vpop.f32.mrb[26].mxu0  ;;  %v970_v3 = vadd.f32 %v969_v61, %v121_v41  ;;  %v971_v4 = vpop.f32.mrb[26].mxu1  ;;  %v75_v57 = vld [vmem:[%s15902_s1 + $0x88] sm:$0xff] }
 0x10e   :  { %1461 = vrot.lane.b32.xlu1 %v11186_v51, %s10893_s29  ;;  %1242 = vrot.lane.b32.xlu0 %v11186_v51, %s10892_s24  ;;  %v929_v7 = vadd.f32 %v928_v1, %v154_v48  ;;  %v930_v8 = vpop.f32.mrb[27].mxu0  ;;  %v972_v9 = vadd.f32 %v971_v4, %v156_v49  ;;  %v973_v10 = vpop.f32.mrb[27].mxu1  ;;  %v129_v18 = vunpack.c.h.bf16 %v75_v57 }
 0x10f   :  { %v931_v13 = vadd.f32 %v930_v8, %v155_v53  ;;  %v974_v14 = vadd.f32 %v973_v10, %v157_v55  ;;  %v128_v10 = vunpack.c.l.bf16 %v75_v57 }
 0x110   :  { %v11308_v21 = vpack.c.bf16 %v929_v7, %v925_v56  ;;  %v11310_v22 = vpack.c.bf16 %v972_v9, %v968_v60  ;;  %v74_v56 = vld [vmem:[%s15902_s1 + $0x80] sm:$0xff] }
 0x111   :  { %v11312_v27 = vpack.c.bf16 %v931_v13, %v927_v0  ;;  %v11314_v28 = vpack.c.bf16 %v974_v14, %v970_v3  ;;  %v126_v9 = vunpack.c.l.bf16 %v74_v56  ;;  %v127_v17 = vunpack.c.h.bf16 %v74_v56 }
 0x112   :  { %1244 = vrot.lane.b32.xlu1 %v11212_v19, %s10892_s24  ;;  %1463 = vrot.lane.b32.xlu0 %v11212_v19, %s10893_s29  ;;  %1427 = vst [vmem:[#allocation2 + $0x1f8] sm:$0xff] %v11308_v21  ;;  %1429 = vst [vmem:[#allocation2 + $0x208] sm:$0xff] %v11310_v22 }
 0x113   :  { %1428 = vst [vmem:[#allocation2 + $0x200] sm:$0xff] %v11312_v27  ;;  %1430 = vst [vmem:[#allocation2 + $0x210] sm:$0xff] %v11314_v28  ;;  %v1010_v32 = vpop.f32.mrb[28].mxu0  ;;  %v1053_v36 = vpop.f32.mrb[28].mxu1 }
 0x114   :  { %v1011_v40 = vadd.f32 %v1010_v32, %v122_v25  ;;  %v1012_v41 = vpop.f32.mrb[29].mxu0  ;;  %v1054_v48 = vadd.f32 %v1053_v36, %v124_v26  ;;  %v1055_v49 = vpop.f32.mrb[29].mxu1  ;;  %v162_v25 = vunpack.c.l.bf16 %v92_v5  ;;  %v164_v26 = vunpack.c.l.bf16 %v93_v6 }
 0x115   :  { %v1013_v52 = vadd.f32 %v1012_v41, %v123_v29  ;;  %v1014_v53 = vpop.f32.mrb[30].mxu0  ;;  %v1056_v54 = vadd.f32 %v1055_v49, %v125_v30  ;;  %v1057_v55 = vpop.f32.mrb[30].mxu1  ;;  %v163_v30 = vunpack.c.h.bf16 %v92_v5 }
 0x116   :  { %1248 = vrot.lane.b32.xlu1 %v11214_v20, %s10892_s24  ;;  %1467 = vrot.lane.b32.xlu0 %v11214_v20, %s10893_s29  ;;  %v1015_v60 = vadd.f32 %v1014_v53, %v158_v31  ;;  %v1016_v61 = vpop.f32.mrb[31].mxu0  ;;  %v1058_v0 = vadd.f32 %v1057_v55, %v160_v2  ;;  %v1059_v1 = vpop.f32.mrb[31].mxu1  ;;  %v165_v2 = vunpack.c.h.bf16 %v93_v6 }
 0x117   :  { %v1017_v3 = vadd.f32 %v1016_v61, %v159_v33  ;;  %v1060_v4 = vadd.f32 %v1059_v1, %v161_v37 }
 0x118   :  { %v11340_v7 = vpack.c.bf16 %v1015_v60, %v1011_v40  ;;  %v11342_v8 = vpack.c.bf16 %v1058_v0, %v1054_v48 }
 0x119   :  { %v11344_v13 = vpack.c.bf16 %v1017_v3, %v1013_v52  ;;  %v11346_v14 = vpack.c.bf16 %v1060_v4, %v1056_v54 }
 0x11a   :  { %1465 = vrot.lane.b32.xlu1 %v11216_v23, %s10893_s29  ;;  %1246 = vrot.lane.b32.xlu0 %v11216_v23, %s10892_s24  ;;  %1431 = vst [vmem:[#allocation2 + $0x218] sm:$0xff] %v11340_v7  ;;  %1433 = vst [vmem:[#allocation2 + $0x228] sm:$0xff] %v11342_v8 }
 0x11b   :  { %1432 = vst [vmem:[#allocation2 + $0x220] sm:$0xff] %v11344_v13  ;;  %1434 = vst [vmem:[#allocation2 + $0x230] sm:$0xff] %v11346_v14  ;;  %v1096_v29 = vpop.f32.mrb[32].mxu0  ;;  %v1139_v31 = vpop.f32.mrb[32].mxu1 }
 0x11c   :  { %v1097_v32 = vadd.f32 %v1096_v29, %v126_v9  ;;  %v1098_v33 = vpop.f32.mrb[33].mxu0  ;;  %v1140_v36 = vadd.f32 %v1139_v31, %v128_v10  ;;  %v1141_v37 = vpop.f32.mrb[33].mxu1 }
 0x11d   :  { %v1099_v40 = vadd.f32 %v1098_v33, %v127_v17  ;;  %v1100_v41 = vpop.f32.mrb[34].mxu0  ;;  %v1142_v48 = vadd.f32 %v1141_v37, %v129_v18  ;;  %v1143_v49 = vpop.f32.mrb[34].mxu1 }
 0x11e   :  { %1469 = vrot.lane.b32.xlu1 %v11218_v24, %s10893_s29  ;;  %1250 = vrot.lane.b32.xlu0 %v11218_v24, %s10892_s24  ;;  %v1101_v52 = vadd.f32 %v1100_v41, %v162_v25  ;;  %v1102_v53 = vpop.f32.mrb[35].mxu0  ;;  %v1144_v54 = vadd.f32 %v1143_v49, %v164_v26  ;;  %v1145_v55 = vpop.f32.mrb[35].mxu1  ;;  %v11504_v49 = vld [vmem:[#allocation2] sm:$0xff] }
 0x11f   :  { %v1103_v56 = vadd.f32 %v1102_v53, %v163_v30  ;;  %v1146_v57 = vadd.f32 %v1145_v55, %v165_v2 }
 0x120   :  { %v11360_v60 = vpack.c.bf16 %v1101_v52, %v1097_v32  ;;  %v11362_v61 = vpack.c.bf16 %v1144_v54, %v1140_v36  ;;  %v11492_v36 = vld [vmem:[%s15903_s4 + $0x8] sm:$0xff]  }
 0x121   :  { %v11364_v0 = vpack.c.bf16 %v1103_v56, %v1099_v40  ;;  %v11366_v1 = vpack.c.bf16 %v1146_v57, %v1142_v48 }
 0x122   :  { %1252 = vrot.lane.b32.xlu1 %v11244_v58, %s10892_s24  ;;  %1471 = vrot.lane.b32.xlu0 %v11244_v58, %s10893_s29  ;;  %1435 = vst [vmem:[#allocation2 + $0x238] sm:$0xff] %v11360_v60  ;;  %1437 = vst [vmem:[#allocation2 + $0x248] sm:$0xff] %v11362_v61 }
 0x123   :  { %1436 = vst [vmem:[#allocation2 + $0x240] sm:$0xff] %v11364_v0  ;;  %1438 = vst [vmem:[#allocation2 + $0x250] sm:$0xff] %v11366_v1 }
 0x126   :  { %1256 = vrot.lane.b32.xlu1 %v11246_v59, %s10892_s24  ;;  %1475 = vrot.lane.b32.xlu0 %v11246_v59, %s10893_s29 }
 0x12a   :  { %1473 = vrot.lane.b32.xlu1 %v11248_v62, %s10893_s29  ;;  %1254 = vrot.lane.b32.xlu0 %v11248_v62, %s10892_s24 }
 0x12e   :  { %1477 = vrot.lane.b32.xlu1 %v11250_v63, %s10893_s29  ;;  %1258 = vrot.lane.b32.xlu0 %v11250_v63, %s10892_s24 }
 0x132   :  { %1260 = vrot.lane.b32.xlu1 %v11276_v34, %s10892_s24  ;;  %1479 = vrot.lane.b32.xlu0 %v11276_v34, %s10893_s29 }
 0x136   :  { %1264 = vrot.lane.b32.xlu1 %v11278_v35, %s10892_s24  ;;  %1483 = vrot.lane.b32.xlu0 %v11278_v35, %s10893_s29 }
 0x13a   :  { %1481 = vrot.lane.b32.xlu1 %v11280_v38, %s10893_s29  ;;  %1262 = vrot.lane.b32.xlu0 %v11280_v38, %s10892_s24 }
 0x13e   :  { %1485 = vrot.lane.b32.xlu1 %v11282_v39, %s10893_s29  ;;  %1266 = vrot.lane.b32.xlu0 %v11282_v39, %s10892_s24 }
 0x142   :  { %1268 = vrot.lane.b32.xlu1 %v11308_v21, %s10892_s24  ;;  %1487 = vrot.lane.b32.xlu0 %v11308_v21, %s10893_s29 }
 0x146   :  { %1272 = vrot.lane.b32.xlu1 %v11310_v22, %s10892_s24  ;;  %1491 = vrot.lane.b32.xlu0 %v11310_v22, %s10893_s29 }
 0x14a   :  { %1489 = vrot.lane.b32.xlu1 %v11312_v27, %s10893_s29  ;;  %1270 = vrot.lane.b32.xlu0 %v11312_v27, %s10892_s24 }
 0x14e   :  { %1493 = vrot.lane.b32.xlu1 %v11314_v28, %s10893_s29  ;;  %1274 = vrot.lane.b32.xlu0 %v11314_v28, %s10892_s24 }
 0x152   :  { %1276 = vrot.lane.b32.xlu1 %v11340_v7, %s10892_s24  ;;  %1495 = vrot.lane.b32.xlu0 %v11340_v7, %s10893_s29 }
 0x154   :  { %v1225_v3 = vpop.permute.xlu1 %1224  ;;  %v1221_v4 = vpop.permute.xlu0 %1220 }
 0x155   :  { %1366 = vst.msk [vmem:[#allocation2 + $0x8] sm:$0xff] %vm1365_vm4, %v1221_v4 }
 0x156   :  { %1280 = vrot.lane.b32.xlu1 %v11342_v8, %s10892_s24  ;;  %1499 = vrot.lane.b32.xlu0 %v11342_v8, %s10893_s29 }
 0x158   :  { %v1444_v5 = vpop.permute.xlu1 %1443  ;;  %v1440_v6 = vpop.permute.xlu0 %1439 }
 0x159   :  { %1584 = vst.msk [vmem:[#allocation2 + $0x260] sm:$0xff] %vm31_vm3, %v1440_v6 }
 0x15a   :  { %1497 = vrot.lane.b32.xlu1 %v11344_v13, %s10893_s29  ;;  %1278 = vrot.lane.b32.xlu0 %v11344_v13, %s10892_s24 }
 0x15c   :  { %v1227_v9 = vpop.permute.xlu1 %1226  ;;  %v1223_v10 = vpop.permute.xlu0 %1222  ;;  %v11443_v26 = vld [vmem:[#allocation2 + $0x8] sm:$0xff] }
 0x15d   :  { %v11435_v17 = vsel %vm25_vm2, %v1225_v3, %v1227_v9  ;;  %v11438_v18 = vsel %vm25_vm2, %v1221_v4, %v1223_v10  ;;  %v11441_v25 = vsel %vm25_vm2, %v1223_v10, %v1225_v3 }
 0x15e   :  { %1369 = vst [vmem:[#allocation2 + $0x20] sm:$0xff] %v11435_v17  ;;  %1367 = vst [vmem:[#allocation2 + $0x10] sm:$0xff] %v11438_v18  ;;  %1501 = vrot.lane.b32.xlu1 %v11346_v14, %s10893_s29  ;;  %1282 = vrot.lane.b32.xlu0 %v11346_v14, %s10892_s24 }
 0x15f   :  { %1368 = vst [vmem:[#allocation2 + $0x18] sm:$0xff] %v11441_v25  ;;  %1790 = vmatprep.subr.bf16.mxu1 %v11435_v17  ;;  %1747 = vmatprep.subr.bf16.mxu0 %v11438_v18 }
 0x160   :  { %v1446_v29 = vpop.permute.xlu1 %1445  ;;  %v1442_v30 = vpop.permute.xlu0 %1441  ;;  %1748 = vmatpush1.bf16.msra.mxu0 %v11443_v26  ;;  %1791 = vmatpush1.bf16.msra.mxu1 %v11441_v25 }
 0x161   :  { %v11457_v31 = vsel %vm1511_vm5, %v1444_v5, %v1446_v29  ;;  %v11460_v2 = vsel %vm1511_vm5, %v1442_v30, %v1444_v5  ;;  %1749 = vmatprep.subr.bf16.mxu0 %v11121_v46  ;;  %1792 = vmatprep.subr.bf16.mxu1 %v11123_v47 }
 0x162   :  { %1587 = vst [vmem:[#allocation2 + $0x278] sm:$0xff] %v11457_v31  ;;  %1586 = vst [vmem:[#allocation2 + $0x270] sm:$0xff] %v11460_v2  ;;  %1284 = vrot.lane.b32.xlu1 %v11360_v60, %s10892_s24  ;;  %1503 = vrot.lane.b32.xlu0 %v11360_v60, %s10893_s29 }
 0x164   :  { %v1229_v32 = vpop.permute.xlu1 %1228  ;;  %v1448_v33 = vpop.permute.xlu0 %1447  ;;  %1750 = vmatpush1.bf16.msra.mxu0 %v11117_v42  ;;  %1793 = vmatpush1.bf16.msra.mxu1 %v11119_v43  ;;  %v11486_v43 = vsel %vm1511_vm5, %v1440_v6, %v1442_v30 }
 0x165   :  { %v11473_v46 = vsel %vm25_vm2, %v1227_v9, %v1229_v32  ;;  %v11476_v47 = vsel %vm1511_vm5, %v1446_v29, %v1448_v33  ;;  %1751 = vmatprep.subr.bf16.mxu0 %v11460_v2 }
 0x166   :  { %1370 = vst [vmem:[#allocation2 + $0x28] sm:$0xff] %v11473_v46  ;;  %1588 = vst [vmem:[#allocation2 + $0x280] sm:$0xff] %v11476_v47  ;;  %1288 = vrot.lane.b32.xlu1 %v11362_v61, %s10892_s24  ;;  %1286 = vrot.lane.b32.xlu0 %v11364_v0, %s10892_s24 }
 0x167   :  { %1794 = vmatprep.subr.bf16.mxu1 %v11476_v47 }
 0x168   :  { %v1233_v37 = vpop.permute.xlu1 %1232  ;;  %v1452_v40 = vpop.permute.xlu0 %1451  ;;  %1752 = vmatpush1.bf16.msra.mxu0 %v11486_v43  ;;  %1795 = vmatpush1.bf16.msra.mxu1 %v11457_v31 }
 0x16a   :  { %1505 = vrot.lane.b32.xlu1 %v11364_v0, %s10893_s29  ;;  %1290 = vrot.lane.b32.xlu0 %v11366_v1, %s10892_s24 }
 0x16b   :  { %9813 = vmatmul.mubr.msk.bf16.vlgmr.msra.gmra.mrb[36].mxu0 %vm1743_vm6, %v11492_v36  ;;  %9814 = vmatmul.mubr.msk.bf16.vlgmr.msra.gmra.mrb[36].mxu1 %vm1743_vm6, %v11492_v36 }
 0x16c   :  { %v1450_v41 = vpop.permute.xlu1 %1449  ;;  %v1231_v48 = vpop.permute.xlu0 %1230  ;;  %1865 = vmatprep.mubr.bf16.mxu0 %v11504_v49  ;;  %1908 = vmatprep.mubr.bf16.mxu1 %v11504_v49 }
 0x16d   :  { %v11509_v52 = vsel %vm1511_vm5, %v1448_v33, %v1450_v41  ;;  %v11512_v53 = vsel %vm1511_vm5, %v1450_v41, %v1452_v40  ;;  %v11515_v54 = vsel %vm25_vm2, %v1229_v32, %v1231_v48  ;;  %v11518_v55 = vsel %vm25_vm2, %v1231_v48, %v1233_v37 }
 0x16e   :  { %1589 = vst [vmem:[#allocation2 + $0x288] sm:$0xff] %v11509_v52  ;;  %1590 = vst [vmem:[#allocation2 + $0x290] sm:$0xff] %v11512_v53  ;;  %1509 = vrot.lane.b32.xlu1 %v11366_v1, %s10893_s29  ;;  %1507 = vrot.lane.b32.xlu0 %v11362_v61, %s10893_s29 }
 0x16f   :  { %1371 = vst [vmem:[#allocation2 + $0x30] sm:$0xff] %v11515_v54  ;;  %1372 = vst [vmem:[#allocation2 + $0x38] sm:$0xff] %v11518_v55  ;;  %1833 = vmatprep.subr.bf16.mxu0 %v11515_v54 }
 0x170   :  { %v1454_v56 = vpop.permute.xlu1 %1453  ;;  %v1235_v57 = vpop.permute.xlu0 %1234  ;;  %1834 = vmatpush1.bf16.msra.mxu0 %v11473_v46 }
 0x171   :  { %v11531_v3 = vsel %vm1511_vm5, %v1452_v40, %v1454_v56  ;;  %v11534_v4 = vsel %vm25_vm2, %v1233_v37, %v1235_v57  ;;  %1835 = vmatprep.subr.bf16.mxu0 %v11152_v15 }
 0x172   :  { %1591 = vst [vmem:[#allocation2 + $0x298] sm:$0xff] %v11531_v3  ;;  %1373 = vst [vmem:[#allocation2 + $0x40] sm:$0xff] %v11534_v4  ;;  %1876 = vmatprep.subr.bf16.mxu1 %v11534_v4 }
 0x173   :  { %1877 = vmatpush1.bf16.msra.mxu1 %v11518_v55 }
 0x174   :  { %v1237_v5 = vpop.permute.xlu1 %1236  ;;  %v1456_v6 = vpop.permute.xlu0 %1455  ;;  %1836 = vmatpush1.bf16.msra.mxu0 %v11148_v11  ;;  %1878 = vmatprep.subr.bf16.mxu1 %v11154_v16 }
 0x175   :  { %v11544_v9 = vsel %vm25_vm2, %v1235_v57, %v1237_v5  ;;  %v11547_v10 = vsel %vm1511_vm5, %v1454_v56, %v1456_v6  ;;  %1837 = vmatprep.subr.bf16.mxu0 %v11512_v53 }
 0x176   :  { %1374 = vst [vmem:[#allocation2 + $0x48] sm:$0xff] %v11544_v9  ;;  %1592 = vst [vmem:[#allocation2 + $0x2a0] sm:$0xff] %v11547_v10 }
 0x177   :  { %1879 = vmatpush1.bf16.msra.mxu1 %v11150_v12 }
 0x178   :  { %v1241_v15 = vpop.permute.xlu1 %1240  ;;  %v1460_v29 = vpop.permute.xlu0 %1459  ;;  %1838 = vmatpush1.bf16.msra.mxu0 %v11509_v52  ;;  %1880 = vmatprep.subr.bf16.mxu1 %v11547_v10 }
 0x17b   :  { %1881 = vmatpush1.bf16.msra.mxu1 %v11531_v3  ;;  %9815 = vmatmul.mubr.msk.bf16.vlgmr.msra.gmra.mrb[40].mxu0 %vm1743_vm6, %v11492_v36 }
 0x17c   :  { %v1458_v11 = vpop.permute.xlu1 %1457  ;;  %v1239_v16 = vpop.permute.xlu0 %1238  ;;  %1951 = vmatprep.mubr.bf16.mxu0 %v11504_v49 }
 0x17d   :  { %v11560_v30 = vsel %vm1511_vm5, %v1456_v6, %v1458_v11  ;;  %v11563_v12 = vsel %vm1511_vm5, %v1458_v11, %v1460_v29  ;;  %v11566_v32 = vsel %vm25_vm2, %v1237_v5, %v1239_v16  ;;  %v11569_v33 = vsel %vm25_vm2, %v1239_v16, %v1241_v15 }
 0x17e   :  { %1593 = vst [vmem:[#allocation2 + $0x2a8] sm:$0xff] %v11560_v30  ;;  %1594 = vst [vmem:[#allocation2 + $0x2b0] sm:$0xff] %v11563_v12  ;;  %1919 = vmatprep.subr.bf16.mxu0 %v11566_v32  ;;  %9816 = vmatmul.mubr.msk.bf16.vlgmr.msra.gmra.mrb[40].mxu1 %vm1743_vm6, %v11492_v36 }
 0x17f   :  { %1375 = vst [vmem:[#allocation2 + $0x50] sm:$0xff] %v11566_v32  ;;  %1376 = vst [vmem:[#allocation2 + $0x58] sm:$0xff] %v11569_v33  ;;  %1920 = vmatpush1.bf16.msra.mxu0 %v11544_v9  ;;  %1994 = vmatprep.mubr.bf16.mxu1 %v11504_v49 }
 0x180   :  { %v1462_v37 = vpop.permute.xlu1 %1461  ;;  %v1243_v40 = vpop.permute.xlu0 %1242  ;;  %1921 = vmatprep.subr.bf16.mxu0 %v11184_v50 }
 0x181   :  { %v11582_v41 = vsel %vm1511_vm5, %v1460_v29, %v1462_v37  ;;  %v11585_v48 = vsel %vm25_vm2, %v1241_v15, %v1243_v40 }
 0x182   :  { %1595 = vst [vmem:[#allocation2 + $0x2b8] sm:$0xff] %v11582_v41  ;;  %1377 = vst [vmem:[#allocation2 + $0x60] sm:$0xff] %v11585_v48  ;;  %1962 = vmatprep.subr.bf16.mxu1 %v11585_v48 }
 0x183   :  { %1922 = vmatpush1.bf16.msra.mxu0 %v11180_v44  ;;  %1963 = vmatpush1.bf16.msra.mxu1 %v11569_v33 }
 0x184   :  { %v1245_v56 = vpop.permute.xlu1 %1244  ;;  %v1464_v57 = vpop.permute.xlu0 %1463  ;;  %1964 = vmatprep.subr.bf16.mxu1 %v11186_v51  ;;  %1923 = vmatprep.subr.bf16.mxu0 %v11563_v12 }
 0x185   :  { %v11595_v50 = vsel %vm25_vm2, %v1243_v40, %v1245_v56  ;;  %v11598_v5 = vsel %vm1511_vm5, %v1462_v37, %v1464_v57 }
 0x186   :  { %1378 = vst [vmem:[#allocation2 + $0x68] sm:$0xff] %v11595_v50  ;;  %1596 = vst [vmem:[#allocation2 + $0x2c0] sm:$0xff] %v11598_v5 }
 0x187   :  { %1924 = vmatpush1.bf16.msra.mxu0 %v11560_v30  ;;  %1965 = vmatpush1.bf16.msra.mxu1 %v11182_v45 }
 0x188   :  { %v1249_v44 = vpop.permute.xlu1 %1248  ;;  %v1468_v6 = vpop.permute.xlu0 %1467  ;;  %1966 = vmatprep.subr.bf16.mxu1 %v11598_v5 }
 0x18a   :  { %9817 = vmatmul.mubr.msk.bf16.vlgmr.msra.gmra.mrb[44].mxu0 %vm1743_vm6, %v11492_v36 }
 0x18b   :  { %1967 = vmatpush1.bf16.msra.mxu1 %v11582_v41  ;;  %2037 = vmatprep.mubr.bf16.mxu0 %v11504_v49 }
 0x18c   :  { %v1466_v51 = vpop.permute.xlu1 %1465  ;;  %v1247_v15 = vpop.permute.xlu0 %1246 }
 0x18d   :  { %v11610_v29 = vsel %vm1511_vm5, %v1464_v57, %v1466_v51  ;;  %v11613_v11 = vsel %vm1511_vm5, %v1466_v51, %v1468_v6  ;;  %v11616_v45 = vsel %vm25_vm2, %v1245_v56, %v1247_v15  ;;  %v11619_v16 = vsel %vm25_vm2, %v1247_v15, %v1249_v44 }
 0x18e   :  { %16091 = vst [vmem:[#allocation3_spill] sm:$0xff] %v11613_v11  ;;  %1597 = vst [vmem:[#allocation2 + $0x2c8] sm:$0xff] %v11610_v29  ;;  %2005 = vmatprep.subr.bf16.mxu0 %v11616_v45  ;;  %9818 = vmatmul.mubr.msk.bf16.vlgmr.msra.gmra.mrb[44].mxu1 %vm1743_vm6, %v11492_v36 }
 0x18f   :  { %1598 = vst [vmem:[#allocation2 + $0x2d0] sm:$0xff] %v11613_v11  ;;  %1379 = vst [vmem:[#allocation2 + $0x70] sm:$0xff] %v11616_v45  ;;  %2006 = vmatpush1.bf16.msra.mxu0 %v11595_v50  ;;  %2080 = vmatprep.mubr.bf16.mxu1 %v11504_v49 }
 0x190   :  { %1380 = vst [vmem:[#allocation2 + $0x78] sm:$0xff] %v11619_v16  ;;  %v1470_v37 = vpop.permute.xlu1 %1469  ;;  %v1251_v40 = vpop.permute.xlu0 %1250  ;;  %2007 = vmatprep.subr.bf16.mxu0 %v11216_v23 }
 0x191   :  { %v11632_v56 = vsel %vm1511_vm5, %v1468_v6, %v1470_v37  ;;  %v11635_v57 = vsel %vm25_vm2, %v1249_v44, %v1251_v40 }
 0x192   :  { %16092 = vst [vmem:[#allocation4_spill] sm:$0xff] %v11635_v57  ;;  %1599 = vst [vmem:[#allocation2 + $0x2d8] sm:$0xff] %v11632_v56  ;;  %2048 = vmatprep.subr.bf16.mxu1 %v11635_v57 }
 0x193   :  { %1381 = vst [vmem:[#allocation2 + $0x80] sm:$0xff] %v11635_v57  ;;  %2008 = vmatpush1.bf16.msra.mxu0 %v11212_v19  ;;  %2049 = vmatpush1.bf16.msra.mxu1 %v11619_v16 }
 0x194   :  { %v1253_v51 = vpop.permute.xlu1 %1252  ;;  %v1472_v15 = vpop.permute.xlu0 %1471  ;;  %2050 = vmatprep.subr.bf16.mxu1 %v11218_v24  ;;  %2009 = vmatprep.subr.bf16.mxu0 %v11613_v11 }
 0x195   :  { %v11645_v23 = vsel %vm25_vm2, %v1251_v40, %v1253_v51  ;;  %v11648_v44 = vsel %vm1511_vm5, %v1470_v37, %v1472_v15 }
 0x196   :  { %16093 = vst [vmem:[#allocation5_spill] sm:$0xff] %v11648_v44  ;;  %1382 = vst [vmem:[#allocation2 + $0x88] sm:$0xff] %v11645_v23 }
 0x197   :  { %1600 = vst [vmem:[#allocation2 + $0x2e0] sm:$0xff] %v11648_v44  ;;  %2010 = vmatpush1.bf16.msra.mxu0 %v11610_v29  ;;  %2051 = vmatpush1.bf16.msra.mxu1 %v11214_v20 }
 0x198   :  { %v1257_v19 = vpop.permute.xlu1 %1256  ;;  %v1476_v6 = vpop.permute.xlu0 %1475  ;;  %2052 = vmatprep.subr.bf16.mxu1 %v11648_v44 }
 0x19a   :  { %9819 = vmatmul.mubr.msk.bf16.vlgmr.msra.gmra.mrb[48].mxu0 %vm1743_vm6, %v11492_v36 }
 0x19b   :  { %2053 = vmatpush1.bf16.msra.mxu1 %v11632_v56  ;;  %2123 = vmatprep.mubr.bf16.mxu0 %v11504_v49 }
 0x19c   :  { %v1474_v24 = vpop.permute.xlu1 %1473  ;;  %v1255_v37 = vpop.permute.xlu0 %1254 }
 0x19d   :  { %v11660_v40 = vsel %vm1511_vm5, %v1472_v15, %v1474_v24  ;;  %v11663_v11 = vsel %vm1511_vm5, %v1474_v24, %v1476_v6  ;;  %v11666_v20 = vsel %vm25_vm2, %v1253_v51, %v1255_v37  ;;  %v11669_v44 = vsel %vm25_vm2, %v1255_v37, %v1257_v19 }
 0x19e   :  { %16094 = vst [vmem:[#allocation6_spill] sm:$0xff] %v11663_v11  ;;  %16095 = vst [vmem:[#allocation7_spill] sm:$0xff] %v11666_v20  ;;  %2091 = vmatprep.subr.bf16.mxu0 %v11666_v20  ;;  %9820 = vmatmul.mubr.msk.bf16.vlgmr.msra.gmra.mrb[48].mxu1 %vm1743_vm6, %v11492_v36 }
 0x19f   :  { %1601 = vst [vmem:[#allocation2 + $0x2e8] sm:$0xff] %v11660_v40  ;;  %1602 = vst [vmem:[#allocation2 + $0x2f0] sm:$0xff] %v11663_v11  ;;  %2092 = vmatpush1.bf16.msra.mxu0 %v11645_v23  ;;  %2166 = vmatprep.mubr.bf16.mxu1 %v11504_v49 }
 0x1a0   :  { %1383 = vst [vmem:[#allocation2 + $0x90] sm:$0xff] %v11666_v20  ;;  %1384 = vst [vmem:[#allocation2 + $0x98] sm:$0xff] %v11669_v44  ;;  %v1478_v51 = vpop.permute.xlu1 %1477  ;;  %v1259_v15 = vpop.permute.xlu0 %1258  ;;  %2093 = vmatprep.subr.bf16.mxu0 %v11248_v62 }
 0x1a1   :  { %v11682_v24 = vsel %vm1511_vm5, %v1476_v6, %v1478_v51  ;;  %v11685_v37 = vsel %vm25_vm2, %v1257_v19, %v1259_v15 }
 0x1a2   :  { %16096 = vst [vmem:[#allocation8_spill] sm:$0xff] %v11682_v24  ;;  %16097 = vst [vmem:[#allocation9_spill] sm:$0xff] %v11685_v37  ;;  %2134 = vmatprep.subr.bf16.mxu1 %v11685_v37 }
 0x1a3   :  { %1603 = vst [vmem:[#allocation2 + $0x2f8] sm:$0xff] %v11682_v24  ;;  %1385 = vst [vmem:[#allocation2 + $0xa0] sm:$0xff] %v11685_v37  ;;  %2094 = vmatpush1.bf16.msra.mxu0 %v11244_v58  ;;  %2135 = vmatpush1.bf16.msra.mxu1 %v11669_v44 }
 0x1a4   :  { %v1261_v20 = vpop.permute.xlu1 %1260  ;;  %v1480_v57 = vpop.permute.xlu0 %1479  ;;  %2136 = vmatprep.subr.bf16.mxu1 %v11250_v63  ;;  %2095 = vmatprep.subr.bf16.mxu0 %v11663_v11 }
 0x1a5   :  { %v11695_v62 = vsel %vm1511_vm5, %v1478_v51, %v1480_v57 }
 0x1a6   :  { %16098 = vst [vmem:[#allocation10_spill] sm:$0xff] %v11695_v62  ;;  %1604 = vst [vmem:[#allocation2 + $0x300] sm:$0xff] %v11695_v62 }
 0x1a7   :  { %2096 = vmatpush1.bf16.msra.mxu0 %v11660_v40  ;;  %2137 = vmatpush1.bf16.msra.mxu1 %v11246_v59  ;;  %v11712_v59 = vsel %vm25_vm2, %v1259_v15, %v1261_v20 }
 0x1a8   :  { %v1265_v19 = vpop.permute.xlu1 %1264  ;;  %v1484_v6 = vpop.permute.xlu0 %1483  ;;  %2138 = vmatprep.subr.bf16.mxu1 %v11695_v62  ;;  %16101 = vst [vmem:[#allocation13_spill] sm:$0xff] %v11712_v59 }
 0x1aa   :  { %9821 = vmatmul.mubr.msk.bf16.vlgmr.msra.gmra.mrb[52].mxu0 %vm1743_vm6, %v11492_v36 }
 0x1ab   :  { %2139 = vmatpush1.bf16.msra.mxu1 %v11682_v24  ;;  %2209 = vmatprep.mubr.bf16.mxu0 %v11504_v49 }
 0x1ac   :  { %v1482_v58 = vpop.permute.xlu1 %1481  ;;  %v1263_v63 = vpop.permute.xlu0 %1262 }
 0x1ad   :  { %v11706_v51 = vsel %vm1511_vm5, %v1482_v58, %v1484_v6  ;;  %v11709_v11 = vsel %vm25_vm2, %v1261_v20, %v1263_v63  ;;  %v11725_v20 = vsel %vm25_vm2, %v1263_v63, %v1265_v19 }
 0x1ae   :  { %16099 = vst [vmem:[#allocation11_spill] sm:$0xff] %v11706_v51  ;;  %16100 = vst [vmem:[#allocation12_spill] sm:$0xff] %v11709_v11  ;;  %2177 = vmatprep.subr.bf16.mxu0 %v11709_v11  ;;  %9822 = vmatmul.mubr.msk.bf16.vlgmr.msra.gmra.mrb[52].mxu1 %vm1743_vm6, %v11492_v36 }
 0x1af   :  { %1606 = vst [vmem:[#allocation2 + $0x310] sm:$0xff] %v11706_v51  ;;  %2178 = vmatpush1.bf16.msra.mxu0 %v11712_v59  ;;  %2252 = vmatprep.mubr.bf16.mxu1 %v11504_v49 }
 0x1b0   :  { %v1486_v62 = vpop.permute.xlu1 %1485  ;;  %v1267_v37 = vpop.permute.xlu0 %1266  ;;  %2179 = vmatprep.subr.bf16.mxu0 %v11280_v38  ;;  %v11733_v38 = vsel %vm1511_vm5, %v1480_v57, %v1482_v58 }
 0x1b1   :  { %v11722_v24 = vsel %vm25_vm2, %v1265_v19, %v1267_v37  ;;  %v11742_v63 = vsel %vm1511_vm5, %v1484_v6, %v1486_v62 }
 0x1b2   :  { %2220 = vmatprep.subr.bf16.mxu1 %v11722_v24 }
 0x1b3   :  { %2180 = vmatpush1.bf16.msra.mxu0 %v11276_v34  ;;  %2221 = vmatpush1.bf16.msra.mxu1 %v11725_v20 }
 0x1b4   :  { %v1269_v15 = vpop.permute.xlu1 %1268  ;;  %v1488_v11 = vpop.permute.xlu0 %1487  ;;  %2222 = vmatprep.subr.bf16.mxu1 %v11282_v39  ;;  %2181 = vmatprep.subr.bf16.mxu0 %v11706_v51 }
 0x1b5   :  { %v11736_v59 = vsel %vm1511_vm5, %v1486_v62, %v1488_v11 }
 0x1b6   :  { %16102 = vst [vmem:[#allocation14_spill] sm:$0xff] %v11736_v59 }
 0x1b7   :  { %2182 = vmatpush1.bf16.msra.mxu0 %v11733_v38  ;;  %2223 = vmatpush1.bf16.msra.mxu1 %v11278_v35  ;;  %v11752_v35 = vsel %vm25_vm2, %v1267_v37, %v1269_v15 }
 0x1b8   :  { %v1273_v19 = vpop.permute.xlu1 %1272  ;;  %v1492_v34 = vpop.permute.xlu0 %1491  ;;  %2224 = vmatprep.subr.bf16.mxu1 %v11736_v59 }
 0x1ba   :  { %9823 = vmatmul.mubr.msk.bf16.vlgmr.msra.gmra.mrb[56].mxu0 %vm1743_vm6, %v11492_v36 }
 0x1bb   :  { %2225 = vmatpush1.bf16.msra.mxu1 %v11742_v63  ;;  %2295 = vmatprep.mubr.bf16.mxu0 %v11504_v49 }
 0x1bc   :  { %v1490_v39 = vpop.permute.xlu1 %1489  ;;  %v1271_v57 = vpop.permute.xlu0 %1270 }
 0x1bd   :  { %v11749_v58 = vsel %vm25_vm2, %v1269_v15, %v1271_v57  ;;  %v11764_v51 = vsel %vm25_vm2, %v1271_v57, %v1273_v19  ;;  %v11768_v37 = vsel %vm1511_vm5, %v1490_v39, %v1492_v34 }
 0x1be   :  { %16103 = vst [vmem:[#allocation15_spill] sm:$0xff] %v11749_v58  ;;  %2263 = vmatprep.subr.bf16.mxu0 %v11749_v58  ;;  %9824 = vmatmul.mubr.msk.bf16.vlgmr.msra.gmra.mrb[56].mxu1 %vm1743_vm6, %v11492_v36  ;;  %16105 = vst [vmem:[#allocation17_spill] sm:$0xff] %v11768_v37 }
 0x1bf   :  { %2264 = vmatpush1.bf16.msra.mxu0 %v11752_v35  ;;  %2338 = vmatprep.mubr.bf16.mxu1 %v11504_v49 }
 0x1c0   :  { %v1494_v62 = vpop.permute.xlu1 %1493  ;;  %v1275_v6 = vpop.permute.xlu0 %1274  ;;  %2265 = vmatprep.subr.bf16.mxu0 %v11312_v27  ;;  %v11775_v27 = vsel %vm1511_vm5, %v1488_v11, %v1490_v39 }
 0x1c1   :  { %v11761_v59 = vsel %vm25_vm2, %v1273_v19, %v1275_v6 }
 0x1c2   :  { %16104 = vst [vmem:[#allocation16_spill] sm:$0xff] %v11761_v59  ;;  %2306 = vmatprep.subr.bf16.mxu1 %v11761_v59  ;;  %v11784_v59 = vsel %vm1511_vm5, %v1492_v34, %v1494_v62 }
 0x1c3   :  { %2266 = vmatpush1.bf16.msra.mxu0 %v11308_v21  ;;  %2307 = vmatpush1.bf16.msra.mxu1 %v11764_v51 }
 0x1c4   :  { %v1277_v15 = vpop.permute.xlu1 %1276  ;;  %v1496_v58 = vpop.permute.xlu0 %1495  ;;  %2308 = vmatprep.subr.bf16.mxu1 %v11314_v28  ;;  %2267 = vmatprep.subr.bf16.mxu0 %v11768_v37 }
 0x1c5   :  { %v11778_v19 = vsel %vm1511_vm5, %v1494_v62, %v1496_v58 }
 0x1c6   :  { %16106 = vst [vmem:[#allocation18_spill] sm:$0xff] %v11778_v19 }
 0x1c7   :  { %2268 = vmatpush1.bf16.msra.mxu0 %v11775_v27  ;;  %2309 = vmatpush1.bf16.msra.mxu1 %v11310_v22  ;;  %v11794_v22 = vsel %vm25_vm2, %v1275_v6, %v1277_v15 }
 0x1c8   :  { %v1281_v57 = vpop.permute.xlu1 %1280  ;;  %v1500_v21 = vpop.permute.xlu0 %1499  ;;  %2310 = vmatprep.subr.bf16.mxu1 %v11778_v19 }
 0x1ca   :  { %9825 = vmatmul.mubr.msk.bf16.vlgmr.msra.gmra.mrb[60].mxu0 %vm1743_vm6, %v11492_v36 }
 0x1cb   :  { %2311 = vmatpush1.bf16.msra.mxu1 %v11784_v59  ;;  %2381 = vmatprep.mubr.bf16.mxu0 %v11504_v49 }
 0x1cc   :  { %v1498_v28 = vpop.permute.xlu1 %1497  ;;  %v1279_v11 = vpop.permute.xlu0 %1278 }
 0x1cd   :  { %v11791_v39 = vsel %vm25_vm2, %v1277_v15, %v1279_v11  ;;  %v11806_v37 = vsel %vm25_vm2, %v1279_v11, %v1281_v57  ;;  %v11810_v6 = vsel %vm1511_vm5, %v1498_v28, %v1500_v21 }
 0x1ce   :  { %16107 = vst [vmem:[#allocation19_spill] sm:$0xff] %v11791_v39  ;;  %2349 = vmatprep.subr.bf16.mxu0 %v11791_v39  ;;  %9826 = vmatmul.mubr.msk.bf16.vlgmr.msra.gmra.mrb[60].mxu1 %vm1743_vm6, %v11492_v36 }
 0x1cf   :  { %2350 = vmatpush1.bf16.msra.mxu0 %v11794_v22  ;;  %2424 = vmatprep.mubr.bf16.mxu1 %v11504_v49 }
 0x1d0   :  { %v1502_v34 = vpop.permute.xlu1 %1501  ;;  %v1283_v62 = vpop.permute.xlu0 %1282  ;;  %2351 = vmatprep.subr.bf16.mxu0 %v11344_v13  ;;  %v11817_v13 = vsel %vm1511_vm5, %v1496_v58, %v1498_v28 }
 0x1d1   :  { %v11803_v19 = vsel %vm25_vm2, %v1281_v57, %v1283_v62 }
 0x1d2   :  { %16108 = vst [vmem:[#allocation20_spill] sm:$0xff] %v11803_v19  ;;  %2392 = vmatprep.subr.bf16.mxu1 %v11803_v19 }
 0x1d3   :  { %2352 = vmatpush1.bf16.msra.mxu0 %v11340_v7  ;;  %2393 = vmatpush1.bf16.msra.mxu1 %v11806_v37 }
 0x1d4   :  { %v1285_v15 = vpop.permute.xlu1 %1284  ;;  %v1504_v39 = vpop.permute.xlu0 %1503  ;;  %2394 = vmatprep.subr.bf16.mxu1 %v11346_v14  ;;  %2353 = vmatprep.subr.bf16.mxu0 %v11810_v6  ;;  %v11829_v14 = vsel %vm1511_vm5, %v1500_v21, %v1502_v34 }
 0x1d5   :  { %v11820_v57 = vsel %vm1511_vm5, %v1502_v34, %v1504_v39  ;;  %v11832_v58 = vsel %vm25_vm2, %v1283_v62, %v1285_v15 }
 0x1d7   :  { %2354 = vmatpush1.bf16.msra.mxu0 %v11817_v13  ;;  %2395 = vmatpush1.bf16.msra.mxu1 %v11342_v8 }
 0x1d8   :  { %v1289_v11 = vpop.permute.xlu1 %1288  ;;  %v1287_v7 = vpop.permute.xlu0 %1286  ;;  %2396 = vmatprep.subr.bf16.mxu1 %v11820_v57 }
 0x1d9   :  { %v11826_v19 = vsel %vm25_vm2, %v1285_v15, %v1287_v7  ;;  %v11846_v34 = vsel %vm25_vm2, %v1287_v7, %v1289_v11  ;;  %v16119_v7 = vld [vmem:[#allocation11_spill] sm:$0xff] }
 0x1da   :  { %2435 = vmatprep.subr.bf16.mxu0 %v11826_v19  ;;  %9827 = vmatmul.mubr.msk.bf16.vlgmr.msra.gmra.mrb[64].mxu0 %vm1743_vm6, %v11492_v36 }
 0x1db   :  { %2397 = vmatpush1.bf16.msra.mxu1 %v11829_v14  ;;  %2436 = vmatpush1.bf16.msra.mxu0 %v11832_v58 }
 0x1dc   :  { %v1506_v8 = vpop.permute.xlu1 %1505  ;;  %v1291_v28 = vpop.permute.xlu0 %1290  ;;  %2437 = vmatprep.subr.bf16.mxu0 %v11364_v0  ;;  %2467 = vmatprep.mubr.bf16.mxu0 %v11504_v49 }
 0x1dd   :  { %v11842_v21 = vsel %vm25_vm2, %v1289_v11, %v1291_v28  ;;  %1402 = vst.msk [vmem:[#allocation2 + $0x128] sm:$0xff] %vm25_vm2, %v1291_v28  ;;  %v11860_v11 = vsel %vm1511_vm5, %v1504_v39, %v1506_v8  ;;  %v16120_v28 = vld [vmem:[#allocation15_spill] sm:$0xff] }
 0x1de   :  { %2478 = vmatprep.subr.bf16.mxu1 %v11842_v21  ;;  %9828 = vmatmul.mubr.msk.bf16.vlgmr.msra.gmra.mrb[64].mxu1 %vm1743_vm6, %v11492_v36 }
 0x1df   :  { %2438 = vmatpush1.bf16.msra.mxu0 %v11360_v60  ;;  %2479 = vmatpush1.bf16.msra.mxu1 %v11846_v34 }
 0x1e0   :  { %v1510_v0 = vpop.permute.xlu1 %1509  ;;  %v1508_v62 = vpop.permute.xlu0 %1507  ;;  %2480 = vmatprep.subr.bf16.mxu1 %v11366_v1  ;;  %2510 = vmatprep.mubr.bf16.mxu1 %v11504_v49 }
 0x1e1   :  { %1621 = vst.msk [vmem:[#allocation2 + $0x380] sm:$0xff] %vm1511_vm5, %v1510_v0  ;;  %v11857_v15 = vsel %vm1511_vm5, %v1506_v8, %v1508_v62  ;;  %v11874_v39 = vsel %vm1511_vm5, %v1508_v62, %v1510_v0  ;;  %v10866_v8 = vld [vmem:[#allocation2 + $0x1f0] sm:$0xff]  ;;  %v10867_v0 = vld [vmem:[#allocation2 + $0x208] sm:$0xff] }
 0x1e2   :  { %2439 = vmatprep.subr.bf16.mxu0 %v11857_v15  ;;  %v16121_v62 = vld [vmem:[#allocation14_spill] sm:$0xff] }
 0x1e3   :  { %2440 = vmatpush1.bf16.msra.mxu0 %v11860_v11  ;;  %2481 = vmatpush1.bf16.msra.mxu1 %v11362_v61  ;;  %v1696_v61 = vld [vmem:[#allocation2 + $0x260] sm:$0xff] }
 0x1e4   :  { %2529 = vmatprep.subr.bf16.mxu0 %v11443_v26  ;;  %v10843_v26 = vld [vmem:[#allocation2 + $0x148] sm:$0xff] }
 0x1e6   :  { %9829 = vmatmul.mubr.msk.bf16.vlgmr.msra.gmra.mrb[68].mxu0 %vm1743_vm6, %v11492_v36 }
 0x1e7   :  { %2530 = vmatpush1.bf16.msra.mxu0 %v11504_v49  ;;  %2561 = vmatprep.mubr.bf16.mxu0 %v11504_v49 }
 0x1e8   :  { %v11870_v1 = vld [vmem:[#allocation2 + $0x380] sm:$0xff]  ;;  %2531 = vmatprep.subr.bf16.mxu0 %v11117_v42 }
 0x1e9   :  { %2482 = vmatprep.subr.bf16.mxu1 %v11870_v1  ;;  %v11887_v42 = vld [vmem:[%s15903_s4] sm:$0xff]  }
 0x1ea   :  { %2483 = vmatpush1.bf16.msra.mxu1 %v11874_v39 }
 0x1eb   :  { %2572 = vmatprep.subr.bf16.mxu1 %v11441_v25  ;;  %2532 = vmatpush1.bf16.msra.mxu0 %v11504_v49  ;;  %v10844_v25 = vld [vmem:[#allocation2 + $0x140] sm:$0xff] }
 0x1ec   :  { %2533 = vmatprep.subr.bf16.mxu0 %v11486_v43  ;;  %v10846_v43 = vld [vmem:[#allocation2 + $0x150] sm:$0xff] }
 0x1ed   :  { %9830 = vmatmul.mubr.msk.bf16.vlgmr.msra.gmra.mrb[68].mxu1 %vm1743_vm6, %v11492_v36  ;;  %v10852_v36 = vld [vmem:[#allocation2 + $0x180] sm:$0xff] }
 0x1ee   :  { %2573 = vmatpush1.bf16.msra.mxu1 %v11438_v18  ;;  %2604 = vmatprep.mubr.bf16.mxu1 %v11504_v49  ;;  %v10845_v18 = vld [vmem:[#allocation2 + $0x158] sm:$0xff] }
 0x1ef   :  { %2574 = vmatprep.subr.bf16.mxu1 %v10843_v26  ;;  %2534 = vmatpush1.bf16.msra.mxu0 %v1696_v61  ;;  %v10868_v61 = vld [vmem:[#allocation2 + $0x200] sm:$0xff]  ;;  %v16122_v26 = vld [vmem:[#allocation16_spill] sm:$0xff] }
 0x1f0   :  { %2615 = vmatprep.subr.bf16.mxu0 %v11473_v46  ;;  %v10850_v46 = vld [vmem:[#allocation2 + $0x170] sm:$0xff] }
 0x1f2   :  { %2575 = vmatpush1.bf16.msra.mxu1 %v10844_v25  ;;  %9832 = vmatmul.mubr.msk.bf16.vlgmr.msra.gmra.mrb[36].mxu0 %vm1743_vm6, %v11887_v42  ;;  %v10869_v25 = vld [vmem:[#allocation2 + $0x218] sm:$0xff] }
 0x1f3   :  { %2576 = vmatprep.subr.bf16.mxu1 %v11457_v31  ;;  %2616 = vmatpush1.bf16.msra.mxu0 %v11435_v17  ;;  %v10847_v17 = vld [vmem:[#allocation2 + $0x168] sm:$0xff]  ;;  %v10848_v31 = vld [vmem:[#allocation2 + $0x160] sm:$0xff] }
 0x1f4   :  { %2617 = vmatprep.subr.bf16.mxu0 %v10845_v18  ;;  %2647 = vmatprep.mubr.bf16.mxu0 %v11504_v49  ;;  %v16123_v18 = vld [vmem:[#allocation17_spill] sm:$0xff] }
 0x1f6   :  { %2577 = vmatpush1.bf16.msra.mxu1 %v11460_v2  ;;  %v10849_v2 = vld [vmem:[#allocation2 + $0x178] sm:$0xff] }
 0x1f7   :  { %2658 = vmatprep.subr.bf16.mxu1 %v11518_v55  ;;  %2618 = vmatpush1.bf16.msra.mxu0 %v10846_v43  ;;  %v10856_v55 = vld [vmem:[#allocation2 + $0x1a0] sm:$0xff]  ;;  %v10870_v43 = vld [vmem:[#allocation2 + $0x210] sm:$0xff] }
 0x1f8   :  { %2619 = vmatprep.subr.bf16.mxu0 %v11509_v52  ;;  %v10853_v52 = vld [vmem:[#allocation2 + $0x198] sm:$0xff] }
 0x1f9   :  { %9833 = vmatmul.mubr.msk.bf16.vlgmr.msra.gmra.mrb[36].mxu1 %vm1743_vm6, %v11887_v42 }
 0x1fa   :  { %2659 = vmatpush1.bf16.msra.mxu1 %v11515_v54  ;;  %2690 = vmatprep.mubr.bf16.mxu1 %v11504_v49  ;;  %v10855_v54 = vld [vmem:[#allocation2 + $0x1a8] sm:$0xff] }
 0x1fb   :  { %2660 = vmatprep.subr.bf16.mxu1 %v10847_v17  ;;  %2620 = vmatpush1.bf16.msra.mxu0 %v11476_v47  ;;  %v10851_v47 = vld [vmem:[#allocation2 + $0x188] sm:$0xff]  ;;  %v16124_v17 = vld [vmem:[#allocation19_spill] sm:$0xff] }
 0x1fc   :  { %2701 = vmatprep.subr.bf16.mxu0 %v11544_v9  ;;  %v16110_v9 = vld [vmem:[#allocation3_spill] sm:$0xff] }
 0x1fe   :  { %2661 = vmatpush1.bf16.msra.mxu1 %v10848_v31  ;;  %9834 = vmatmul.mubr.msk.bf16.vlgmr.msra.gmra.mrb[40].mxu0 %vm1743_vm6, %v11887_v42  ;;  %v10871_v31 = vld [vmem:[#allocation2 + $0x228] sm:$0xff] }
 0x1ff   :  { %2662 = vmatprep.subr.bf16.mxu1 %v11531_v3  ;;  %2702 = vmatpush1.bf16.msra.mxu0 %v11534_v4  ;;  %v16109_v3 = vld [vmem:[#allocation4_spill] sm:$0xff] }
 0x200   :  { %2703 = vmatprep.subr.bf16.mxu0 %v10849_v2  ;;  %2733 = vmatprep.mubr.bf16.mxu0 %v11504_v49  ;;  %v10857_v4 = vld [vmem:[#allocation2 + $0x1b8] sm:$0xff]  ;;  %v16125_v2 = vld [vmem:[#allocation18_spill] sm:$0xff] }
 0x202   :  { %2663 = vmatpush1.bf16.msra.mxu1 %v11512_v53  ;;  %v10854_v53 = vld [vmem:[#allocation2 + $0x190] sm:$0xff] }
 0x203   :  { %2744 = vmatprep.subr.bf16.mxu1 %v11569_v33  ;;  %2704 = vmatpush1.bf16.msra.mxu0 %v10850_v46  ;;  %v16113_v33 = vld [vmem:[#allocation13_spill] sm:$0xff] }
 0x204   :  { %2705 = vmatprep.subr.bf16.mxu0 %v11560_v30  ;;  %v16111_v30 = vld [vmem:[#allocation7_spill] sm:$0xff]  ;;  %v10872_v46 = vld [vmem:[#allocation2 + $0x220] sm:$0xff] }
 0x205   :  { %9835 = vmatmul.mubr.msk.bf16.vlgmr.msra.gmra.mrb[40].mxu1 %vm1743_vm6, %v11887_v42 }
 0x206   :  { %2745 = vmatpush1.bf16.msra.mxu1 %v11566_v32  ;;  %2776 = vmatprep.mubr.bf16.mxu1 %v11504_v49  ;;  %v16112_v32 = vld [vmem:[#allocation5_spill] sm:$0xff] }
 0x207   :  { %2746 = vmatprep.subr.bf16.mxu1 %v10851_v47  ;;  %2706 = vmatpush1.bf16.msra.mxu0 %v11547_v10  ;;  %v10858_v10 = vld [vmem:[#allocation2 + $0x1b0] sm:$0xff]  ;;  %v16126_v47 = vld [vmem:[#allocation20_spill] sm:$0xff] }
 0x208   :  { %2787 = vmatprep.subr.bf16.mxu0 %v11595_v50  ;;  %v16115_v50 = vld [vmem:[#allocation9_spill] sm:$0xff] }
 0x20a   :  { %2747 = vmatpush1.bf16.msra.mxu1 %v10852_v36  ;;  %9836 = vmatmul.mubr.msk.bf16.vlgmr.msra.gmra.mrb[44].mxu0 %vm1743_vm6, %v11887_v42  ;;  %v10873_v36 = vld [vmem:[#allocation2 + $0x230] sm:$0xff] }
 0x20b   :  { %2748 = vmatprep.subr.bf16.mxu1 %v11582_v41  ;;  %2788 = vmatpush1.bf16.msra.mxu0 %v11585_v48  ;;  %v10860_v41 = vld [vmem:[#allocation2 + $0x1c0] sm:$0xff]  ;;  %v16114_v48 = vld [vmem:[#allocation8_spill] sm:$0xff] }
 0x20c   :  { %2789 = vmatprep.subr.bf16.mxu0 %v10853_v52  ;;  %2819 = vmatprep.mubr.bf16.mxu0 %v11504_v49  ;;  %v10874_v52 = vld [vmem:[#allocation2 + $0x248] sm:$0xff] }
 0x20e   :  { %2749 = vmatpush1.bf16.msra.mxu1 %v11563_v12  ;;  %v10859_v12 = vld [vmem:[#allocation2 + $0x1c8] sm:$0xff] }
 0x20f   :  { %2830 = vmatprep.subr.bf16.mxu1 %v11619_v16  ;;  %2790 = vmatpush1.bf16.msra.mxu0 %v10854_v53  ;;  %v16117_v16 = vld [vmem:[#allocation12_spill] sm:$0xff]  ;;  %v10875_v53 = vld [vmem:[#allocation2 + $0x240] sm:$0xff] }
 0x210   :  { %2791 = vmatprep.subr.bf16.mxu0 %v11610_v29  ;;  %v16116_v29 = vld [vmem:[#allocation6_spill] sm:$0xff] }
 0x211   :  { %9837 = vmatmul.mubr.msk.bf16.vlgmr.msra.gmra.mrb[44].mxu1 %vm1743_vm6, %v11887_v42 }
 0x212   :  { %2831 = vmatpush1.bf16.msra.mxu1 %v11616_v45  ;;  %2862 = vmatprep.mubr.bf16.mxu1 %v11504_v49  ;;  %v10862_v45 = vld [vmem:[#allocation2 + $0x1d0] sm:$0xff] }
 0x213   :  { %2832 = vmatprep.subr.bf16.mxu1 %v10855_v54  ;;  %2792 = vmatpush1.bf16.msra.mxu0 %v11598_v5  ;;  %v10861_v5 = vld [vmem:[#allocation2 + $0x1d8] sm:$0xff]  ;;  %v3306_v54 = vld [vmem:[#allocation2 + $0x10] sm:$0xff] }
 0x214   :  { %2873 = vmatprep.subr.bf16.mxu0 %v11645_v23  ;;  %v16118_v23 = vld [vmem:[#allocation10_spill] sm:$0xff] }
 0x216   :  { %2833 = vmatpush1.bf16.msra.mxu1 %v10856_v55  ;;  %9838 = vmatmul.mubr.msk.bf16.vlgmr.msra.gmra.mrb[48].mxu0 %vm1743_vm6, %v11887_v42  ;;  %v3343_v55 = vld [vmem:[#allocation2 + $0x148] sm:$0xff] }
 0x217   :  { %2834 = vmatprep.subr.bf16.mxu1 %v11632_v56  ;;  %2874 = vmatpush1.bf16.msra.mxu0 %v16109_v3  ;;  %v10863_v56 = vld [vmem:[#allocation2 + $0x1e8] sm:$0xff] }
 0x218   :  { %2875 = vmatprep.subr.bf16.mxu0 %v10857_v4  ;;  %2905 = vmatprep.mubr.bf16.mxu0 %v11504_v49  ;;  %v3309_v3 = vld [vmem:[#allocation2 + $0x28] sm:$0xff]  ;;  %v3342_v4 = vld [vmem:[#allocation2 + $0x140] sm:$0xff] }
 0x21a   :  { %2835 = vmatpush1.bf16.msra.mxu1 %v16110_v9  ;;  %v3379_v9 = vld [vmem:[#allocation2 + $0x278] sm:$0xff] }
 0x21b   :  { %2916 = vmatprep.subr.bf16.mxu1 %v11669_v44  ;;  %2876 = vmatpush1.bf16.msra.mxu0 %v10858_v10  ;;  %v10864_v44 = vld [vmem:[#allocation2 + $0x1e0] sm:$0xff] }
 0x21c   :  { %2877 = vmatprep.subr.bf16.mxu0 %v11660_v40  ;;  %v10865_v40 = vld [vmem:[#allocation2 + $0x1f8] sm:$0xff]  ;;  %v3308_v10 = vld [vmem:[#allocation2 + $0x20] sm:$0xff] }
 0x21d   :  { %9839 = vmatmul.mubr.msk.bf16.vlgmr.msra.gmra.mrb[48].mxu1 %vm1743_vm6, %v11887_v42 }
 0x21e   :  { %2917 = vmatpush1.bf16.msra.mxu1 %v16111_v30  ;;  %2948 = vmatprep.mubr.bf16.mxu1 %v11504_v49  ;;  %v3345_v30 = vld [vmem:[#allocation2 + $0x158] sm:$0xff] }
 0x21f   :  { %2918 = vmatprep.subr.bf16.mxu1 %v10859_v12  ;;  %2878 = vmatpush1.bf16.msra.mxu0 %v16112_v32  ;;  %v3378_v12 = vld [vmem:[#allocation2 + $0x270] sm:$0xff] }
 0x220   :  { %2959 = vmatprep.subr.bf16.mxu0 %v16113_v33  ;;  %v12013_v32 = vld [vmem:[%s15903_s4 + $0x10] sm:$0xff]  }
 0x222   :  { %2919 = vmatpush1.bf16.msra.mxu1 %v10860_v41  ;;  %9840 = vmatmul.mubr.msk.bf16.vlgmr.msra.gmra.mrb[52].mxu0 %vm1743_vm6, %v11887_v42  ;;  %v3311_v41 = vld [vmem:[#allocation2 + $0x38] sm:$0xff] }
 0x223   :  { %2920 = vmatprep.subr.bf16.mxu1 %v16114_v48  ;;  %2960 = vmatpush1.bf16.msra.mxu0 %v16115_v50  ;;  %v3344_v48 = vld [vmem:[#allocation2 + $0x150] sm:$0xff]  ;;  %v3381_v50 = vld [vmem:[#allocation2 + $0x288] sm:$0xff] }
 0x224   :  { %2961 = vmatprep.subr.bf16.mxu0 %v10861_v5  ;;  %2991 = vmatprep.mubr.bf16.mxu0 %v11504_v49  ;;  %v3347_v5 = vld [vmem:[#allocation2 + $0x168] sm:$0xff] }
 0x226   :  { %2921 = vmatpush1.bf16.msra.mxu1 %v16116_v29  ;;  %v3380_v29 = vld [vmem:[#allocation2 + $0x280] sm:$0xff] }
 0x227   :  { %3002 = vmatprep.subr.bf16.mxu1 %v11725_v20  ;;  %2962 = vmatpush1.bf16.msra.mxu0 %v10862_v45  ;;  %v3313_v45 = vld [vmem:[#allocation2 + $0x48] sm:$0xff] }
 0x228   :  { %2963 = vmatprep.subr.bf16.mxu0 %v11733_v38 }
 0x229   :  { %9841 = vmatmul.mubr.msk.bf16.vlgmr.msra.gmra.mrb[52].mxu1 %vm1743_vm6, %v11887_v42 }
 0x22a   :  { %3003 = vmatpush1.bf16.msra.mxu1 %v16117_v16  ;;  %3034 = vmatprep.mubr.bf16.mxu1 %v11504_v49 }
 0x22b   :  { %3004 = vmatprep.subr.bf16.mxu1 %v10863_v56  ;;  %2964 = vmatpush1.bf16.msra.mxu0 %v16118_v23  ;;  %v3346_v56 = vld [vmem:[#allocation2 + $0x160] sm:$0xff]  ;;  %v3383_v23 = vld [vmem:[#allocation2 + $0x298] sm:$0xff] }
 0x22c   :  { %3045 = vmatprep.subr.bf16.mxu0 %v11752_v35 }
 0x22e   :  { %3005 = vmatpush1.bf16.msra.mxu1 %v10864_v44  ;;  %9842 = vmatmul.mubr.msk.bf16.vlgmr.msra.gmra.mrb[56].mxu0 %vm1743_vm6, %v11887_v42  ;;  %v3312_v44 = vld [vmem:[#allocation2 + $0x40] sm:$0xff] }
 0x22f   :  { %3006 = vmatprep.subr.bf16.mxu1 %v11742_v63  ;;  %3046 = vmatpush1.bf16.msra.mxu0 %v11722_v24 }
 0x230   :  { %3047 = vmatprep.subr.bf16.mxu0 %v10865_v40  ;;  %3077 = vmatprep.mubr.bf16.mxu0 %v11504_v49  ;;  %v3349_v40 = vld [vmem:[#allocation2 + $0x178] sm:$0xff] }
 0x232   :  { %3007 = vmatpush1.bf16.msra.mxu1 %v16119_v7  ;;  %v3382_v7 = vld [vmem:[#allocation2 + $0x290] sm:$0xff] }
 0x233   :  { %3088 = vmatprep.subr.bf16.mxu1 %v11764_v51  ;;  %3048 = vmatpush1.bf16.msra.mxu0 %v10866_v8  ;;  %v3315_v8 = vld [vmem:[#allocation2 + $0x58] sm:$0xff] }
 0x234   :  { %3049 = vmatprep.subr.bf16.mxu0 %v11775_v27 }
 0x235   :  { %9843 = vmatmul.mubr.msk.bf16.vlgmr.msra.gmra.mrb[56].mxu1 %vm1743_vm6, %v11887_v42 }
 0x236   :  { %3089 = vmatpush1.bf16.msra.mxu1 %v16120_v28  ;;  %3120 = vmatprep.mubr.bf16.mxu1 %v11504_v49 }
 0x237   :  { %3090 = vmatprep.subr.bf16.mxu1 %v10867_v0  ;;  %3050 = vmatpush1.bf16.msra.mxu0 %v16121_v62  ;;  %v3348_v0 = vld [vmem:[#allocation2 + $0x170] sm:$0xff] }
 0x238   :  { %3131 = vmatprep.subr.bf16.mxu0 %v11794_v22 }
 0x23a   :  { %3091 = vmatpush1.bf16.msra.mxu1 %v10868_v61  ;;  %9844 = vmatmul.mubr.msk.bf16.vlgmr.msra.gmra.mrb[60].mxu0 %vm1743_vm6, %v11887_v42  ;;  %v3385_v61 = vld [vmem:[#allocation2 + $0x2a8] sm:$0xff] }
 0x23b   :  { %3092 = vmatprep.subr.bf16.mxu1 %v11784_v59  ;;  %3132 = vmatpush1.bf16.msra.mxu0 %v16122_v26 }
 0x23c   :  { %3133 = vmatprep.subr.bf16.mxu0 %v10869_v25  ;;  %3163 = vmatprep.mubr.bf16.mxu0 %v11504_v49  ;;  %v3314_v25 = vld [vmem:[#allocation2 + $0x50] sm:$0xff] }
 0x23e   :  { %3093 = vmatpush1.bf16.msra.mxu1 %v16123_v18 }
 0x23f   :  { %3174 = vmatprep.subr.bf16.mxu1 %v11806_v37  ;;  %3134 = vmatpush1.bf16.msra.mxu0 %v10870_v43  ;;  %v3351_v43 = vld [vmem:[#allocation2 + $0x188] sm:$0xff] }
 0x240   :  { %3135 = vmatprep.subr.bf16.mxu0 %v11817_v13 }
 0x241   :  { %9845 = vmatmul.mubr.msk.bf16.vlgmr.msra.gmra.mrb[60].mxu1 %vm1743_vm6, %v11887_v42 }
 0x242   :  { %3175 = vmatpush1.bf16.msra.mxu1 %v16124_v17  ;;  %3206 = vmatprep.mubr.bf16.mxu1 %v11504_v49 }
 0x243   :  { %3176 = vmatprep.subr.bf16.mxu1 %v10871_v31  ;;  %3136 = vmatpush1.bf16.msra.mxu0 %v16125_v2  ;;  %v3384_v31 = vld [vmem:[#allocation2 + $0x2a0] sm:$0xff] }
 0x244   :  { %3217 = vmatprep.subr.bf16.mxu0 %v11832_v58 }
 0x246   :  { %3177 = vmatpush1.bf16.msra.mxu1 %v10872_v46  ;;  %9846 = vmatmul.mubr.msk.bf16.vlgmr.msra.gmra.mrb[64].mxu0 %vm1743_vm6, %v11887_v42  ;;  %v3317_v46 = vld [vmem:[#allocation2 + $0x68] sm:$0xff] }
 0x247   :  { %3178 = vmatprep.subr.bf16.mxu1 %v11829_v14  ;;  %3218 = vmatpush1.bf16.msra.mxu0 %v16126_v47 }
 0x248   :  { %3219 = vmatprep.subr.bf16.mxu0 %v11360_v60  ;;  %3249 = vmatprep.mubr.bf16.mxu0 %v11504_v49  ;;  %v3307_v60 = vld [vmem:[#allocation2 + $0x18] sm:$0xff] }
 0x24a   :  { %3179 = vmatpush1.bf16.msra.mxu1 %v11810_v6 }
 0x24b   :  { %3260 = vmatprep.subr.bf16.mxu1 %v11846_v34  ;;  %3220 = vmatpush1.bf16.msra.mxu0 %v10873_v36  ;;  %v3350_v36 = vld [vmem:[#allocation2 + $0x180] sm:$0xff] }
 0x24c   :  { %3221 = vmatprep.subr.bf16.mxu0 %v11860_v11 }
 0x24d   :  { %9847 = vmatmul.mubr.msk.bf16.vlgmr.msra.gmra.mrb[64].mxu1 %vm1743_vm6, %v11887_v42 }
 0x24e   :  { %3261 = vmatpush1.bf16.msra.mxu1 %v11826_v19  ;;  %3292 = vmatprep.mubr.bf16.mxu1 %v11504_v49 }
 0x24f   :  { %3262 = vmatprep.subr.bf16.mxu1 %v10874_v52  ;;  %3222 = vmatpush1.bf16.msra.mxu0 %v11820_v57  ;;  %v3387_v52 = vld [vmem:[#allocation2 + $0x2b8] sm:$0xff] }
 0x250   :  { %3422 = vmatprep.subr.bf16.mxu0 %v3307_v60  ;;  %v3316_v60 = vld [vmem:[#allocation2 + $0x60] sm:$0xff] }
 0x252   :  { %3263 = vmatpush1.bf16.msra.mxu1 %v10875_v53  ;;  %9848 = vmatmul.mubr.msk.bf16.vlgmr.msra.gmra.mrb[68].mxu0 %vm1743_vm6, %v11887_v42  ;;  %v3353_v53 = vld [vmem:[#allocation2 + $0x198] sm:$0xff] }
 0x253   :  { %3264 = vmatprep.subr.bf16.mxu1 %v11874_v39  ;;  %3423 = vmatpush1.bf16.msra.mxu0 %v3306_v54  ;;  %v3386_v54 = vld [vmem:[#allocation2 + $0x2b0] sm:$0xff] }
 0x254   :  { %3424 = vmatprep.subr.bf16.mxu0 %v3343_v55  ;;  %3454 = vmatprep.mubr.bf16.mxu0 %v11504_v49  ;;  %v3319_v55 = vld [vmem:[#allocation2 + $0x78] sm:$0xff] }
 0x256   :  { %3265 = vmatpush1.bf16.msra.mxu1 %v11857_v15 }
 0x257   :  { %3465 = vmatprep.subr.bf16.mxu1 %v3309_v3  ;;  %3425 = vmatpush1.bf16.msra.mxu0 %v3342_v4  ;;  %v3352_v3 = vld [vmem:[#allocation2 + $0x190] sm:$0xff]  ;;  %v3389_v4 = vld [vmem:[#allocation2 + $0x2c8] sm:$0xff] }
 0x258   :  { %3426 = vmatprep.subr.bf16.mxu0 %v3379_v9  ;;  %v3318_v9 = vld [vmem:[#allocation2 + $0x70] sm:$0xff] }
 0x259   :  { %9849 = vmatmul.mubr.msk.bf16.vlgmr.msra.gmra.mrb[68].mxu1 %vm1743_vm6, %v11887_v42  ;;  %v3310_v42 = vld [vmem:[#allocation2 + $0x30] sm:$0xff] }
 0x25a   :  { %3466 = vmatpush1.bf16.msra.mxu1 %v3308_v10  ;;  %3497 = vmatprep.mubr.bf16.mxu1 %v11504_v49  ;;  %v3355_v10 = vld [vmem:[#allocation2 + $0x1a8] sm:$0xff] }
 0x25b   :  { %3467 = vmatprep.subr.bf16.mxu1 %v3345_v30  ;;  %3427 = vmatpush1.bf16.msra.mxu0 %v3378_v12  ;;  %v12030_v30 = vld [vmem:[#allocation2] sm:$0xff]  ;;  %v3321_v12 = vld [vmem:[#allocation2 + $0x88] sm:$0xff] }
 0x25c   :  { %3508 = vmatprep.subr.bf16.mxu0 %v3311_v41  ;;  %v3354_v41 = vld [vmem:[#allocation2 + $0x1a0] sm:$0xff] }
 0x25e   :  { %3468 = vmatpush1.bf16.msra.mxu1 %v3344_v48  ;;  %9853 = vmatmul.mubr.msk.bf16.vlgmr.msra.gmra.mrb[36].mxu0 %vm1743_vm6, %v12013_v32  ;;  %v3391_v48 = vld [vmem:[#allocation2 + $0x2d8] sm:$0xff] }
 0x25f   :  { %3469 = vmatprep.subr.bf16.mxu1 %v3381_v50  ;;  %3509 = vmatpush1.bf16.msra.mxu0 %v3310_v42  ;;  %v3320_v50 = vld [vmem:[#allocation2 + $0x80] sm:$0xff]  ;;  %v3357_v42 = vld [vmem:[#allocation2 + $0x1b8] sm:$0xff] }
 0x260   :  { %3510 = vmatprep.subr.bf16.mxu0 %v3347_v5  ;;  %3540 = vmatprep.mubr.bf16.mxu0 %v11504_v49  ;;  %v3390_v5 = vld [vmem:[#allocation2 + $0x2d0] sm:$0xff] }
 0x262   :  { %3470 = vmatpush1.bf16.msra.mxu1 %v3380_v29  ;;  %v3323_v29 = vld [vmem:[#allocation2 + $0x98] sm:$0xff] }
 0x263   :  { %3551 = vmatprep.subr.bf16.mxu1 %v3313_v45  ;;  %3511 = vmatpush1.bf16.msra.mxu0 %v3346_v56  ;;  %v3356_v45 = vld [vmem:[#allocation2 + $0x1b0] sm:$0xff]  ;;  %v3393_v56 = vld [vmem:[#allocation2 + $0x2e8] sm:$0xff] }
 0x264   :  { %3512 = vmatprep.subr.bf16.mxu0 %v3383_v23  ;;  %v3322_v23 = vld [vmem:[#allocation2 + $0x90] sm:$0xff] }
 0x265   :  { %9854 = vmatmul.mubr.msk.bf16.vlgmr.msra.gmra.mrb[36].mxu1 %vm1743_vm6, %v12013_v32 }
 0x266   :  { %3552 = vmatpush1.bf16.msra.mxu1 %v3312_v44  ;;  %3583 = vmatprep.mubr.bf16.mxu1 %v11504_v49  ;;  %v3359_v44 = vld [vmem:[#allocation2 + $0x1c8] sm:$0xff] }
 0x267   :  { %3553 = vmatprep.subr.bf16.mxu1 %v3349_v40  ;;  %3513 = vmatpush1.bf16.msra.mxu0 %v3382_v7  ;;  %v3392_v40 = vld [vmem:[#allocation2 + $0x2e0] sm:$0xff] }
 0x268   :  { %3594 = vmatprep.subr.bf16.mxu0 %v3315_v8  ;;  %v3358_v7 = vld [vmem:[#allocation2 + $0x1c0] sm:$0xff]  ;;  %v3395_v8 = vld [vmem:[#allocation2 + $0x2f8] sm:$0xff] }
 0x26a   :  { %3554 = vmatpush1.bf16.msra.mxu1 %v3348_v0  ;;  %9855 = vmatmul.mubr.msk.bf16.vlgmr.msra.gmra.mrb[40].mxu0 %vm1743_vm6, %v12013_v32  ;;  %v3324_v0 = vld [vmem:[#allocation2 + $0xa0] sm:$0xff] }
 0x26b   :  { %3555 = vmatprep.subr.bf16.mxu1 %v3385_v61  ;;  %3595 = vmatpush1.bf16.msra.mxu0 %v3314_v25  ;;  %v3361_v61 = vld [vmem:[#allocation2 + $0x1d8] sm:$0xff]  ;;  %v3394_v25 = vld [vmem:[#allocation2 + $0x2f0] sm:$0xff] }
 0x26c   :  { %3596 = vmatprep.subr.bf16.mxu0 %v3351_v43  ;;  %3626 = vmatprep.mubr.bf16.mxu0 %v11504_v49  ;;  %v3360_v43 = vld [vmem:[#allocation2 + $0x1d0] sm:$0xff] }
 0x26e   :  { %3556 = vmatpush1.bf16.msra.mxu1 %v3384_v31  ;;  %v3396_v31 = vld [vmem:[#allocation2 + $0x300] sm:$0xff] }
 0x26f   :  { %3637 = vmatprep.subr.bf16.mxu1 %v3317_v46  ;;  %3597 = vmatpush1.bf16.msra.mxu0 %v3350_v36  ;;  %v3362_v46 = vld [vmem:[#allocation2 + $0x1e0] sm:$0xff] }
 0x270   :  { %3598 = vmatprep.subr.bf16.mxu0 %v3387_v52 }
 0x271   :  { %9856 = vmatmul.mubr.msk.bf16.vlgmr.msra.gmra.mrb[40].mxu1 %vm1743_vm6, %v12013_v32 }
 0x272   :  { %3638 = vmatpush1.bf16.msra.mxu1 %v3316_v60  ;;  %3669 = vmatprep.mubr.bf16.mxu1 %v11504_v49  ;;  %v3388_v49 = vld [vmem:[#allocation2 + $0x2c0] sm:$0xff] }
 0x273   :  { %3639 = vmatprep.subr.bf16.mxu1 %v3353_v53  ;;  %3599 = vmatpush1.bf16.msra.mxu0 %v3386_v54  ;;  %v5286_v53 = vlaneseq }
 0x274   :  { %3680 = vmatprep.subr.bf16.mxu0 %v3319_v55 }
 0x276   :  { %3640 = vmatpush1.bf16.msra.mxu1 %v3352_v3  ;;  %9857 = vmatmul.mubr.msk.bf16.vlgmr.msra.gmra.mrb[44].mxu0 %vm1743_vm6, %v12013_v32 }
 0x277   :  { %3641 = vmatprep.subr.bf16.mxu1 %v3389_v4  ;;  %3681 = vmatpush1.bf16.msra.mxu0 %v3318_v9 }
 0x278   :  { %3682 = vmatprep.subr.bf16.mxu0 %v3355_v10  ;;  %3712 = vmatprep.mubr.bf16.mxu0 %v12030_v30 }
 0x27a   :  { %3642 = vmatpush1.bf16.msra.mxu1 %v3388_v49 }
 0x27b   :  { %3723 = vmatprep.subr.bf16.mxu1 %v3321_v12  ;;  %3683 = vmatpush1.bf16.msra.mxu0 %v3354_v41 }
 0x27c   :  { %3684 = vmatprep.subr.bf16.mxu0 %v3391_v48 }
 0x27d   :  { %9858 = vmatmul.mubr.msk.bf16.vlgmr.msra.gmra.mrb[44].mxu1 %vm1743_vm6, %v12013_v32 }
 0x27e   :  { %3724 = vmatpush1.bf16.msra.mxu1 %v3320_v50  ;;  %3755 = vmatprep.mubr.bf16.mxu1 %v12030_v30 }
 0x27f   :  { %3725 = vmatprep.subr.bf16.mxu1 %v3357_v42  ;;  %3685 = vmatpush1.bf16.msra.mxu0 %v3390_v5 }
 0x280   :  { %3766 = vmatprep.subr.bf16.mxu0 %v3323_v29 }
 0x282   :  { %3726 = vmatpush1.bf16.msra.mxu1 %v3356_v45  ;;  %9859 = vmatmul.mubr.msk.bf16.vlgmr.msra.gmra.mrb[48].mxu0 %vm1743_vm6, %v12013_v32 }
 0x283   :  { %3727 = vmatprep.subr.bf16.mxu1 %v3393_v56  ;;  %3767 = vmatpush1.bf16.msra.mxu0 %v3322_v23 }
 0x284   :  { %3768 = vmatprep.subr.bf16.mxu0 %v3359_v44  ;;  %3798 = vmatprep.mubr.bf16.mxu0 %v12030_v30 }
 0x286   :  { %3728 = vmatpush1.bf16.msra.mxu1 %v3392_v40 }
 0x287   :  { %3809 = vmatprep.subr.bf16.mxu1 %v16113_v33  ;;  %3769 = vmatpush1.bf16.msra.mxu0 %v3358_v7  ;;  %v3363_v33 = vld [vmem:[#allocation2 + $0x1e8] sm:$0xff] }
 0x288   :  { %3770 = vmatprep.subr.bf16.mxu0 %v3395_v8  ;;  %v5276_v8 = vld [vmem:[%s15904_s2] sm:$0xff] }
 0x289   :  { %9860 = vmatmul.mubr.msk.bf16.vlgmr.msra.gmra.mrb[48].mxu1 %vm1743_vm6, %v12013_v32 }
 0x28a   :  { %3810 = vmatpush1.bf16.msra.mxu1 %v3324_v0  ;;  %3841 = vmatprep.mubr.bf16.mxu1 %v12030_v30 }
 0x28b   :  { %3811 = vmatprep.subr.bf16.mxu1 %v3361_v61  ;;  %3771 = vmatpush1.bf16.msra.mxu0 %v3394_v25 }
 0x28c   :  { %3852 = vmatprep.subr.bf16.mxu0 %v11725_v20  ;;  %v3365_v20 = vld [vmem:[#allocation2 + $0x1f8] sm:$0xff] }
 0x28e   :  { %3812 = vmatpush1.bf16.msra.mxu1 %v3360_v43  ;;  %9861 = vmatmul.mubr.msk.bf16.vlgmr.msra.gmra.mrb[52].mxu0 %vm1743_vm6, %v12013_v32 }
 0x28f   :  { %3813 = vmatprep.subr.bf16.mxu1 %v11733_v38  ;;  %3853 = vmatpush1.bf16.msra.mxu0 %v16117_v16  ;;  %v3398_v38 = vld [vmem:[#allocation2 + $0x310] sm:$0xff] }
 0x290   :  { %3854 = vmatprep.subr.bf16.mxu0 %v3363_v33  ;;  %3884 = vmatprep.mubr.bf16.mxu0 %v12030_v30  ;;  %v3364_v16 = vld [vmem:[#allocation2 + $0x1f0] sm:$0xff] }
 0x292   :  { %3814 = vmatpush1.bf16.msra.mxu1 %v3396_v31 }
 0x293   :  { %3895 = vmatprep.subr.bf16.mxu1 %v11752_v35  ;;  %3855 = vmatpush1.bf16.msra.mxu0 %v3362_v46  ;;  %v3368_v35 = vld [vmem:[#allocation2 + $0x210] sm:$0xff] }
 0x294   :  { %3856 = vmatprep.subr.bf16.mxu0 %v11742_v63  ;;  %v3367_v63 = vld [vmem:[#allocation2 + $0x208] sm:$0xff] }
 0x295   :  { %9862 = vmatmul.mubr.msk.bf16.vlgmr.msra.gmra.mrb[52].mxu1 %vm1743_vm6, %v12013_v32 }
 0x296   :  { %3896 = vmatpush1.bf16.msra.mxu1 %v11722_v24  ;;  %3927 = vmatprep.mubr.bf16.mxu1 %v12030_v30  ;;  %v3366_v24 = vld [vmem:[#allocation2 + $0x200] sm:$0xff] }
 0x297   :  { %3897 = vmatprep.subr.bf16.mxu1 %v3365_v20  ;;  %3857 = vmatpush1.bf16.msra.mxu0 %v3398_v38 }
 0x298   :  { %3938 = vmatprep.subr.bf16.mxu0 %v11764_v51  ;;  %v3369_v51 = vld [vmem:[#allocation2 + $0x218] sm:$0xff] }
 0x29a   :  { %3898 = vmatpush1.bf16.msra.mxu1 %v3364_v16  ;;  %9863 = vmatmul.mubr.msk.bf16.vlgmr.msra.gmra.mrb[56].mxu0 %vm1743_vm6, %v12013_v32 }
 0x29b   :  { %3899 = vmatprep.subr.bf16.mxu1 %v11775_v27  ;;  %3939 = vmatpush1.bf16.msra.mxu0 %v16120_v28  ;;  %v3370_v27 = vld [vmem:[#allocation2 + $0x220] sm:$0xff] }
 0x29c   :  { %3940 = vmatprep.subr.bf16.mxu0 %v3367_v63  ;;  %3970 = vmatprep.mubr.bf16.mxu0 %v12030_v30 }
 0x29e   :  { %3900 = vmatpush1.bf16.msra.mxu1 %v16121_v62 }
 0x29f   :  { %3981 = vmatprep.subr.bf16.mxu1 %v11794_v22  ;;  %3941 = vmatpush1.bf16.msra.mxu0 %v3366_v24  ;;  %v3372_v22 = vld [vmem:[#allocation2 + $0x230] sm:$0xff] }
 0x2a0   :  { %3942 = vmatprep.subr.bf16.mxu0 %v11784_v59  ;;  %v3371_v59 = vld [vmem:[#allocation2 + $0x228] sm:$0xff] }
 0x2a1   :  { %9864 = vmatmul.mubr.msk.bf16.vlgmr.msra.gmra.mrb[56].mxu1 %vm1743_vm6, %v12013_v32 }
 0x2a2   :  { %3982 = vmatpush1.bf16.msra.mxu1 %v16122_v26  ;;  %4013 = vmatprep.mubr.bf16.mxu1 %v12030_v30 }
 0x2a3   :  { %3983 = vmatprep.subr.bf16.mxu1 %v3369_v51  ;;  %3943 = vmatpush1.bf16.msra.mxu0 %v16123_v18 }
 0x2a4   :  { %4024 = vmatprep.subr.bf16.mxu0 %v11806_v37  ;;  %v3373_v37 = vld [vmem:[#allocation2 + $0x238] sm:$0xff] }
 0x2a6   :  { %3984 = vmatpush1.bf16.msra.mxu1 %v3368_v35  ;;  %9865 = vmatmul.mubr.msk.bf16.vlgmr.msra.gmra.mrb[60].mxu0 %vm1743_vm6, %v12013_v32 }
 0x2a7   :  { %3985 = vmatprep.subr.bf16.mxu1 %v11817_v13  ;;  %4025 = vmatpush1.bf16.msra.mxu0 %v16124_v17  ;;  %v3375_v13 = vld [vmem:[#allocation2 + $0x248] sm:$0xff] }
 0x2a8   :  { %4026 = vmatprep.subr.bf16.mxu0 %v3371_v59  ;;  %4056 = vmatprep.mubr.bf16.mxu0 %v12030_v30 }
 0x2aa   :  { %3986 = vmatpush1.bf16.msra.mxu1 %v16125_v2 }
 0x2ab   :  { %4067 = vmatprep.subr.bf16.mxu1 %v11832_v58  ;;  %4027 = vmatpush1.bf16.msra.mxu0 %v3370_v27  ;;  %v3374_v58 = vld [vmem:[#allocation2 + $0x240] sm:$0xff] }
 0x2ac   :  { %4028 = vmatprep.subr.bf16.mxu0 %v11829_v14  ;;  %v3341_v14 = vld [vmem:[#allocation2 + $0x128] sm:$0xff] }
 0x2ad   :  { %9866 = vmatmul.mubr.msk.bf16.vlgmr.msra.gmra.mrb[60].mxu1 %vm1743_vm6, %v12013_v32 }
 0x2ae   :  { %4068 = vmatpush1.bf16.msra.mxu1 %v16126_v47  ;;  %4099 = vmatprep.mubr.bf16.mxu1 %v12030_v30 }
 0x2af   :  { %4069 = vmatprep.subr.bf16.mxu1 %v3373_v37  ;;  %4029 = vmatpush1.bf16.msra.mxu0 %v11810_v6 }
 0x2b0   :  { %4110 = vmatprep.subr.bf16.mxu0 %v11846_v34 }
 0x2b2   :  { %4070 = vmatpush1.bf16.msra.mxu1 %v3372_v22  ;;  %9867 = vmatmul.mubr.msk.bf16.vlgmr.msra.gmra.mrb[64].mxu0 %vm1743_vm6, %v12013_v32  ;;  %v5277_v22 = vld [vmem:[%s15904_s2 + $0x8] sm:$0xff] }
 0x2b3   :  { %4071 = vmatprep.subr.bf16.mxu1 %v11860_v11  ;;  %4111 = vmatpush1.bf16.msra.mxu0 %v11826_v19  ;;  %v3376_v19 = vld [vmem:[#allocation2 + $0x250] sm:$0xff] }
 0x2b4   :  { %4112 = vmatprep.subr.bf16.mxu0 %v3375_v13  ;;  %4142 = vmatprep.mubr.bf16.mxu0 %v12030_v30 }
 0x2b6   :  { %4072 = vmatpush1.bf16.msra.mxu1 %v11820_v57 }
 0x2b7   :  { %4153 = vmatprep.subr.bf16.mxu1 %v3341_v14  ;;  %4113 = vmatpush1.bf16.msra.mxu0 %v3374_v58 }
 0x2b8   :  { %4114 = vmatprep.subr.bf16.mxu0 %v11874_v39 }
 0x2b9   :  { %9868 = vmatmul.mubr.msk.bf16.vlgmr.msra.gmra.mrb[64].mxu1 %vm1743_vm6, %v12013_v32 }
 0x2ba   :  { %4154 = vmatpush1.bf16.msra.mxu1 %v11842_v21  ;;  %4185 = vmatprep.mubr.bf16.mxu1 %v12030_v30 }
 0x2bb   :  { %4155 = vmatprep.subr.bf16.mxu1 %v12030_v30  ;;  %4115 = vmatpush1.bf16.msra.mxu0 %v11857_v15 }
 0x2be   :  { %4156 = vmatpush1.bf16.msra.mxu1 %v3376_v19  ;;  %9869 = vmatmul.mubr.msk.bf16.vlgmr.msra.gmra.mrb[68].mxu0 %vm1743_vm6, %v12013_v32 }
 0x2bf   :  { %4157 = vmatprep.subr.bf16.mxu1 %v12030_v30  ;;  %6164 = vmatprep.mubr.bf16.mxu0 %v12030_v30 }
 0x2c2   :  { %4158 = vmatpush1.bf16.msra.mxu1 %v11870_v1 }
 0x2c5   :  { %9870 = vmatmul.mubr.msk.bf16.vlgmr.msra.gmra.mrb[68].mxu1 %vm1743_vm6, %v12013_v32 }
 0x2c6   :  { %6207 = vmatprep.mubr.bf16.mxu1 %v12030_v30  ;;  %v5287_v30 = vshrl.u32 %v5286_v53, 7 }
 0x2c8   :  { %v12148_v56 = vsub.s32 0, %v5287_v30  ;;  %v12150_v23 = vsub.s32 1, %v5287_v30  ;;  %v12158_v0 = vsub.s32 2, %v5287_v30  ;;  %v12163_v43 = vsub.s32 3, %v5287_v30 }
 0x2c9   :  { %v12165_v33 = vsub.s32 4, %v5287_v30  ;;  %v12171_v20 = vsub.s32 5, %v5287_v30  ;;  %v12173_v38 = vsub.s32 6, %v5287_v30  ;;  %v12175_v16 = vsub.s32 7, %v5287_v30 }
 0x2ca   :  { %16128 = vst [vmem:[#allocation3_spill] sm:$0xff] %v12148_v56  ;;  %16129 = vst [vmem:[#allocation7_spill] sm:$0xff] %v12150_v23  ;;  %v12180_v24 = vrot.slane %v5276_v8, %v12148_v56  ;;  %v12183_v51 = vrot.slane %v5276_v8, %v12150_v23  ;;  %v12189_v27 = vrot.slane %v5276_v8, %v12158_v0 }
 0x2cb   :  { %16130 = vst [vmem:[#allocation5_spill] sm:$0xff] %v12158_v0  ;;  %16131 = vst [vmem:[#allocation13_spill] sm:$0xff] %v12163_v43  ;;  %v12199_v58 = vrot.slane %v5276_v8, %v12163_v43  ;;  %v12202_v19 = vrot.slane %v5276_v8, %v12165_v33 }
 0x2cc   :  { %16132 = vst [vmem:[#allocation8_spill] sm:$0xff] %v12165_v33  ;;  %16133 = vst [vmem:[#allocation9_spill] sm:$0xff] %v12171_v20 }
 0x2cd   :  { %16134 = vst [vmem:[#allocation6_spill] sm:$0xff] %v12173_v38  ;;  %16135 = vst [vmem:[#allocation12_spill] sm:$0xff] %v12175_v16 }
 0x331   :  { %v12105_v6 = vpop.f32.mrb[36].mxu0 }
 0x332   :  { %v12107_v57 = vpop.f32.mrb[37].mxu0  ;;  %v4340_v21 = vmin.f32 %v12105_v6, 20.0  ;;  %vm4268_vm9 = vcmp.gt.f32.partialorder %v12105_v6, 20.0 }
 0x333   :  { %v12110_v34 = vpop.f32.mrb[38].mxu0  ;;  %v4341_v15 = vmin.f32 %v12107_v57, 20.0  ;;  %vm4269_vm10 = vcmp.gt.f32.partialorder %v12107_v57, 20.0 }
 0x334   :  { %v12113_v11 = vpop.f32.mrb[39].mxu0  ;;  %v4412_v39 = vmul.f32 1.442695, %v4340_v21  ;;  %v4376_v1 = vmin.f32 %v12110_v34, 20.0  ;;  %vm4304_vm13 = vcmp.gt.f32.partialorder %v12110_v34, 20.0 }
 0x335   :  { %v4414_v28 = vmul.f32 1.442695, %v4341_v15  ;;  %v4377_v62 = vmin.f32 %v12113_v11, 20.0  ;;  %v12206_v15 = vrot.slane %v5276_v8, %v12171_v20  ;;  %vm4305_vm14 = vcmp.gt.f32.partialorder %v12113_v11, 20.0 }
 0x336   :  { %10266 = vpow2.f32 %v4412_v39  ;;  %v4484_v2 = vmul.f32 1.442695, %v4376_v1  ;;  %v12209_v39 = vrot.slane %v5276_v8, %v12173_v38  ;;  %v12212_v1 = vrot.slane %v5276_v8, %v12175_v16 }
 0x337   :  { %10268 = vpow2.f32 %v4414_v28  ;;  %v4486_v32 = vmul.f32 1.442695, %v4377_v62  ;;  %v12243_v8 = vrot.slane %v5277_v22, %v12165_v33 }
 0x338   :  { %v12117_v26 = vpop.f32.mrb[36].mxu1  ;;  %10270 = vpow2.f32 %v4484_v2  ;;  %16136 = vst [vmem:[#allocation10_spill] sm:$0xff] %v12209_v39 }
 0x339   :  { %v12119_v18 = vpop.f32.mrb[37].mxu1  ;;  %v4342_v36 = vmin.f32 %v12117_v26, 20.0  ;;  %10272 = vpow2.f32 %v4486_v32  ;;  %v12219_v32 = vrot.slane %v5277_v22, %v12148_v56  ;;  %16142 = vst [vmem:[#allocation19_spill] sm:$0xff] %v12243_v8  ;;  %vm4270_vm0 = vcmp.gt.f32.partialorder %v12117_v26, 20.0 }
 0x33a   :  { %v12121_v17 = vpop.f32.mrb[38].mxu1  ;;  %v4343_v54 = vmin.f32 %v12119_v18, 20.0 }
 0x33b   :  { %v12123_v47 = vpop.f32.mrb[39].mxu1  ;;  %v4416_v4 = vmul.f32 1.442695, %v4342_v36  ;;  %v4378_v9 = vmin.f32 %v12121_v17, 20.0  ;;  %16137 = vst [vmem:[#allocation11_spill] sm:$0xff] %v12219_v32  ;;  %v12222_v36 = vrot.slane %v5277_v22, %v12150_v23 }
 0x33c   :  { %v4379_v10 = vmin.f32 %v12123_v47, 20.0  ;;  %v4418_v49 = vmul.f32 1.442695, %v4343_v54 }
 0x33d   :  { %v12126_v52 = vpop.f32.mrb[40].mxu0  ;;  %10274 = vpow2.f32 %v4416_v4  ;;  %v4488_v50 = vmul.f32 1.442695, %v4378_v9  ;;  %16138 = vst [vmem:[#allocation15_spill] sm:$0xff] %v12222_v36  ;;  %v12228_v9 = vrot.slane %v5277_v22, %v12158_v0 }
 0x33e   :  { %v12128_v60 = vpop.f32.mrb[41].mxu0  ;;  %v4344_v12 = vmin.f32 %v12126_v52, 20.0  ;;  %v4490_v29 = vmul.f32 1.442695, %v4379_v10  ;;  %10276 = vpow2.f32 %v4418_v49 }
 0x33f   :  { %v12131_v55 = vpop.f32.mrb[42].mxu0  ;;  %10278 = vpow2.f32 %v4488_v50  ;;  %v4345_v37 = vmin.f32 %v12128_v60, 20.0  ;;  %16139 = vst [vmem:[#allocation14_spill] sm:$0xff] %v12228_v9  ;;  %v12237_v50 = vrot.slane %v5277_v22, %v12163_v43 }
 0x340   :  { %v12133_v3 = vpop.f32.mrb[43].mxu0  ;;  %v12140_v48 = vpop.eup %10266  ;;  %v4420_v44 = vmul.f32 1.442695, %v4344_v12  ;;  %10280 = vpow2.f32 %v4490_v29  ;;  %v4380_v0 = vmin.f32 %v12131_v55, 20.0 }
 0x341   :  { %v12144_v5 = vpop.eup %10268  ;;  %v4556_v7 = vadd.f32 1.0, %v12140_v48  ;;  %v4559_v21 = vmul.f32 -0.5, %v12140_v48  ;;  %v4562_v53 = vand.u32 2147483647, %v12140_v48  ;;  %v4422_v54 = vmul.f32 1.442695, %v4345_v37 }
 0x342   :  { %v12160_v61 = vpop.eup %10270  ;;  %v4565_v25 = vadd.f32 1.0, %v12144_v5  ;;  %10282 = vpow2.f32 %v4420_v44  ;;  %v4568_v62 = vmul.f32 -0.5, %v12144_v5  ;;  %v4571_v30 = vand.u32 2147483647, %v12144_v5  ;;  %16140 = vst [vmem:[#allocation16_spill] sm:$0xff] %v12237_v50 }
 0x343   :  { %v12169_v46 = vpop.eup %10272  ;;  %10284 = vlog2.f32 %v4556_v7  ;;  %v4880_v59 = vadd.f32 1.0, %v12160_v61  ;;  %v4883_v2 = vmul.f32 -0.5, %v12160_v61  ;;  %v4560_v29 = vadd.f32 1.0, %v4559_v21 }
 0x344   :  { %v12138_v41 = vpop.f32.mrb[40].mxu1  ;;  %10286 = vlog2.f32 %v4565_v25  ;;  %v4889_v14 = vadd.f32 1.0, %v12169_v46  ;;  %v4892_v49 = vmul.f32 -0.5, %v12169_v46  ;;  %v12246_v25 = vrot.slane %v5277_v22, %v12171_v20 }
 0x345   :  { %16127 = vst [vmem:[#allocation4_spill] sm:$0xff] %v12138_v41  ;;  %v12142_v42 = vpop.f32.mrb[41].mxu1  ;;  %10288 = vlog2.f32 %v4880_v59  ;;  %v4569_v37 = vadd.f32 1.0, %v4568_v62  ;;  %v12254_v21 = vrot.slane %v5277_v22, %v12173_v38  ;;  %vm12258_vm7 = vcmp.lt.f32.partialorder %v4562_v53, 0.0004427343 }
 0x346   :  { %v12146_v45 = vpop.f32.mrb[42].mxu1  ;;  %10290 = vlog2.f32 %v4889_v14  ;;  %16143 = vst [vmem:[#allocation18_spill] sm:$0xff] %v12246_v25  ;;  %v4884_v14 = vadd.f32 1.0, %v4883_v2  ;;  %v4381_v62 = vmin.f32 %v12133_v3, 20.0  ;;  %vm12267_vm8 = vcmp.lt.f32.partialorder %v4571_v30, 0.0004427343 }
 0x347   :  { %v12152_v40 = vpop.f32.mrb[43].mxu1  ;;  %v12214_v28 = vpop.eup %10274  ;;  %16145 = vst [vmem:[#allocation21_spill] sm:$0xff] %v12254_v21  ;;  %10292 = vpow2.f32 %v4422_v54  ;;  %v4886_v38 = vand.u32 2147483647, %v12160_v61  ;;  %v4893_v56 = vadd.f32 1.0, %v4892_v49  ;;  %v12276_v25 = vrot.slane %v5277_v22, %v12175_v16 }
 0x348   :  { %v12230_v10 = vpop.eup %10276  ;;  %v4574_v44 = vadd.f32 1.0, %v12214_v28  ;;  %v4577_v20 = vmul.f32 -0.5, %v12214_v28  ;;  %v4895_v53 = vand.u32 2147483647, %v12169_v46  ;;  %v12279_v54 = vmul.f32 %v12140_v48, %v4560_v29 }
 0x349   :  { %v12167_v31 = vpop.f32.mrb[44].mxu0  ;;  %v12248_v59 = vpop.eup %10278  ;;  %v4586_v33 = vmul.f32 -0.5, %v12230_v10  ;;  %16151 = vst [vmem:[#allocation23_spill] sm:$0xff] %v12276_v25  ;;  %v4583_v30 = vadd.f32 1.0, %v12230_v10  ;;  %v4494_v50 = vmul.f32 1.442695, %v4381_v62  ;;  %v4570_v49 = vmul.f32 %v12144_v5, %v4569_v37 }
 0x34a   :  { %v12177_v63 = vpop.f32.mrb[45].mxu0  ;;  %v12256_v43 = vpop.eup %10280  ;;  %10294 = vlog2.f32 %v4574_v44  ;;  %v4492_v22 = vmul.f32 1.442695, %v4380_v0  ;;  %v4578_v48 = vadd.f32 1.0, %v4577_v20  ;;  %v4901_v44 = vmul.f32 -0.5, %v12248_v59 }
 0x34b   :  { %v12185_v35 = vpop.f32.mrb[46].mxu0  ;;  %v4587_v29 = vadd.f32 1.0, %v4586_v33  ;;  %10296 = vpow2.f32 %v4494_v50  ;;  %vm12296_vm11 = vcmp.lt.f32.partialorder %v4886_v38, 0.0004427343  ;;  %v12301_v0 = vmul.f32 %v12169_v46, %v4893_v56 }
 0x34c   :  { %v12195_v13 = vpop.f32.mrb[47].mxu0  ;;  %v12265_v2 = vpop.eup %10282  ;;  %vm12303_vm12 = vcmp.lt.f32.partialorder %v4895_v53, 0.0004427343  ;;  %v4580_v20 = vand.u32 2147483647, %v12214_v28  ;;  %v4907_v33 = vadd.f32 1.0, %v12256_v43  ;;  %10298 = vlog2.f32 %v4583_v30 }
 0x34d   :  { %v10285_v8 = vpop.eup %10284  ;;  %v4592_v38 = vadd.f32 1.0, %v12265_v2  ;;  %v4910_v56 = vmul.f32 -0.5, %v12256_v43  ;;  %v4346_v46 = vmin.f32 %v12138_v41, 20.0  ;;  %v4347_v53 = vmin.f32 %v12142_v42, 20.0 }
 0x34e   :  { %v10287_v36 = vpop.eup %10286  ;;  %v4558_v5 = vmul.f32 0.6931472, %v10285_v8  ;;  %v4589_v8 = vand.u32 2147483647, %v12230_v10  ;;  %v4904_v30 = vand.u32 2147483647, %v12248_v59 }
 0x34f   :  { %v4567_v50 = vmul.f32 0.6931472, %v10287_v36  ;;  %v4902_v36 = vadd.f32 1.0, %v4901_v44  ;;  %v4426_v41 = vmul.f32 1.442695, %v4347_v53 }
 0x350   :  { %v12225_v4 = vpop.f32.mrb[44].mxu1  ;;  %vm12335_vm15 = vcmp.lt.f32.partialorder %v4580_v20, 0.0004427343  ;;  %v4424_v53 = vmul.f32 1.442695, %v4346_v46 }
 0x351   :  { %v12234_v12 = vpop.f32.mrb[45].mxu1  ;;  %v4913_v32 = vand.u32 2147483647, %v12256_v43  ;;  %vm12366_vm1 = vcmp.lt.f32.partialorder %v4589_v8, 0.0004427343  ;;  %v4348_v8 = vmin.f32 %v12167_v31, 20.0 }
 0x352   :  { %v12240_v7 = vpop.f32.mrb[46].mxu1 }
 0x353   :  { %16141 = vst [vmem:[#allocation17_spill] sm:$0xff] %v12240_v7  ;;  %v12251_v23 = vpop.f32.mrb[47].mxu1  ;;  %v12286_v7 = vmul.f32 %v12160_v61, %v4884_v14  ;;  %v10289_v14 = vpop.eup %10288 }
 0x354   :  { %16144 = vst [vmem:[#allocation20_spill] sm:$0xff] %v12251_v23  ;;  %v10291_v25 = vpop.eup %10290  ;;  %v4882_v44 = vmul.f32 0.6931472, %v10289_v14 }
 0x355   :  { %v12273_v21 = vpop.f32.mrb[48].mxu0 }
 0x356   :  { %16150 = vst [vmem:[#allocation22_spill] sm:$0xff] %v12273_v21  ;;  %v12282_v39 = vpop.f32.mrb[49].mxu0  ;;  %v4898_v21 = vadd.f32 1.0, %v12248_v59 }
 0x357   :  { %16152 = vst [vmem:[#allocation24_spill] sm:$0xff] %v12282_v39  ;;  %v12289_v16 = vpop.f32.mrb[50].mxu0 }
 0x358   :  { %16153 = vst [vmem:[#allocation25_spill] sm:$0xff] %v12289_v16  ;;  %v12294_v62 = vpop.f32.mrb[51].mxu0  ;;  %10300 = vlog2.f32 %v4898_v21  ;;  %v12318_v16 = vmul.f32 %v12230_v10, %v4587_v29  ;;  %v4564_v21 = vsel %vm12258_vm7, %v12279_v54, %v4558_v5  ;;  %v12331_v10 = vpop.eup %10292  ;;  %v4573_v29 = vsel %vm12267_vm8, %v4570_v49, %v4567_v50 }
 0x359   :  { %16154 = vst [vmem:[#allocation26_spill] sm:$0xff] %v12294_v62  ;;  %v12315_v62 = vmul.f32 %v12214_v28, %v4578_v48  ;;  %10302 = vlog2.f32 %v4907_v33  ;;  %v4383_v28 = vmin.f32 %v12152_v40, 20.0  ;;  %v4911_v5 = vadd.f32 1.0, %v4910_v56  ;;  %v10295_v23 = vpop.eup %10294 }
 0x35a   :  { %10304 = vlog2.f32 %v4592_v38  ;;  %v4601_v33 = vadd.f32 1.0, %v12331_v10  ;;  %v5204_v20 = vsel %vm4268_vm9, %v12105_v6, %v4564_v21  ;;  %v5205_v14 = vsel %vm4269_vm10, %v12107_v57, %v4573_v29 }
 0x35b   :  { %10306 = vpow2.f32 %v4492_v22  ;;  %v4498_v49 = vmul.f32 1.442695, %v4383_v28  ;;  %v12354_v22 = vmul.f32 %v12248_v59, %v4902_v36  ;;  %v4888_v38 = vsel %vm12296_vm11, %v12286_v7, %v4882_v44 }
 0x35c   :  { %v12321_v39 = vpop.f32.mrb[48].mxu1  ;;  %10308 = vpow2.f32 %v4426_v41  ;;  %v12358_v41 = vpop.eup %10296  ;;  %v4595_v59 = vmul.f32 -0.5, %v12265_v2  ;;  %v4598_v56 = vand.u32 2147483647, %v12265_v2  ;;  %v4576_v36 = vmul.f32 0.6931472, %v10295_v23 }
 0x35d   :  { %16159 = vst [vmem:[#allocation27_spill] sm:$0xff] %v12321_v39  ;;  %v12329_v48 = vpop.f32.mrb[49].mxu1  ;;  %v4891_v39 = vmul.f32 0.6931472, %v10291_v25  ;;  %v4382_v25 = vmin.f32 %v12146_v45, 20.0  ;;  %10310 = vlog2.f32 %v4601_v33  ;;  %v4604_v21 = vmul.f32 -0.5, %v12331_v10  ;;  %v10299_v37 = vpop.eup %10298 }
 0x35e   :  { %16160 = vst [vmem:[#allocation28_spill] sm:$0xff] %v12329_v48  ;;  %v12339_v54 = vpop.f32.mrb[50].mxu1  ;;  %v4925_v61 = vadd.f32 1.0, %v12358_v41  ;;  %10312 = vpow2.f32 %v4424_v53  ;;  %v12385_v23 = vmul.f32 %v12180_v24, %v5204_v20  ;;  %v12388_v44 = vmul.f32 %v12183_v51, %v5205_v14 }
 0x35f   :  { %v12342_v48 = vpop.f32.mrb[51].mxu1  ;;  %v4897_v6 = vsel %vm12303_vm12, %v12301_v0, %v4891_v39  ;;  %v12379_v39 = vmul.f32 %v12256_v43, %v4911_v5  ;;  %v4496_v0 = vmul.f32 1.442695, %v4382_v25  ;;  %10314 = vpow2.f32 %v4498_v49 }
 0x360   :  { %vm12390_vm7 = vcmp.lt.f32.partialorder %v4904_v30, 0.0004427343  ;;  %vm12394_vm8 = vcmp.lt.f32.partialorder %v4913_v32, 0.0004427343  ;;  %10316 = vlog2.f32 %v4925_v61  ;;  %v4349_v5 = vmin.f32 %v12177_v63, 20.0 }
 0x361   :  { %v12356_v50 = vpop.f32.mrb[52].mxu0  ;;  %v5240_v53 = vsel %vm4304_vm13, %v12110_v34, %v4888_v38  ;;  %v5241_v25 = vsel %vm4305_vm14, %v12113_v11, %v4897_v6  ;;  %v4596_v49 = vadd.f32 1.0, %v4595_v59  ;;  %vm12405_vm9 = vcmp.lt.f32.partialorder %v4598_v56, 0.0004427343 }
 0x362   :  { %v12372_v46 = vpop.f32.mrb[53].mxu0  ;;  %v10301_v29 = vpop.eup %10300  ;;  %vm4273_vm10 = vcmp.gt.f32.partialorder %v12128_v60, 20.0  ;;  %v4582_v20 = vsel %vm12335_vm15, %v12315_v62, %v4576_v36  ;;  %v4585_v14 = vmul.f32 0.6931472, %v10299_v37  ;;  %v4605_v61 = vadd.f32 1.0, %v4604_v21 }
 0x363   :  { %v12376_v7 = vpop.f32.mrb[54].mxu0  ;;  %v10303_v32 = vpop.eup %10302  ;;  %v4384_v34 = vmin.f32 %v12185_v35, 20.0  ;;  %vm4271_vm11 = vcmp.gt.f32.partialorder %v12119_v18, 20.0  ;;  %vm4306_vm12 = vcmp.gt.f32.partialorder %v12121_v17, 20.0  ;;  %v4928_v11 = vmul.f32 -0.5, %v12358_v41 }
 0x364   :  { %v12382_v28 = vpop.f32.mrb[55].mxu0  ;;  %v10305_v38 = vpop.eup %10304  ;;  %10318 = vpow2.f32 %v4496_v0  ;;  %v4428_v6 = vmul.f32 1.442695, %v4348_v8  ;;  %v4430_v59 = vmul.f32 1.442695, %v4349_v5  ;;  %v12423_v62 = vmul.f32 %v12183_v51, %v5241_v25 }
 0x365   :  { %16165 = vst [vmem:[#allocation29_spill] sm:$0xff] %v12382_v28  ;;  %v12417_v56 = vpop.eup %10306  ;;  %v12420_v28 = vmul.f32 %v12180_v24, %v5240_v53  ;;  %v4900_v9 = vmul.f32 0.6931472, %v10301_v29  ;;  %v4607_v36 = vand.u32 2147483647, %v12331_v10  ;;  %v5206_v0 = vsel %vm4270_vm0, %v12117_v26, %v4582_v20 }
 0x366   :  { %v12428_v37 = vpop.eup %10308  ;;  %vm4307_vm13 = vcmp.gt.f32.partialorder %v12123_v47, 20.0  ;;  %v4909_v8 = vmul.f32 0.6931472, %v10303_v32  ;;  %vm4272_vm14 = vcmp.gt.f32.partialorder %v12126_v52, 20.0  ;;  %v4597_v24 = vmul.f32 %v12265_v2, %v4596_v49 }
 0x367   :  { %vm4309_vm15 = vcmp.gt.f32.partialorder %v12133_v3, 20.0  ;;  %10320 = vpow2.f32 %v4430_v59  ;;  %v10311_v29 = vpop.eup %10310  ;;  %v4591_v5 = vsel %vm12366_vm1, %v12318_v16, %v4585_v14  ;;  %v4594_v53 = vmul.f32 0.6931472, %v10305_v38 }
 0x368   :  { %v12426_v21 = vpop.f32.mrb[52].mxu1  ;;  %v4619_v26 = vadd.f32 1.0, %v12428_v37  ;;  %v4500_v25 = vmul.f32 1.442695, %v4384_v34  ;;  %v4603_v32 = vmul.f32 0.6931472, %v10311_v29  ;;  %10322 = vpow2.f32 %v4428_v6  ;;  %v12448_v59 = vpop.eup %10312 }
 0x369   :  { %16172 = vst [vmem:[#allocation30_spill] sm:$0xff] %v12426_v21  ;;  %v12437_v51 = vpop.f32.mrb[53].mxu1  ;;  %v4606_v21 = vmul.f32 %v12331_v10, %v4605_v61  ;;  %v4929_v2 = vadd.f32 1.0, %v4928_v11  ;;  %vm4608_vm0 = vcmp.lt.f32.partialorder %v4607_v36, 0.0004427343  ;;  %v12456_v14 = vpop.eup %10314  ;;  %v4906_v10 = vsel %vm12390_vm7, %v12354_v22, %v4900_v9 }
 0x36a   :  { %16173 = vst [vmem:[#allocation31_spill] sm:$0xff] %v12437_v51  ;;  %v12443_v20 = vpop.f32.mrb[54].mxu1  ;;  %v12451_v51 = vmul.f32 %v12189_v27, %v5206_v0  ;;  %v4931_v16 = vand.u32 2147483647, %v12358_v41  ;;  %10324 = vlog2.f32 %v4619_v26  ;;  %v4915_v61 = vsel %vm12394_vm8, %v12379_v39, %v4909_v8  ;;  %v10317_v6 = vpop.eup %10316 }
 0x36b   :  { %v12446_v49 = vpop.f32.mrb[55].mxu1  ;;  %v4609_v34 = vsel %vm4608_vm0, %v4606_v21, %v4603_v32  ;;  %v4916_v38 = vadd.f32 1.0, %v12417_v56  ;;  %v4600_v36 = vsel %vm12405_vm9, %v4597_v24, %v4594_v53  ;;  %v4943_v33 = vadd.f32 1.0, %v12456_v14 }
 0x36c   :  { %v5209_v0 = vsel %vm4273_vm10, %v12128_v60, %v4609_v34  ;;  %10326 = vpow2.f32 %v4500_v25  ;;  %v4927_v43 = vmul.f32 0.6931472, %v10317_v6  ;;  %v4930_v9 = vmul.f32 %v12358_v41, %v4929_v2 }
 0x36d   :  { %v12454_v57 = vpop.f32.mrb[56].mxu0  ;;  %v12476_v39 = vmul.f32 %v12206_v15, %v5209_v0  ;;  %v4622_v21 = vmul.f32 -0.5, %v12428_v37  ;;  %v5207_v30 = vsel %vm4271_vm11, %v12119_v18, %v4591_v5  ;;  %v5242_v60 = vsel %vm4306_vm12, %v12121_v17, %v4906_v10 }
 0x36e   :  { %v12465_v11 = vpop.f32.mrb[57].mxu0  ;;  %vm4932_vm1 = vcmp.lt.f32.partialorder %v4931_v16, 0.0004427343  ;;  %10328 = vlog2.f32 %v4943_v33  ;;  %v12488_v24 = vpop.eup %10318  ;;  %v4610_v41 = vadd.f32 1.0, %v12448_v59  ;;  %vm4275_vm7 = vcmp.gt.f32.partialorder %v12142_v42, 20.0 }
 0x36f   :  { %v12473_v22 = vpop.f32.mrb[58].mxu0  ;;  %10330 = vlog2.f32 %v4916_v38  ;;  %v4933_v29 = vsel %vm4932_vm1, %v4930_v9, %v4927_v43  ;;  %v4385_v53 = vmin.f32 %v12195_v13, 20.0  ;;  %v5243_v18 = vsel %vm4307_vm13, %v12123_v47, %v4915_v61 }
 0x370   :  { %v12480_v8 = vpop.f32.mrb[59].mxu0  ;;  %v5208_v17 = vsel %vm4272_vm14, %v12126_v52, %v4600_v36  ;;  %v5245_v5 = vsel %vm4309_vm15, %v12133_v3, %v4933_v29  ;;  %v4946_v26 = vmul.f32 -0.5, %v12456_v14  ;;  %v12506_v32 = vmul.f32 %v12199_v58, %v5207_v30 }
 0x371   :  { %16174 = vst [vmem:[#allocation32_spill] sm:$0xff] %v12480_v8  ;;  %v12503_v25 = vpop.eup %10320  ;;  %v12509_v2 = vmul.f32 %v12206_v15, %v5245_v5  ;;  %v4623_v16 = vadd.f32 1.0, %v4622_v21  ;;  %v4625_v47 = vand.u32 2147483647, %v12428_v37  ;;  %v12513_v10 = vmul.f32 %v12189_v27, %v5242_v60  ;;  %v16196_v8 = vld [vmem:[#allocation4_spill] sm:$0xff] }
 0x372   :  { %v4934_v52 = vadd.f32 1.0, %v12488_v24  ;;  %v4637_v3 = vadd.f32 1.0, %v12503_v25  ;;  %v4351_v61 = vmin.f32 %v12234_v12, 20.0  ;;  %v12520_v38 = vpop.eup %10322  ;;  %v12523_v6 = vmul.f32 %v12199_v58, %v5243_v18 }
 0x373   :  { %16175 = vst [vmem:[#allocation33_spill] sm:$0xff] %v12509_v2  ;;  %v12526_v15 = vmul.f32 %v12202_v19, %v5208_v17  ;;  %10332 = vlog2.f32 %v4610_v41  ;;  %vm4311_vm8 = vcmp.gt.f32.partialorder %v12152_v40, 20.0  ;;  %v4502_v27 = vmul.f32 1.442695, %v4385_v53 }
 0x374   :  { %v12518_v34 = vpop.f32.mrb[56].mxu1  ;;  %v10325_v0 = vpop.eup %10324  ;;  %v4919_v33 = vmul.f32 -0.5, %v12417_v56  ;;  %v4922_v43 = vand.u32 2147483647, %v12417_v56  ;;  %v4947_v9 = vadd.f32 1.0, %v4946_v26  ;;  %10334 = vlog2.f32 %v4637_v3 }
 0x375   :  { %16176 = vst [vmem:[#allocation34_spill] sm:$0xff] %v12518_v34  ;;  %v12529_v36 = vpop.f32.mrb[57].mxu1  ;;  %v4613_v58 = vmul.f32 -0.5, %v12448_v59  ;;  %v4621_v30 = vmul.f32 0.6931472, %v10325_v0  ;;  %v4624_v60 = vmul.f32 %v12428_v37, %v4623_v16  ;;  %10336 = vlog2.f32 %v4934_v52 }
 0x376   :  { %16177 = vst [vmem:[#allocation35_spill] sm:$0xff] %v12529_v36  ;;  %v12533_v21 = vpop.f32.mrb[58].mxu1  ;;  %vm12537_vm9 = vcmp.lt.f32.partialorder %v4625_v47, 0.0004427343  ;;  %v12543_v53 = vpop.eup %10326  ;;  %v4949_v18 = vand.u32 2147483647, %v12456_v14  ;;  %10338 = vpow2.f32 %v4502_v27 }
 0x377   :  { %16178 = vst [vmem:[#allocation36_spill] sm:$0xff] %v12533_v21  ;;  %v12541_v41 = vpop.f32.mrb[59].mxu1  ;;  %v4628_v17 = vadd.f32 1.0, %v12520_v38  ;;  %v4434_v5 = vmul.f32 1.442695, %v4351_v61  ;;  %v4627_v3 = vsel %vm12537_vm9, %v4624_v60, %v4621_v30  ;;  %v4640_v37 = vmul.f32 -0.5, %v12503_v25 }
 0x378   :  { %16181 = vst [vmem:[#allocation37_spill] sm:$0xff] %v12541_v41  ;;  %v4350_v16 = vmin.f32 %v12225_v4, 20.0  ;;  %v10329_v0 = vpop.eup %10328  ;;  %v4920_v41 = vadd.f32 1.0, %v4919_v33  ;;  %v4616_v52 = vand.u32 2147483647, %v12448_v59  ;;  %v5211_v61 = vsel %vm4275_vm7, %v12142_v42, %v4627_v3 }
 0x379   :  { %v12547_v26 = vpop.f32.mrb[60].mxu0  ;;  %v10331_v30 = vpop.eup %10330  ;;  %v12563_v60 = vmul.f32 %v12212_v1, %v5211_v61  ;;  %v4945_v27 = vmul.f32 0.6931472, %v10329_v0  ;;  %vm4277_vm10 = vcmp.gt.f32.partialorder %v12177_v63, 20.0  ;;  %v4952_v29 = vadd.f32 1.0, %v12543_v53  ;;  %v16189_v0 = vld [vmem:[#allocation20_spill] sm:$0xff] }
 0x37a   :  { %16182 = vst [vmem:[#allocation38_spill] sm:$0xff] %v12547_v26  ;;  %v12553_v47 = vpop.f32.mrb[61].mxu0  ;;  %v4948_v26 = vmul.f32 %v12456_v14, %v4947_v9  ;;  %10340 = vpow2.f32 %v4434_v5  ;;  %vm12569_vm11 = vcmp.lt.f32.partialorder %v4922_v43, 0.0004427343  ;;  %v4614_v42 = vadd.f32 1.0, %v4613_v58 }
 0x37b   :  { %16183 = vst [vmem:[#allocation39_spill] sm:$0xff] %v12553_v47  ;;  %v12560_v21 = vpop.f32.mrb[62].mxu0  ;;  %16185 = vst [vmem:[#allocation41_spill] sm:$0xff] %v12563_v60  ;;  %vm4950_vm12 = vcmp.lt.f32.partialorder %v4949_v18, 0.0004427343  ;;  %10342 = vlog2.f32 %v4628_v17  ;;  %vm4308_vm13 = vcmp.gt.f32.partialorder %v12131_v55, 20.0 }
 0x37c   :  { %16184 = vst [vmem:[#allocation40_spill] sm:$0xff] %v12560_v21  ;;  %v12567_v33 = vpop.f32.mrb[63].mxu0  ;;  %v4951_v14 = vsel %vm4950_vm12, %v4948_v26, %v4945_v27  ;;  %v4641_v9 = vadd.f32 1.0, %v4640_v37  ;;  %v4432_v3 = vmul.f32 1.442695, %v4350_v16  ;;  %v4387_v61 = vmin.f32 %v16189_v0, 20.0 }
 0x37d   :  { %16186 = vst [vmem:[#allocation42_spill] sm:$0xff] %v12567_v33  ;;  %v4918_v21 = vmul.f32 0.6931472, %v10331_v30  ;;  %vm12575_vm14 = vcmp.lt.f32.partialorder %v4616_v52, 0.0004427343  ;;  %v5247_v43 = vsel %vm4311_vm8, %v12152_v40, %v4951_v14  ;;  %v16192_v18 = vld [vmem:[#allocation22_spill] sm:$0xff]  ;;  %v10333_v5 = vpop.eup %10332  ;;  %10344 = vlog2.f32 %v4952_v29 }
 0x37e   :  { %v4643_v58 = vand.u32 2147483647, %v12503_v25  ;;  %v4352_v17 = vmin.f32 %v16192_v18, 20.0  ;;  %v4937_v26 = vmul.f32 -0.5, %v12488_v24  ;;  %v12586_v37 = vmul.f32 %v12212_v1, %v5247_v43  ;;  %v10335_v30 = vpop.eup %10334  ;;  %v16194_v40 = vld [vmem:[#allocation17_spill] sm:$0xff]  ;;  %v16197_v29 = vld [vmem:[#allocation24_spill] sm:$0xff] }
 0x37f   :  { %v4506_v16 = vmul.f32 1.442695, %v4387_v61  ;;  %v4921_v27 = vmul.f32 %v12417_v56, %v4920_v41  ;;  %v4940_v33 = vand.u32 2147483647, %v12488_v24  ;;  %v4386_v14 = vmin.f32 %v16194_v40, 20.0 }
 0x380   :  { %v12588_v52 = vpop.f32.mrb[60].mxu1  ;;  %v4436_v36 = vmul.f32 1.442695, %v4352_v17  ;;  %vm4274_vm15 = vcmp.gt.f32.partialorder %v16196_v8, 20.0  ;;  %v4639_v2 = vmul.f32 0.6931472, %v10335_v30  ;;  %v4642_v1 = vmul.f32 %v12503_v25, %v4641_v9 }
 0x381   :  { %16193 = vst [vmem:[#allocation20_spill] sm:$0xff] %v12588_v52  ;;  %v12593_v34 = vpop.f32.mrb[61].mxu1  ;;  %10346 = vpow2.f32 %v4506_v16  ;;  %v4353_v61 = vmin.f32 %v16197_v29, 20.0  ;;  %v10337_v52 = vpop.eup %10336  ;;  %v4924_v56 = vsel %vm12569_vm11, %v4921_v27, %v4918_v21  ;;  %vm4644_vm0 = vcmp.lt.f32.partialorder %v4643_v58, 0.0004427343  ;;  %v16201_v58 = vld [vmem:[#allocation15_spill] sm:$0xff] }
 0x382   :  { %16195 = vst [vmem:[#allocation22_spill] sm:$0xff] %v12593_v34  ;;  %v12598_v43 = vpop.f32.mrb[62].mxu1  ;;  %10348 = vpow2.f32 %v4436_v36  ;;  %v12604_v41 = vpack.c.bf16 %v12420_v28, %v12385_v23  ;;  %v12608_v30 = vpop.eup %10338  ;;  %v4612_v25 = vmul.f32 0.6931472, %v10333_v5  ;;  %v4631_v9 = vmul.f32 -0.5, %v12520_v38  ;;  %v16200_v34 = vld [vmem:[#allocation25_spill] sm:$0xff] }
 0x383   :  { %16198 = vst [vmem:[#allocation17_spill] sm:$0xff] %v12598_v43  ;;  %v12606_v17 = vpop.f32.mrb[63].mxu1  ;;  %v4645_v16 = vsel %vm4644_vm0, %v4642_v1, %v4639_v2  ;;  %v4388_v43 = vmin.f32 %v16200_v34, 20.0  ;;  %vm4310_vm1 = vcmp.gt.f32.partialorder %v12146_v45, 20.0  ;;  %v4938_v47 = vadd.f32 1.0, %v4937_v26 }
 0x384   :  { %16199 = vst [vmem:[#allocation4_spill] sm:$0xff] %v12606_v17  ;;  %v5213_v36 = vsel %vm4277_vm10, %v12177_v63, %v4645_v16  ;;  %v4961_v28 = vadd.f32 1.0, %v12608_v30  ;;  %v4504_v23 = vmul.f32 1.442695, %v4386_v14  ;;  %5610 = vrot.lane.b32.xlu0 %v12604_v41, %s10892_s24  ;;  %5791 = vst [vmem:[#allocation2 + $0x138] sm:$0xff] %v12604_v41  ;;  %v12620_v21 = vpop.eup %10340  ;;  %v4615_v2 = vmul.f32 %v12448_v59, %v4614_v42 }
 0x385   :  { %v12624_v5 = vmul.f32 %v16201_v58, %v5213_v36  ;;  %10350 = vpow2.f32 %v4432_v3  ;;  %v4438_v26 = vmul.f32 1.442695, %v4353_v61  ;;  %v10343_v27 = vpop.eup %10342  ;;  %v5244_v63 = vsel %vm4308_vm13, %v12131_v55, %v4924_v56  ;;  %v16204_v36 = vld [vmem:[#allocation26_spill] sm:$0xff] }
 0x386   :  { %v4936_v14 = vmul.f32 0.6931472, %v10337_v52  ;;  %v4955_v1 = vmul.f32 -0.5, %v12543_v53  ;;  %10352 = vlog2.f32 %v4961_v28  ;;  %v4618_v16 = vsel %vm12575_vm14, %v4615_v2, %v4612_v25 }
 0x387   :  { %vm12632_vm7 = vcmp.lt.f32.partialorder %v4940_v33, 0.0004427343  ;;  %vm4276_vm8 = vcmp.gt.f32.partialorder %v12167_v31, 20.0  ;;  %v4632_v59 = vadd.f32 1.0, %v4631_v9  ;;  %v4508_v42 = vmul.f32 1.442695, %v4388_v43  ;;  %v10345_v52 = vpop.eup %10344 }
 0x388   :  { %v4939_v3 = vmul.f32 %v12488_v24, %v4938_v47  ;;  %v4634_v61 = vand.u32 2147483647, %v12520_v38  ;;  %v4655_v55 = vadd.f32 1.0, %v12620_v21  ;;  %10354 = vpow2.f32 %v4504_v23 }
 0x389   :  { %v12641_v56 = vmul.f32 %v12202_v19, %v5244_v63  ;;  %v4630_v60 = vmul.f32 0.6931472, %v10343_v27  ;;  %v4964_v33 = vmul.f32 -0.5, %v12608_v30  ;;  %10356 = vpow2.f32 %v4438_v26 }
 0x38a   :  { %v5210_v25 = vsel %vm4274_vm15, %v16196_v8, %v4618_v16  ;;  %v4942_v24 = vsel %vm12632_vm7, %v4939_v3, %v4936_v14  ;;  %v4956_v43 = vadd.f32 1.0, %v4955_v1  ;;  %10358 = vlog2.f32 %v4655_v55  ;;  %v16207_v1 = vld [vmem:[#allocation10_spill] sm:$0xff]  ;;  %v16210_v8 = vld [vmem:[#allocation27_spill] sm:$0xff] }
 0x38b   :  { %v12649_v9 = vpop.eup %10346  ;;  %v4633_v47 = vmul.f32 %v12520_v38, %v4632_v59  ;;  %v4958_v19 = vand.u32 2147483647, %v12543_v53  ;;  %vm4313_vm9 = vcmp.gt.f32.partialorder %v12195_v13, 20.0  ;;  %10360 = vpow2.f32 %v4508_v42 }
 0x38c   :  { %v4389_v28 = vmin.f32 %v16204_v36, 20.0  ;;  %v12655_v23 = vpop.eup %10348  ;;  %vm12657_vm10 = vcmp.lt.f32.partialorder %v4634_v61, 0.0004427343  ;;  %v12661_v17 = vmul.f32 0.6931472, %v10345_v52  ;;  %v4658_v2 = vmul.f32 -0.5, %v12620_v21 }
 0x38d   :  { %v4979_v26 = vadd.f32 1.0, %v12649_v9  ;;  %v5246_v38 = vsel %vm4310_vm1, %v12146_v45, %v4942_v24  ;;  %v4636_v27 = vsel %vm12657_vm10, %v4633_v47, %v4630_v60  ;;  %v4965_v63 = vadd.f32 1.0, %v4964_v33 }
 0x38e   :  { %v4664_v14 = vadd.f32 1.0, %v12655_v23  ;;  %v12672_v16 = vmul.f32 %v16207_v1, %v5210_v25  ;;  %v12675_v59 = vmul.f32 %v12543_v53, %v4956_v43  ;;  %v4967_v42 = vand.u32 2147483647, %v12608_v30 }
 0x38f   :  { %10362 = vlog2.f32 %v4979_v26  ;;  %v12678_v3 = vpop.eup %10350  ;;  %vm12680_vm11 = vcmp.lt.f32.partialorder %v4958_v19, 0.0004427343  ;;  %vm4279_vm12 = vcmp.gt.f32.partialorder %v12234_v12, 20.0  ;;  %v4661_v45 = vand.u32 2147483647, %v12620_v21 }
 0x390   :  { %10364 = vlog2.f32 %v4664_v14  ;;  %v4510_v55 = vmul.f32 1.442695, %v4389_v28  ;;  %v10353_v52 = vpop.eup %10352  ;;  %v12687_v60 = vmul.f32 %v16207_v1, %v5246_v38  ;;  %v12692_v53 = vsel %vm4276_vm8, %v12167_v31, %v4636_v27 }
 0x391   :  { %v4659_v25 = vadd.f32 1.0, %v4658_v2  ;;  %v4963_v24 = vmul.f32 0.6931472, %v10353_v52  ;;  %v4966_v43 = vmul.f32 %v12608_v30, %v4965_v63  ;;  %v4982_v47 = vmul.f32 -0.5, %v12649_v9 }
 0x392   :  { %10366 = vpow2.f32 %v4510_v55  ;;  %v12700_v19 = vpop.eup %10354  ;;  %vm4968_vm13 = vcmp.lt.f32.partialorder %v4967_v42, 0.0004427343  ;;  %v4646_v28 = vadd.f32 1.0, %v12678_v3  ;;  %v4667_v31 = vmul.f32 -0.5, %v12655_v23 }
 0x393   :  { %v4354_v26 = vmin.f32 %v16210_v8, 20.0  ;;  %v12705_v38 = vpop.eup %10356  ;;  %v4969_v27 = vsel %vm4968_vm13, %v4966_v43, %v4963_v24  ;;  %v4649_v2 = vmul.f32 -0.5, %v12678_v3  ;;  %vm12708_vm14 = vcmp.lt.f32.partialorder %v4661_v45, 0.0004427343 }
 0x394   :  { %vm4315_vm15 = vcmp.gt.f32.partialorder %v16189_v0, 20.0  ;;  %v5540_v30 = vpack.c.bf16 %v12513_v10, %v12451_v51  ;;  %v10359_v63 = vpop.eup %10358  ;;  %v5249_v1 = vsel %vm4313_vm9, %v12195_v13, %v4969_v27  ;;  %v4660_v42 = vmul.f32 %v12620_v21, %v4659_v25 }
 0x395   :  { %v4985_v55 = vand.u32 2147483647, %v12649_v9  ;;  %vm4280_vm0 = vcmp.gt.f32.partialorder %v16192_v18, 20.0  ;;  %v4673_v45 = vadd.f32 1.0, %v12705_v38  ;;  %v12722_v52 = vpop.eup %10360  ;;  %v12725_v24 = vmul.f32 %v16201_v58, %v5249_v1 }
 0x396   :  { %v4657_v43 = vmul.f32 0.6931472, %v10359_v63  ;;  %v4983_v51 = vadd.f32 1.0, %v4982_v47  ;;  %v4670_v10 = vand.u32 2147483647, %v12655_v23  ;;  %5831 = vrot.lane.b32.xlu1 %v5540_v30, %s10893_s29  ;;  %5793 = vst [vmem:[#allocation2 + $0x148] sm:$0xff] %v5540_v30  ;;  %5614 = vrot.lane.b32.xlu0 %v5540_v30, %s10892_s24 }
 0x397   :  { %16213 = vst [vmem:[#allocation24_spill] sm:$0xff] %v12725_v24  ;;  %v4668_v13 = vadd.f32 1.0, %v4667_v31  ;;  %10368 = vlog2.f32 %v4673_v45  ;;  %v4988_v21 = vadd.f32 1.0, %v12722_v52  ;;  %v4440_v25 = vmul.f32 1.442695, %v4354_v26  ;;  %v16214_v63 = vld [vmem:[#allocation28_spill] sm:$0xff] }
 0x398   :  { %10370 = vlog2.f32 %v4646_v28  ;;  %v4663_v27 = vsel %vm12708_vm14, %v4660_v42, %v4657_v43  ;;  %v4970_v58 = vadd.f32 1.0, %v12700_v19  ;;  %v4355_v47 = vmin.f32 %v16214_v63, 20.0  ;;  %v16215_v26 = vld [vmem:[#allocation16_spill] sm:$0xff] }
 0x399   :  { %v10363_v1 = vpop.eup %10362  ;;  %v5215_v33 = vsel %vm4279_vm12, %v12234_v12, %v4663_v27  ;;  %v4973_v30 = vmul.f32 -0.5, %v12700_v19  ;;  %10372 = vlog2.f32 %v4988_v21  ;;  %v4390_v31 = vmin.f32 %v12339_v54, 20.0 }
 0x39a   :  { %v10365_v45 = vpop.eup %10364  ;;  %v12741_v28 = vmul.f32 %v16215_v26, %v5215_v33  ;;  %v4981_v14 = vmul.f32 0.6931472, %v10363_v1  ;;  %v4984_v42 = vmul.f32 %v12649_v9, %v4983_v51  ;;  %vm4986_vm1 = vcmp.lt.f32.partialorder %v4985_v55, 0.0004427343  ;;  %5827 = vrot.lane.b32.xlu0 %v12604_v41, %s10893_s29  ;;  %v12755_v1 = vpop.f32.mrb[64].mxu0 }
 0x39b   :  { %v4666_v43 = vmul.f32 0.6931472, %v10365_v45  ;;  %v4669_v24 = vmul.f32 %v12655_v23, %v4668_v13  ;;  %vm4671_vm7 = vcmp.lt.f32.partialorder %v4670_v10, 0.0004427343  ;;  %10374 = vpow2.f32 %v4440_v25  ;;  %v12765_v25 = vpop.f32.mrb[65].mxu0 }
 0x39c   :  { %16216 = vst [vmem:[#allocation25_spill] sm:$0xff] %v12741_v28  ;;  %v12747_v12 = vpop.eup %10366  ;;  %v4987_v21 = vsel %vm4986_vm1, %v4984_v42, %v4981_v14  ;;  %v4676_v27 = vmul.f32 -0.5, %v12705_v38  ;;  %v4991_v33 = vmul.f32 -0.5, %v12722_v52  ;;  %v4442_v28 = vmul.f32 1.442695, %v4355_v47 }
 0x39d   :  { %v5251_v9 = vsel %vm4315_vm15, %v16189_v0, %v4987_v21  ;;  %v4672_v55 = vsel %vm4671_vm7, %v4669_v24, %v4666_v43  ;;  %v4997_v41 = vadd.f32 1.0, %v12747_v12  ;;  %v4512_v51 = vmul.f32 1.442695, %v4390_v31  ;;  %v16217_v24 = vld [vmem:[#allocation19_spill] sm:$0xff]  ;;  %v12772_v31 = vpop.f32.mrb[66].mxu0 }
 0x39e   :  { %10376 = vlog2.f32 %v4970_v58  ;;  %v12758_v23 = vmul.f32 %v16215_v26, %v5251_v9  ;;  %v5216_v10 = vsel %vm4280_vm0, %v16192_v18, %v4672_v55  ;;  %v4679_v13 = vand.u32 2147483647, %v12705_v38  ;;  %16219 = vst [vmem:[#allocation26_spill] sm:$0xff] %v12772_v31  ;;  %v12776_v14 = vpop.f32.mrb[67].mxu0 }
 0x39f   :  { %vm4316_vm8 = vcmp.gt.f32.partialorder %v16200_v34, 20.0  ;;  %vm4312_vm9 = vcmp.gt.f32.partialorder %v12185_v35, 20.0  ;;  %v4650_v0 = vadd.f32 1.0, %v4649_v2  ;;  %v12769_v47 = vmul.f32 %v16217_v24, %v5216_v10  ;;  %16220 = vst [vmem:[#allocation10_spill] sm:$0xff] %v12776_v14  ;;  %v12793_v14 = vpop.f32.mrb[64].mxu1 }
 0x3a0   :  { %10378 = vlog2.f32 %v4997_v41  ;;  %v4391_v58 = vmin.f32 %v12342_v48, 20.0  ;;  %v4677_v45 = vadd.f32 1.0, %v4676_v27  ;;  %v4992_v26 = vadd.f32 1.0, %v4991_v33  ;;  %16223 = vst [vmem:[#allocation27_spill] sm:$0xff] %v12793_v14 }
 0x3a1   :  { %16218 = vst [vmem:[#allocation15_spill] sm:$0xff] %v12769_v47  ;;  %10380 = vpow2.f32 %v4442_v28  ;;  %v5539_v18 = vpack.c.bf16 %v12423_v62, %v12388_v44  ;;  %v10369_v42 = vpop.eup %10368  ;;  %vm4281_vm10 = vcmp.gt.f32.partialorder %v16197_v29, 20.0  ;;  %v4994_v2 = vand.u32 2147483647, %v12722_v52 }
 0x3a2   :  { %10382 = vpow2.f32 %v4512_v51  ;;  %v4514_v43 = vmul.f32 1.442695, %v4391_v58  ;;  %v4356_v21 = vmin.f32 %v12356_v50, 20.0  ;;  %v10371_v9 = vpop.eup %10370  ;;  %v4652_v55 = vand.u32 2147483647, %v12678_v3 }
 0x3a3   :  { %v4974_v27 = vadd.f32 1.0, %v4973_v30  ;;  %vm12782_vm12 = vcmp.lt.f32.partialorder %v4679_v13, 0.0004427343  ;;  %v5000_v44 = vmul.f32 -0.5, %v12747_v12  ;;  %5612 = vrot.lane.b32.xlu1 %v5539_v18, %s10892_s24  ;;  %5792 = vst [vmem:[#allocation2 + $0x140] sm:$0xff] %v5539_v18  ;;  %5829 = vrot.lane.b32.xlu0 %v5539_v18, %s10893_s29  ;;  %v10373_v62 = vpop.eup %10372  ;;  %v4357_v51 = vmin.f32 %v12372_v46, 20.0 }
 0x3a4   :  { %v4675_v33 = vmul.f32 0.6931472, %v10369_v42  ;;  %10384 = vpow2.f32 %v4514_v43  ;;  %v4444_v41 = vmul.f32 1.442695, %v4356_v21  ;;  %v4678_v10 = vmul.f32 %v12705_v38, %v4677_v45  ;;  %v12799_v43 = vpop.f32.mrb[65].mxu1 }
 0x3a5   :  { %v4990_v30 = vmul.f32 0.6931472, %v10373_v62  ;;  %v4993_v13 = vmul.f32 %v12722_v52, %v4992_v26  ;;  %v4392_v58 = vmin.f32 %v12376_v7, 20.0  ;;  %v12795_v47 = vpop.eup %10374  ;;  %vm4995_vm13 = vcmp.lt.f32.partialorder %v4994_v2, 0.0004427343  ;;  %16224 = vst [vmem:[#allocation28_spill] sm:$0xff] %v12799_v43 }
 0x3a6   :  { %10386 = vpow2.f32 %v4444_v41  ;;  %v4446_v18 = vmul.f32 1.442695, %v4357_v51  ;;  %v5541_v42 = vpack.c.bf16 %v12523_v6, %v12506_v32  ;;  %v5001_v31 = vadd.f32 1.0, %v5000_v44  ;;  %v12803_v45 = vpop.f32.mrb[66].mxu1 }
 0x3a7   :  { %v4996_v21 = vsel %vm4995_vm13, %v4993_v13, %v4990_v30  ;;  %v5003_v38 = vand.u32 2147483647, %v12747_v12  ;;  %v4682_v52 = vadd.f32 1.0, %v12795_v47  ;;  %16225 = vst [vmem:[#allocation16_spill] sm:$0xff] %v12803_v45  ;;  %v4681_v26 = vsel %vm12782_vm12, %v4678_v10, %v4675_v33  ;;  %v12812_v32 = vpop.f32.mrb[67].mxu1 }
 0x3a8   :  { %v5252_v2 = vsel %vm4316_vm8, %v16200_v34, %v4996_v21  ;;  %10388 = vpow2.f32 %v4446_v18  ;;  %v4516_v62 = vmul.f32 1.442695, %v4392_v58  ;;  %5794 = vst [vmem:[#allocation2 + $0x150] sm:$0xff] %v5541_v42  ;;  %5616 = vrot.lane.b32.xlu1 %v5541_v42, %s10892_s24  ;;  %5833 = vrot.lane.b32.xlu0 %v5541_v42, %s10893_s29  ;;  %16226 = vst [vmem:[#allocation19_spill] sm:$0xff] %v12812_v32  ;;  %v10377_v6 = vpop.eup %10376  ;;  %v12824_v34 = vmul.f32 0.6931472, %v10371_v9 }
 0x3a9   :  { %v16227_v28 = vsel %vm12680_vm11, %v12675_v59, %v12661_v17  ;;  %v12827_v33 = vmul.f32 %v16217_v24, %v5252_v2  ;;  %10390 = vlog2.f32 %v4682_v52  ;;  %v12830_v51 = vmul.f32 %v12678_v3, %v4650_v0  ;;  %v12837_v17 = vpop.f32.mrb[68].mxu0 }
 0x3aa   :  { %v12822_v44 = vsel %vm4312_vm9, %v12185_v35, %v16227_v28  ;;  %v10379_v41 = vpop.eup %10378  ;;  %vm12832_vm14 = vcmp.lt.f32.partialorder %v4652_v55, 0.0004427343  ;;  %vm4317_vm11 = vcmp.gt.f32.partialorder %v16204_v36, 20.0  ;;  %10392 = vpow2.f32 %v4516_v62  ;;  %16230 = vst [vmem:[#allocation43_spill] sm:$0xff] %v12837_v17  ;;  %v12844_v0 = vpop.f32.mrb[69].mxu0 }
 0x3ab   :  { %v10381_v35 = vpop.eup %10380  ;;  %v5217_v24 = vsel %vm4281_vm10, %v16197_v29, %v4681_v26  ;;  %v4999_v9 = vmul.f32 0.6931472, %v10379_v41  ;;  %v5002_v3 = vmul.f32 %v12747_v12, %v5001_v31  ;;  %16231 = vst [vmem:[#allocation44_spill] sm:$0xff] %v12844_v0  ;;  %v12847_v10 = vmul.f32 %v12700_v19, %v4974_v27  ;;  %v12854_v21 = vpop.f32.mrb[70].mxu0  ;;  %v16233_v27 = vld [vmem:[#allocation18_spill] sm:$0xff] }
 0x3ac   :  { %v10383_v55 = vpop.eup %10382  ;;  %vm5004_vm15 = vcmp.lt.f32.partialorder %v5003_v38, 0.0004427343  ;;  %v4685_v30 = vmul.f32 -0.5, %v12795_v47  ;;  %v4691_v13 = vadd.f32 1.0, %v10381_v35  ;;  %v4694_v29 = vmul.f32 -0.5, %v10381_v35  ;;  %16232 = vst [vmem:[#allocation45_spill] sm:$0xff] %v12854_v21 }
 0x3ad   :  { %v5005_v18 = vsel %vm5004_vm15, %v5002_v3, %v4999_v9  ;;  %v5006_v42 = vadd.f32 1.0, %v10383_v55  ;;  %v12858_v31 = vmul.f32 0.6931472, %v10377_v6  ;;  %v5479_v52 = vmul.f32 %v16233_v27, %v5217_v24  ;;  %v12867_v28 = vpop.f32.mrb[71].mxu0  ;;  %v16235_v3 = vld [vmem:[#allocation29_spill] sm:$0xff] }
 0x3ae   :  { %v12856_v12 = vpop.eup %10384  ;;  %v5253_v38 = vsel %vm4317_vm11, %v16204_v36, %v5005_v18  ;;  %10394 = vlog2.f32 %v4691_v13  ;;  %vm4282_vm0 = vcmp.gt.f32.partialorder %v16210_v8, 20.0  ;;  %v4688_v2 = vand.u32 2147483647, %v12795_v47  ;;  %16234 = vst [vmem:[#allocation18_spill] sm:$0xff] %v12867_v28  ;;  %v16236_v28 = vld [vmem:[#allocation30_spill] sm:$0xff] }
 0x3af   :  { %v5515_v26 = vmul.f32 %v16233_v27, %v5253_v38  ;;  %10396 = vlog2.f32 %v5006_v42  ;;  %v5009_v62 = vmul.f32 -0.5, %v10383_v55  ;;  %v4686_v6 = vadd.f32 1.0, %v4685_v30 }
 0x3b0   :  { %v12869_v41 = vpop.eup %10386  ;;  %v4697_v9 = vand.u32 2147483647, %v10381_v35  ;;  %v5015_v24 = vadd.f32 1.0, %v12856_v12  ;;  %v4393_v58 = vmin.f32 %v16235_v3, 20.0  ;;  %v4695_v13 = vadd.f32 1.0, %v4694_v29 }
 0x3b1   :  { %v5551_v36 = vpack.c.bf16 %v5515_v26, %v5479_v52  ;;  %v5012_v18 = vand.u32 2147483647, %v10383_v55  ;;  %v4700_v27 = vadd.f32 1.0, %v12869_v41  ;;  %v5018_v42 = vmul.f32 -0.5, %v12856_v12 }
 0x3b2   :  { %v12874_v38 = vpop.eup %10388  ;;  %10398 = vlog2.f32 %v5015_v24  ;;  %v4703_v59 = vmul.f32 -0.5, %v12869_v41  ;;  %v4358_v21 = vmin.f32 %v16236_v28, 20.0  ;;  %v5010_v0 = vadd.f32 1.0, %v5009_v62 }
 0x3b3   :  { %v10391_v30 = vpop.eup %10390  ;;  %5804 = vst [vmem:[#allocation2 + $0x1a0] sm:$0xff] %v5551_v36  ;;  %v5021_v17 = vand.u32 2147483647, %v12856_v12  ;;  %10400 = vlog2.f32 %v4700_v27  ;;  %v4709_v29 = vadd.f32 1.0, %v12874_v38  ;;  %v4687_v32 = vmul.f32 %v12795_v47, %v4686_v6 }
 0x3b4   :  { %v12881_v52 = vpop.eup %10392  ;;  %v4684_v26 = vmul.f32 0.6931472, %v10391_v30  ;;  %vm12884_vm1 = vcmp.lt.f32.partialorder %v4688_v2, 0.0004427343  ;;  %vm4283_vm7 = vcmp.gt.f32.partialorder %v16214_v63, 20.0  ;;  %vm4318_vm8 = vcmp.gt.f32.partialorder %v12339_v54, 20.0 }
 0x3b5   :  { %v4518_v36 = vmul.f32 1.442695, %v4393_v58  ;;  %v4696_v62 = vmul.f32 %v10381_v35, %v4695_v13  ;;  %vm12890_vm9 = vcmp.lt.f32.partialorder %v4697_v9, 0.0004427343  ;;  %vm12894_vm10 = vcmp.lt.f32.partialorder %v5012_v18, 0.0004427343 }
 0x3b6   :  { %v5024_v47 = vadd.f32 1.0, %v12881_v52  ;;  %v4690_v2 = vsel %vm12884_vm1, %v4687_v32, %v4684_v26  ;;  %v5019_v6 = vadd.f32 1.0, %v5018_v42  ;;  %v4704_v30 = vadd.f32 1.0, %v4703_v59  ;;  %v12906_v9 = vpop.f32.mrb[68].mxu1 }
 0x3b7   :  { %10402 = vlog2.f32 %v4709_v29  ;;  %v5011_v43 = vmul.f32 %v10383_v55, %v5010_v0  ;;  %vm4319_vm12 = vcmp.gt.f32.partialorder %v12342_v48, 20.0  ;;  %vm12902_vm13 = vcmp.lt.f32.partialorder %v5021_v17, 0.0004427343  ;;  %16245 = vst [vmem:[#allocation29_spill] sm:$0xff] %v12906_v9  ;;  %v12913_v0 = vpop.f32.mrb[69].mxu1 }
 0x3b8   :  { %10404 = vlog2.f32 %v5024_v47  ;;  %v4448_v58 = vmul.f32 1.442695, %v4358_v21  ;;  %v10395_v13 = vpop.eup %10394  ;;  %v5218_v18 = vsel %vm4282_vm0, %v16210_v8, %v4690_v2  ;;  %v4706_v32 = vand.u32 2147483647, %v12869_v41  ;;  %16246 = vst [vmem:[#allocation30_spill] sm:$0xff] %v12913_v0  ;;  %v16247_v21 = vld [vmem:[#allocation31_spill] sm:$0xff] }
 0x3b9   :  { %v5027_v59 = vmul.f32 -0.5, %v12881_v52  ;;  %10406 = vpow2.f32 %v4518_v36  ;;  %v10397_v17 = vpop.eup %10396  ;;  %v4693_v55 = vmul.f32 0.6931472, %v10395_v13  ;;  %v4712_v42 = vmul.f32 -0.5, %v12874_v38  ;;  %v16248_v2 = vld [vmem:[#allocation21_spill] sm:$0xff] }
 0x3ba   :  { %10408 = vpow2.f32 %v4448_v58  ;;  %v4359_v29 = vmin.f32 %v16247_v21, 20.0  ;;  %v5008_v26 = vmul.f32 0.6931472, %v10397_v17  ;;  %v5020_v24 = vmul.f32 %v12856_v12, %v5019_v6  ;;  %v12925_v58 = vpop.f32.mrb[70].mxu1 }
 0x3bb   :  { %vm4284_vm11 = vcmp.gt.f32.partialorder %v12356_v50, 20.0  ;;  %v4705_v8 = vmul.f32 %v12869_v41, %v4704_v30  ;;  %v5030_v47 = vand.u32 2147483647, %v12881_v52  ;;  %v5480_v36 = vmul.f32 %v16248_v2, %v5218_v18 }
 0x3bc   :  { %v4699_v0 = vsel %vm12890_vm9, %v4696_v62, %v4693_v55  ;;  %v4450_v13 = vmul.f32 1.442695, %v4359_v29  ;;  %v4394_v9 = vmin.f32 %v12443_v20, 20.0  ;;  %v10399_v14 = vpop.eup %10398  ;;  %vm4278_vm15 = vcmp.gt.f32.partialorder %v12225_v4, 20.0 }
 0x3bd   :  { %v5014_v12 = vsel %vm12894_vm10, %v5011_v43, %v5008_v26  ;;  %v5028_v6 = vadd.f32 1.0, %v5027_v59  ;;  %v4395_v41 = vmin.f32 %v12446_v49, 20.0  ;;  %v5542_v30 = vpack.c.bf16 %v12641_v56, %v12526_v15  ;;  %v10401_v18 = vpop.eup %10400  ;;  %v12948_v15 = vld [vmem:[%s15904_s2 + $0x10] sm:$0xff]  ;;  %v12950_v56 = vpop.f32.mrb[71].mxu1 }
 0x3be   :  { %v16249_v45 = vand.u32 2147483647, %v12700_v19  ;;  %v5219_v17 = vsel %vm4283_vm7, %v16214_v63, %v4699_v0  ;;  %v5254_v43 = vsel %vm4318_vm8, %v12339_v54, %v5014_v12  ;;  %v5017_v27 = vmul.f32 0.6931472, %v10399_v14  ;;  %16252 = vst [vmem:[#allocation31_spill] sm:$0xff] %v12950_v56  ;;  %v16256_v12 = vld [vmem:[#allocation23_spill] sm:$0xff] }
 0x3bf   :  { %10410 = vpow2.f32 %v4450_v13  ;;  %v5516_v19 = vmul.f32 %v16248_v2, %v5254_v43  ;;  %v4702_v59 = vmul.f32 0.6931472, %v10401_v18  ;;  %v4520_v55 = vmul.f32 1.442695, %v4394_v9  ;;  %5835 = vrot.lane.b32.xlu1 %v5542_v30, %s10893_s29  ;;  %5795 = vst [vmem:[#allocation2 + $0x158] sm:$0xff] %v5542_v30 }
 0x3c0   :  { %vm12935_vm0 = vcmp.lt.f32.partialorder %v16249_v45, 0.0004427343  ;;  %v4522_v29 = vmul.f32 1.442695, %v4395_v41  ;;  %v5023_v54 = vsel %vm12902_vm13, %v5020_v24, %v5017_v27  ;;  %vm12956_vm1 = vcmp.lt.f32.partialorder %v4706_v32, 0.0004427343 }
 0x3c1   :  { %v5544_v14 = vpack.c.bf16 %v12687_v60, %v12672_v16  ;;  %v4360_v0 = vmin.f32 %v12454_v57, 20.0  ;;  %v10403_v26 = vpop.eup %10402  ;;  %vm4314_vm7 = vcmp.gt.f32.partialorder %v16194_v40, 20.0  ;;  %v12964_v9 = vpack.c.bf16 %v5516_v19, %v5480_v36  ;;  %v16255_v32 = vld [vmem:[#allocation3_spill] sm:$0xff] }
 0x3c2   :  { %v5255_v2 = vsel %vm4319_vm12, %v12342_v48, %v5023_v54  ;;  %v4708_v35 = vsel %vm12956_vm1, %v4705_v8, %v4702_v59  ;;  %v5353_v24 = vrot.slane %v12948_v15, %v16255_v32  ;;  %v10405_v13 = vpop.eup %10404  ;;  %v5481_v16 = vmul.f32 %v16256_v12, %v5219_v17 }
 0x3c3   :  { %v5517_v60 = vmul.f32 %v16256_v12, %v5255_v2  ;;  %v4713_v41 = vadd.f32 1.0, %v4712_v42  ;;  %10412 = vpow2.f32 %v4520_v55  ;;  %5797 = vst [vmem:[#allocation2 + $0x168] sm:$0xff] %v5544_v14  ;;  %5839 = vrot.lane.b32.xlu0 %v5544_v14, %s10893_s29  ;;  %v12976_v36 = vpop.eup %10406  ;;  %5805 = vst [vmem:[#allocation2 + $0x1a8] sm:$0xff] %v12964_v9  ;;  %v5026_v48 = vmul.f32 0.6931472, %v10405_v13  ;;  %5618 = vrot.lane.b32.xlu1 %v5542_v30, %s10892_s24 }
 0x3c4   :  { %v5029_v8 = vmul.f32 %v12881_v52, %v5028_v6  ;;  %vm12980_vm8 = vcmp.lt.f32.partialorder %v5030_v47, 0.0004427343  ;;  %10414 = vpow2.f32 %v4522_v29  ;;  %v12985_v45 = vpop.eup %10408  ;;  %v5220_v17 = vsel %vm4284_vm11, %v12356_v50, %v4708_v35 }
 0x3c5   :  { %v12987_v42 = vpack.c.bf16 %v5517_v60, %v5481_v16  ;;  %v5033_v43 = vadd.f32 1.0, %v12976_v36  ;;  %v4452_v27 = vmul.f32 1.442695, %v4360_v0  ;;  %v4715_v52 = vand.u32 2147483647, %v12874_v38  ;;  %v16265_v16 = vld [vmem:[#allocation33_spill] sm:$0xff] }
 0x3c6   :  { %vm4320_vm9 = vcmp.gt.f32.partialorder %v12376_v7, 20.0  ;;  %v5032_v47 = vsel %vm12980_vm8, %v5029_v8, %v5026_v48  ;;  %v4718_v6 = vadd.f32 1.0, %v12985_v45  ;;  %v16259_v30 = vsel %vm12832_vm14, %v12830_v51, %v12824_v34 }
 0x3c7   :  { %v5214_v50 = vsel %vm4278_vm15, %v12225_v4, %v16259_v30  ;;  %5806 = vst [vmem:[#allocation2 + $0x1b0] sm:$0xff] %v12987_v42  ;;  %v4711_v19 = vmul.f32 0.6931472, %v10403_v26  ;;  %v5256_v59 = vsel %vm4320_vm9, %v12376_v7, %v5032_v47  ;;  %10416 = vlog2.f32 %v5033_v43  ;;  %5622 = vrot.lane.b32.xlu1 %v5544_v14, %s10892_s24  ;;  %v16260_v4 = vld [vmem:[#allocation11_spill] sm:$0xff]  ;;  %v16263_v14 = vld [vmem:[#allocation14_spill] sm:$0xff]  ;;  %v16266_v43 = vld [vmem:[#allocation5_spill] sm:$0xff] }
 0x3c8   :  { %v4978_v55 = vsel %vm12935_vm0, %v12847_v10, %v12858_v31  ;;  %v5482_v29 = vmul.f32 %v5353_v24, %v5220_v17  ;;  %v5518_v61 = vmul.f32 %v5353_v24, %v5256_v59  ;;  %10418 = vlog2.f32 %v4718_v6  ;;  %v16264_v26 = vld [vmem:[#allocation7_spill] sm:$0xff] }
 0x3c9   :  { %v13013_v34 = vpop.eup %10410  ;;  %v13017_v51 = vmul.f32 %v16260_v4, %v12692_v53  ;;  %v4714_v54 = vmul.f32 %v12874_v38, %v4713_v41  ;;  %v5036_v7 = vmul.f32 -0.5, %v12976_v36  ;;  %10420 = vpow2.f32 %v4452_v27 }
 0x3ca   :  { %v13023_v62 = vmul.f32 %v16260_v4, %v12822_v44  ;;  %vm13025_vm14 = vcmp.lt.f32.partialorder %v4715_v52, 0.0004427343  ;;  %v13029_v31 = vpack.c.bf16 %v5518_v61, %v5482_v29  ;;  %v4727_v63 = vadd.f32 1.0, %v13013_v34  ;;  %v16270_v4 = vld [vmem:[#allocation32_spill] sm:$0xff] }
 0x3cb   :  { %v13033_v53 = vmul.f32 %v16263_v14, %v5214_v50  ;;  %v5250_v38 = vsel %vm4314_vm7, %v16194_v40, %v4978_v55  ;;  %v4717_v0 = vsel %vm13025_vm14, %v4714_v54, %v4711_v19  ;;  %v4361_v44 = vmin.f32 %v12465_v11, 20.0 }
 0x3cc   :  { %vm4285_vm10 = vcmp.gt.f32.partialorder %v12372_v46, 20.0  ;;  %v5357_v2 = vrot.slane %v12948_v15, %v16264_v26  ;;  %5807 = vst [vmem:[#allocation2 + $0x1b8] sm:$0xff] %v13029_v31  ;;  %v5039_v35 = vand.u32 2147483647, %v12976_v36  ;;  %10422 = vlog2.f32 %v4727_v63 }
 0x3cd   :  { %v13046_v24 = vpop.eup %10412  ;;  %v5037_v13 = vadd.f32 1.0, %v5036_v7  ;;  %v4454_v12 = vmul.f32 1.442695, %v4361_v44  ;;  %v4396_v40 = vmin.f32 %v12473_v22, 20.0  ;;  %v5543_v60 = vpack.c.bf16 %v16265_v16, %v12476_v39  ;;  %v16267_v39 = vld [vmem:[#allocation13_spill] sm:$0xff] }
 0x3ce   :  { %v13051_v41 = vpop.eup %10414  ;;  %v13054_v48 = vmul.f32 %v16263_v14, %v5250_v38  ;;  %v5221_v8 = vsel %vm4285_vm10, %v12372_v46, %v4717_v0  ;;  %v4721_v18 = vmul.f32 -0.5, %v12985_v45  ;;  %v5042_v17 = vadd.f32 1.0, %v13046_v24  ;;  %v16271_v14 = vld [vmem:[#allocation34_spill] sm:$0xff] }
 0x3cf   :  { %vm4321_vm12 = vcmp.gt.f32.partialorder %v16235_v3, 20.0  ;;  %v13062_v27 = vrot.slane %v12948_v15, %v16266_v43  ;;  %v5051_v52 = vadd.f32 1.0, %v13051_v41  ;;  %10424 = vpow2.f32 %v4454_v12  ;;  %5620 = vrot.lane.b32.xlu0 %v5543_v60, %s10892_s24  ;;  %5796 = vst [vmem:[#allocation2 + $0x160] sm:$0xff] %v5543_v60  ;;  %5837 = vrot.lane.b32.xlu1 %v5543_v60, %s10893_s29 }
 0x3d0   :  { %v4730_v46 = vmul.f32 -0.5, %v13013_v34  ;;  %v13070_v47 = vrot.slane %v12948_v15, %v16267_v39  ;;  %10426 = vlog2.f32 %v5042_v17  ;;  %v4524_v6 = vmul.f32 1.442695, %v4396_v40 }
 0x3d1   :  { %v10417_v30 = vpop.eup %10416  ;;  %v5483_v50 = vmul.f32 %v5357_v2, %v5221_v8  ;;  %v5038_v19 = vmul.f32 %v12976_v36, %v5037_v13  ;;  %vm13073_vm13 = vcmp.lt.f32.partialorder %v5039_v35, 0.0004427343  ;;  %10428 = vlog2.f32 %v5051_v52 }
 0x3d2   :  { %v10419_v55 = vpop.eup %10418  ;;  %v5035_v29 = vmul.f32 0.6931472, %v10417_v30  ;;  %v4722_v61 = vadd.f32 1.0, %v4721_v18  ;;  %10430 = vpow2.f32 %v4524_v6  ;;  %v4397_v54 = vmin.f32 %v16270_v4, 20.0 }
 0x3d3   :  { %v13078_v7 = vpop.eup %10420  ;;  %vm4286_vm11 = vcmp.gt.f32.partialorder %v16236_v28, 20.0  ;;  %v4724_v10 = vand.u32 2147483647, %v12985_v45  ;;  %v5045_v63 = vmul.f32 -0.5, %v13046_v24  ;;  %v5054_v36 = vmul.f32 -0.5, %v13051_v41 }
 0x3d4   :  { %v4362_v38 = vmin.f32 %v16271_v14, 20.0  ;;  %v5041_v0 = vsel %vm13073_vm13, %v5038_v19, %v5035_v29  ;;  %vm4287_vm15 = vcmp.gt.f32.partialorder %v16247_v21, 20.0  ;;  %v4731_v44 = vadd.f32 1.0, %v4730_v46 }
 0x3d5   :  { %v4733_v35 = vand.u32 2147483647, %v13013_v34  ;;  %v4736_v13 = vadd.f32 1.0, %v13078_v7  ;;  %v5257_v12 = vsel %vm4321_vm12, %v16235_v3, %v5041_v0  ;;  %v4720_v40 = vmul.f32 0.6931472, %v10419_v55 }
 0x3d6   :  { %v4526_v16 = vmul.f32 1.442695, %v4397_v54  ;;  %v4456_v60 = vmul.f32 1.442695, %v4362_v38  ;;  %v10423_v8 = vpop.eup %10422  ;;  %v5519_v18 = vmul.f32 %v5357_v2, %v5257_v12  ;;  %v4723_v17 = vmul.f32 %v12985_v45, %v4722_v61 }
 0x3d7   :  { %v5048_v52 = vand.u32 2147483647, %v13046_v24  ;;  %10432 = vlog2.f32 %v4736_v13  ;;  %v4729_v6 = vmul.f32 0.6931472, %v10423_v8  ;;  %v5046_v46 = vadd.f32 1.0, %v5045_v63 }
 0x3d8   :  { %v5055_v30 = vadd.f32 1.0, %v5054_v36  ;;  %10434 = vpow2.f32 %v4526_v16  ;;  %v13095_v19 = vpack.c.bf16 %v5519_v18, %v5483_v50  ;;  %vm13097_vm0 = vcmp.lt.f32.partialorder %v4724_v10, 0.0004427343  ;;  %v16276_v50 = vld [vmem:[#allocation35_spill] sm:$0xff] }
 0x3d9   :  { %v4732_v3 = vmul.f32 %v13013_v34, %v4731_v44  ;;  %10436 = vpow2.f32 %v4456_v60  ;;  %v13102_v55 = vpop.eup %10424  ;;  %v4726_v45 = vsel %vm13097_vm0, %v4723_v17, %v4720_v40  ;;  %vm13106_vm1 = vcmp.lt.f32.partialorder %v4733_v35, 0.0004427343 }
 0x3da   :  { %v5057_v29 = vand.u32 2147483647, %v13051_v41  ;;  %v4363_v61 = vmin.f32 %v16276_v50, 20.0  ;;  %v10427_v54 = vpop.eup %10426  ;;  %5808 = vst [vmem:[#allocation2 + $0x1c0] sm:$0xff] %v13095_v19  ;;  %vm4322_vm7 = vcmp.gt.f32.partialorder %v12443_v20, 20.0  ;;  %v4745_v63 = vadd.f32 1.0, %v13102_v55 }
 0x3db   :  { %v4735_v34 = vsel %vm13106_vm1, %v4732_v3, %v4729_v6  ;;  %vm13116_vm8 = vcmp.lt.f32.partialorder %v5048_v52, 0.0004427343  ;;  %v10429_v36 = vpop.eup %10428  ;;  %v5044_v38 = vmul.f32 0.6931472, %v10427_v54  ;;  %v5047_v0 = vmul.f32 %v13046_v24, %v5046_v46 }
 0x3dc   :  { %v5056_v44 = vmul.f32 %v13051_v41, %v5055_v30  ;;  %v4458_v35 = vmul.f32 1.442695, %v4363_v61  ;;  %v13123_v13 = vpop.eup %10430  ;;  %v5222_v12 = vsel %vm4286_vm11, %v16236_v28, %v4726_v45  ;;  %v5053_v40 = vmul.f32 0.6931472, %v10429_v36 }
 0x3dd   :  { %v4739_v16 = vmul.f32 -0.5, %v13078_v7  ;;  %10438 = vlog2.f32 %v4745_v63  ;;  %v5223_v60 = vsel %vm4287_vm15, %v16247_v21, %v4735_v34  ;;  %v5050_v24 = vsel %vm13116_vm8, %v5047_v0, %v5044_v38  ;;  %v16280_v34 = vld [vmem:[#allocation37_spill] sm:$0xff]  ;;  %v16281_v63 = vld [vmem:[#allocation8_spill] sm:$0xff] }
 0x3de   :  { %vm5058_vm9 = vcmp.lt.f32.partialorder %v5057_v29, 0.0004427343  ;;  %v5060_v41 = vadd.f32 1.0, %v13123_v13  ;;  %v5258_v8 = vsel %vm4322_vm7, %v12443_v20, %v5050_v24  ;;  %vm4323_vm14 = vcmp.gt.f32.partialorder %v12446_v49, 20.0 }
 0x3df   :  { %v5059_v28 = vsel %vm5058_vm9, %v5056_v44, %v5053_v40  ;;  %10440 = vpow2.f32 %v4458_v35  ;;  %v5484_v18 = vmul.f32 %v13062_v27, %v5222_v12  ;;  %v5520_v17 = vmul.f32 %v13062_v27, %v5258_v8  ;;  %v16279_v27 = vld [vmem:[#allocation36_spill] sm:$0xff]  ;;  %v16282_v12 = vld [vmem:[#allocation9_spill] sm:$0xff] }
 0x3e0   :  { %v5259_v21 = vsel %vm4323_vm14, %v12446_v49, %v5059_v28  ;;  %10442 = vlog2.f32 %v5060_v41  ;;  %v5485_v6 = vmul.f32 %v13070_v47, %v5223_v60  ;;  %v4740_v30 = vadd.f32 1.0, %v4739_v16 }
 0x3e1   :  { %v10433_v52 = vpop.eup %10432  ;;  %v5521_v46 = vmul.f32 %v13070_v47, %v5259_v21  ;;  %v4748_v59 = vmul.f32 -0.5, %v13102_v55  ;;  %v13147_v3 = vpack.c.bf16 %v5520_v17, %v5484_v18  ;;  %v4742_v45 = vand.u32 2147483647, %v13078_v7  ;;  %v16285_v18 = vld [vmem:[#allocation41_spill] sm:$0xff]  ;;  %v16293_v21 = vld [vmem:[#allocation42_spill] sm:$0xff] }
 0x3e2   :  { %v13145_v20 = vpop.eup %10434  ;;  %v5063_v2 = vmul.f32 -0.5, %v13123_v13  ;;  %v4398_v29 = vmin.f32 %v16279_v27, 20.0  ;;  %v4738_v54 = vmul.f32 0.6931472, %v10433_v52  ;;  %v4399_v10 = vmin.f32 %v16280_v34, 20.0 }
 0x3e3   :  { %v13152_v49 = vpop.eup %10436  ;;  %v13154_v61 = vpack.c.bf16 %v5521_v46, %v5485_v6  ;;  %v5069_v47 = vadd.f32 1.0, %v13145_v20  ;;  %5809 = vst [vmem:[#allocation2 + $0x1c8] sm:$0xff] %v13147_v3  ;;  %vm4288_vm10 = vcmp.gt.f32.partialorder %v12454_v57, 20.0  ;;  %v5369_v36 = vrot.slane %v12948_v15, %v16281_v63 }
 0x3e4   :  { %v4751_v38 = vand.u32 2147483647, %v13102_v55  ;;  %v4754_v0 = vadd.f32 1.0, %v13152_v49  ;;  %v4741_v44 = vmul.f32 %v13078_v7, %v4740_v30  ;;  %v4749_v35 = vadd.f32 1.0, %v4748_v59 }
 0x3e5   :  { %5810 = vst [vmem:[#allocation2 + $0x1d0] sm:$0xff] %v13154_v61  ;;  %v13168_v40 = vrot.slane %v12948_v15, %v16282_v12  ;;  %10444 = vlog2.f32 %v5069_v47  ;;  %vm13170_vm12 = vcmp.lt.f32.partialorder %v4742_v45, 0.0004427343  ;;  %vm4324_vm13 = vcmp.gt.f32.partialorder %v12473_v22, 20.0 }
 0x3e6   :  { %v5064_v60 = vadd.f32 1.0, %v5063_v2  ;;  %v5072_v24 = vmul.f32 -0.5, %v13145_v20  ;;  %v4744_v8 = vsel %vm13170_vm12, %v4741_v44, %v4738_v54  ;;  %v4528_v7 = vmul.f32 1.442695, %v4398_v29 }
 0x3e7   :  { %v10439_v41 = vpop.eup %10438  ;;  %v4530_v28 = vmul.f32 1.442695, %v4399_v10  ;;  %v5545_v17 = vpack.c.bf16 %v12586_v37, %v16285_v18  ;;  %vm4289_vm11 = vcmp.gt.f32.partialorder %v12465_v11, 20.0  ;;  %vm13181_vm15 = vcmp.lt.f32.partialorder %v4751_v38, 0.0004427343  ;;  %v16288_v37 = vld [vmem:[#allocation38_spill] sm:$0xff] }
 0x3e8   :  { %v5066_v52 = vand.u32 2147483647, %v13123_v13  ;;  %10446 = vlog2.f32 %v4754_v0  ;;  %v5546_v6 = vpack.c.bf16 %v13023_v62, %v13017_v51  ;;  %v4750_v30 = vmul.f32 %v13102_v55, %v4749_v35 }
 0x3e9   :  { %v13188_v46 = vpop.eup %10440  ;;  %v5075_v59 = vand.u32 2147483647, %v13145_v20  ;;  %10448 = vpow2.f32 %v4528_v7  ;;  %5798 = vst [vmem:[#allocation2 + $0x170] sm:$0xff] %v5545_v17  ;;  %5624 = vrot.lane.b32.xlu0 %v5545_v17, %s10892_s24  ;;  %5841 = vrot.lane.b32.xlu1 %v5545_v17, %s10893_s29  ;;  %v4364_v45 = vmin.f32 %v16288_v37, 20.0  ;;  %v5224_v29 = vsel %vm4288_vm10, %v12454_v57, %v4744_v8 }
 0x3ea   :  { %v10443_v2 = vpop.eup %10442  ;;  %v4747_v51 = vmul.f32 0.6931472, %v10439_v41  ;;  %v5065_v62 = vmul.f32 %v13123_v13, %v5064_v60  ;;  %vm4325_vm0 = vcmp.gt.f32.partialorder %v16270_v4, 20.0  ;;  %v4763_v55 = vadd.f32 1.0, %v13188_v46  ;;  %5799 = vst [vmem:[#allocation2 + $0x178] sm:$0xff] %v5546_v6  ;;  %v16291_v13 = vld [vmem:[#allocation39_spill] sm:$0xff] }
 0x3eb   :  { %v5062_v54 = vmul.f32 0.6931472, %v10443_v2  ;;  %v5073_v47 = vadd.f32 1.0, %v5072_v24  ;;  %10450 = vpow2.f32 %v4530_v28  ;;  %v4460_v10 = vmul.f32 1.442695, %v4364_v45  ;;  %v16292_v41 = vld [vmem:[#allocation40_spill] sm:$0xff] }
 0x3ec   :  { %vm5067_vm1 = vcmp.lt.f32.partialorder %v5066_v52, 0.0004427343  ;;  %v4757_v38 = vmul.f32 -0.5, %v13152_v49  ;;  %v4760_v0 = vand.u32 2147483647, %v13152_v49  ;;  %10452 = vlog2.f32 %v4763_v55 }
 0x3ed   :  { %v5068_v44 = vsel %vm5067_vm1, %v5065_v62, %v5062_v54  ;;  %vm13203_vm7 = vcmp.lt.f32.partialorder %v5075_v59, 0.0004427343  ;;  %5843 = vrot.lane.b32.xlu0 %v5546_v6, %s10893_s29  ;;  %10454 = vpow2.f32 %v4460_v10  ;;  %v4365_v35 = vmin.f32 %v16291_v13, 20.0  ;;  %5626 = vrot.lane.b32.xlu1 %v5546_v6, %s10892_s24 }
 0x3ee   :  { %v5486_v16 = vmul.f32 %v5369_v36, %v5224_v29  ;;  %v4753_v60 = vsel %vm13181_vm15, %v4750_v30, %v4747_v51  ;;  %v5260_v24 = vsel %vm4324_vm13, %v12473_v22, %v5068_v44  ;;  %v4400_v8 = vmin.f32 %v16292_v41, 20.0 }
 0x3ef   :  { %v10445_v7 = vpop.eup %10444  ;;  %v5522_v28 = vmul.f32 %v5369_v36, %v5260_v24  ;;  %v5074_v18 = vmul.f32 %v13145_v20, %v5073_v47  ;;  %v4462_v17 = vmul.f32 1.442695, %v4365_v35  ;;  %v5548_v52 = vpack.c.bf16 %v13054_v48, %v13033_v53  ;;  %v16294_v20 = vld [vmem:[#allocation20_spill] sm:$0xff]  ;;  %v16295_v24 = vld [vmem:[#allocation22_spill] sm:$0xff] }
 0x3f0   :  { %v5071_v59 = vmul.f32 0.6931472, %v10445_v7  ;;  %v4766_v6 = vmul.f32 -0.5, %v13188_v46  ;;  %v4532_v45 = vmul.f32 1.442695, %v4400_v8  ;;  %v4401_v30 = vmin.f32 %v16293_v21, 20.0 }
 0x3f1   :  { %v5225_v22 = vsel %vm4289_vm11, %v12465_v11, %v4753_v60  ;;  %v13224_v2 = vpack.c.bf16 %v5522_v28, %v5486_v16  ;;  %10456 = vpow2.f32 %v4462_v17  ;;  %5801 = vst [vmem:[#allocation2 + $0x188] sm:$0xff] %v5548_v52  ;;  %5847 = vrot.lane.b32.xlu0 %v5548_v52, %s10893_s29  ;;  %v4366_v36 = vmin.f32 %v16294_v20, 20.0  ;;  %5630 = vrot.lane.b32.xlu1 %v5548_v52, %s10892_s24  ;;  %v16296_v28 = vld [vmem:[#allocation6_spill] sm:$0xff] }
 0x3f2   :  { %v10447_v53 = vpop.eup %10446  ;;  %v5077_v48 = vsel %vm13203_vm7, %v5074_v18, %v5071_v59  ;;  %v4758_v29 = vadd.f32 1.0, %v4757_v38  ;;  %10458 = vpow2.f32 %v4532_v45  ;;  %v4534_v51 = vmul.f32 1.442695, %v4401_v30 }
 0x3f3   :  { %v13231_v62 = vpop.eup %10448  ;;  %5811 = vst [vmem:[#allocation2 + $0x1d8] sm:$0xff] %v13224_v2  ;;  %v5261_v11 = vsel %vm4325_vm0, %v16270_v4, %v5077_v48  ;;  %v4769_v55 = vand.u32 2147483647, %v13188_v46  ;;  %v4464_v54 = vmul.f32 1.442695, %v4366_v36  ;;  %v5487_v47 = vmul.f32 %v13168_v40, %v5225_v22 }
 0x3f4   :  { %v5523_v10 = vmul.f32 %v13168_v40, %v5261_v11  ;;  %v5078_v44 = vadd.f32 1.0, %v13231_v62  ;;  %vm4290_vm8 = vcmp.gt.f32.partialorder %v16271_v14, 20.0  ;;  %v4756_v57 = vmul.f32 0.6931472, %v10447_v53  ;;  %v13278_v53 = vld [vmem:[%s15904_s2 + $0x18] sm:$0xff] }
 0x3f5   :  { %v13241_v38 = vpop.eup %10450  ;;  %v4767_v35 = vadd.f32 1.0, %v4766_v6  ;;  %10460 = vpow2.f32 %v4534_v51  ;;  %v4367_v8 = vmin.f32 %v16295_v24, 20.0  ;;  %v4759_v40 = vmul.f32 %v13152_v49, %v4758_v29 }
 0x3f6   :  { %v10453_v16 = vpop.eup %10452  ;;  %v13244_v60 = vpack.c.bf16 %v5523_v10, %v5487_v47  ;;  %10462 = vlog2.f32 %v5078_v44  ;;  %v5087_v4 = vadd.f32 1.0, %v13241_v38  ;;  %v13253_v18 = vrot.slane %v12948_v15, %v16296_v28 }
 0x3f7   :  { %v13248_v7 = vpop.eup %10454  ;;  %v4765_v17 = vmul.f32 0.6931472, %v10453_v16  ;;  %10464 = vpow2.f32 %v4464_v54  ;;  %vm13256_vm9 = vcmp.lt.f32.partialorder %v4760_v0, 0.0004427343  ;;  %v5081_v59 = vmul.f32 -0.5, %v13231_v62  ;;  %v16301_v0 = vld [vmem:[#allocation12_spill] sm:$0xff] }
 0x3f8   :  { %5812 = vst [vmem:[#allocation2 + $0x1e0] sm:$0xff] %v13244_v60  ;;  %10466 = vlog2.f32 %v5087_v4  ;;  %v4772_v6 = vadd.f32 1.0, %v13248_v7  ;;  %v4762_v49 = vsel %vm13256_vm9, %v4759_v40, %v4756_v57  ;;  %vm4291_vm14 = vcmp.gt.f32.partialorder %v16276_v50, 20.0 }
 0x3f9   :  { %v4768_v45 = vmul.f32 %v13188_v46, %v4767_v35  ;;  %v5090_v30 = vmul.f32 -0.5, %v13241_v38  ;;  %vm13267_vm10 = vcmp.lt.f32.partialorder %v4769_v55, 0.0004427343  ;;  %v13273_v36 = vrot.slane %v12948_v15, %v16301_v0  ;;  %v13287_v15 = vpop.permute.xlu0 %5610 }
 0x3fa   :  { %10468 = vlog2.f32 %v4772_v6  ;;  %v4466_v48 = vmul.f32 1.442695, %v4367_v8  ;;  %vm4326_vm12 = vcmp.gt.f32.partialorder %v16279_v27, 20.0  ;;  %v5084_v51 = vand.u32 2147483647, %v13231_v62  ;;  %16302 = vst [vmem:[#allocation21_spill] sm:$0xff] %v13287_v15 }
 0x3fb   :  { %v13280_v29 = vpop.eup %10456  ;;  %v4771_v46 = vsel %vm13267_vm10, %v4768_v45, %v4765_v17  ;;  %v4775_v11 = vmul.f32 -0.5, %v13248_v7  ;;  %v5226_v54 = vsel %vm4290_vm8, %v16271_v14, %v4762_v49  ;;  %v5082_v47 = vadd.f32 1.0, %v5081_v59  ;;  %5754 = vst.msk [vmem:[#allocation2 + $0x8] sm:$0xff] %vm1365_vm4, %v13287_v15 }
 0x3fc   :  { %v13289_v55 = vpop.eup %10458  ;;  %v5093_v10 = vand.u32 2147483647, %v13241_v38  ;;  %v4781_v44 = vadd.f32 1.0, %v13280_v29  ;;  %vm4327_vm13 = vcmp.gt.f32.partialorder %v16280_v34, 20.0  ;;  %v5091_v57 = vadd.f32 1.0, %v5090_v30 }
 0x3fd   :  { %v13301_v35 = vrot.slane %v13278_v53, %v16255_v32  ;;  %v5096_v16 = vadd.f32 1.0, %v13289_v55  ;;  %10470 = vpow2.f32 %v4466_v48  ;;  %v5227_v14 = vsel %vm4291_vm14, %v16276_v50, %v4771_v46 }
 0x3fe   :  { %v4778_v4 = vand.u32 2147483647, %v13248_v7  ;;  %10472 = vlog2.f32 %v4781_v44  ;;  %v13310_v8 = vrot.slane %v13278_v53, %v16264_v26  ;;  %v5488_v17 = vmul.f32 %v13253_v18, %v5226_v54 }
 0x3ff   :  { %v13312_v40 = vpop.eup %10460  ;;  %vm13315_vm4 = vcmp.lt.f32.partialorder %v5084_v51, 0.0004427343  ;;  %v4776_v59 = vadd.f32 1.0, %v4775_v11  ;;  %10474 = vlog2.f32 %v5096_v16  ;;  %v5083_v50 = vmul.f32 %v13231_v62, %v5082_v47  ;;  %v16307_v11 = vld [vmem:[#allocation17_spill] sm:$0xff] }
 0x400   :  { %v10463_v6 = vpop.eup %10462  ;;  %vm13320_vm11 = vcmp.lt.f32.partialorder %v5093_v10, 0.0004427343  ;;  %v4784_v45 = vmul.f32 -0.5, %v13280_v29  ;;  %v5105_v30 = vadd.f32 1.0, %v13312_v40  ;;  %v5489_v48 = vmul.f32 %v13273_v36, %v5227_v14 }
 0x401   :  { %v13326_v22 = vpop.eup %10464  ;;  %v5080_v46 = vmul.f32 0.6931472, %v10463_v6  ;;  %v5092_v51 = vmul.f32 %v13241_v38, %v5091_v57  ;;  %vm4292_vm15 = vcmp.gt.f32.partialorder %v16288_v37, 20.0  ;;  %v4402_v54 = vmin.f32 %v16307_v11, 20.0 }
 0x402   :  { %v10467_v62 = vpop.eup %10466  ;;  %vm13332_vm0 = vcmp.lt.f32.partialorder %v4778_v4, 0.0004427343  ;;  %v4787_v10 = vand.u32 2147483647, %v13280_v29  ;;  %v5099_v44 = vmul.f32 -0.5, %v13289_v55  ;;  %10476 = vlog2.f32 %v5105_v30 }
 0x403   :  { %v5086_v16 = vsel %vm13315_vm4, %v5083_v50, %v5080_v46  ;;  %v5089_v14 = vmul.f32 0.6931472, %v10467_v62  ;;  %v4777_v38 = vmul.f32 %v13248_v7, %v4776_v59  ;;  %v5102_v57 = vand.u32 2147483647, %v13289_v55 }
 0x404   :  { %v10469_v6 = vpop.eup %10468  ;;  %v5262_v4 = vsel %vm4326_vm12, %v16279_v27, %v5086_v16  ;;  %v4785_v26 = vadd.f32 1.0, %v4784_v45  ;;  %v5108_v32 = vmul.f32 -0.5, %v13312_v40  ;;  %v4536_v15 = vmul.f32 1.442695, %v4402_v54  ;;  %v16310_v27 = vld [vmem:[#allocation4_spill] sm:$0xff] }
 0x405   :  { %v5524_v56 = vmul.f32 %v13253_v18, %v5262_v4  ;;  %v5095_v52 = vsel %vm13320_vm11, %v5092_v51, %v5089_v14  ;;  %v4774_v50 = vmul.f32 0.6931472, %v10469_v6  ;;  %vm4293_vm1 = vcmp.gt.f32.partialorder %v16291_v13, 20.0 }
 0x406   :  { %v4790_v7 = vadd.f32 1.0, %v13326_v22  ;;  %v5263_v59 = vsel %vm4327_vm13, %v16280_v34, %v5095_v52  ;;  %v5100_v30 = vadd.f32 1.0, %v5099_v44  ;;  %10478 = vpow2.f32 %v4536_v15  ;;  %v16322_v52 = vld [vmem:[#allocation27_spill] sm:$0xff] }
 0x407   :  { %v4403_v45 = vmin.f32 %v16310_v27, 20.0  ;;  %v13355_v46 = vpop.eup %10470  ;;  %v13357_v54 = vpack.c.bf16 %v5524_v56, %v5488_v17  ;;  %v5525_v18 = vmul.f32 %v13273_v36, %v5263_v59  ;;  %v4780_v49 = vsel %vm13332_vm0, %v4777_v38, %v4774_v50 }
 0x408   :  { %vm13362_vm7 = vcmp.lt.f32.partialorder %v4787_v10, 0.0004427343  ;;  %v10473_v62 = vpop.eup %10472  ;;  %v4786_v34 = vmul.f32 %v13280_v29, %v4785_v26  ;;  %vm13367_vm8 = vcmp.lt.f32.partialorder %v5102_v57, 0.0004427343  ;;  %v5109_v44 = vadd.f32 1.0, %v5108_v32  ;;  %v16316_v57 = vld [vmem:[#allocation25_spill] sm:$0xff]  ;;  %v13395_v50 = vpop.permute.xlu0 %5614 }
 0x409   :  { %v5111_v56 = vand.u32 2147483647, %v13312_v40  ;;  %v10475_v17 = vpop.eup %10474  ;;  %5813 = vst [vmem:[#allocation2 + $0x1e8] sm:$0xff] %v13357_v54  ;;  %v13373_v36 = vpack.c.bf16 %v5525_v18, %v5489_v48  ;;  %v4783_v47 = vmul.f32 0.6931472, %v10473_v62  ;;  %10480 = vlog2.f32 %v4790_v7  ;;  %v16315_v48 = vld [vmem:[#allocation24_spill] sm:$0xff] }
 0x40a   :  { %v4538_v10 = vmul.f32 1.442695, %v4403_v45  ;;  %v5228_v16 = vsel %vm4292_vm15, %v16288_v37, %v4780_v49  ;;  %v5098_v26 = vmul.f32 0.6931472, %v10475_v17  ;;  %v5101_v29 = vmul.f32 %v13289_v55, %v5100_v30 }
 0x40b   :  { %v4799_v14 = vadd.f32 1.0, %v13355_v46  ;;  %5814 = vst [vmem:[#allocation2 + $0x1f0] sm:$0xff] %v13373_v36  ;;  %v4789_v32 = vsel %vm13362_vm7, %v4786_v34, %v4783_v47  ;;  %v5547_v38 = vpack.c.bf16 %v16315_v48, %v12624_v5  ;;  %v5549_v6 = vpack.c.bf16 %v12758_v23, %v16316_v57 }
 0x40c   :  { %10482 = vpow2.f32 %v4538_v10  ;;  %v10477_v4 = vpop.eup %10476  ;;  %vm4328_vm9 = vcmp.gt.f32.partialorder %v16292_v41, 20.0  ;;  %v5104_v37 = vsel %vm13367_vm8, %v5101_v29, %v5098_v26  ;;  %v5110_v55 = vmul.f32 %v13312_v40, %v5109_v44  ;;  %v13416_v15 = vpop.permute.xlu0 %5827  ;;  %v16320_v29 = vld [vmem:[#allocation15_spill] sm:$0xff] }
 0x40d   :  { %vm13391_vm14 = vcmp.lt.f32.partialorder %v5111_v56, 0.0004427343  ;;  %v5490_v7 = vmul.f32 %v13301_v35, %v5228_v16  ;;  %v5264_v5 = vsel %vm4328_vm9, %v16292_v41, %v5104_v37  ;;  %v5107_v59 = vmul.f32 0.6931472, %v10477_v4  ;;  %5628 = vrot.lane.b32.xlu0 %v5547_v38, %s10892_s24  ;;  %5800 = vst [vmem:[#allocation2 + $0x180] sm:$0xff] %v5547_v38  ;;  %5845 = vrot.lane.b32.xlu1 %v5547_v38, %s10893_s29  ;;  %v16321_v38 = vld [vmem:[#allocation10_spill] sm:$0xff] }
 0x40e   :  { %5802 = vst [vmem:[#allocation2 + $0x190] sm:$0xff] %v5549_v6  ;;  %v4368_v23 = vmin.f32 %v12755_v1, 20.0  ;;  %v5229_v40 = vsel %vm4293_vm1, %v16291_v13, %v4789_v32  ;;  %v5526_v30 = vmul.f32 %v13301_v35, %v5264_v5  ;;  %10484 = vlog2.f32 %v4799_v14  ;;  %5971 = vst.msk [vmem:[#allocation2 + $0x260] sm:$0xff] %vm31_vm3, %v13416_v15 }
 0x40f   :  { %v4369_v45 = vmin.f32 %v12765_v25, 20.0  ;;  %vm4329_vm10 = vcmp.gt.f32.partialorder %v16293_v21, 20.0  ;;  %v5113_v41 = vsel %vm13391_vm14, %v5110_v55, %v5107_v59  ;;  %v4793_v18 = vmul.f32 -0.5, %v13326_v22 }
 0x410   :  { %v4468_v49 = vmul.f32 1.442695, %v4368_v23  ;;  %v13411_v51 = vpop.eup %10478  ;;  %v13413_v62 = vpack.c.bf16 %v5526_v30, %v5490_v7  ;;  %v5265_v34 = vsel %vm4329_vm10, %v16293_v21, %v5113_v41  ;;  %v5491_v35 = vmul.f32 %v13310_v8, %v5229_v40  ;;  %v16319_v21 = vld [vmem:[#allocation26_spill] sm:$0xff] }
 0x411   :  { %v4470_v13 = vmul.f32 1.442695, %v4369_v45  ;;  %v5527_v44 = vmul.f32 %v13310_v8, %v5265_v34  ;;  %v5114_v56 = vadd.f32 1.0, %v13411_v51  ;;  %5632 = vrot.lane.b32.xlu0 %v5549_v6, %s10892_s24  ;;  %5849 = vrot.lane.b32.xlu1 %v5549_v6, %s10893_s29  ;;  %v4404_v17 = vmin.f32 %v16319_v21, 20.0  ;;  %v16325_v34 = vld [vmem:[#allocation28_spill] sm:$0xff] }
 0x412   :  { %5815 = vst [vmem:[#allocation2 + $0x1f8] sm:$0xff] %v13413_v62  ;;  %10486 = vpow2.f32 %v4468_v49  ;;  %v4794_v16 = vadd.f32 1.0, %v4793_v18  ;;  %v4802_v8 = vmul.f32 -0.5, %v13355_v46  ;;  %v5550_v14 = vpack.c.bf16 %v12827_v33, %v16320_v29 }
 0x413   :  { %v10481_v47 = vpop.eup %10480  ;;  %v13427_v10 = vpack.c.bf16 %v5527_v44, %v5491_v35  ;;  %10488 = vlog2.f32 %v5114_v56  ;;  %v4540_v26 = vmul.f32 1.442695, %v4404_v17  ;;  %v4796_v48 = vand.u32 2147483647, %v13326_v22  ;;  %v16326_v56 = vld [vmem:[#allocation16_spill] sm:$0xff] }
 0x414   :  { %10490 = vpow2.f32 %v4470_v13  ;;  %v4405_v57 = vmin.f32 %v16321_v38, 20.0  ;;  %v4792_v6 = vmul.f32 0.6931472, %v10481_v47  ;;  %v5117_v4 = vmul.f32 -0.5, %v13411_v51  ;;  %5803 = vst [vmem:[#allocation2 + $0x198] sm:$0xff] %v5550_v14 }
 0x415   :  { %5816 = vst [vmem:[#allocation2 + $0x200] sm:$0xff] %v13427_v10  ;;  %10492 = vpow2.f32 %v4540_v26  ;;  %5851 = vrot.lane.b32.xlu0 %v5550_v14, %s10893_s29  ;;  %5634 = vrot.lane.b32.xlu1 %v5550_v14, %s10892_s24  ;;  %vm4294_vm3 = vcmp.gt.f32.partialorder %v16294_v20, 20.0  ;;  %v5393_v33 = vrot.slane %v13278_v53, %v16266_v43  ;;  %v4370_v7 = vmin.f32 %v16322_v52, 20.0 }
 0x416   :  { %v13432_v32 = vpop.eup %10482  ;;  %v4542_v55 = vmul.f32 1.442695, %v4405_v57  ;;  %v4795_v59 = vmul.f32 %v13326_v22, %v4794_v16  ;;  %v4803_v23 = vadd.f32 1.0, %v4802_v8  ;;  %v4805_v40 = vand.u32 2147483647, %v13355_v46  ;;  %v16334_v8 = vld [vmem:[#allocation43_spill] sm:$0xff] }
 0x417   :  { %v5123_v37 = vadd.f32 1.0, %v13432_v32  ;;  %vm13447_vm12 = vcmp.lt.f32.partialorder %v4796_v48, 0.0004427343  ;;  %vm4295_vm13 = vcmp.gt.f32.partialorder %v16295_v24, 20.0  ;;  %v5120_v45 = vand.u32 2147483647, %v13411_v51 }
 0x418   :  { %v10485_v5 = vpop.eup %10484  ;;  %v4472_v41 = vmul.f32 1.442695, %v4370_v7  ;;  %v4798_v18 = vsel %vm13447_vm12, %v4795_v59, %v4792_v6  ;;  %v13457_v22 = vrot.slane %v13278_v53, %v16267_v39  ;;  %v5118_v49 = vadd.f32 1.0, %v5117_v4 }
 0x419   :  { %10494 = vlog2.f32 %v5123_v37  ;;  %v4371_v13 = vmin.f32 %v16325_v34, 20.0  ;;  %5855 = vrot.lane.b32.xlu0 %v12964_v9, %s10893_s29  ;;  %5638 = vrot.lane.b32.xlu1 %v12964_v9, %s10892_s24  ;;  %v4801_v35 = vmul.f32 0.6931472, %v10485_v5  ;;  %v5126_v44 = vmul.f32 -0.5, %v13432_v32 }
 0x41a   :  { %10496 = vpow2.f32 %v4542_v55  ;;  %v4406_v17 = vmin.f32 %v16326_v56, 20.0  ;;  %v4804_v16 = vmul.f32 %v13355_v46, %v4803_v23  ;;  %vm13469_vm4 = vcmp.lt.f32.partialorder %v4805_v40, 0.0004427343  ;;  %v10877_v55 = vld [vmem:[#allocation2 + $0x1a0] sm:$0xff] }
 0x41b   :  { %10498 = vpow2.f32 %v4472_v41  ;;  %vm4330_vm11 = vcmp.gt.f32.partialorder %v16307_v11, 20.0  ;;  %v4474_v26 = vmul.f32 1.442695, %v4371_v13  ;;  %v5230_v9 = vsel %vm4294_vm3, %v16294_v20, %v4798_v18  ;;  %v16331_v41 = vld [vmem:[#allocation19_spill] sm:$0xff] }
 0x41c   :  { %v13466_v47 = vpop.eup %10486  ;;  %vm13477_vm15 = vcmp.lt.f32.partialorder %v5120_v45, 0.0004427343  ;;  %vm4331_vm0 = vcmp.gt.f32.partialorder %v16310_v27, 20.0  ;;  %v4544_v48 = vmul.f32 1.442695, %v4406_v17  ;;  %v5119_v4 = vmul.f32 %v13411_v51, %v5118_v49 }
 0x41d   :  { %v10489_v29 = vpop.eup %10488  ;;  %v4808_v46 = vadd.f32 1.0, %v13466_v47  ;;  %v5129_v37 = vand.u32 2147483647, %v13432_v32  ;;  %10500 = vpow2.f32 %v4474_v26  ;;  %5636 = vrot.lane.b32.xlu0 %v10877_v55, %s10892_s24  ;;  %5853 = vrot.lane.b32.xlu1 %v10877_v55, %s10893_s29  ;;  %v4807_v20 = vsel %vm13469_vm4, %v4804_v16, %v4801_v35 }
 0x41e   :  { %v13483_v57 = vpop.eup %10490  ;;  %v5116_v6 = vmul.f32 0.6931472, %v10489_v29  ;;  %v5127_v7 = vadd.f32 1.0, %v5126_v44  ;;  %v4811_v23 = vmul.f32 -0.5, %v13466_v47  ;;  %v13499_v40 = vrot.slane %v13278_v53, %v16281_v63 }
 0x41f   :  { %10502 = vlog2.f32 %v4808_v46  ;;  %v4817_v5 = vadd.f32 1.0, %v13483_v57  ;;  %v13492_v59 = vpop.eup %10492  ;;  %v4407_v18 = vmin.f32 %v16331_v41, 20.0  ;;  %v5492_v13 = vmul.f32 %v5393_v33, %v5230_v9 }
 0x420   :  { %v5122_v51 = vsel %vm13477_vm15, %v5119_v4, %v5116_v6  ;;  %10504 = vpow2.f32 %v4544_v48  ;;  %v5132_v45 = vadd.f32 1.0, %v13492_v59  ;;  %v5231_v35 = vsel %vm4295_vm13, %v16295_v24, %v4807_v20 }
 0x421   :  { %v5266_v30 = vsel %vm4330_vm11, %v16307_v11, %v5122_v51  ;;  %10506 = vlog2.f32 %v4817_v5  ;;  %vm13509_vm1 = vcmp.lt.f32.partialorder %v5129_v37, 0.0004427343  ;;  %5640 = vrot.lane.b32.xlu0 %v12987_v42, %s10892_s24  ;;  %5857 = vrot.lane.b32.xlu1 %v12987_v42, %s10893_s29  ;;  %v5128_v16 = vmul.f32 %v13432_v32, %v5127_v7 }
 0x422   :  { %v5528_v44 = vmul.f32 %v5393_v33, %v5266_v30  ;;  %10508 = vlog2.f32 %v5132_v45  ;;  %v4372_v26 = vmin.f32 %v16334_v8, 20.0  ;;  %v4812_v33 = vadd.f32 1.0, %v4811_v23 }
 0x423   :  { %v10495_v49 = vpop.eup %10494  ;;  %v4814_v29 = vand.u32 2147483647, %v13466_v47  ;;  %vm4296_vm7 = vcmp.gt.f32.partialorder %v12755_v1, 20.0  ;;  %v4820_v46 = vmul.f32 -0.5, %v13483_v57  ;;  %v13533_v32 = vrot.slane %v13278_v53, %v16282_v12 }
 0x424   :  { %v13517_v11 = vpop.eup %10496  ;;  %v5125_v17 = vmul.f32 0.6931472, %v10495_v49  ;;  %v13521_v24 = vpack.c.bf16 %v5528_v44, %v5492_v13  ;;  %v4546_v48 = vmul.f32 1.442695, %v4407_v18  ;;  %v5135_v4 = vmul.f32 -0.5, %v13492_v59 }
 0x425   :  { %v5141_v9 = vadd.f32 1.0, %v13517_v11  ;;  %v13525_v14 = vpop.eup %10498  ;;  %5859 = vrot.lane.b32.xlu0 %v13029_v31, %s10893_s29  ;;  %5642 = vrot.lane.b32.xlu1 %v13029_v31, %s10892_s24  ;;  %v5493_v12 = vmul.f32 %v13457_v22, %v5231_v35  ;;  %v5144_v20 = vmul.f32 -0.5, %v13517_v11  ;;  %v4476_v7 = vmul.f32 1.442695, %v4372_v26 }
 0x426   :  { %v5131_v42 = vsel %vm13509_vm1, %v5128_v16, %v5125_v17  ;;  %5817 = vst [vmem:[#allocation2 + $0x208] sm:$0xff] %v13521_v24  ;;  %v4826_v37 = vadd.f32 1.0, %v13525_v14  ;;  %vm13551_vm8 = vcmp.lt.f32.partialorder %v4814_v29, 0.0004427343  ;;  %v4823_v23 = vand.u32 2147483647, %v13483_v57 }
 0x427   :  { %v5267_v6 = vsel %vm4331_vm0, %v16310_v27, %v5131_v42  ;;  %10510 = vlog2.f32 %v5141_v9  ;;  %v13548_v5 = vpop.eup %10500  ;;  %v4813_v27 = vmul.f32 %v13466_v47, %v4812_v33  ;;  %vm4332_vm9 = vcmp.gt.f32.partialorder %v16319_v21, 20.0  ;;  %v13562_v47 = vpop.permute.xlu1 %5831  ;;  %v16337_v42 = vld [vmem:[#allocation44_spill] sm:$0xff] }
 0x428   :  { %v5529_v55 = vmul.f32 %v13457_v22, %v5267_v6  ;;  %10512 = vlog2.f32 %v4826_v37  ;;  %vm4297_vm14 = vcmp.gt.f32.partialorder %v12765_v25, 20.0  ;;  %v4821_v22 = vadd.f32 1.0, %v4820_v46 }
 0x429   :  { %v10503_v31 = vpop.eup %10502  ;;  %v5138_v45 = vand.u32 2147483647, %v13492_v59  ;;  %v4835_v18 = vadd.f32 1.0, %v13548_v5  ;;  %v5136_v35 = vadd.f32 1.0, %v5135_v4  ;;  %v5147_v44 = vand.u32 2147483647, %v13517_v11  ;;  %5863 = vrot.lane.b32.xlu0 %v13147_v3, %s10893_s29  ;;  %5646 = vrot.lane.b32.xlu1 %v13147_v3, %s10892_s24 }
 0x42a   :  { %v13557_v30 = vpack.c.bf16 %v5529_v55, %v5493_v12  ;;  %v13564_v49 = vpop.eup %10504  ;;  %v4810_v13 = vmul.f32 0.6931472, %v10503_v31  ;;  %10514 = vpow2.f32 %v4546_v48  ;;  %vm4333_vm10 = vcmp.gt.f32.partialorder %v16321_v38, 20.0 }
 0x42b   :  { %v10507_v63 = vpop.eup %10506  ;;  %v5145_v17 = vadd.f32 1.0, %v5144_v20  ;;  %v4829_v16 = vmul.f32 -0.5, %v13525_v14  ;;  %v4832_v26 = vand.u32 2147483647, %v13525_v14  ;;  %v5150_v33 = vadd.f32 1.0, %v13564_v49 }
 0x42c   :  { %5818 = vst [vmem:[#allocation2 + $0x210] sm:$0xff] %v13557_v30  ;;  %v4816_v29 = vsel %vm13551_vm8, %v4813_v27, %v4810_v13  ;;  %v4819_v9 = vmul.f32 0.6931472, %v10507_v63  ;;  %10516 = vlog2.f32 %v4835_v18  ;;  %v4373_v46 = vmin.f32 %v16337_v42, 20.0  ;;  %v10509_v3 = vpop.eup %10508  ;;  %v16346_v63 = vld [vmem:[#allocation45_spill] sm:$0xff] }
 0x42d   :  { %v4822_v48 = vmul.f32 %v13483_v57, %v4821_v22  ;;  %vm13580_vm3 = vcmp.lt.f32.partialorder %v4823_v23, 0.0004427343  ;;  %vm13584_vm12 = vcmp.lt.f32.partialorder %v5138_v45, 0.0004427343  ;;  %10518 = vlog2.f32 %v5150_v33  ;;  %5644 = vrot.lane.b32.xlu0 %v13095_v19, %s10892_s24  ;;  %5861 = vrot.lane.b32.xlu1 %v13095_v19, %s10893_s29  ;;  %v13658_v22 = vpop.permute.xlu0 %5829 }
 0x42e   :  { %v5232_v37 = vsel %vm4296_vm7, %v12755_v1, %v4816_v29  ;;  %v5134_v12 = vmul.f32 0.6931472, %v10509_v3  ;;  %v5137_v55 = vmul.f32 %v13492_v59, %v5136_v35  ;;  %vm13592_vm13 = vcmp.lt.f32.partialorder %v5147_v44, 0.0004427343  ;;  %v13603_v1 = vpop.permute.xlu1 %5612 }
 0x42f   :  { %v4825_v57 = vsel %vm13580_vm3, %v4822_v48, %v4819_v9  ;;  %v4830_v27 = vadd.f32 1.0, %v4829_v16  ;;  %v5153_v51 = vmul.f32 -0.5, %v13564_v49  ;;  %10520 = vpow2.f32 %v4476_v7 }
 0x430   :  { %v5140_v23 = vsel %vm13584_vm12, %v5137_v55, %v5134_v12  ;;  %v5146_v31 = vmul.f32 %v13517_v11, %v5145_v17  ;;  %vm13608_vm4 = vcmp.lt.f32.partialorder %v4832_v26, 0.0004427343  ;;  %v4478_v19 = vmul.f32 1.442695, %v4373_v46  ;;  %v16347_v46 = vld [vmem:[#allocation18_spill] sm:$0xff]  ;;  %v16348_v12 = vld [vmem:[#allocation29_spill] sm:$0xff] }
 0x431   :  { %v10511_v59 = vpop.eup %10510  ;;  %v5494_v45 = vmul.f32 %v13499_v40, %v5232_v37  ;;  %v5268_v18 = vsel %vm4332_vm9, %v16319_v21, %v5140_v23  ;;  %v4838_v13 = vmul.f32 -0.5, %v13548_v5  ;;  %v5233_v44 = vsel %vm4297_vm14, %v12765_v25, %v4825_v57  ;;  %5648 = vrot.lane.b32.xlu0 %v13154_v61, %s10892_s24  ;;  %5865 = vrot.lane.b32.xlu1 %v13154_v61, %s10893_s29 }
 0x432   :  { %v5143_v7 = vmul.f32 0.6931472, %v10511_v59  ;;  %v10513_v35 = vpop.eup %10512  ;;  %v5530_v11 = vmul.f32 %v13499_v40, %v5268_v18  ;;  %10522 = vpow2.f32 %v4478_v19  ;;  %v4408_v17 = vmin.f32 %v16346_v63, 20.0  ;;  %v13641_v4 = vpop.permute.xlu1 %5616 }
 0x433   :  { %v4828_v16 = vmul.f32 0.6931472, %v10513_v35  ;;  %v4831_v26 = vmul.f32 %v13525_v14, %v4830_v27  ;;  %v5154_v33 = vadd.f32 1.0, %v5153_v51  ;;  %v4409_v3 = vmin.f32 %v16347_v46, 20.0 }
 0x434   :  { %v5149_v21 = vsel %vm13592_vm13, %v5146_v31, %v5143_v7  ;;  %v13629_v29 = vpop.eup %10514  ;;  %v13631_v25 = vpack.c.bf16 %v5530_v11, %v5494_v45  ;;  %v4548_v9 = vmul.f32 1.442695, %v4408_v17  ;;  %v5495_v61 = vmul.f32 %v13533_v32, %v5233_v44 }
 0x435   :  { %v5269_v40 = vsel %vm4333_vm10, %v16321_v38, %v5149_v21  ;;  %v5156_v6 = vand.u32 2147483647, %v13564_v49  ;;  %v5159_v14 = vadd.f32 1.0, %v13629_v29  ;;  %vm4298_vm11 = vcmp.gt.f32.partialorder %v16322_v52, 20.0  ;;  %5867 = vrot.lane.b32.xlu0 %v13224_v2, %s10893_s29  ;;  %5650 = vrot.lane.b32.xlu1 %v13224_v2, %s10892_s24 }
 0x436   :  { %v5531_v48 = vmul.f32 %v13533_v32, %v5269_v40  ;;  %v10517_v37 = vpop.eup %10516  ;;  %5819 = vst [vmem:[#allocation2 + $0x218] sm:$0xff] %v13631_v25  ;;  %v4834_v38 = vsel %vm13608_vm4, %v4831_v26, %v4828_v16  ;;  %10524 = vpow2.f32 %v4548_v9  ;;  %v4374_v55 = vmin.f32 %v16348_v12, 20.0  ;;  %v13679_v44 = vpop.permute.xlu1 %5835  ;;  %v16351_v16 = vld [vmem:[#allocation30_spill] sm:$0xff] }
 0x437   :  { %v10519_v32 = vpop.eup %10518  ;;  %v4839_v57 = vadd.f32 1.0, %v4838_v13  ;;  %v4841_v27 = vand.u32 2147483647, %v13548_v5  ;;  %10526 = vlog2.f32 %v5159_v14  ;;  %v5409_v51 = vrot.slane %v13278_v53, %v16296_v28  ;;  %v5834_v9 = vpop.permute.xlu0 %5833 }
 0x438   :  { %v13652_v20 = vpack.c.bf16 %v5531_v48, %v5495_v61  ;;  %v5152_v59 = vmul.f32 0.6931472, %v10519_v32  ;;  %v5155_v23 = vmul.f32 %v13564_v49, %v5154_v33  ;;  %v4550_v31 = vmul.f32 1.442695, %v4409_v3 }
 0x439   :  { %v13660_v19 = vpop.eup %10520  ;;  %v5234_v2 = vsel %vm4298_vm11, %v16322_v52, %v4834_v38  ;;  %v4837_v45 = vmul.f32 0.6931472, %v10517_v37  ;;  %vm5157_vm15 = vcmp.lt.f32.partialorder %v5156_v6, 0.0004427343  ;;  %v5162_v18 = vmul.f32 -0.5, %v13629_v29  ;;  %5871 = vrot.lane.b32.xlu0 %v13357_v54, %s10893_s29  ;;  %5654 = vrot.lane.b32.xlu1 %v13357_v54, %s10892_s24 }
 0x43a   :  { %5820 = vst [vmem:[#allocation2 + $0x220] sm:$0xff] %v13652_v20  ;;  %vm4334_vm0 = vcmp.gt.f32.partialorder %v16326_v56, 20.0  ;;  %v5158_v28 = vsel %vm5157_vm15, %v5155_v23, %v5152_v59  ;;  %v4844_v49 = vadd.f32 1.0, %v13660_v19  ;;  %v4480_v7 = vmul.f32 1.442695, %v4374_v55 }
 0x43b   :  { %v4840_v13 = vmul.f32 %v13548_v5, %v4839_v57  ;;  %vm13674_vm1 = vcmp.lt.f32.partialorder %v4841_v27, 0.0004427343  ;;  %v5270_v35 = vsel %vm4334_vm0, %v16326_v56, %v5158_v28  ;;  %10528 = vpow2.f32 %v4550_v31  ;;  %v16352_v57 = vld [vmem:[#allocation31_spill] sm:$0xff]  ;;  %v16353_v27 = vld [vmem:[#allocation21_spill] sm:$0xff]  ;;  %v6011_v31 = vld [vmem:[#allocation2 + $0x8] sm:$0xff] }
 0x43c   :  { %v13681_v11 = vpop.eup %10522  ;;  %v5496_v17 = vmul.f32 %v5409_v51, %v5234_v2  ;;  %v5532_v21 = vmul.f32 %v5409_v51, %v5270_v35  ;;  %10530 = vlog2.f32 %v4844_v49  ;;  %v4375_v26 = vmin.f32 %v16351_v16, 20.0  ;;  %v6048_v28 = vld [vmem:[#allocation2 + $0x140] sm:$0xff] }
 0x43d   :  { %v4843_v54 = vsel %vm13674_vm1, %v4840_v13, %v4837_v45  ;;  %v5163_v5 = vadd.f32 1.0, %v5162_v18  ;;  %v4853_v33 = vadd.f32 1.0, %v13681_v11  ;;  %10532 = vpow2.f32 %v4480_v7  ;;  %5652 = vrot.lane.b32.xlu0 %v13244_v60, %s10892_s24  ;;  %5869 = vrot.lane.b32.xlu1 %v13244_v60, %s10893_s29  ;;  %v13730_v18 = vpop.permute.xlu0 %5839 }
 0x43e   :  { %v13687_v40 = vpack.c.bf16 %v5532_v21, %v5496_v17  ;;  %v4482_v56 = vmul.f32 1.442695, %v4375_v26  ;;  %vm4299_vm7 = vcmp.gt.f32.partialorder %v16325_v34, 20.0  ;;  %v5413_v3 = vrot.slane %v13278_v53, %v16301_v0  ;;  %v13706_v53 = vpop.permute.xlu1 %5618 }
 0x43f   :  { %v5165_v61 = vand.u32 2147483647, %v13629_v29  ;;  %10534 = vlog2.f32 %v4853_v33  ;;  %v5235_v6 = vsel %vm4299_vm7, %v16325_v34, %v4843_v54  ;;  %v4410_v14 = vmin.f32 %v12925_v58, 20.0 }
 0x440   :  { %v13697_v48 = vpop.eup %10524  ;;  %5821 = vst [vmem:[#allocation2 + $0x228] sm:$0xff] %v13687_v40  ;;  %10536 = vpow2.f32 %v4482_v56  ;;  %vm4335_vm8 = vcmp.gt.f32.partialorder %v16331_v41, 20.0  ;;  %v5164_v60 = vmul.f32 %v13629_v29, %v5163_v5  ;;  %v4847_v38 = vmul.f32 -0.5, %v13660_v19  ;;  %v13764_v5 = vld [vmem:[#allocation2 + $0x138] sm:$0xff] }
 0x441   :  { %v10527_v37 = vpop.eup %10526  ;;  %v5168_v0 = vadd.f32 1.0, %v13697_v48  ;;  %v4552_v32 = vmul.f32 1.442695, %v4410_v14  ;;  %v4411_v34 = vmin.f32 %v16352_v57, 20.0  ;;  %5656 = vrot.lane.b32.xlu0 %v13373_v36, %s10892_s24  ;;  %5873 = vrot.lane.b32.xlu1 %v13373_v36, %s10893_s29  ;;  %v5682_v29 = vsel %vm25_vm2, %v16353_v27, %v13603_v1  ;;  %v5621_v27 = vpop.permute.xlu0 %5620 }
 0x442   :  { %v5161_v55 = vmul.f32 0.6931472, %v10527_v37  ;;  %v5497_v51 = vmul.f32 %v5413_v3, %v5235_v6  ;;  %vm13716_vm9 = vcmp.lt.f32.partialorder %v5165_v61, 0.0004427343  ;;  %v5683_v23 = vsel %vm25_vm2, %v13603_v1, %v13395_v50  ;;  %5755 = vst [vmem:[#allocation2 + $0x10] sm:$0xff] %v5682_v29  ;;  %6132 = vmatprep.subr.bf16.mxu0 %v5682_v29  ;;  %v13766_v33 = vpop.permute.xlu1 %5622  ;;  %v16356_v6 = vld [vmem:[#allocation3_spill] sm:$0xff] }
 0x443   :  { %10538 = vlog2.f32 %v5168_v0  ;;  %v4554_v2 = vmul.f32 1.442695, %v4411_v34  ;;  %5756 = vst [vmem:[#allocation2 + $0x18] sm:$0xff] %v5683_v23  ;;  %v13728_v45 = vsel %vm1511_vm5, %v13416_v15, %v13658_v22  ;;  %6133 = vmatpush1.bf16.msra.mxu0 %v6011_v31  ;;  %v4856_v7 = vmul.f32 -0.5, %v13681_v11  ;;  %v13798_v29 = vld [vmem:[#allocation2 + $0x148] sm:$0xff] }
 0x444   :  { %v5167_v36 = vsel %vm13716_vm9, %v5164_v60, %v5161_v55  ;;  %10540 = vpow2.f32 %v4552_v32  ;;  %v5900_v13 = vsel %vm1511_vm5, %v13658_v22, %v13562_v47  ;;  %5972 = vst [vmem:[#allocation2 + $0x268] sm:$0xff] %v13728_v45  ;;  %v5684_v15 = vsel %vm25_vm2, %v13395_v50, %v13641_v4  ;;  %6134 = vmatprep.subr.bf16.mxu0 %v6048_v28 }
 0x445   :  { %v13732_v49 = vpop.eup %10528  ;;  %v5271_v1 = vsel %vm4335_vm8, %v16331_v41, %v5167_v36  ;;  %vm4300_vm14 = vcmp.gt.f32.partialorder %v16334_v8, 20.0  ;;  %v4848_v17 = vadd.f32 1.0, %v4847_v38  ;;  %v13749_v41 = vld [vmem:[%s15904_s2 + $0x20] sm:$0xf]  ;;  %v5171_v21 = vmul.f32 -0.5, %v13697_v48  ;;  %5875 = vrot.lane.b32.xlu0 %v13413_v62, %s10893_s29  ;;  %5658 = vrot.lane.b32.xlu1 %v13413_v62, %s10892_s24  ;;  %5973 = vst [vmem:[#allocation2 + $0x270] sm:$0xff] %v5900_v13 }
 0x446   :  { %v10531_v52 = vpop.eup %10530  ;;  %v5533_v35 = vmul.f32 %v5413_v3, %v5271_v1  ;;  %v5177_v22 = vadd.f32 1.0, %v13732_v49  ;;  %5757 = vst [vmem:[#allocation2 + $0x20] sm:$0xff] %v5684_v15  ;;  %v4850_v50 = vand.u32 2147483647, %v13660_v19  ;;  %10542 = vpow2.f32 %v4554_v2  ;;  %6175 = vmatprep.subr.bf16.mxu1 %v5684_v15 }
 0x447   :  { %v13760_v26 = vsel %vm1511_vm5, %v13562_v47, %v5834_v9  ;;  %v5902_v54 = vsel %vm1511_vm5, %v5834_v9, %v13679_v44  ;;  %v13768_v56 = vpop.eup %10532  ;;  %v4846_v3 = vmul.f32 0.6931472, %v10531_v52  ;;  %v4859_v61 = vand.u32 2147483647, %v13681_v11  ;;  %6135 = vmatpush1.bf16.msra.mxu0 %v13764_v5  ;;  %6176 = vmatpush1.bf16.msra.mxu1 %v5683_v23  ;;  %v13775_v47 = vld [vmem:[#allocation2 + $0x150] sm:$0xff] }
 0x448   :  { %v13770_v62 = vpack.c.bf16 %v5533_v35, %v5497_v51  ;;  %10544 = vlog2.f32 %v5177_v22  ;;  %5974 = vst [vmem:[#allocation2 + $0x278] sm:$0xff] %v13760_v26  ;;  %5975 = vst [vmem:[#allocation2 + $0x280] sm:$0xff] %v5902_v54  ;;  %v13779_v14 = vrot.slane %v13749_v41, %v16356_v6  ;;  %v4857_v37 = vadd.f32 1.0, %v4856_v7  ;;  %6136 = vmatprep.subr.bf16.mxu0 %v5900_v13  ;;  %v5838_v13 = vpop.permute.xlu1 %5837  ;;  %v13893_v51 = vld [vmem:[#allocation2 + $0x158] sm:$0xff] }
 0x449   :  { %v10535_v9 = vpop.eup %10534  ;;  %v5180_v60 = vmul.f32 -0.5, %v13732_v49  ;;  %v4862_v38 = vadd.f32 1.0, %v13768_v56  ;;  %6177 = vmatprep.subr.bf16.mxu1 %v13775_v47  ;;  %v4849_v55 = vmul.f32 %v13660_v19, %v4848_v17  ;;  %vm4301_vm10 = vcmp.gt.f32.partialorder %v16337_v42, 20.0  ;;  %5879 = vrot.lane.b32.xlu0 %v13521_v24, %s10893_s29 }
 0x44a   :  { %v13784_v0 = vpop.eup %10536  ;;  %5822 = vst [vmem:[#allocation2 + $0x230] sm:$0xff] %v13770_v62  ;;  %v5172_v32 = vadd.f32 1.0, %v5171_v21  ;;  %5662 = vrot.lane.b32.xlu1 %v13521_v24, %s10892_s24  ;;  %v13796_v34 = vsel %vm25_vm2, %v13641_v4, %v13706_v53  ;;  %vm13800_vm3 = vcmp.lt.f32.partialorder %v4850_v50, 0.0004427343  ;;  %vm4336_vm12 = vcmp.gt.f32.partialorder %v16346_v63, 20.0  ;;  %v13810_v24 = vld [vmem:[%s15905_s5 + $0x8] sm:$0xff]  }
 0x44b   :  { %v5174_v19 = vand.u32 2147483647, %v13697_v48  ;;  %10546 = vlog2.f32 %v4862_v38  ;;  %5758 = vst [vmem:[#allocation2 + $0x28] sm:$0xff] %v13796_v34  ;;  %v4852_v4 = vsel %vm13800_vm3, %v4849_v55, %v4846_v3  ;;  %v4855_v59 = vmul.f32 0.6931472, %v10535_v9  ;;  %6137 = vmatpush1.bf16.msra.mxu0 %v13728_v45  ;;  %6178 = vmatpush1.bf16.msra.mxu1 %v13798_v29  ;;  %v16361_v50 = vld [vmem:[#allocation7_spill] sm:$0xff] }
 0x44c   :  { %vm13814_vm13 = vcmp.lt.f32.partialorder %v4859_v61, 0.0004427343  ;;  %v4871_v31 = vadd.f32 1.0, %v13784_v0  ;;  %v4858_v2 = vmul.f32 %v13681_v11, %v4857_v37  ;;  %v5181_v28 = vadd.f32 1.0, %v5180_v60  ;;  %6179 = vmatprep.subr.bf16.mxu1 %v5902_v54 }
 0x44d   :  { %v10539_v36 = vpop.eup %10538  ;;  %v13824_v1 = vsel %vm25_vm2, %v13706_v53, %v5621_v27  ;;  %v13828_v7 = vsel %vm25_vm2, %v5621_v27, %v13766_v33  ;;  %v5173_v45 = vmul.f32 %v13697_v48, %v5172_v32  ;;  %v4865_v35 = vmul.f32 -0.5, %v13768_v56  ;;  %5660 = vrot.lane.b32.xlu0 %v13427_v10, %s10892_s24 }
 0x44e   :  { %v13830_v15 = vpop.eup %10540  ;;  %v5170_v52 = vmul.f32 0.6931472, %v10539_v36  ;;  %10548 = vlog2.f32 %v4871_v31  ;;  %5877 = vrot.lane.b32.xlu1 %v13427_v10, %s10893_s29  ;;  %5759 = vst [vmem:[#allocation2 + $0x30] sm:$0xff] %v13824_v1  ;;  %5760 = vst [vmem:[#allocation2 + $0x38] sm:$0xff] %v13828_v7  ;;  %v5236_v11 = vsel %vm4300_vm14, %v16334_v8, %v4852_v4  ;;  %vm5175_vm4 = vcmp.lt.f32.partialorder %v5174_v19, 0.0004427343  ;;  %6218 = vmatprep.subr.bf16.mxu0 %v13824_v1 }
 0x44f   :  { %v5183_v48 = vand.u32 2147483647, %v13732_v49  ;;  %v5186_v53 = vadd.f32 1.0, %v13830_v15  ;;  %9874 = vmatmul.mubr.msk.bf16.vlgmr.msra.gmra.mrb[72].mxu0 %vm1743_vm6, %v13810_v24  ;;  %v4861_v10 = vsel %vm13814_vm13, %v4858_v2, %v4855_v59  ;;  %v13852_v21 = vsel %vm1511_vm5, %v13679_v44, %v5838_v13  ;;  %6180 = vmatpush1.bf16.msra.mxu1 %v13760_v26  ;;  %v13870_v44 = vld [vmem:[#allocation2] sm:$0xff] }
 0x450   :  { %v5176_v17 = vsel %vm5175_vm4, %v5173_v45, %v5170_v52  ;;  %v13856_v8 = vsel %vm1511_vm5, %v5838_v13, %v13730_v18  ;;  %v13859_v22 = vpop.eup %10542  ;;  %v5421_v54 = vrot.slane %v13749_v41, %v16361_v50  ;;  %v5182_v61 = vmul.f32 %v13732_v49, %v5181_v28  ;;  %5976 = vst [vmem:[#allocation2 + $0x288] sm:$0xff] %v13852_v21  ;;  %v13880_v49 = vld [vmem:[#allocation2 + $0x160] sm:$0xff]  ;;  %v14056_v50 = vld [vmem:[#allocation2 + $0x188] sm:$0xff] }
 0x451   :  { %v5272_v3 = vsel %vm4336_vm12, %v16346_v63, %v5176_v17  ;;  %10550 = vlog2.f32 %v5186_v53  ;;  %5977 = vst [vmem:[#allocation2 + $0x290] sm:$0xff] %v13856_v8  ;;  %6219 = vmatpush1.bf16.msra.mxu0 %v13796_v34  ;;  %6250 = vmatprep.mubr.bf16.mxu0 %v13870_v44  ;;  %v5498_v6 = vmul.f32 %v13779_v14, %v5236_v11  ;;  %v4866_v60 = vadd.f32 1.0, %v4865_v35  ;;  %v14030_v35 = vld [vmem:[#allocation2 + $0x180] sm:$0xff] }
 0x452   :  { %v10545_v9 = vpop.eup %10544  ;;  %v5534_v37 = vmul.f32 %v13779_v14, %v5272_v3  ;;  %v5195_v63 = vadd.f32 1.0, %v13859_v22  ;;  %5664 = vrot.lane.b32.xlu0 %v13557_v30, %s10892_s24  ;;  %5881 = vrot.lane.b32.xlu1 %v13557_v30, %s10893_s29  ;;  %v5237_v38 = vsel %vm4301_vm10, %v16337_v42, %v4861_v10  ;;  %v4874_v32 = vmul.f32 -0.5, %v13784_v0 }
 0x453   :  { %v5179_v55 = vmul.f32 0.6931472, %v10545_v9  ;;  %v5189_v14 = vmul.f32 -0.5, %v13830_v15  ;;  %6220 = vmatprep.subr.bf16.mxu0 %v13880_v49  ;;  %9875 = vmatmul.mubr.msk.bf16.vlgmr.msra.gmra.mrb[72].mxu1 %vm1743_vm6, %v13810_v24  ;;  %vm5184_vm11 = vcmp.lt.f32.partialorder %v5183_v48, 0.0004427343  ;;  %vm4337_vm15 = vcmp.gt.f32.partialorder %v16347_v46, 20.0 }
 0x454   :  { %v13890_v27 = vpack.c.bf16 %v5534_v37, %v5498_v6  ;;  %v4868_v30 = vand.u32 2147483647, %v13768_v56  ;;  %10552 = vlog2.f32 %v5195_v63  ;;  %6293 = vmatprep.mubr.bf16.mxu1 %v13870_v44  ;;  %v4877_v4 = vand.u32 2147483647, %v13784_v0 }
 0x455   :  { %v10547_v42 = vpop.eup %10546  ;;  %v5185_v19 = vsel %vm5184_vm11, %v5182_v61, %v5179_v55  ;;  %6221 = vmatpush1.bf16.msra.mxu0 %v13893_v51  ;;  %v5499_v59 = vmul.f32 %v5421_v54, %v5237_v38  ;;  %v4867_v36 = vmul.f32 %v13768_v56, %v4866_v60  ;;  %v4875_v28 = vadd.f32 1.0, %v4874_v32  ;;  %v13965_v32 = vld [vmem:[#allocation2 + $0x170] sm:$0xff] }
 0x456   :  { %5823 = vst [vmem:[#allocation2 + $0x238] sm:$0xff] %v13890_v27  ;;  %v5273_v23 = vsel %vm4337_vm15, %v16347_v46, %v5185_v19  ;;  %v4864_v31 = vmul.f32 0.6931472, %v10547_v42  ;;  %5883 = vrot.lane.b32.xlu0 %v13631_v25, %s10893_s29  ;;  %5666 = vrot.lane.b32.xlu1 %v13631_v25, %s10892_s24  ;;  %v5190_v13 = vadd.f32 1.0, %v5189_v14  ;;  %v5198_v52 = vmul.f32 -0.5, %v13859_v22  ;;  %v13987_v19 = vld [vmem:[#allocation2 + $0x168] sm:$0xff] }
 0x457   :  { %v5535_v2 = vmul.f32 %v5421_v54, %v5273_v23  ;;  %6222 = vmatprep.subr.bf16.mxu0 %v13856_v8  ;;  %vm13908_vm0 = vcmp.lt.f32.partialorder %v4868_v30, 0.0004427343  ;;  %v5192_v25 = vand.u32 2147483647, %v13830_v15  ;;  %vm4302_vm1 = vcmp.gt.f32.partialorder %v16348_v12, 20.0 }
 0x458   :  { %v10549_v45 = vpop.eup %10548  ;;  %v4870_v56 = vsel %vm13908_vm0, %v4867_v36, %v4864_v31  ;;  %v5425_v48 = vrot.slane %v13749_v41, %v16266_v43  ;;  %v5201_v53 = vand.u32 2147483647, %v13859_v22  ;;  %v4876_v17 = vmul.f32 %v13784_v0, %v4875_v28 }
 0x459   :  { %v13912_v46 = vpack.c.bf16 %v5535_v2, %v5499_v59  ;;  %v4873_v11 = vmul.f32 0.6931472, %v10549_v45  ;;  %6223 = vmatpush1.bf16.msra.mxu0 %v13852_v21  ;;  %vm13928_vm7 = vcmp.lt.f32.partialorder %v4877_v4, 0.0004427343  ;;  %v5191_v54 = vmul.f32 %v13830_v15, %v5190_v13 }
 0x45a   :  { %5887 = vrot.lane.b32.xlu0 %v13687_v40, %s10893_s29  ;;  %5670 = vrot.lane.b32.xlu1 %v13687_v40, %s10892_s24  ;;  %v5199_v43 = vadd.f32 1.0, %v5198_v52  ;;  %v5238_v9 = vsel %vm4302_vm1, %v16348_v12, %v4870_v56  ;;  %vm4303_vm8 = vcmp.gt.f32.partialorder %v16351_v16, 20.0  ;;  %vm5193_vm9 = vcmp.lt.f32.partialorder %v5192_v25, 0.0004427343  ;;  %v14047_v25 = vld [vmem:[#allocation2 + $0x190] sm:$0xff] }
 0x45b   :  { %v10551_v10 = vpop.eup %10550  ;;  %5824 = vst [vmem:[#allocation2 + $0x240] sm:$0xff] %v13912_v46  ;;  %v5625_v3 = vpop.permute.xlu0 %5624  ;;  %v4879_v0 = vsel %vm13928_vm7, %v4876_v17, %v4873_v11  ;;  %vm4338_vm14 = vcmp.gt.f32.partialorder %v12925_v58, 20.0  ;;  %vm13954_vm10 = vcmp.lt.f32.partialorder %v5201_v53, 0.0004427343  ;;  %v5500_v60 = vmul.f32 %v5425_v48, %v5238_v9  ;;  %v14042_v11 = vld [vmem:[#allocation2 + $0x178] sm:$0xff] }
 0x45c   :  { %v5842_v61 = vpop.permute.xlu1 %5841  ;;  %v5188_v6 = vmul.f32 0.6931472, %v10551_v10  ;;  %v13936_v40 = vsel %vm25_vm2, %v13766_v33, %v5625_v3  ;;  %9876 = vmatmul.mubr.msk.bf16.vlgmr.msra.gmra.mrb[76].mxu0 %vm1743_vm6, %v13810_v24  ;;  %v5200_v55 = vmul.f32 %v13859_v22, %v5199_v43  ;;  %v5239_v14 = vsel %vm4303_vm8, %v16351_v16, %v4879_v0 }
 0x45d   :  { %v13940_v37 = vsel %vm1511_vm5, %v13730_v18, %v5842_v61  ;;  %5761 = vst [vmem:[#allocation2 + $0x40] sm:$0xff] %v13936_v40  ;;  %6261 = vmatprep.subr.bf16.mxu1 %v13936_v40  ;;  %6336 = vmatprep.mubr.bf16.mxu0 %v13870_v44  ;;  %v5429_v18 = vrot.slane %v13749_v41, %v16267_v39  ;;  %vm4339_vm3 = vcmp.gt.f32.partialorder %v16352_v57, 20.0 }
 0x45e   :  { %5978 = vst [vmem:[#allocation2 + $0x298] sm:$0xff] %v13940_v37  ;;  %v10553_v12 = vpop.eup %10552  ;;  %v5194_v33 = vsel %vm5193_vm9, %v5191_v54, %v5188_v6  ;;  %5668 = vrot.lane.b32.xlu0 %v13652_v20, %s10892_s24  ;;  %5885 = vrot.lane.b32.xlu1 %v13652_v20, %s10893_s29 }
 0x45f   :  { %v5274_v63 = vsel %vm4338_vm14, %v12925_v58, %v5194_v33  ;;  %v5197_v38 = vmul.f32 0.6931472, %v10553_v12  ;;  %v5844_v39 = vpop.permute.xlu0 %5843  ;;  %6262 = vmatpush1.bf16.msra.mxu1 %v13828_v7  ;;  %v5501_v4 = vmul.f32 %v5429_v18, %v5239_v14 }
 0x460   :  { %v5627_v41 = vpop.permute.xlu1 %5626  ;;  %v5536_v30 = vmul.f32 %v5425_v48, %v5274_v63  ;;  %v13971_v42 = vsel %vm1511_vm5, %v5842_v61, %v5844_v39  ;;  %6263 = vmatprep.subr.bf16.mxu1 %v13965_v32 }
 0x461   :  { %v13974_v20 = vsel %vm25_vm2, %v5625_v3, %v5627_v41  ;;  %v5203_v58 = vsel %vm13954_vm10, %v5200_v55, %v5197_v38  ;;  %5979 = vst [vmem:[#allocation2 + $0x2a0] sm:$0xff] %v13971_v42  ;;  %v14100_v38 = vld [vmem:[#allocation2 + $0x198] sm:$0xff]  ;;  %v14104_v55 = vld [vmem:[#allocation2 + $0x1b0] sm:$0xff] }
 0x462   :  { %5762 = vst [vmem:[#allocation2 + $0x48] sm:$0xff] %v13974_v20  ;;  %v5572_v22 = vpack.c.bf16 %v5536_v30, %v5500_v60  ;;  %v5275_v16 = vsel %vm4339_vm3, %v16352_v57, %v5203_v58  ;;  %5672 = vrot.lane.b32.xlu0 %v13770_v62, %s10892_s24  ;;  %5889 = vrot.lane.b32.xlu1 %v13770_v62, %s10893_s29  ;;  %v14116_v58 = vld [vmem:[#allocation2 + $0x1a8] sm:$0xff] }
 0x463   :  { %v5537_v59 = vmul.f32 %v5429_v18, %v5275_v16  ;;  %6264 = vmatpush1.bf16.msra.mxu1 %v13987_v19  ;;  %v5848_v57 = vpop.permute.xlu0 %5847  ;;  %v14088_v18 = vld [vmem:[#allocation2 + $0x1a0] sm:$0xff] }
 0x464   :  { %5825 = vst [vmem:[#allocation2 + $0x248] sm:$0xff] %v5572_v22  ;;  %6265 = vmatprep.subr.bf16.mxu1 %v13971_v42  ;;  %v5631_v62 = vpop.permute.xlu1 %5630 }
 0x465   :  { %v13991_v23 = vpack.c.bf16 %v5537_v59, %v5501_v4 }
 0x466   :  { %5891 = vrot.lane.b32.xlu0 %v13890_v27, %s10893_s29  ;;  %5674 = vrot.lane.b32.xlu1 %v13890_v27, %s10892_s24 }
 0x467   :  { %5826 = vst [vmem:[#allocation2 + $0x250] sm:$0xff] %v13991_v23  ;;  %6266 = vmatpush1.bf16.msra.mxu1 %v13940_v37 }
 0x46a   :  { %5676 = vrot.lane.b32.xlu0 %v13912_v46, %s10892_s24  ;;  %5678 = vrot.lane.b32.xlu1 %v5572_v22, %s10892_s24 }
 0x46b   :  { %9877 = vmatmul.mubr.msk.bf16.vlgmr.msra.gmra.mrb[76].mxu1 %vm1743_vm6, %v13810_v24 }
 0x46c   :  { %6379 = vmatprep.mubr.bf16.mxu1 %v13870_v44 }
 0x46e   :  { %5680 = vrot.lane.b32.xlu0 %v13991_v23, %s10892_s24  ;;  %5893 = vrot.lane.b32.xlu1 %v13912_v46, %s10893_s29 }
 0x472   :  { %5895 = vrot.lane.b32.xlu0 %v5572_v22, %s10893_s29  ;;  %5897 = vrot.lane.b32.xlu1 %v13991_v23, %s10893_s29 }
 0x47f   :  { %v5629_v27 = vpop.permute.xlu0 %5628  ;;  %v5846_v31 = vpop.permute.xlu1 %5845 }
 0x480   :  { %v14013_v36 = vsel %vm25_vm2, %v5627_v41, %v5629_v27  ;;  %v14016_v2 = vsel %vm25_vm2, %v5629_v27, %v5631_v62  ;;  %v14019_v28 = vsel %vm1511_vm5, %v5844_v39, %v5846_v31  ;;  %v14022_v13 = vsel %vm1511_vm5, %v5846_v31, %v5848_v57 }
 0x481   :  { %5763 = vst [vmem:[#allocation2 + $0x50] sm:$0xff] %v14013_v36  ;;  %5764 = vst [vmem:[#allocation2 + $0x58] sm:$0xff] %v14016_v2  ;;  %6304 = vmatprep.subr.bf16.mxu0 %v14013_v36 }
 0x482   :  { %5980 = vst [vmem:[#allocation2 + $0x2a8] sm:$0xff] %v14019_v28  ;;  %5981 = vst [vmem:[#allocation2 + $0x2b0] sm:$0xff] %v14022_v13  ;;  %6305 = vmatpush1.bf16.msra.mxu0 %v13974_v20 }
 0x483   :  { %v5633_v52 = vpop.permute.xlu0 %5632  ;;  %v5850_v45 = vpop.permute.xlu1 %5849  ;;  %6306 = vmatprep.subr.bf16.mxu0 %v14030_v35 }
 0x484   :  { %v14034_v46 = vsel %vm25_vm2, %v5631_v62, %v5633_v52  ;;  %v14037_v56 = vsel %vm1511_vm5, %v5848_v57, %v5850_v45 }
 0x485   :  { %5765 = vst [vmem:[#allocation2 + $0x60] sm:$0xff] %v14034_v46  ;;  %5982 = vst [vmem:[#allocation2 + $0x2b8] sm:$0xff] %v14037_v56  ;;  %6347 = vmatprep.subr.bf16.mxu1 %v14034_v46 }
 0x486   :  { %6307 = vmatpush1.bf16.msra.mxu0 %v14042_v11  ;;  %6348 = vmatpush1.bf16.msra.mxu1 %v14016_v2 }
 0x487   :  { %6308 = vmatprep.subr.bf16.mxu0 %v14022_v13  ;;  %6349 = vmatprep.subr.bf16.mxu1 %v14047_v25  ;;  %v5852_v48 = vpop.permute.xlu0 %5851  ;;  %v5635_v53 = vpop.permute.xlu1 %5634 }
 0x488   :  { %v14051_v10 = vsel %vm1511_vm5, %v5850_v45, %v5852_v48  ;;  %v14054_v17 = vsel %vm25_vm2, %v5633_v52, %v5635_v53  ;;  %v14145_v52 = vld [vmem:[#allocation2 + $0x1c0] sm:$0xff] }
 0x489   :  { %5983 = vst [vmem:[#allocation2 + $0x2c0] sm:$0xff] %v14051_v10  ;;  %5766 = vst [vmem:[#allocation2 + $0x68] sm:$0xff] %v14054_v17 }
 0x48a   :  { %6309 = vmatpush1.bf16.msra.mxu0 %v14019_v28  ;;  %6350 = vmatpush1.bf16.msra.mxu1 %v14056_v50  ;;  %16369 = vst [vmem:[#allocation11_spill] sm:$0xff] %v14145_v52 }
 0x48b   :  { %6351 = vmatprep.subr.bf16.mxu1 %v14051_v10  ;;  %v5856_v54 = vpop.permute.xlu0 %5855  ;;  %v5639_v43 = vpop.permute.xlu1 %5638 }
 0x48d   :  { %9878 = vmatmul.mubr.msk.bf16.vlgmr.msra.gmra.mrb[80].mxu0 %vm1743_vm6, %v13810_v24 }
 0x48e   :  { %6352 = vmatpush1.bf16.msra.mxu1 %v14037_v56  ;;  %6422 = vmatprep.mubr.bf16.mxu0 %v13870_v44 }
 0x48f   :  { %v5637_v3 = vpop.permute.xlu0 %5636  ;;  %v5854_v61 = vpop.permute.xlu1 %5853 }
 0x490   :  { %v14068_v9 = vsel %vm25_vm2, %v5635_v53, %v5637_v3  ;;  %v14071_v6 = vsel %vm25_vm2, %v5637_v3, %v5639_v43  ;;  %v14074_v0 = vsel %vm1511_vm5, %v5852_v48, %v5854_v61  ;;  %v14077_v12 = vsel %vm1511_vm5, %v5854_v61, %v5856_v54  ;;  %v14162_v3 = vld [vmem:[#allocation2 + $0x1d0] sm:$0xff] }
 0x491   :  { %9879 = vmatmul.mubr.msk.bf16.vlgmr.msra.gmra.mrb[80].mxu1 %vm1743_vm6, %v13810_v24  ;;  %5767 = vst [vmem:[#allocation2 + $0x70] sm:$0xff] %v14068_v9  ;;  %5768 = vst [vmem:[#allocation2 + $0x78] sm:$0xff] %v14071_v6  ;;  %6390 = vmatprep.subr.bf16.mxu0 %v14068_v9 }
 0x492   :  { %5984 = vst [vmem:[#allocation2 + $0x2c8] sm:$0xff] %v14074_v0  ;;  %5985 = vst [vmem:[#allocation2 + $0x2d0] sm:$0xff] %v14077_v12  ;;  %6465 = vmatprep.mubr.bf16.mxu1 %v13870_v44  ;;  %6391 = vmatpush1.bf16.msra.mxu0 %v14054_v17 }
 0x493   :  { %v5641_v33 = vpop.permute.xlu0 %5640  ;;  %v5858_v15 = vpop.permute.xlu1 %5857  ;;  %6392 = vmatprep.subr.bf16.mxu0 %v14088_v18  ;;  %16372 = vst [vmem:[#allocation5_spill] sm:$0xff] %v14162_v3 }
 0x494   :  { %v14092_v60 = vsel %vm25_vm2, %v5639_v43, %v5641_v33  ;;  %v14095_v63 = vsel %vm1511_vm5, %v5856_v54, %v5858_v15  ;;  %v14158_v43 = vld [vmem:[#allocation2 + $0x1b8] sm:$0xff] }
 0x495   :  { %5769 = vst [vmem:[#allocation2 + $0x80] sm:$0xff] %v14092_v60  ;;  %5986 = vst [vmem:[#allocation2 + $0x2d8] sm:$0xff] %v14095_v63  ;;  %6433 = vmatprep.subr.bf16.mxu1 %v14092_v60 }
 0x496   :  { %6393 = vmatpush1.bf16.msra.mxu0 %v14100_v38  ;;  %6434 = vmatpush1.bf16.msra.mxu1 %v14071_v6 }
 0x497   :  { %v5860_v39 = vpop.permute.xlu0 %5859  ;;  %v5643_v41 = vpop.permute.xlu1 %5642  ;;  %6394 = vmatprep.subr.bf16.mxu0 %v14077_v12  ;;  %6435 = vmatprep.subr.bf16.mxu1 %v14104_v55 }
 0x498   :  { %v14109_v14 = vsel %vm1511_vm5, %v5858_v15, %v5860_v39  ;;  %v14112_v30 = vsel %vm25_vm2, %v5641_v33, %v5643_v41 }
 0x499   :  { %5987 = vst [vmem:[#allocation2 + $0x2e0] sm:$0xff] %v14109_v14  ;;  %5770 = vst [vmem:[#allocation2 + $0x88] sm:$0xff] %v14112_v30 }
 0x49a   :  { %6395 = vmatpush1.bf16.msra.mxu0 %v14074_v0  ;;  %6436 = vmatpush1.bf16.msra.mxu1 %v14116_v58 }
 0x49b   :  { %v5864_v22 = vpop.permute.xlu0 %5863  ;;  %v5647_v16 = vpop.permute.xlu1 %5646  ;;  %6437 = vmatprep.subr.bf16.mxu1 %v14109_v14 }
 0x49d   :  { %9880 = vmatmul.mubr.msk.bf16.vlgmr.msra.gmra.mrb[84].mxu0 %vm1743_vm6, %v13810_v24 }
 0x49e   :  { %6438 = vmatpush1.bf16.msra.mxu1 %v14095_v63  ;;  %6508 = vmatprep.mubr.bf16.mxu0 %v13870_v44 }
 0x49f   :  { %v5645_v4 = vpop.permute.xlu0 %5644  ;;  %v5862_v59 = vpop.permute.xlu1 %5861 }
 0x4a0   :  { %v14126_v57 = vsel %vm25_vm2, %v5643_v41, %v5645_v4  ;;  %v14129_v62 = vsel %vm25_vm2, %v5645_v4, %v5647_v16  ;;  %v14132_v27 = vsel %vm1511_vm5, %v5860_v39, %v5862_v59  ;;  %v14135_v31 = vsel %vm1511_vm5, %v5862_v59, %v5864_v22  ;;  %v14173_v41 = vld [vmem:[#allocation2 + $0x1c8] sm:$0xff] }
 0x4a1   :  { %16368 = vst [vmem:[#allocation23_spill] sm:$0xff] %v14135_v31  ;;  %5771 = vst [vmem:[#allocation2 + $0x90] sm:$0xff] %v14126_v57  ;;  %6476 = vmatprep.subr.bf16.mxu0 %v14126_v57  ;;  %9881 = vmatmul.mubr.msk.bf16.vlgmr.msra.gmra.mrb[84].mxu1 %vm1743_vm6, %v13810_v24 }
 0x4a2   :  { %5772 = vst [vmem:[#allocation2 + $0x98] sm:$0xff] %v14129_v62  ;;  %5988 = vst [vmem:[#allocation2 + $0x2e8] sm:$0xff] %v14132_v27  ;;  %6477 = vmatpush1.bf16.msra.mxu0 %v14112_v30  ;;  %6551 = vmatprep.mubr.bf16.mxu1 %v13870_v44 }
 0x4a3   :  { %5989 = vst [vmem:[#allocation2 + $0x2f0] sm:$0xff] %v14135_v31  ;;  %v5649_v45 = vpop.permute.xlu0 %5648  ;;  %v5866_v48 = vpop.permute.xlu1 %5865  ;;  %6478 = vmatprep.subr.bf16.mxu0 %v14145_v52 }
 0x4a4   :  { %v14150_v53 = vsel %vm25_vm2, %v5647_v16, %v5649_v45  ;;  %v14153_v54 = vsel %vm1511_vm5, %v5864_v22, %v5866_v48 }
 0x4a5   :  { %16370 = vst [vmem:[#allocation14_spill] sm:$0xff] %v14150_v53  ;;  %16371 = vst [vmem:[#allocation33_spill] sm:$0xff] %v14153_v54  ;;  %6519 = vmatprep.subr.bf16.mxu1 %v14150_v53 }
 0x4a6   :  { %5773 = vst [vmem:[#allocation2 + $0xa0] sm:$0xff] %v14150_v53  ;;  %5990 = vst [vmem:[#allocation2 + $0x2f8] sm:$0xff] %v14153_v54  ;;  %6479 = vmatpush1.bf16.msra.mxu0 %v14158_v43  ;;  %6520 = vmatpush1.bf16.msra.mxu1 %v14129_v62  ;;  %v14214_v53 = vld [vmem:[#allocation2 + $0x1f0] sm:$0xff] }
 0x4a7   :  { %v5868_v61 = vpop.permute.xlu0 %5867  ;;  %v5651_v33 = vpop.permute.xlu1 %5650  ;;  %6480 = vmatprep.subr.bf16.mxu0 %v14135_v31  ;;  %6521 = vmatprep.subr.bf16.mxu1 %v14162_v3  ;;  %16382 = vst [vmem:[#allocation38_spill] sm:$0xff] %v14214_v53 }
 0x4a8   :  { %v14167_v15 = vsel %vm1511_vm5, %v5866_v48, %v5868_v61  ;;  %v14170_v39 = vsel %vm25_vm2, %v5649_v45, %v5651_v33 }
 0x4a9   :  { %16373 = vst [vmem:[#allocation13_spill] sm:$0xff] %v14167_v15  ;;  %5991 = vst [vmem:[#allocation2 + $0x300] sm:$0xff] %v14167_v15 }
 0x4aa   :  { %6481 = vmatpush1.bf16.msra.mxu0 %v14132_v27  ;;  %6522 = vmatpush1.bf16.msra.mxu1 %v14173_v41 }
 0x4ab   :  { %v5872_v22 = vpop.permute.xlu0 %5871  ;;  %v5655_v16 = vpop.permute.xlu1 %5654  ;;  %6523 = vmatprep.subr.bf16.mxu1 %v14167_v15 }
 0x4ad   :  { %9882 = vmatmul.mubr.msk.bf16.vlgmr.msra.gmra.mrb[88].mxu0 %vm1743_vm6, %v13810_v24 }
 0x4ae   :  { %6524 = vmatpush1.bf16.msra.mxu1 %v14153_v54  ;;  %6594 = vmatprep.mubr.bf16.mxu0 %v13870_v44 }
 0x4af   :  { %v5653_v4 = vpop.permute.xlu0 %5652  ;;  %v5870_v59 = vpop.permute.xlu1 %5869 }
 0x4b0   :  { %v14183_v45 = vsel %vm25_vm2, %v5651_v33, %v5653_v4  ;;  %v14186_v48 = vsel %vm25_vm2, %v5653_v4, %v5655_v16  ;;  %v14189_v3 = vsel %vm1511_vm5, %v5868_v61, %v5870_v59  ;;  %v14192_v15 = vsel %vm1511_vm5, %v5870_v59, %v5872_v22  ;;  %v14199_v33 = vld [vmem:[#allocation2 + $0x1e0] sm:$0xff] }
 0x4b1   :  { %16374 = vst [vmem:[#allocation32_spill] sm:$0xff] %v14183_v45  ;;  %16375 = vst [vmem:[#allocation34_spill] sm:$0xff] %v14186_v48  ;;  %6562 = vmatprep.subr.bf16.mxu0 %v14183_v45  ;;  %9883 = vmatmul.mubr.msk.bf16.vlgmr.msra.gmra.mrb[88].mxu1 %vm1743_vm6, %v13810_v24  ;;  %v14210_v45 = vld [vmem:[#allocation2 + $0x1d8] sm:$0xff] }
 0x4b2   :  { %16376 = vst [vmem:[#allocation35_spill] sm:$0xff] %v14189_v3  ;;  %16377 = vst [vmem:[#allocation36_spill] sm:$0xff] %v14192_v15  ;;  %6563 = vmatpush1.bf16.msra.mxu0 %v14170_v39  ;;  %6637 = vmatprep.mubr.bf16.mxu1 %v13870_v44 }
 0x4b3   :  { %5993 = vst [vmem:[#allocation2 + $0x310] sm:$0xff] %v14192_v15  ;;  %16378 = vst [vmem:[#allocation37_spill] sm:$0xff] %v14199_v33  ;;  %v5657_v4 = vpop.permute.xlu0 %5656  ;;  %v5874_v31 = vpop.permute.xlu1 %5873  ;;  %6564 = vmatprep.subr.bf16.mxu0 %v14199_v33 }
 0x4b4   :  { %v14204_v61 = vsel %vm25_vm2, %v5655_v16, %v5657_v4  ;;  %v14207_v59 = vsel %vm1511_vm5, %v5872_v22, %v5874_v31  ;;  %16381 = vst [vmem:[#allocation41_spill] sm:$0xff] %v14210_v45 }
 0x4b5   :  { %16379 = vst [vmem:[#allocation8_spill] sm:$0xff] %v14204_v61  ;;  %16380 = vst [vmem:[#allocation9_spill] sm:$0xff] %v14207_v59  ;;  %6605 = vmatprep.subr.bf16.mxu1 %v14204_v61  ;;  %v14224_v61 = vld [vmem:[#allocation2 + $0x1e8] sm:$0xff] }
 0x4b6   :  { %6565 = vmatpush1.bf16.msra.mxu0 %v14210_v45  ;;  %6606 = vmatpush1.bf16.msra.mxu1 %v14186_v48  ;;  %16385 = vst [vmem:[#allocation42_spill] sm:$0xff] %v14224_v61 }
 0x4b7   :  { %v5876_v54 = vpop.permute.xlu0 %5875  ;;  %v5659_v52 = vpop.permute.xlu1 %5658  ;;  %6566 = vmatprep.subr.bf16.mxu0 %v14192_v15  ;;  %6607 = vmatprep.subr.bf16.mxu1 %v14214_v53 }
 0x4b8   :  { %v14219_v16 = vsel %vm1511_vm5, %v5874_v31, %v5876_v54  ;;  %v14222_v22 = vsel %vm25_vm2, %v5657_v4, %v5659_v52 }
 0x4b9   :  { %16383 = vst [vmem:[#allocation39_spill] sm:$0xff] %v14219_v16  ;;  %16384 = vst [vmem:[#allocation40_spill] sm:$0xff] %v14222_v22 }
 0x4ba   :  { %6567 = vmatpush1.bf16.msra.mxu0 %v14189_v3  ;;  %6608 = vmatpush1.bf16.msra.mxu1 %v14224_v61 }
 0x4bb   :  { %v5880_v33 = vpop.permute.xlu0 %5879  ;;  %6609 = vmatprep.subr.bf16.mxu1 %v14219_v16 }
 0x4bc   :  { %v5663_v48 = vpop.permute.xlu1 %5662 }
 0x4bd   :  { %9884 = vmatmul.mubr.msk.bf16.vlgmr.msra.gmra.mrb[92].mxu0 %vm1743_vm6, %v13810_v24 }
 0x4be   :  { %6610 = vmatpush1.bf16.msra.mxu1 %v14207_v59  ;;  %6680 = vmatprep.mubr.bf16.mxu0 %v13870_v44  ;;  %v14249_v59 = vld [vmem:[#allocation2 + $0x200] sm:$0xff] }
 0x4bf   :  { %v5661_v31 = vpop.permute.xlu0 %5660  ;;  %16390 = vst [vmem:[#allocation17_spill] sm:$0xff] %v14249_v59 }
 0x4c0   :  { %v5878_v4 = vpop.permute.xlu1 %5877  ;;  %v14234_v53 = vsel %vm25_vm2, %v5659_v52, %v5661_v31  ;;  %v14237_v15 = vsel %vm25_vm2, %v5661_v31, %v5663_v48 }
 0x4c1   :  { %16386 = vst [vmem:[#allocation20_spill] sm:$0xff] %v14234_v53  ;;  %16387 = vst [vmem:[#allocation22_spill] sm:$0xff] %v14237_v15  ;;  %v14240_v61 = vsel %vm1511_vm5, %v5876_v54, %v5878_v4  ;;  %v14243_v16 = vsel %vm1511_vm5, %v5878_v4, %v5880_v33  ;;  %6648 = vmatprep.subr.bf16.mxu0 %v14234_v53  ;;  %9885 = vmatmul.mubr.msk.bf16.vlgmr.msra.gmra.mrb[92].mxu1 %vm1743_vm6, %v13810_v24  ;;  %v14260_v53 = vld [vmem:[#allocation2 + $0x1f8] sm:$0xff] }
 0x4c2   :  { %16388 = vst [vmem:[#allocation6_spill] sm:$0xff] %v14240_v61  ;;  %16389 = vst [vmem:[#allocation12_spill] sm:$0xff] %v14243_v16  ;;  %6649 = vmatpush1.bf16.msra.mxu0 %v14222_v22  ;;  %6723 = vmatprep.mubr.bf16.mxu1 %v13870_v44  ;;  %v14264_v22 = vld [vmem:[#allocation2 + $0x210] sm:$0xff] }
 0x4c3   :  { %6650 = vmatprep.subr.bf16.mxu0 %v14249_v59  ;;  %16393 = vst [vmem:[#allocation25_spill] sm:$0xff] %v14260_v53  ;;  %16394 = vst [vmem:[#allocation26_spill] sm:$0xff] %v14264_v22 }
 0x4c4   :  { %v5665_v52 = vpop.permute.xlu0 %5664  ;;  %v5882_v31 = vpop.permute.xlu1 %5881 }
 0x4c5   :  { %v14254_v54 = vsel %vm25_vm2, %v5663_v48, %v5665_v52  ;;  %v14257_v4 = vsel %vm1511_vm5, %v5880_v33, %v5882_v31 }
 0x4c6   :  { %16391 = vst [vmem:[#allocation4_spill] sm:$0xff] %v14254_v54  ;;  %16392 = vst [vmem:[#allocation24_spill] sm:$0xff] %v14257_v4  ;;  %6691 = vmatprep.subr.bf16.mxu1 %v14254_v54  ;;  %6651 = vmatpush1.bf16.msra.mxu0 %v14260_v53  ;;  %v14274_v54 = vld [vmem:[#allocation2 + $0x208] sm:$0xff] }
 0x4c7   :  { %6692 = vmatpush1.bf16.msra.mxu1 %v14237_v15  ;;  %6652 = vmatprep.subr.bf16.mxu0 %v14243_v16  ;;  %16397 = vst [vmem:[#allocation27_spill] sm:$0xff] %v14274_v54 }
 0x4c8   :  { %v5884_v3 = vpop.permute.xlu0 %5883  ;;  %v5667_v45 = vpop.permute.xlu1 %5666  ;;  %6693 = vmatprep.subr.bf16.mxu1 %v14264_v22 }
 0x4c9   :  { %v14269_v48 = vsel %vm1511_vm5, %v5882_v31, %v5884_v3  ;;  %v14272_v33 = vsel %vm25_vm2, %v5665_v52, %v5667_v45 }
 0x4ca   :  { %16395 = vst [vmem:[#allocation15_spill] sm:$0xff] %v14269_v48  ;;  %16396 = vst [vmem:[#allocation10_spill] sm:$0xff] %v14272_v33  ;;  %6653 = vmatpush1.bf16.msra.mxu0 %v14240_v61 }
 0x4cb   :  { %6694 = vmatpush1.bf16.msra.mxu1 %v14274_v54 }
 0x4cc   :  { %v5888_v59 = vpop.permute.xlu0 %5887  ;;  %v5671_v15 = vpop.permute.xlu1 %5670  ;;  %6695 = vmatprep.subr.bf16.mxu1 %v14269_v48 }
 0x4cd   :  { %9886 = vmatmul.mubr.msk.bf16.vlgmr.msra.gmra.mrb[96].mxu0 %vm1743_vm6, %v13810_v24 }
 0x4ce   :  { %6766 = vmatprep.mubr.bf16.mxu0 %v13870_v44 }
 0x4cf   :  { %6696 = vmatpush1.bf16.msra.mxu1 %v14257_v4  ;;  %v14299_v4 = vld [vmem:[#allocation2 + $0x220] sm:$0xff] }
 0x4d0   :  { %v5669_v31 = vpop.permute.xlu0 %5668  ;;  %v5886_v52 = vpop.permute.xlu1 %5885  ;;  %16401 = vst [vmem:[#allocation43_spill] sm:$0xff] %v14299_v4 }
 0x4d1   :  { %v14284_v22 = vsel %vm25_vm2, %v5667_v45, %v5669_v31  ;;  %v14287_v16 = vsel %vm25_vm2, %v5669_v31, %v5671_v15  ;;  %v14290_v54 = vsel %vm1511_vm5, %v5884_v3, %v5886_v52  ;;  %v14293_v48 = vsel %vm1511_vm5, %v5886_v52, %v5888_v59 }
 0x4d2   :  { %16398 = vst [vmem:[#allocation28_spill] sm:$0xff] %v14284_v22  ;;  %16399 = vst [vmem:[#allocation16_spill] sm:$0xff] %v14287_v16  ;;  %6734 = vmatprep.subr.bf16.mxu0 %v14284_v22  ;;  %9887 = vmatmul.mubr.msk.bf16.vlgmr.msra.gmra.mrb[96].mxu1 %vm1743_vm6, %v13810_v24  ;;  %v14310_v22 = vld [vmem:[#allocation2 + $0x218] sm:$0xff] }
 0x4d3   :  { %16400 = vst [vmem:[#allocation19_spill] sm:$0xff] %v14293_v48  ;;  %6735 = vmatpush1.bf16.msra.mxu0 %v14272_v33  ;;  %6809 = vmatprep.mubr.bf16.mxu1 %v13870_v44  ;;  %v14314_v33 = vld [vmem:[#allocation2 + $0x230] sm:$0xff] }
 0x4d4   :  { %v5673_v45 = vpop.permute.xlu0 %5672  ;;  %v5890_v31 = vpop.permute.xlu1 %5889  ;;  %6736 = vmatprep.subr.bf16.mxu0 %v14299_v4  ;;  %16403 = vst [vmem:[#allocation45_spill] sm:$0xff] %v14314_v33 }
 0x4d5   :  { %v14304_v3 = vsel %vm25_vm2, %v5671_v15, %v5673_v45  ;;  %v14307_v52 = vsel %vm1511_vm5, %v5888_v59, %v5890_v31 }
 0x4d6   :  { %16402 = vst [vmem:[#allocation44_spill] sm:$0xff] %v14304_v3  ;;  %6777 = vmatprep.subr.bf16.mxu1 %v14304_v3  ;;  %v14324_v3 = vld [vmem:[#allocation2 + $0x228] sm:$0xff] }
 0x4d7   :  { %6737 = vmatpush1.bf16.msra.mxu0 %v14310_v22  ;;  %6778 = vmatpush1.bf16.msra.mxu1 %v14287_v16  ;;  %16405 = vst [vmem:[#allocation29_spill] sm:$0xff] %v14324_v3 }
 0x4d8   :  { %v5892_v61 = vpop.permute.xlu0 %5891  ;;  %v5675_v53 = vpop.permute.xlu1 %5674  ;;  %6738 = vmatprep.subr.bf16.mxu0 %v14293_v48  ;;  %6779 = vmatprep.subr.bf16.mxu1 %v14314_v33 }
 0x4d9   :  { %v14319_v15 = vsel %vm1511_vm5, %v5890_v31, %v5892_v61  ;;  %v14322_v59 = vsel %vm25_vm2, %v5673_v45, %v5675_v53  ;;  %v14340_v45 = vld [vmem:[#allocation2 + $0x240] sm:$0xff] }
 0x4da   :  { %16404 = vst [vmem:[#allocation18_spill] sm:$0xff] %v14319_v15  ;;  %16407 = vst [vmem:[#allocation31_spill] sm:$0xff] %v14340_v45 }
 0x4db   :  { %6739 = vmatpush1.bf16.msra.mxu0 %v14290_v54  ;;  %6780 = vmatpush1.bf16.msra.mxu1 %v14324_v3 }
 0x4dc   :  { %v5677_v4 = vpop.permute.xlu0 %5676  ;;  %v5679_v16 = vpop.permute.xlu1 %5678  ;;  %6781 = vmatprep.subr.bf16.mxu1 %v14319_v15  ;;  %v14354_v15 = vld [vmem:[#allocation2 + $0x238] sm:$0xff] }
 0x4dd   :  { %v14330_v48 = vsel %vm25_vm2, %v5675_v53, %v5677_v4  ;;  %v14333_v33 = vsel %vm25_vm2, %v5677_v4, %v5679_v16 }
 0x4de   :  { %16406 = vst [vmem:[#allocation30_spill] sm:$0xff] %v14330_v48  ;;  %6820 = vmatprep.subr.bf16.mxu0 %v14330_v48  ;;  %9888 = vmatmul.mubr.msk.bf16.vlgmr.msra.gmra.mrb[100].mxu0 %vm1743_vm6, %v13810_v24 }
 0x4df   :  { %6782 = vmatpush1.bf16.msra.mxu1 %v14307_v52  ;;  %6821 = vmatpush1.bf16.msra.mxu0 %v14322_v59 }
 0x4e0   :  { %v5681_v31 = vpop.permute.xlu0 %5680  ;;  %v5894_v3 = vpop.permute.xlu1 %5893  ;;  %6822 = vmatprep.subr.bf16.mxu0 %v14340_v45  ;;  %6852 = vmatprep.mubr.bf16.mxu0 %v13870_v44 }
 0x4e1   :  { %v14345_v53 = vsel %vm25_vm2, %v5679_v16, %v5681_v31  ;;  %5790 = vst.msk [vmem:[#allocation2 + $0x128] sm:$0xff] %vm25_vm2, %v5681_v31  ;;  %v14349_v4 = vsel %vm1511_vm5, %v5892_v61, %v5894_v3  ;;  %v14368_v31 = vld [vmem:[#allocation2 + $0x248] sm:$0xff] }
 0x4e2   :  { %16408 = vst [vmem:[#allocation21_spill] sm:$0xff] %v14345_v53  ;;  %6863 = vmatprep.subr.bf16.mxu1 %v14345_v53  ;;  %9889 = vmatmul.mubr.msk.bf16.vlgmr.msra.gmra.mrb[100].mxu1 %vm1743_vm6, %v13810_v24  ;;  %v10882_v53 = vld [vmem:[#allocation2 + $0x8] sm:$0xff] }
 0x4e3   :  { %6823 = vmatpush1.bf16.msra.mxu0 %v14354_v15  ;;  %6864 = vmatpush1.bf16.msra.mxu1 %v14333_v33 }
 0x4e4   :  { %v5896_v45 = vpop.permute.xlu0 %5895  ;;  %v5898_v48 = vpop.permute.xlu1 %5897  ;;  %6865 = vmatprep.subr.bf16.mxu1 %v13991_v23  ;;  %6895 = vmatprep.mubr.bf16.mxu1 %v13870_v44 }
 0x4e5   :  { %v14361_v61 = vsel %vm1511_vm5, %v5894_v3, %v5896_v45  ;;  %v14364_v16 = vsel %vm1511_vm5, %v5896_v45, %v5898_v48  ;;  %6007 = vst.msk [vmem:[#allocation2 + $0x380] sm:$0xff] %vm1511_vm5, %v5898_v48  ;;  %v10883_v48 = vld [vmem:[#allocation2 + $0x18] sm:$0xff]  ;;  %v10884_v3 = vld [vmem:[#allocation2 + $0x268] sm:$0xff]  ;;  %v10885_v45 = vld [vmem:[#allocation2 + $0x10] sm:$0xff] }
 0x4e6   :  { %6824 = vmatprep.subr.bf16.mxu0 %v14361_v61 }
 0x4e7   :  { %6825 = vmatpush1.bf16.msra.mxu0 %v14349_v4  ;;  %6866 = vmatpush1.bf16.msra.mxu1 %v14368_v31 }
 0x4e8   :  { %6914 = vmatprep.subr.bf16.mxu0 %v10882_v53  ;;  %v6082_v53 = vld [vmem:[#allocation2 + $0x260] sm:$0xff] }
 0x4ea   :  { %9890 = vmatmul.mubr.msk.bf16.vlgmr.msra.gmra.mrb[104].mxu0 %vm1743_vm6, %v13810_v24 }
 0x4eb   :  { %6915 = vmatpush1.bf16.msra.mxu0 %v13870_v44  ;;  %6946 = vmatprep.mubr.bf16.mxu0 %v13870_v44 }
 0x4ec   :  { %v14376_v23 = vld [vmem:[#allocation2 + $0x380] sm:$0xff]  ;;  %6916 = vmatprep.subr.bf16.mxu0 %v13764_v5 }
 0x4ed   :  { %6867 = vmatprep.subr.bf16.mxu1 %v14376_v23  ;;  %v14387_v5 = vld [vmem:[%s15905_s5] sm:$0xff]  }
 0x4ee   :  { %6868 = vmatpush1.bf16.msra.mxu1 %v14364_v16 }
 0x4ef   :  { %6957 = vmatprep.subr.bf16.mxu1 %v10883_v48  ;;  %6917 = vmatpush1.bf16.msra.mxu0 %v13870_v44  ;;  %v10886_v48 = vld [vmem:[#allocation2 + $0x140] sm:$0xff] }
 0x4f0   :  { %6918 = vmatprep.subr.bf16.mxu0 %v10884_v3  ;;  %v10888_v3 = vld [vmem:[#allocation2 + $0x270] sm:$0xff] }
 0x4f1   :  { %9891 = vmatmul.mubr.msk.bf16.vlgmr.msra.gmra.mrb[104].mxu1 %vm1743_vm6, %v13810_v24  ;;  %v10887_v24 = vld [vmem:[#allocation2 + $0x20] sm:$0xff] }
 0x4f2   :  { %6958 = vmatpush1.bf16.msra.mxu1 %v10885_v45  ;;  %6989 = vmatprep.mubr.bf16.mxu1 %v13870_v44  ;;  %v16448_v45 = vld [vmem:[#allocation31_spill] sm:$0xff] }
 0x4f3   :  { %6959 = vmatprep.subr.bf16.mxu1 %v13798_v29  ;;  %6919 = vmatpush1.bf16.msra.mxu0 %v6082_v53  ;;  %v16411_v29 = vld [vmem:[#allocation14_spill] sm:$0xff]  ;;  %v7691_v53 = vld [vmem:[#allocation2 + $0x10] sm:$0xff] }
 0x4f4   :  { %7000 = vmatprep.subr.bf16.mxu0 %v13796_v34  ;;  %v16410_v34 = vld [vmem:[#allocation33_spill] sm:$0xff] }
 0x4f6   :  { %6960 = vmatpush1.bf16.msra.mxu1 %v10886_v48  ;;  %9893 = vmatmul.mubr.msk.bf16.vlgmr.msra.gmra.mrb[72].mxu0 %vm1743_vm6, %v14387_v5  ;;  %v7728_v48 = vld [vmem:[#allocation2 + $0x148] sm:$0xff] }
 0x4f7   :  { %6961 = vmatprep.subr.bf16.mxu1 %v13760_v26  ;;  %7001 = vmatpush1.bf16.msra.mxu0 %v10887_v24  ;;  %v10889_v26 = vld [vmem:[#allocation2 + $0x280] sm:$0xff]  ;;  %v7694_v24 = vld [vmem:[#allocation2 + $0x28] sm:$0xff] }
 0x4f8   :  { %7002 = vmatprep.subr.bf16.mxu0 %v13893_v51  ;;  %7032 = vmatprep.mubr.bf16.mxu0 %v13870_v44  ;;  %v16417_v51 = vld [vmem:[#allocation32_spill] sm:$0xff] }
 0x4fa   :  { %6962 = vmatpush1.bf16.msra.mxu1 %v10888_v3  ;;  %v7727_v3 = vld [vmem:[#allocation2 + $0x140] sm:$0xff] }
 0x4fb   :  { %7043 = vmatprep.subr.bf16.mxu1 %v13828_v7  ;;  %7003 = vmatpush1.bf16.msra.mxu0 %v13775_v47  ;;  %v16409_v47 = vld [vmem:[#allocation11_spill] sm:$0xff] }
 0x4fc   :  { %7004 = vmatprep.subr.bf16.mxu0 %v13852_v21  ;;  %v16413_v7 = vld [vmem:[#allocation23_spill] sm:$0xff]  ;;  %v16414_v21 = vld [vmem:[#allocation34_spill] sm:$0xff] }
 0x4fd   :  { %9894 = vmatmul.mubr.msk.bf16.vlgmr.msra.gmra.mrb[72].mxu1 %vm1743_vm6, %v14387_v5 }
 0x4fe   :  { %7044 = vmatpush1.bf16.msra.mxu1 %v13824_v1  ;;  %7075 = vmatprep.mubr.bf16.mxu1 %v13870_v44  ;;  %v16412_v1 = vld [vmem:[#allocation41_spill] sm:$0xff] }
 0x4ff   :  { %7045 = vmatprep.subr.bf16.mxu1 %v13987_v19  ;;  %7005 = vmatpush1.bf16.msra.mxu0 %v10889_v26  ;;  %v16423_v19 = vld [vmem:[#allocation8_spill] sm:$0xff] }
 0x500   :  { %7086 = vmatprep.subr.bf16.mxu0 %v13974_v20  ;;  %v16422_v20 = vld [vmem:[#allocation9_spill] sm:$0xff]  ;;  %v7764_v26 = vld [vmem:[#allocation2 + $0x278] sm:$0xff] }
 0x502   :  { %7046 = vmatpush1.bf16.msra.mxu1 %v13880_v49  ;;  %9895 = vmatmul.mubr.msk.bf16.vlgmr.msra.gmra.mrb[76].mxu0 %vm1743_vm6, %v14387_v5  ;;  %v16416_v49 = vld [vmem:[#allocation35_spill] sm:$0xff] }
 0x503   :  { %7047 = vmatprep.subr.bf16.mxu1 %v13940_v37  ;;  %7087 = vmatpush1.bf16.msra.mxu0 %v13936_v40  ;;  %v16418_v40 = vld [vmem:[#allocation42_spill] sm:$0xff]  ;;  %v16419_v37 = vld [vmem:[#allocation13_spill] sm:$0xff] }
 0x504   :  { %7088 = vmatprep.subr.bf16.mxu0 %v14042_v11  ;;  %7118 = vmatprep.mubr.bf16.mxu0 %v13870_v44  ;;  %v16431_v11 = vld [vmem:[#allocation39_spill] sm:$0xff] }
 0x506   :  { %7048 = vmatpush1.bf16.msra.mxu1 %v13856_v8  ;;  %v16415_v8 = vld [vmem:[#allocation5_spill] sm:$0xff] }
 0x507   :  { %7129 = vmatprep.subr.bf16.mxu1 %v14016_v2  ;;  %7089 = vmatpush1.bf16.msra.mxu0 %v13965_v32  ;;  %v16420_v32 = vld [vmem:[#allocation40_spill] sm:$0xff]  ;;  %v14484_v2 = vld [vmem:[#allocation2] sm:$0xff] }
 0x508   :  { %7090 = vmatprep.subr.bf16.mxu0 %v14019_v28  ;;  %v16426_v28 = vld [vmem:[#allocation22_spill] sm:$0xff] }
 0x509   :  { %9896 = vmatmul.mubr.msk.bf16.vlgmr.msra.gmra.mrb[76].mxu1 %vm1743_vm6, %v14387_v5 }
 0x50a   :  { %7130 = vmatpush1.bf16.msra.mxu1 %v14013_v36  ;;  %7161 = vmatprep.mubr.bf16.mxu1 %v13870_v44  ;;  %v16424_v36 = vld [vmem:[#allocation25_spill] sm:$0xff] }
 0x50b   :  { %7131 = vmatprep.subr.bf16.mxu1 %v14056_v50  ;;  %7091 = vmatpush1.bf16.msra.mxu0 %v13971_v42  ;;  %v16421_v42 = vld [vmem:[#allocation37_spill] sm:$0xff]  ;;  %v16435_v50 = vld [vmem:[#allocation4_spill] sm:$0xff] }
 0x50c   :  { %7172 = vmatprep.subr.bf16.mxu0 %v14054_v17  ;;  %v16434_v17 = vld [vmem:[#allocation24_spill] sm:$0xff] }
 0x50e   :  { %7132 = vmatpush1.bf16.msra.mxu1 %v14030_v35  ;;  %9897 = vmatmul.mubr.msk.bf16.vlgmr.msra.gmra.mrb[80].mxu0 %vm1743_vm6, %v14387_v5  ;;  %v16428_v35 = vld [vmem:[#allocation6_spill] sm:$0xff] }
 0x50f   :  { %7133 = vmatprep.subr.bf16.mxu1 %v14037_v56  ;;  %7173 = vmatpush1.bf16.msra.mxu0 %v14034_v46  ;;  %v16429_v46 = vld [vmem:[#allocation20_spill] sm:$0xff]  ;;  %v16430_v56 = vld [vmem:[#allocation27_spill] sm:$0xff] }
 0x510   :  { %7174 = vmatprep.subr.bf16.mxu0 %v14100_v38  ;;  %7204 = vmatprep.mubr.bf16.mxu0 %v13870_v44  ;;  %v16443_v38 = vld [vmem:[#allocation44_spill] sm:$0xff] }
 0x512   :  { %7134 = vmatpush1.bf16.msra.mxu1 %v14022_v13  ;;  %v16427_v13 = vld [vmem:[#allocation38_spill] sm:$0xff] }
 0x513   :  { %7215 = vmatprep.subr.bf16.mxu1 %v14071_v6  ;;  %7175 = vmatpush1.bf16.msra.mxu0 %v14047_v25  ;;  %v16432_v25 = vld [vmem:[#allocation10_spill] sm:$0xff]  ;;  %v16437_v6 = vld [vmem:[#allocation16_spill] sm:$0xff] }
 0x514   :  { %7176 = vmatprep.subr.bf16.mxu0 %v14074_v0  ;;  %v16438_v0 = vld [vmem:[#allocation26_spill] sm:$0xff] }
 0x515   :  { %9898 = vmatmul.mubr.msk.bf16.vlgmr.msra.gmra.mrb[80].mxu1 %vm1743_vm6, %v14387_v5 }
 0x516   :  { %7216 = vmatpush1.bf16.msra.mxu1 %v14068_v9  ;;  %7247 = vmatprep.mubr.bf16.mxu1 %v13870_v44  ;;  %v16436_v9 = vld [vmem:[#allocation12_spill] sm:$0xff] }
 0x517   :  { %7217 = vmatprep.subr.bf16.mxu1 %v14116_v58  ;;  %7177 = vmatpush1.bf16.msra.mxu0 %v14051_v10  ;;  %v16433_v10 = vld [vmem:[#allocation17_spill] sm:$0xff] }
 0x518   :  { %7258 = vmatprep.subr.bf16.mxu0 %v14112_v30  ;;  %v16446_v30 = vld [vmem:[#allocation30_spill] sm:$0xff] }
 0x51a   :  { %7218 = vmatpush1.bf16.msra.mxu1 %v14088_v18  ;;  %9899 = vmatmul.mubr.msk.bf16.vlgmr.msra.gmra.mrb[84].mxu0 %vm1743_vm6, %v14387_v5  ;;  %v16440_v18 = vld [vmem:[#allocation29_spill] sm:$0xff] }
 0x51b   :  { %7219 = vmatprep.subr.bf16.mxu1 %v14095_v63  ;;  %7259 = vmatpush1.bf16.msra.mxu0 %v14092_v60  ;;  %v16441_v60 = vld [vmem:[#allocation15_spill] sm:$0xff] }
 0x51c   :  { %7260 = vmatprep.subr.bf16.mxu0 %v14158_v43  ;;  %7290 = vmatprep.mubr.bf16.mxu0 %v13870_v44  ;;  %v16442_v63 = vld [vmem:[#allocation43_spill] sm:$0xff] }
 0x51e   :  { %7220 = vmatpush1.bf16.msra.mxu1 %v14077_v12  ;;  %v16439_v12 = vld [vmem:[#allocation28_spill] sm:$0xff] }
 0x51f   :  { %7301 = vmatprep.subr.bf16.mxu1 %v14129_v62  ;;  %7261 = vmatpush1.bf16.msra.mxu0 %v14104_v55  ;;  %v16444_v55 = vld [vmem:[#allocation19_spill] sm:$0xff]  ;;  %v7692_v62 = vld [vmem:[#allocation2 + $0x18] sm:$0xff] }
 0x520   :  { %7262 = vmatprep.subr.bf16.mxu0 %v14132_v27 }
 0x521   :  { %9900 = vmatmul.mubr.msk.bf16.vlgmr.msra.gmra.mrb[84].mxu1 %vm1743_vm6, %v14387_v5 }
 0x522   :  { %7302 = vmatpush1.bf16.msra.mxu1 %v14126_v57  ;;  %7333 = vmatprep.mubr.bf16.mxu1 %v13870_v44  ;;  %v16447_v57 = vld [vmem:[#allocation18_spill] sm:$0xff] }
 0x523   :  { %7303 = vmatprep.subr.bf16.mxu1 %v14173_v41  ;;  %7263 = vmatpush1.bf16.msra.mxu0 %v14109_v14  ;;  %v16445_v14 = vld [vmem:[#allocation45_spill] sm:$0xff] }
 0x524   :  { %7344 = vmatprep.subr.bf16.mxu0 %v14170_v39 }
 0x526   :  { %7304 = vmatpush1.bf16.msra.mxu1 %v16409_v47  ;;  %9901 = vmatmul.mubr.msk.bf16.vlgmr.msra.gmra.mrb[88].mxu0 %vm1743_vm6, %v14387_v5 }
 0x527   :  { %7305 = vmatprep.subr.bf16.mxu1 %v16410_v34  ;;  %7345 = vmatpush1.bf16.msra.mxu0 %v16411_v29  ;;  %v7693_v34 = vld [vmem:[#allocation2 + $0x20] sm:$0xff]  ;;  %v7730_v29 = vld [vmem:[#allocation2 + $0x158] sm:$0xff] }
 0x528   :  { %7346 = vmatprep.subr.bf16.mxu0 %v16412_v1  ;;  %7376 = vmatprep.mubr.bf16.mxu0 %v13870_v44 }
 0x52a   :  { %7306 = vmatpush1.bf16.msra.mxu1 %v16413_v7  ;;  %v7763_v7 = vld [vmem:[#allocation2 + $0x270] sm:$0xff] }
 0x52b   :  { %7387 = vmatprep.subr.bf16.mxu1 %v16414_v21  ;;  %7347 = vmatpush1.bf16.msra.mxu0 %v16415_v8 }
 0x52c   :  { %7348 = vmatprep.subr.bf16.mxu0 %v16416_v49 }
 0x52d   :  { %9902 = vmatmul.mubr.msk.bf16.vlgmr.msra.gmra.mrb[88].mxu1 %vm1743_vm6, %v14387_v5 }
 0x52e   :  { %7388 = vmatpush1.bf16.msra.mxu1 %v16417_v51  ;;  %7419 = vmatprep.mubr.bf16.mxu1 %v13870_v44  ;;  %v16425_v44 = vld [vmem:[#allocation36_spill] sm:$0xff] }
 0x52f   :  { %7389 = vmatprep.subr.bf16.mxu1 %v16418_v40  ;;  %7349 = vmatpush1.bf16.msra.mxu0 %v16419_v37  ;;  %v14544_v37 = vld [vmem:[%s15905_s5 + $0x10] sm:$0xff]  }
 0x530   :  { %7430 = vmatprep.subr.bf16.mxu0 %v16420_v32 }
 0x532   :  { %7390 = vmatpush1.bf16.msra.mxu1 %v16421_v42  ;;  %9903 = vmatmul.mubr.msk.bf16.vlgmr.msra.gmra.mrb[92].mxu0 %vm1743_vm6, %v14387_v5 }
 0x533   :  { %7391 = vmatprep.subr.bf16.mxu1 %v16422_v20  ;;  %7431 = vmatpush1.bf16.msra.mxu0 %v16423_v19 }
 0x534   :  { %7432 = vmatprep.subr.bf16.mxu0 %v16424_v36  ;;  %7462 = vmatprep.mubr.bf16.mxu0 %v14484_v2 }
 0x536   :  { %7392 = vmatpush1.bf16.msra.mxu1 %v16425_v44 }
 0x537   :  { %7473 = vmatprep.subr.bf16.mxu1 %v16426_v28  ;;  %7433 = vmatpush1.bf16.msra.mxu0 %v16427_v13 }
 0x538   :  { %7434 = vmatprep.subr.bf16.mxu0 %v16428_v35 }
 0x539   :  { %9904 = vmatmul.mubr.msk.bf16.vlgmr.msra.gmra.mrb[92].mxu1 %vm1743_vm6, %v14387_v5 }
 0x53a   :  { %7474 = vmatpush1.bf16.msra.mxu1 %v16429_v46  ;;  %7505 = vmatprep.mubr.bf16.mxu1 %v14484_v2 }
 0x53b   :  { %7475 = vmatprep.subr.bf16.mxu1 %v16430_v56  ;;  %7435 = vmatpush1.bf16.msra.mxu0 %v16431_v11 }
 0x53c   :  { %7516 = vmatprep.subr.bf16.mxu0 %v16432_v25 }
 0x53e   :  { %7476 = vmatpush1.bf16.msra.mxu1 %v16433_v10  ;;  %9905 = vmatmul.mubr.msk.bf16.vlgmr.msra.gmra.mrb[96].mxu0 %vm1743_vm6, %v14387_v5 }
 0x53f   :  { %7477 = vmatprep.subr.bf16.mxu1 %v16434_v17  ;;  %7517 = vmatpush1.bf16.msra.mxu0 %v16435_v50 }
 0x540   :  { %7518 = vmatprep.subr.bf16.mxu0 %v14310_v22  ;;  %7548 = vmatprep.mubr.bf16.mxu0 %v14484_v2 }
 0x542   :  { %7478 = vmatpush1.bf16.msra.mxu1 %v16436_v9 }
 0x543   :  { %7559 = vmatprep.subr.bf16.mxu1 %v16437_v6  ;;  %7519 = vmatpush1.bf16.msra.mxu0 %v16438_v0 }
 0x544   :  { %7520 = vmatprep.subr.bf16.mxu0 %v14290_v54 }
 0x545   :  { %9906 = vmatmul.mubr.msk.bf16.vlgmr.msra.gmra.mrb[96].mxu1 %vm1743_vm6, %v14387_v5 }
 0x546   :  { %7560 = vmatpush1.bf16.msra.mxu1 %v16439_v12  ;;  %7591 = vmatprep.mubr.bf16.mxu1 %v14484_v2 }
 0x547   :  { %7561 = vmatprep.subr.bf16.mxu1 %v16440_v18  ;;  %7521 = vmatpush1.bf16.msra.mxu0 %v16441_v60 }
 0x548   :  { %7602 = vmatprep.subr.bf16.mxu0 %v14322_v59 }
 0x54a   :  { %7562 = vmatpush1.bf16.msra.mxu1 %v16442_v63  ;;  %9907 = vmatmul.mubr.msk.bf16.vlgmr.msra.gmra.mrb[100].mxu0 %vm1743_vm6, %v14387_v5 }
 0x54b   :  { %7563 = vmatprep.subr.bf16.mxu1 %v14307_v52  ;;  %7603 = vmatpush1.bf16.msra.mxu0 %v16443_v38 }
 0x54c   :  { %7604 = vmatprep.subr.bf16.mxu0 %v14354_v15  ;;  %7634 = vmatprep.mubr.bf16.mxu0 %v14484_v2 }
 0x54e   :  { %7564 = vmatpush1.bf16.msra.mxu1 %v16444_v55 }
 0x54f   :  { %7645 = vmatprep.subr.bf16.mxu1 %v14333_v33  ;;  %7605 = vmatpush1.bf16.msra.mxu0 %v16445_v14 }
 0x550   :  { %7606 = vmatprep.subr.bf16.mxu0 %v14349_v4 }
 0x551   :  { %9908 = vmatmul.mubr.msk.bf16.vlgmr.msra.gmra.mrb[100].mxu1 %vm1743_vm6, %v14387_v5 }
 0x552   :  { %7646 = vmatpush1.bf16.msra.mxu1 %v16446_v30  ;;  %7677 = vmatprep.mubr.bf16.mxu1 %v14484_v2 }
 0x553   :  { %7647 = vmatprep.subr.bf16.mxu1 %v14368_v31  ;;  %7607 = vmatpush1.bf16.msra.mxu0 %v16447_v57 }
 0x554   :  { %7807 = vmatprep.subr.bf16.mxu0 %v7692_v62  ;;  %v7696_v62 = vld [vmem:[#allocation2 + $0x38] sm:$0xff] }
 0x556   :  { %7648 = vmatpush1.bf16.msra.mxu1 %v16448_v45  ;;  %9909 = vmatmul.mubr.msk.bf16.vlgmr.msra.gmra.mrb[104].mxu0 %vm1743_vm6, %v14387_v5 }
 0x557   :  { %7649 = vmatprep.subr.bf16.mxu1 %v14364_v16  ;;  %7808 = vmatpush1.bf16.msra.mxu0 %v7691_v53  ;;  %v7729_v53 = vld [vmem:[#allocation2 + $0x150] sm:$0xff] }
 0x558   :  { %7809 = vmatprep.subr.bf16.mxu0 %v7728_v48  ;;  %7839 = vmatprep.mubr.bf16.mxu0 %v14484_v2  ;;  %v7766_v48 = vld [vmem:[#allocation2 + $0x288] sm:$0xff] }
 0x55a   :  { %7650 = vmatpush1.bf16.msra.mxu1 %v14361_v61 }
 0x55b   :  { %7850 = vmatprep.subr.bf16.mxu1 %v7694_v24  ;;  %7810 = vmatpush1.bf16.msra.mxu0 %v7727_v3  ;;  %v7732_v24 = vld [vmem:[#allocation2 + $0x168] sm:$0xff]  ;;  %v7765_v3 = vld [vmem:[#allocation2 + $0x280] sm:$0xff] }
 0x55c   :  { %7811 = vmatprep.subr.bf16.mxu0 %v7764_v26  ;;  %v7698_v26 = vld [vmem:[#allocation2 + $0x48] sm:$0xff] }
 0x55d   :  { %9910 = vmatmul.mubr.msk.bf16.vlgmr.msra.gmra.mrb[104].mxu1 %vm1743_vm6, %v14387_v5  ;;  %v7695_v5 = vld [vmem:[#allocation2 + $0x30] sm:$0xff] }
 0x55e   :  { %7851 = vmatpush1.bf16.msra.mxu1 %v7693_v34  ;;  %7882 = vmatprep.mubr.bf16.mxu1 %v14484_v2  ;;  %v7731_v34 = vld [vmem:[#allocation2 + $0x160] sm:$0xff] }
 0x55f   :  { %7852 = vmatprep.subr.bf16.mxu1 %v7730_v29  ;;  %7812 = vmatpush1.bf16.msra.mxu0 %v7763_v7  ;;  %v7768_v29 = vld [vmem:[#allocation2 + $0x298] sm:$0xff]  ;;  %v7697_v7 = vld [vmem:[#allocation2 + $0x40] sm:$0xff] }
 0x560   :  { %7893 = vmatprep.subr.bf16.mxu0 %v7696_v62  ;;  %v7734_v62 = vld [vmem:[#allocation2 + $0x178] sm:$0xff] }
 0x562   :  { %7853 = vmatpush1.bf16.msra.mxu1 %v7729_v53  ;;  %9914 = vmatmul.mubr.msk.bf16.vlgmr.msra.gmra.mrb[72].mxu0 %vm1743_vm6, %v14544_v37  ;;  %v7767_v53 = vld [vmem:[#allocation2 + $0x290] sm:$0xff] }
 0x563   :  { %7854 = vmatprep.subr.bf16.mxu1 %v7766_v48  ;;  %7894 = vmatpush1.bf16.msra.mxu0 %v7695_v5  ;;  %v7700_v48 = vld [vmem:[#allocation2 + $0x58] sm:$0xff]  ;;  %v7733_v5 = vld [vmem:[#allocation2 + $0x170] sm:$0xff] }
 0x564   :  { %7895 = vmatprep.subr.bf16.mxu0 %v7732_v24  ;;  %7925 = vmatprep.mubr.bf16.mxu0 %v14484_v2  ;;  %v7770_v24 = vld [vmem:[#allocation2 + $0x2a8] sm:$0xff] }
 0x566   :  { %7855 = vmatpush1.bf16.msra.mxu1 %v7765_v3  ;;  %v7699_v3 = vld [vmem:[#allocation2 + $0x50] sm:$0xff] }
 0x567   :  { %7936 = vmatprep.subr.bf16.mxu1 %v7698_v26  ;;  %7896 = vmatpush1.bf16.msra.mxu0 %v7731_v34  ;;  %v7736_v26 = vld [vmem:[#allocation2 + $0x188] sm:$0xff]  ;;  %v7769_v34 = vld [vmem:[#allocation2 + $0x2a0] sm:$0xff] }
 0x568   :  { %7897 = vmatprep.subr.bf16.mxu0 %v7768_v29  ;;  %v7702_v29 = vld [vmem:[#allocation2 + $0x68] sm:$0xff] }
 0x569   :  { %9915 = vmatmul.mubr.msk.bf16.vlgmr.msra.gmra.mrb[72].mxu1 %vm1743_vm6, %v14544_v37 }
 0x56a   :  { %7937 = vmatpush1.bf16.msra.mxu1 %v7697_v7  ;;  %7968 = vmatprep.mubr.bf16.mxu1 %v14484_v2  ;;  %v7735_v7 = vld [vmem:[#allocation2 + $0x180] sm:$0xff] }
 0x56b   :  { %7938 = vmatprep.subr.bf16.mxu1 %v7734_v62  ;;  %7898 = vmatpush1.bf16.msra.mxu0 %v7767_v53  ;;  %v7772_v62 = vld [vmem:[#allocation2 + $0x2b8] sm:$0xff]  ;;  %v7701_v53 = vld [vmem:[#allocation2 + $0x60] sm:$0xff] }
 0x56c   :  { %7979 = vmatprep.subr.bf16.mxu0 %v7700_v48  ;;  %v7738_v48 = vld [vmem:[#allocation2 + $0x198] sm:$0xff] }
 0x56e   :  { %7939 = vmatpush1.bf16.msra.mxu1 %v7733_v5  ;;  %9916 = vmatmul.mubr.msk.bf16.vlgmr.msra.gmra.mrb[76].mxu0 %vm1743_vm6, %v14544_v37  ;;  %v7771_v5 = vld [vmem:[#allocation2 + $0x2b0] sm:$0xff] }
 0x56f   :  { %7940 = vmatprep.subr.bf16.mxu1 %v7770_v24  ;;  %7980 = vmatpush1.bf16.msra.mxu0 %v7699_v3  ;;  %v7704_v24 = vld [vmem:[#allocation2 + $0x78] sm:$0xff]  ;;  %v7737_v3 = vld [vmem:[#allocation2 + $0x190] sm:$0xff] }
 0x570   :  { %7981 = vmatprep.subr.bf16.mxu0 %v7736_v26  ;;  %8011 = vmatprep.mubr.bf16.mxu0 %v14484_v2  ;;  %v7774_v26 = vld [vmem:[#allocation2 + $0x2c8] sm:$0xff] }
 0x572   :  { %7941 = vmatpush1.bf16.msra.mxu1 %v7769_v34  ;;  %v7703_v34 = vld [vmem:[#allocation2 + $0x70] sm:$0xff] }
 0x573   :  { %8022 = vmatprep.subr.bf16.mxu1 %v7702_v29  ;;  %7982 = vmatpush1.bf16.msra.mxu0 %v7735_v7  ;;  %v7773_v29 = vld [vmem:[#allocation2 + $0x2c0] sm:$0xff]  ;;  %v7706_v7 = vld [vmem:[#allocation2 + $0x88] sm:$0xff] }
 0x574   :  { %7983 = vmatprep.subr.bf16.mxu0 %v7772_v62  ;;  %v7739_v62 = vld [vmem:[#allocation2 + $0x1a0] sm:$0xff] }
 0x575   :  { %9917 = vmatmul.mubr.msk.bf16.vlgmr.msra.gmra.mrb[76].mxu1 %vm1743_vm6, %v14544_v37 }
 0x576   :  { %8023 = vmatpush1.bf16.msra.mxu1 %v7701_v53  ;;  %8054 = vmatprep.mubr.bf16.mxu1 %v14484_v2  ;;  %v7776_v53 = vld [vmem:[#allocation2 + $0x2d8] sm:$0xff] }
 0x577   :  { %8024 = vmatprep.subr.bf16.mxu1 %v7738_v48  ;;  %7984 = vmatpush1.bf16.msra.mxu0 %v7771_v5  ;;  %v7705_v48 = vld [vmem:[#allocation2 + $0x80] sm:$0xff]  ;;  %v7775_v5 = vld [vmem:[#allocation2 + $0x2d0] sm:$0xff] }
 0x578   :  { %8065 = vmatprep.subr.bf16.mxu0 %v7704_v24  ;;  %v7741_v24 = vld [vmem:[#allocation2 + $0x1b0] sm:$0xff] }
 0x57a   :  { %8025 = vmatpush1.bf16.msra.mxu1 %v7737_v3  ;;  %9918 = vmatmul.mubr.msk.bf16.vlgmr.msra.gmra.mrb[80].mxu0 %vm1743_vm6, %v14544_v37  ;;  %v7707_v3 = vld [vmem:[#allocation2 + $0x90] sm:$0xff] }
 0x57b   :  { %8026 = vmatprep.subr.bf16.mxu1 %v7774_v26  ;;  %8066 = vmatpush1.bf16.msra.mxu0 %v7703_v34  ;;  %v7777_v26 = vld [vmem:[#allocation2 + $0x2e0] sm:$0xff] }
 0x57c   :  { %8067 = vmatprep.subr.bf16.mxu0 %v14116_v58  ;;  %8097 = vmatprep.mubr.bf16.mxu0 %v14484_v2  ;;  %v7708_v58 = vld [vmem:[#allocation2 + $0x98] sm:$0xff]  ;;  %v7709_v34 = vld [vmem:[#allocation2 + $0xa0] sm:$0xff] }
 0x57e   :  { %8027 = vmatpush1.bf16.msra.mxu1 %v7773_v29  ;;  %v7779_v29 = vld [vmem:[#allocation2 + $0x2f0] sm:$0xff] }
 0x57f   :  { %8108 = vmatprep.subr.bf16.mxu1 %v7706_v7  ;;  %8068 = vmatpush1.bf16.msra.mxu0 %v7739_v62 }
 0x580   :  { %8069 = vmatprep.subr.bf16.mxu0 %v7776_v53 }
 0x581   :  { %9919 = vmatmul.mubr.msk.bf16.vlgmr.msra.gmra.mrb[80].mxu1 %vm1743_vm6, %v14544_v37 }
 0x582   :  { %8109 = vmatpush1.bf16.msra.mxu1 %v7705_v48  ;;  %8140 = vmatprep.mubr.bf16.mxu1 %v14484_v2 }
 0x583   :  { %8110 = vmatprep.subr.bf16.mxu1 %v14158_v43  ;;  %8070 = vmatpush1.bf16.msra.mxu0 %v7775_v5  ;;  %v7780_v43 = vld [vmem:[#allocation2 + $0x2f8] sm:$0xff] }
 0x584   :  { %8151 = vmatprep.subr.bf16.mxu0 %v7708_v58 }
 0x586   :  { %8111 = vmatpush1.bf16.msra.mxu1 %v7741_v24  ;;  %9920 = vmatmul.mubr.msk.bf16.vlgmr.msra.gmra.mrb[84].mxu0 %vm1743_vm6, %v14544_v37 }
 0x587   :  { %8112 = vmatprep.subr.bf16.mxu1 %v14132_v27  ;;  %8152 = vmatpush1.bf16.msra.mxu0 %v7707_v3  ;;  %v7781_v27 = vld [vmem:[#allocation2 + $0x300] sm:$0xff] }
 0x588   :  { %8153 = vmatprep.subr.bf16.mxu0 %v14173_v41  ;;  %8183 = vmatprep.mubr.bf16.mxu0 %v14484_v2  ;;  %v16449_v41 = vld [vmem:[#allocation21_spill] sm:$0xff] }
 0x58a   :  { %8113 = vmatpush1.bf16.msra.mxu1 %v7777_v26 }
 0x58b   :  { %8194 = vmatprep.subr.bf16.mxu1 %v14170_v39  ;;  %8154 = vmatpush1.bf16.msra.mxu0 %v16409_v47  ;;  %v7726_v39 = vld [vmem:[#allocation2 + $0x128] sm:$0xff] }
 0x58c   :  { %8155 = vmatprep.subr.bf16.mxu0 %v7780_v43 }
 0x58d   :  { %9921 = vmatmul.mubr.msk.bf16.vlgmr.msra.gmra.mrb[84].mxu1 %vm1743_vm6, %v14544_v37 }
 0x58e   :  { %8195 = vmatpush1.bf16.msra.mxu1 %v7709_v34  ;;  %8226 = vmatprep.mubr.bf16.mxu1 %v14484_v2 }
 0x58f   :  { %8196 = vmatprep.subr.bf16.mxu1 %v16412_v1  ;;  %8156 = vmatpush1.bf16.msra.mxu0 %v7779_v29 }
 0x590   :  { %8237 = vmatprep.subr.bf16.mxu0 %v16414_v21 }
 0x592   :  { %8197 = vmatpush1.bf16.msra.mxu1 %v16415_v8  ;;  %9922 = vmatmul.mubr.msk.bf16.vlgmr.msra.gmra.mrb[88].mxu0 %vm1743_vm6, %v14544_v37 }
 0x593   :  { %8198 = vmatprep.subr.bf16.mxu1 %v16416_v49  ;;  %8238 = vmatpush1.bf16.msra.mxu0 %v16417_v51 }
 0x594   :  { %8239 = vmatprep.subr.bf16.mxu0 %v16418_v40  ;;  %8269 = vmatprep.mubr.bf16.mxu0 %v14484_v2 }
 0x596   :  { %8199 = vmatpush1.bf16.msra.mxu1 %v7781_v27 }
 0x597   :  { %8280 = vmatprep.subr.bf16.mxu1 %v16420_v32  ;;  %8240 = vmatpush1.bf16.msra.mxu0 %v16421_v42 }
 0x598   :  { %8241 = vmatprep.subr.bf16.mxu0 %v16422_v20 }
 0x599   :  { %9923 = vmatmul.mubr.msk.bf16.vlgmr.msra.gmra.mrb[88].mxu1 %vm1743_vm6, %v14544_v37 }
 0x59a   :  { %8281 = vmatpush1.bf16.msra.mxu1 %v16423_v19  ;;  %8312 = vmatprep.mubr.bf16.mxu1 %v14484_v2 }
 0x59b   :  { %8282 = vmatprep.subr.bf16.mxu1 %v16424_v36  ;;  %8242 = vmatpush1.bf16.msra.mxu0 %v16425_v44 }
 0x59c   :  { %8323 = vmatprep.subr.bf16.mxu0 %v16426_v28 }
 0x59e   :  { %8283 = vmatpush1.bf16.msra.mxu1 %v16427_v13  ;;  %9924 = vmatmul.mubr.msk.bf16.vlgmr.msra.gmra.mrb[92].mxu0 %vm1743_vm6, %v14544_v37 }
 0x59f   :  { %8284 = vmatprep.subr.bf16.mxu1 %v16428_v35  ;;  %8324 = vmatpush1.bf16.msra.mxu0 %v16429_v46 }
 0x5a0   :  { %8325 = vmatprep.subr.bf16.mxu0 %v16430_v56  ;;  %8355 = vmatprep.mubr.bf16.mxu0 %v14484_v2 }
 0x5a2   :  { %8285 = vmatpush1.bf16.msra.mxu1 %v16431_v11 }
 0x5a3   :  { %8366 = vmatprep.subr.bf16.mxu1 %v16432_v25  ;;  %8326 = vmatpush1.bf16.msra.mxu0 %v16433_v10 }
 0x5a4   :  { %8327 = vmatprep.subr.bf16.mxu0 %v16434_v17 }
 0x5a5   :  { %9925 = vmatmul.mubr.msk.bf16.vlgmr.msra.gmra.mrb[92].mxu1 %vm1743_vm6, %v14544_v37 }
 0x5a6   :  { %8367 = vmatpush1.bf16.msra.mxu1 %v16435_v50  ;;  %8398 = vmatprep.mubr.bf16.mxu1 %v14484_v2 }
 0x5a7   :  { %8368 = vmatprep.subr.bf16.mxu1 %v14310_v22  ;;  %8328 = vmatpush1.bf16.msra.mxu0 %v16436_v9  ;;  %v7761_v22 = vld [vmem:[#allocation2 + $0x250] sm:$0xff] }
 0x5a8   :  { %8409 = vmatprep.subr.bf16.mxu0 %v16437_v6 }
 0x5aa   :  { %8369 = vmatpush1.bf16.msra.mxu1 %v16438_v0  ;;  %9926 = vmatmul.mubr.msk.bf16.vlgmr.msra.gmra.mrb[96].mxu0 %vm1743_vm6, %v14544_v37 }
 0x5ab   :  { %8370 = vmatprep.subr.bf16.mxu1 %v14290_v54  ;;  %8410 = vmatpush1.bf16.msra.mxu0 %v16439_v12 }
 0x5ac   :  { %8411 = vmatprep.subr.bf16.mxu0 %v16440_v18  ;;  %8441 = vmatprep.mubr.bf16.mxu0 %v14484_v2 }
 0x5ae   :  { %8371 = vmatpush1.bf16.msra.mxu1 %v16441_v60 }
 0x5af   :  { %8452 = vmatprep.subr.bf16.mxu1 %v14322_v59  ;;  %8412 = vmatpush1.bf16.msra.mxu0 %v16442_v63 }
 0x5b0   :  { %8413 = vmatprep.subr.bf16.mxu0 %v14307_v52 }
 0x5b1   :  { %9927 = vmatmul.mubr.msk.bf16.vlgmr.msra.gmra.mrb[96].mxu1 %vm1743_vm6, %v14544_v37 }
 0x5b2   :  { %8453 = vmatpush1.bf16.msra.mxu1 %v16443_v38  ;;  %8484 = vmatprep.mubr.bf16.mxu1 %v14484_v2 }
 0x5b3   :  { %8454 = vmatprep.subr.bf16.mxu1 %v14354_v15  ;;  %8414 = vmatpush1.bf16.msra.mxu0 %v16444_v55 }
 0x5b4   :  { %8495 = vmatprep.subr.bf16.mxu0 %v14333_v33 }
 0x5b6   :  { %8455 = vmatpush1.bf16.msra.mxu1 %v16445_v14  ;;  %9928 = vmatmul.mubr.msk.bf16.vlgmr.msra.gmra.mrb[100].mxu0 %vm1743_vm6, %v14544_v37 }
 0x5b7   :  { %8456 = vmatprep.subr.bf16.mxu1 %v14349_v4  ;;  %8496 = vmatpush1.bf16.msra.mxu0 %v16446_v30 }
 0x5b8   :  { %8497 = vmatprep.subr.bf16.mxu0 %v14368_v31  ;;  %8527 = vmatprep.mubr.bf16.mxu0 %v14484_v2 }
 0x5ba   :  { %8457 = vmatpush1.bf16.msra.mxu1 %v16447_v57 }
 0x5bb   :  { %8538 = vmatprep.subr.bf16.mxu1 %v7726_v39  ;;  %8498 = vmatpush1.bf16.msra.mxu0 %v16448_v45 }
 0x5bc   :  { %8499 = vmatprep.subr.bf16.mxu0 %v14364_v16 }
 0x5bd   :  { %9929 = vmatmul.mubr.msk.bf16.vlgmr.msra.gmra.mrb[100].mxu1 %vm1743_vm6, %v14544_v37 }
 0x5be   :  { %8539 = vmatpush1.bf16.msra.mxu1 %v16449_v41  ;;  %8570 = vmatprep.mubr.bf16.mxu1 %v14484_v2 }
 0x5bf   :  { %8540 = vmatprep.subr.bf16.mxu1 %v14484_v2  ;;  %8500 = vmatpush1.bf16.msra.mxu0 %v14361_v61 }
 0x5c2   :  { %8541 = vmatpush1.bf16.msra.mxu1 %v7761_v22  ;;  %9930 = vmatmul.mubr.msk.bf16.vlgmr.msra.gmra.mrb[104].mxu0 %vm1743_vm6, %v14544_v37 }
 0x5c3   :  { %8542 = vmatprep.subr.bf16.mxu1 %v14484_v2 }
 0x5c6   :  { %8543 = vmatpush1.bf16.msra.mxu1 %v14376_v23 }
 0x5c9   :  { %9931 = vmatmul.mubr.msk.bf16.vlgmr.msra.gmra.mrb[104].mxu1 %vm1743_vm6, %v14544_v37 }
 0x635   :  { %v14654_v54 = vpop.f32.mrb[72].mxu0 }
 0x636   :  { %v8725_v33 = vmin.f32 %v14654_v54, 20.0  ;;  %v14657_v52 = vpop.f32.mrb[73].mxu0  ;;  %vm8653_vm5 = vcmp.gt.f32.partialorder %v14654_v54, 20.0 }
 0x637   :  { %v8726_v15 = vmin.f32 %v14657_v52, 20.0  ;;  %v14660_v59 = vpop.f32.mrb[74].mxu0  ;;  %vm8654_vm12 = vcmp.gt.f32.partialorder %v14657_v52, 20.0 }
 0x638   :  { %v8797_v4 = vmul.f32 1.442695, %v8725_v33  ;;  %v8761_v61 = vmin.f32 %v14660_v59, 20.0  ;;  %v14663_v16 = vpop.f32.mrb[75].mxu0  ;;  %vm8689_vm13 = vcmp.gt.f32.partialorder %v14660_v59, 20.0 }
 0x639   :  { %v8799_v31 = vmul.f32 1.442695, %v8726_v15  ;;  %v8762_v23 = vmin.f32 %v14663_v16, 20.0  ;;  %vm8690_vm11 = vcmp.gt.f32.partialorder %v14663_v16, 20.0 }
 0x63a   :  { %10554 = vpow2.f32 %v8797_v4  ;;  %v8869_v47 = vmul.f32 1.442695, %v8761_v61 }
 0x63b   :  { %10556 = vpow2.f32 %v8799_v31  ;;  %v8871_v1 = vmul.f32 1.442695, %v8762_v23 }
 0x63c   :  { %10558 = vpow2.f32 %v8869_v47  ;;  %v14666_v21 = vpop.f32.mrb[72].mxu1 }
 0x63d   :  { %10560 = vpow2.f32 %v8871_v1  ;;  %v8727_v8 = vmin.f32 %v14666_v21, 20.0  ;;  %v14669_v49 = vpop.f32.mrb[73].mxu1  ;;  %vm8655_vm1 = vcmp.gt.f32.partialorder %v14666_v21, 20.0 }
 0x63e   :  { %v8728_v51 = vmin.f32 %v14669_v49, 20.0  ;;  %v14672_v40 = vpop.f32.mrb[74].mxu1  ;;  %vm8656_vm8 = vcmp.gt.f32.partialorder %v14669_v49, 20.0 }
 0x63f   :  { %v8801_v32 = vmul.f32 1.442695, %v8727_v8  ;;  %v8763_v42 = vmin.f32 %v14672_v40, 20.0  ;;  %v14675_v20 = vpop.f32.mrb[75].mxu1  ;;  %vm8691_vm9 = vcmp.gt.f32.partialorder %v14672_v40, 20.0 }
 0x640   :  { %v8803_v19 = vmul.f32 1.442695, %v8728_v51  ;;  %v8764_v36 = vmin.f32 %v14675_v20, 20.0  ;;  %vm8692_vm10 = vcmp.gt.f32.partialorder %v14675_v20, 20.0 }
 0x641   :  { %10562 = vpow2.f32 %v8801_v32  ;;  %v8873_v2 = vmul.f32 1.442695, %v8763_v42  ;;  %v14678_v44 = vpop.f32.mrb[76].mxu0 }
 0x642   :  { %10564 = vpow2.f32 %v8803_v19  ;;  %v8875_v28 = vmul.f32 1.442695, %v8764_v36  ;;  %v8729_v13 = vmin.f32 %v14678_v44, 20.0  ;;  %v14681_v35 = vpop.f32.mrb[77].mxu0 }
 0x643   :  { %10566 = vpow2.f32 %v8873_v2  ;;  %v14683_v46 = vpop.f32.mrb[78].mxu0  ;;  %v8730_v12 = vmin.f32 %v14681_v35, 20.0 }
 0x644   :  { %v10555_v56 = vpop.eup %10554  ;;  %10568 = vpow2.f32 %v8875_v28  ;;  %v8805_v11 = vmul.f32 1.442695, %v8729_v13  ;;  %v14685_v25 = vpop.f32.mrb[79].mxu0  ;;  %v8765_v24 = vmin.f32 %v14683_v46, 20.0 }
 0x645   :  { %v10557_v10 = vpop.eup %10556  ;;  %v8941_v17 = vadd.f32 1.0, %v10555_v56  ;;  %v8944_v50 = vmul.f32 -0.5, %v10555_v56  ;;  %v8947_v60 = vand.u32 2147483647, %v10555_v56  ;;  %v14692_v62 = vmul.f32 1.442695, %v8730_v12 }
 0x646   :  { %v10559_v9 = vpop.eup %10558  ;;  %v8950_v6 = vadd.f32 1.0, %v10557_v10  ;;  %v8953_v0 = vmul.f32 -0.5, %v10557_v10  ;;  %10570 = vpow2.f32 %v8805_v11  ;;  %v8956_v63 = vand.u32 2147483647, %v10557_v10 }
 0x647   :  { %v10561_v18 = vpop.eup %10560  ;;  %10572 = vlog2.f32 %v8941_v17  ;;  %v9265_v38 = vadd.f32 1.0, %v10559_v9  ;;  %v8945_v55 = vadd.f32 1.0, %v8944_v50  ;;  %v9268_v30 = vmul.f32 -0.5, %v10559_v9 }
 0x648   :  { %10574 = vlog2.f32 %v8950_v6  ;;  %v8954_v14 = vadd.f32 1.0, %v8953_v0  ;;  %v14688_v57 = vpop.f32.mrb[76].mxu1  ;;  %v9274_v45 = vadd.f32 1.0, %v10561_v18  ;;  %v9277_v7 = vmul.f32 -0.5, %v10561_v18 }
 0x649   :  { %10576 = vlog2.f32 %v9265_v38  ;;  %v14690_v37 = vpop.f32.mrb[77].mxu1  ;;  %vm14696_vm2 = vcmp.lt.f32.partialorder %v8947_v60, 0.0004427343  ;;  %v9271_v58 = vand.u32 2147483647, %v10559_v9  ;;  %v8946_v43 = vmul.f32 %v10555_v56, %v8945_v55 }
 0x64a   :  { %v14694_v53 = vpop.f32.mrb[78].mxu1  ;;  %10578 = vlog2.f32 %v9274_v45  ;;  %v14706_v34 = vmul.f32 %v10557_v10, %v8954_v14  ;;  %vm14708_vm6 = vcmp.lt.f32.partialorder %v8956_v63, 0.0004427343  ;;  %v9269_v27 = vadd.f32 1.0, %v9268_v30 }
 0x64b   :  { %v10563_v48 = vpop.eup %10562  ;;  %v14701_v3 = vpop.f32.mrb[79].mxu1  ;;  %v9278_v22 = vadd.f32 1.0, %v9277_v7  ;;  %v9280_v33 = vand.u32 2147483647, %v10561_v18  ;;  %vm14725_vm4 = vcmp.lt.f32.partialorder %v9271_v58, 0.0004427343 }
 0x64c   :  { %v14703_v26 = vpop.eup %10564  ;;  %v8959_v39 = vadd.f32 1.0, %v10563_v48  ;;  %v8962_v15 = vmul.f32 -0.5, %v10563_v48  ;;  %v8965_v23 = vand.u32 2147483647, %v10563_v48  ;;  %v9270_v2 = vmul.f32 %v10559_v9, %v9269_v27 }
 0x64d   :  { %v14712_v41 = vpop.eup %10566  ;;  %v8968_v4 = vadd.f32 1.0, %v14703_v26  ;;  %v14716_v61 = vpop.f32.mrb[80].mxu0  ;;  %v8971_v47 = vmul.f32 -0.5, %v14703_v26  ;;  %v8974_v42 = vand.u32 2147483647, %v14703_v26  ;;  %v9279_v10 = vmul.f32 %v10561_v18, %v9278_v22 }
 0x64e   :  { %v14718_v31 = vpop.eup %10568  ;;  %10580 = vlog2.f32 %v8959_v39  ;;  %v9283_v1 = vadd.f32 1.0, %v14712_v41  ;;  %v14723_v8 = vpop.f32.mrb[81].mxu0  ;;  %v8963_v32 = vadd.f32 1.0, %v8962_v15  ;;  %v9286_v28 = vmul.f32 -0.5, %v14712_v41 }
 0x64f   :  { %10582 = vlog2.f32 %v8968_v4  ;;  %v14730_v19 = vpop.f32.mrb[82].mxu0  ;;  %v8877_v13 = vmul.f32 1.442695, %v8765_v24  ;;  %vm14738_vm15 = vcmp.lt.f32.partialorder %v9280_v33, 0.0004427343  ;;  %v9292_v50 = vadd.f32 1.0, %v14718_v31 }
 0x650   :  { %v14732_v36 = vpop.eup %10570  ;;  %10584 = vlog2.f32 %v9283_v1  ;;  %v14736_v56 = vpop.f32.mrb[83].mxu0  ;;  %v9295_v6 = vmul.f32 -0.5, %v14718_v31  ;;  %vm14744_vm0 = vcmp.lt.f32.partialorder %v8965_v23, 0.0004427343  ;;  %v8972_v60 = vadd.f32 1.0, %v8971_v47 }
 0x651   :  { %v10573_v11 = vpop.eup %10572  ;;  %v8977_v63 = vadd.f32 1.0, %v14732_v36  ;;  %v8964_v18 = vmul.f32 %v10563_v48, %v8963_v32  ;;  %vm14750_vm7 = vcmp.lt.f32.partialorder %v8974_v42, 0.0004427343  ;;  %v9289_v30 = vand.u32 2147483647, %v14712_v41 }
 0x652   :  { %v10575_v0 = vpop.eup %10574  ;;  %v8943_v9 = vmul.f32 0.6931472, %v10573_v11  ;;  %10586 = vlog2.f32 %v9292_v50  ;;  %v9287_v58 = vadd.f32 1.0, %v9286_v28  ;;  %v9296_v5 = vadd.f32 1.0, %v9295_v6 }
 0x653   :  { %v10577_v38 = vpop.eup %10576  ;;  %v8952_v55 = vmul.f32 0.6931472, %v10575_v0  ;;  %10588 = vlog2.f32 %v8977_v63  ;;  %v8973_v23 = vmul.f32 %v14703_v26, %v8972_v60  ;;  %vm14798_vm14 = vcmp.lt.f32.partialorder %v9289_v30, 0.0004427343 }
 0x654   :  { %v8949_v45 = vsel %vm14696_vm2, %v8946_v43, %v8943_v9  ;;  %v9267_v7 = vmul.f32 0.6931472, %v10577_v38  ;;  %v14758_v24 = vpop.f32.mrb[80].mxu1  ;;  %v10579_v27 = vpop.eup %10578  ;;  %v9298_v43 = vand.u32 2147483647, %v14718_v31  ;;  %10590 = vpow2.f32 %v14692_v62 }
 0x655   :  { %v9589_v48 = vsel %vm8653_vm5, %v14654_v54, %v8949_v45  ;;  %v8958_v39 = vsel %vm14708_vm6, %v14706_v34, %v8952_v55  ;;  %v14768_v22 = vpop.f32.mrb[81].mxu1  ;;  %v9276_v29 = vmul.f32 0.6931472, %v10579_v27  ;;  %v8980_v34 = vmul.f32 -0.5, %v14732_v36 }
 0x656   :  { %9661 = vst [vmem:[%s15906_s6] sm:$0xff] %v9589_v48  ;;  %v9590_v33 = vsel %vm8654_vm12, %v14657_v52, %v8958_v39  ;;  %v9273_v54 = vsel %vm14725_vm4, %v9270_v2, %v9267_v7  ;;  %v14779_v15 = vpop.f32.mrb[82].mxu1  ;;  %v8766_v52 = vmin.f32 %v14685_v25, 20.0  ;;  %v9288_v32 = vmul.f32 %v14712_v41, %v9287_v58 }
 0x657   :  { %9662 = vst [vmem:[%s15906_s6 + $0x8] sm:$0xff] %v9590_v33  ;;  %v9625_v4 = vsel %vm8689_vm13, %v14660_v59, %v9273_v54  ;;  %v14790_v47 = vpop.f32.mrb[83].mxu1  ;;  %v9282_v51 = vsel %vm14738_vm15, %v9279_v10, %v9276_v29  ;;  %10592 = vpow2.f32 %v8877_v13  ;;  %vm14806_vm3 = vcmp.lt.f32.partialorder %v9298_v43, 0.0004427343 }
 0x658   :  { %v10581_v1 = vpop.eup %10580  ;;  %9697 = vst [vmem:[%s15906_s6 + $0x120] sm:$0xff] %v9625_v4  ;;  %v9626_v26 = vsel %vm8690_vm11, %v14663_v16, %v9282_v51  ;;  %v8879_v28 = vmul.f32 1.442695, %v8766_v52  ;;  %v9297_v10 = vmul.f32 %v14718_v31, %v9296_v5  ;;  %v8981_v13 = vadd.f32 1.0, %v8980_v34 }
 0x659   :  { %v10583_v62 = vpop.eup %10582  ;;  %v8961_v42 = vmul.f32 0.6931472, %v10581_v1  ;;  %9698 = vst [vmem:[%s15906_s6 + $0x128] sm:$0xff] %v9626_v26  ;;  %v8731_v17 = vmin.f32 %v14688_v57, 20.0  ;;  %v14815_v50 = vpop.f32.mrb[84].mxu0  ;;  %v8732_v0 = vmin.f32 %v14690_v37, 20.0 }
 0x65a   :  { %v10585_v11 = vpop.eup %10584  ;;  %v8970_v41 = vmul.f32 0.6931472, %v10583_v62  ;;  %10594 = vpow2.f32 %v8879_v28  ;;  %v14820_v9 = vpop.f32.mrb[85].mxu0  ;;  %v8983_v63 = vand.u32 2147483647, %v14732_v36  ;;  %v8767_v14 = vmin.f32 %v14694_v53, 20.0 }
 0x65b   :  { %v8967_v16 = vsel %vm14744_vm0, %v8964_v18, %v8961_v42  ;;  %v9285_v6 = vmul.f32 0.6931472, %v10585_v11  ;;  %v8809_v38 = vmul.f32 1.442695, %v8731_v17  ;;  %v14828_v55 = vpop.f32.mrb[86].mxu0  ;;  %v8768_v5 = vmin.f32 %v14701_v3, 20.0 }
 0x65c   :  { %v9591_v60 = vsel %vm8655_vm1, %v14666_v21, %v8967_v16  ;;  %v8976_v31 = vsel %vm14750_vm7, %v8973_v23, %v8970_v41  ;;  %v10587_v12 = vpop.eup %10586  ;;  %v8811_v30 = vmul.f32 1.442695, %v8732_v0  ;;  %v14839_v45 = vpop.f32.mrb[87].mxu0  ;;  %v8881_v39 = vmul.f32 1.442695, %v8767_v14 }
 0x65d   :  { %9663 = vst [vmem:[%s15906_s6 + $0x10] sm:$0xff] %v9591_v60  ;;  %v9592_v18 = vsel %vm8656_vm8, %v14669_v49, %v8976_v31  ;;  %v9291_v21 = vsel %vm14798_vm14, %v9288_v32, %v9285_v6  ;;  %v10589_v7 = vpop.eup %10588  ;;  %v9294_v27 = vmul.f32 0.6931472, %v10587_v12  ;;  %v8982_v49 = vmul.f32 %v14732_v36, %v8981_v13 }
 0x65e   :  { %9664 = vst [vmem:[%s15906_s6 + $0x18] sm:$0xff] %v9592_v18  ;;  %v9627_v58 = vsel %vm8691_vm9, %v14672_v40, %v9291_v21  ;;  %10596 = vpow2.f32 %v8809_v38  ;;  %v8979_v48 = vmul.f32 0.6931472, %v10589_v7  ;;  %vm8657_vm2 = vcmp.gt.f32.partialorder %v14678_v44, 20.0  ;;  %v10591_v36 = vpop.eup %10590 }
 0x65f   :  { %9699 = vst [vmem:[%s15906_s6 + $0x130] sm:$0xff] %v9627_v58  ;;  %10598 = vpow2.f32 %v8811_v30  ;;  %v9300_v43 = vsel %vm14806_vm3, %v9297_v10, %v9294_v27  ;;  %vm8984_vm5 = vcmp.lt.f32.partialorder %v8983_v63, 0.0004427343  ;;  %v8733_v40 = vmin.f32 %v14716_v61, 20.0 }
 0x660   :  { %v14856_v33 = vpop.f32.mrb[84].mxu1  ;;  %v9628_v54 = vsel %vm8692_vm10, %v14675_v20, %v9300_v43  ;;  %v8985_v29 = vsel %vm8984_vm5, %v8982_v49, %v8979_v48  ;;  %10600 = vpow2.f32 %v8881_v39  ;;  %v8883_v34 = vmul.f32 1.442695, %v8768_v5 }
 0x661   :  { %v14861_v4 = vpop.f32.mrb[85].mxu1  ;;  %v14863_v23 = vpop.eup %10592  ;;  %9700 = vst [vmem:[%s15906_s6 + $0x138] sm:$0xff] %v9628_v54  ;;  %v9593_v52 = vsel %vm8657_vm2, %v14678_v44, %v8985_v29  ;;  %v8986_v1 = vadd.f32 1.0, %v10591_v36  ;;  %v8813_v59 = vmul.f32 1.442695, %v8733_v40  ;;  %v8989_v26 = vmul.f32 -0.5, %v10591_v36 }
 0x662   :  { %v14869_v51 = vpop.f32.mrb[86].mxu1  ;;  %9665 = vst [vmem:[%s15906_s6 + $0x20] sm:$0xff] %v9593_v52  ;;  %v9301_v20 = vadd.f32 1.0, %v14863_v23  ;;  %10602 = vpow2.f32 %v8883_v34  ;;  %v8992_v42 = vand.u32 2147483647, %v10591_v36  ;;  %v8734_v44 = vmin.f32 %v14723_v8, 20.0 }
 0x663   :  { %v14875_v32 = vpop.f32.mrb[87].mxu1  ;;  %10604 = vlog2.f32 %v8986_v1  ;;  %v9304_v28 = vmul.f32 -0.5, %v14863_v23  ;;  %v9307_v11 = vand.u32 2147483647, %v14863_v23  ;;  %v8769_v6 = vmin.f32 %v14730_v19, 20.0 }
 0x664   :  { %v14877_v62 = vpop.eup %10594  ;;  %10606 = vlog2.f32 %v9301_v20  ;;  %v8815_v13 = vmul.f32 1.442695, %v8734_v44  ;;  %vm8658_vm6 = vcmp.gt.f32.partialorder %v14681_v35, 20.0  ;;  %v8990_v31 = vadd.f32 1.0, %v8989_v26 }
 0x665   :  { %v14880_v2 = vpop.f32.mrb[88].mxu0  ;;  %v9310_v41 = vadd.f32 1.0, %v14877_v62  ;;  %10608 = vpow2.f32 %v8813_v59  ;;  %v9313_v63 = vmul.f32 -0.5, %v14877_v62  ;;  %vm14899_vm12 = vcmp.lt.f32.partialorder %v8992_v42, 0.0004427343 }
 0x666   :  { %v14885_v10 = vpop.f32.mrb[89].mxu0  ;;  %vm8693_vm13 = vcmp.gt.f32.partialorder %v14683_v46, 20.0  ;;  %v9305_v18 = vadd.f32 1.0, %v9304_v28  ;;  %vm14904_vm4 = vcmp.lt.f32.partialorder %v9307_v11, 0.0004427343  ;;  %v8991_v40 = vmul.f32 %v10591_v36, %v8990_v31 }
 0x667   :  { %v14887_v17 = vpop.f32.mrb[90].mxu0  ;;  %10610 = vlog2.f32 %v9310_v41  ;;  %v9316_v7 = vand.u32 2147483647, %v14877_v62  ;;  %v8885_v27 = vmul.f32 1.442695, %v8769_v6  ;;  %vm8694_vm11 = vcmp.gt.f32.partialorder %v14685_v25, 20.0 }
 0x668   :  { %v14889_v16 = vpop.eup %10596  ;;  %v14892_v0 = vpop.f32.mrb[91].mxu0  ;;  %10612 = vpow2.f32 %v8815_v13  ;;  %v9314_v54 = vadd.f32 1.0, %v9313_v63  ;;  %v9306_v44 = vmul.f32 %v14863_v23, %v9305_v18  ;;  %vm8659_vm0 = vcmp.gt.f32.partialorder %v14688_v57, 20.0 }
 0x669   :  { %v14894_v60 = vpop.eup %10598  ;;  %v8995_v38 = vadd.f32 1.0, %v14889_v16  ;;  %v8998_v58 = vmul.f32 -0.5, %v14889_v16  ;;  %v9001_v49 = vand.u32 2147483647, %v14889_v16  ;;  %vm14930_vm15 = vcmp.lt.f32.partialorder %v9316_v7, 0.0004427343 }
 0x66a   :  { %v9004_v30 = vadd.f32 1.0, %v14894_v60  ;;  %v14909_v14 = vpop.eup %10600  ;;  %v9007_v48 = vmul.f32 -0.5, %v14894_v60  ;;  %v9010_v29 = vand.u32 2147483647, %v14894_v60  ;;  %vm8660_vm7 = vcmp.gt.f32.partialorder %v14690_v37, 20.0 }
 0x66b   :  { %10614 = vlog2.f32 %v8995_v38  ;;  %v9319_v39 = vadd.f32 1.0, %v14909_v14  ;;  %v9322_v1 = vmul.f32 -0.5, %v14909_v14  ;;  %v8999_v11 = vadd.f32 1.0, %v8998_v58 }
 0x66c   :  { %10616 = vlog2.f32 %v9004_v30  ;;  %v14916_v5 = vpop.f32.mrb[88].mxu1  ;;  %v14918_v43 = vpop.eup %10602  ;;  %vm14935_vm1 = vcmp.lt.f32.partialorder %v9001_v49, 0.0004427343  ;;  %v9008_v6 = vadd.f32 1.0, %v9007_v48  ;;  %v9315_v38 = vmul.f32 %v14877_v62, %v9314_v54 }
 0x66d   :  { %10618 = vpow2.f32 %v8885_v27  ;;  %v14922_v34 = vpop.f32.mrb[89].mxu1  ;;  %v10605_v52 = vpop.eup %10604  ;;  %v9328_v20 = vadd.f32 1.0, %v14918_v43  ;;  %v9331_v59 = vmul.f32 -0.5, %v14918_v43  ;;  %vm14947_vm8 = vcmp.lt.f32.partialorder %v9010_v29, 0.0004427343 }
 0x66e   :  { %10620 = vlog2.f32 %v9319_v39  ;;  %v14927_v26 = vpop.f32.mrb[90].mxu1  ;;  %v10607_v42 = vpop.eup %10606  ;;  %v8988_v36 = vmul.f32 0.6931472, %v10605_v52  ;;  %v9325_v30 = vand.u32 2147483647, %v14909_v14  ;;  %v9323_v49 = vadd.f32 1.0, %v9322_v1 }
 0x66f   :  { %v9303_v41 = vmul.f32 0.6931472, %v10607_v42  ;;  %10622 = vlog2.f32 %v9328_v20  ;;  %v14939_v31 = vpop.f32.mrb[91].mxu1  ;;  %v14941_v63 = vpop.eup %10608  ;;  %v9332_v62 = vadd.f32 1.0, %v9331_v59  ;;  %vm8695_vm9 = vcmp.gt.f32.partialorder %v14694_v53, 20.0 }
 0x670   :  { %v8994_v23 = vsel %vm14899_vm12, %v8991_v40, %v8988_v36  ;;  %v8770_v21 = vmin.f32 %v14736_v56, 20.0  ;;  %v9000_v52 = vmul.f32 %v14889_v16, %v8999_v11  ;;  %v9009_v1 = vmul.f32 %v14894_v60, %v9008_v6 }
 0x671   :  { %v14952_v7 = vpop.f32.mrb[92].mxu0  ;;  %v10611_v58 = vpop.eup %10610  ;;  %v9594_v27 = vsel %vm8658_vm6, %v14681_v35, %v8994_v23  ;;  %v9309_v12 = vsel %vm14904_vm4, %v9306_v44, %v9303_v41  ;;  %v9013_v35 = vadd.f32 1.0, %v14941_v63  ;;  %v9334_v20 = vand.u32 2147483647, %v14918_v43 }
 0x672   :  { %v14959_v48 = vpop.f32.mrb[93].mxu0  ;;  %v14961_v39 = vpop.eup %10612  ;;  %9666 = vst [vmem:[%s15906_s6 + $0x28] sm:$0xff] %v9594_v27  ;;  %v9629_v40 = vsel %vm8693_vm13, %v14683_v46, %v9309_v12  ;;  %v9312_v54 = vmul.f32 0.6931472, %v10611_v58  ;;  %vm14983_vm14 = vcmp.lt.f32.partialorder %v9325_v30, 0.0004427343  ;;  %v9333_v30 = vmul.f32 %v14918_v43, %v9332_v62 }
 0x673   :  { %v14972_v29 = vpop.f32.mrb[94].mxu0  ;;  %9701 = vst [vmem:[%s15906_s6 + $0x140] sm:$0xff] %v9629_v40  ;;  %v9022_v46 = vadd.f32 1.0, %v14961_v39  ;;  %vm8696_vm10 = vcmp.gt.f32.partialorder %v14701_v3, 20.0  ;;  %10624 = vlog2.f32 %v9013_v35  ;;  %v9016_v44 = vmul.f32 -0.5, %v14941_v63 }
 0x674   :  { %v9318_v42 = vsel %vm14930_vm15, %v9315_v38, %v9312_v54  ;;  %v14989_v16 = vpop.f32.mrb[95].mxu0  ;;  %v9025_v28 = vmul.f32 -0.5, %v14961_v39  ;;  %v9324_v38 = vmul.f32 %v14909_v14, %v9323_v49  ;;  %v8887_v58 = vmul.f32 1.442695, %v8770_v21 }
 0x675   :  { %v10615_v59 = vpop.eup %10614  ;;  %v9630_v11 = vsel %vm8694_vm11, %v14685_v25, %v9318_v42  ;;  %10626 = vlog2.f32 %v9022_v46  ;;  %vm15004_vm3 = vcmp.lt.f32.partialorder %v9334_v20, 0.0004427343  ;;  %v9019_v40 = vand.u32 2147483647, %v14941_v63 }
 0x676   :  { %v10617_v60 = vpop.eup %10616  ;;  %v8997_v41 = vmul.f32 0.6931472, %v10615_v59  ;;  %9702 = vst [vmem:[%s15906_s6 + $0x148] sm:$0xff] %v9630_v11  ;;  %v9017_v13 = vadd.f32 1.0, %v9016_v44  ;;  %vm8661_vm2 = vcmp.gt.f32.partialorder %v14716_v61, 20.0  ;;  %v9026_v20 = vadd.f32 1.0, %v9025_v28 }
 0x677   :  { %v14995_v6 = vpop.eup %10618  ;;  %v9006_v23 = vmul.f32 0.6931472, %v10617_v60  ;;  %vm8662_vm5 = vcmp.gt.f32.partialorder %v14723_v8, 20.0  ;;  %vm15041_vm6 = vcmp.lt.f32.partialorder %v9019_v40, 0.0004427343  ;;  %v8736_v36 = vmin.f32 %v14768_v22, 20.0 }
 0x678   :  { %v10621_v27 = vpop.eup %10620  ;;  %v9003_v25 = vsel %vm14935_vm1, %v9000_v52, %v8997_v41  ;;  %v9337_v54 = vadd.f32 1.0, %v14995_v6  ;;  %v15010_v35 = vpop.f32.mrb[92].mxu1  ;;  %v9340_v60 = vmul.f32 -0.5, %v14995_v6  ;;  %v9018_v41 = vmul.f32 %v14941_v63, %v9017_v13 }
 0x679   :  { %v9595_v14 = vsel %vm8659_vm0, %v14688_v57, %v9003_v25  ;;  %v9012_v43 = vsel %vm14947_vm8, %v9009_v1, %v9006_v23  ;;  %v9321_v49 = vmul.f32 0.6931472, %v10621_v27  ;;  %v15017_v62 = vpop.f32.mrb[93].mxu1  ;;  %v10623_v21 = vpop.eup %10622  ;;  %v9028_v57 = vand.u32 2147483647, %v14961_v39 }
 0x67a   :  { %9667 = vst [vmem:[%s15906_s6 + $0x30] sm:$0xff] %v9595_v14  ;;  %v9596_v52 = vsel %vm8660_vm7, %v14690_v37, %v9012_v43  ;;  %10628 = vlog2.f32 %v9337_v54  ;;  %v15027_v18 = vpop.f32.mrb[94].mxu1  ;;  %v9330_v46 = vmul.f32 0.6931472, %v10623_v21  ;;  %v8735_v37 = vmin.f32 %v14758_v24, 20.0 }
 0x67b   :  { %9668 = vst [vmem:[%s15906_s6 + $0x38] sm:$0xff] %v9596_v52  ;;  %v9327_v1 = vsel %vm14983_vm14, %v9324_v38, %v9321_v49  ;;  %10630 = vpow2.f32 %v8887_v58  ;;  %v15036_v59 = vpop.f32.mrb[95].mxu1  ;;  %vm15059_vm12 = vcmp.lt.f32.partialorder %v9028_v57, 0.0004427343  ;;  %v8819_v27 = vmul.f32 1.442695, %v8736_v36 }
 0x67c   :  { %v9631_v42 = vsel %vm8695_vm9, %v14694_v53, %v9327_v1  ;;  %v9336_v11 = vsel %vm15004_vm3, %v9333_v30, %v9330_v46  ;;  %v8817_v28 = vmul.f32 1.442695, %v8735_v37  ;;  %v8771_v53 = vmin.f32 %v14779_v15, 20.0 }
 0x67d   :  { %9703 = vst [vmem:[%s15906_s6 + $0x150] sm:$0xff] %v9631_v42  ;;  %v15054_v23 = vpop.f32.mrb[96].mxu0  ;;  %v9632_v38 = vsel %vm8696_vm10, %v14701_v3, %v9336_v11  ;;  %v8772_v25 = vmin.f32 %v14790_v47, 20.0  ;;  %v10625_v30 = vpop.eup %10624  ;;  %v9027_v63 = vmul.f32 %v14961_v39, %v9026_v20  ;;  %v8737_v3 = vmin.f32 %v14815_v50, 20.0 }
 0x67e   :  { %v15064_v12 = vpop.f32.mrb[97].mxu0  ;;  %9704 = vst [vmem:[%s15906_s6 + $0x158] sm:$0xff] %v9632_v38  ;;  %10632 = vpow2.f32 %v8817_v28  ;;  %v8889_v40 = vmul.f32 1.442695, %v8771_v53  ;;  %v9015_v43 = vmul.f32 0.6931472, %v10625_v30 }
 0x67f   :  { %v15071_v54 = vpop.f32.mrb[98].mxu0  ;;  %v10627_v14 = vpop.eup %10626  ;;  %v9341_v49 = vadd.f32 1.0, %v9340_v60  ;;  %10634 = vpow2.f32 %v8819_v27  ;;  %v8891_v13 = vmul.f32 1.442695, %v8772_v25  ;;  %v8821_v57 = vmul.f32 1.442695, %v8737_v3 }
 0x680   :  { %v15073_v21 = vpop.f32.mrb[99].mxu0  ;;  %v9024_v52 = vmul.f32 0.6931472, %v10627_v14  ;;  %10636 = vpow2.f32 %v8889_v40  ;;  %v8738_v1 = vmin.f32 %v14820_v9, 20.0  ;;  %v9021_v39 = vsel %vm15041_vm6, %v9018_v41, %v9015_v43 }
 0x681   :  { %v9343_v20 = vand.u32 2147483647, %v14995_v6  ;;  %10638 = vpow2.f32 %v8891_v13  ;;  %v8773_v46 = vmin.f32 %v14828_v55, 20.0  ;;  %v9597_v37 = vsel %vm8661_vm2, %v14716_v61, %v9021_v39 }
 0x682   :  { %v9030_v42 = vsel %vm15059_vm12, %v9027_v63, %v9024_v52  ;;  %10640 = vpow2.f32 %v8821_v57  ;;  %v8823_v60 = vmul.f32 1.442695, %v8738_v1  ;;  %9669 = vst [vmem:[%s15906_s6 + $0x40] sm:$0xff] %v9597_v37  ;;  %v8774_v41 = vmin.f32 %v14839_v45, 20.0 }
 0x683   :  { %v9598_v44 = vsel %vm8662_vm5, %v14723_v8, %v9030_v42  ;;  %v8893_v11 = vmul.f32 1.442695, %v8773_v46  ;;  %v9342_v38 = vmul.f32 %v14995_v6, %v9341_v49  ;;  %v8739_v58 = vmin.f32 %v14856_v33, 20.0 }
 0x684   :  { %v10629_v36 = vpop.eup %10628  ;;  %v15092_v28 = vpop.f32.mrb[96].mxu1  ;;  %9670 = vst [vmem:[%s15906_s6 + $0x48] sm:$0xff] %v9598_v44  ;;  %10642 = vpow2.f32 %v8823_v60  ;;  %vm8697_vm13 = vcmp.gt.f32.partialorder %v14730_v19, 20.0  ;;  %vm9344_vm4 = vcmp.lt.f32.partialorder %v9343_v20, 0.0004427343  ;;  %vm8698_vm11 = vcmp.gt.f32.partialorder %v14736_v56, 20.0 }
 0x685   :  { %16484 = vst [vmem:[#allocation3_spill] sm:$0xff] %v15092_v28  ;;  %v10631_v61 = vpop.eup %10630  ;;  %v9339_v53 = vmul.f32 0.6931472, %v10629_v36  ;;  %v15099_v27 = vpop.f32.mrb[97].mxu1  ;;  %10644 = vpow2.f32 %v8893_v11  ;;  %v8895_v63 = vmul.f32 1.442695, %v8774_v41 }
 0x686   :  { %16485 = vst [vmem:[#allocation7_spill] sm:$0xff] %v15099_v27  ;;  %v9346_v8 = vadd.f32 1.0, %v10631_v61  ;;  %v15102_v25 = vpop.f32.mrb[98].mxu1  ;;  %v8825_v40 = vmul.f32 1.442695, %v8739_v58  ;;  %v9349_v43 = vmul.f32 -0.5, %v10631_v61 }
 0x687   :  { %16486 = vst [vmem:[#allocation11_spill] sm:$0xff] %v15102_v25  ;;  %v9345_v30 = vsel %vm9344_vm4, %v9342_v38, %v9339_v53  ;;  %v15104_v3 = vpop.f32.mrb[99].mxu1  ;;  %v9352_v20 = vand.u32 2147483647, %v10631_v61  ;;  %vm8663_vm1 = vcmp.gt.f32.partialorder %v14758_v24, 20.0  ;;  %vm8664_vm8 = vcmp.gt.f32.partialorder %v14768_v22, 20.0 }
 0x688   :  { %16487 = vst [vmem:[#allocation33_spill] sm:$0xff] %v15104_v3  ;;  %v9633_v14 = vsel %vm8697_vm13, %v14730_v19, %v9345_v30  ;;  %10646 = vlog2.f32 %v9346_v8  ;;  %v10633_v6 = vpop.eup %10632  ;;  %v9350_v41 = vadd.f32 1.0, %v9349_v43  ;;  %vm8699_vm9 = vcmp.gt.f32.partialorder %v14779_v15, 20.0 }
 0x689   :  { %9705 = vst [vmem:[%s15906_s6 + $0x160] sm:$0xff] %v9633_v14  ;;  %10648 = vpow2.f32 %v8895_v63  ;;  %v15110_v49 = vpop.f32.mrb[100].mxu0  ;;  %v10635_v13 = vpop.eup %10634  ;;  %v9031_v52 = vadd.f32 1.0, %v10633_v6  ;;  %v9034_v57 = vmul.f32 -0.5, %v10633_v6  ;;  %v9037_v60 = vand.u32 2147483647, %v10633_v6 }
 0x68a   :  { %16488 = vst [vmem:[#allocation14_spill] sm:$0xff] %v15110_v49  ;;  %v15112_v1 = vpop.f32.mrb[101].mxu0  ;;  %v10637_v39 = vpop.eup %10636  ;;  %v9040_v46 = vadd.f32 1.0, %v10635_v13  ;;  %v9043_v37 = vmul.f32 -0.5, %v10635_v13  ;;  %10650 = vpow2.f32 %v8825_v40  ;;  %v9046_v53 = vand.u32 2147483647, %v10635_v13 }
 0x68b   :  { %16489 = vst [vmem:[#allocation41_spill] sm:$0xff] %v15112_v1  ;;  %v15114_v19 = vpop.f32.mrb[102].mxu0  ;;  %v10639_v42 = vpop.eup %10638  ;;  %10652 = vlog2.f32 %v9031_v52  ;;  %v9355_v36 = vadd.f32 1.0, %v10637_v39  ;;  %v9358_v38 = vmul.f32 -0.5, %v10637_v39  ;;  %v9035_v58 = vadd.f32 1.0, %v9034_v57 }
 0x68c   :  { %16490 = vst [vmem:[#allocation23_spill] sm:$0xff] %v15114_v19  ;;  %v15116_v44 = vpop.f32.mrb[103].mxu0  ;;  %v15118_v11 = vpop.eup %10640  ;;  %10654 = vlog2.f32 %v9040_v46  ;;  %v9044_v8 = vadd.f32 1.0, %v9043_v37  ;;  %v9364_v30 = vadd.f32 1.0, %v10639_v42  ;;  %vm15123_vm15 = vcmp.lt.f32.partialorder %v9352_v20, 0.0004427343 }
 0x68d   :  { %16491 = vst [vmem:[#allocation34_spill] sm:$0xff] %v15116_v44  ;;  %10656 = vlog2.f32 %v9355_v36  ;;  %v9367_v14 = vmul.f32 -0.5, %v10639_v42  ;;  %vm15129_vm0 = vcmp.lt.f32.partialorder %v9037_v60, 0.0004427343  ;;  %v9361_v46 = vand.u32 2147483647, %v10637_v39 }
 0x68e   :  { %v15121_v63 = vpop.eup %10642  ;;  %10658 = vlog2.f32 %v9364_v30  ;;  %v9049_v57 = vadd.f32 1.0, %v15118_v11  ;;  %v9052_v37 = vmul.f32 -0.5, %v15118_v11  ;;  %v9351_v19 = vmul.f32 %v10631_v61, %v9350_v41 }
 0x68f   :  { %v15137_v20 = vpop.eup %10644  ;;  %vm15140_vm7 = vcmp.lt.f32.partialorder %v9046_v53, 0.0004427343  ;;  %v9359_v60 = vadd.f32 1.0, %v9358_v38  ;;  %v9368_v44 = vadd.f32 1.0, %v9367_v14  ;;  %v9370_v1 = vand.u32 2147483647, %v10639_v42 }
 0x690   :  { %v15135_v36 = vpop.f32.mrb[100].mxu1  ;;  %v9036_v3 = vmul.f32 %v10633_v6, %v9035_v58  ;;  %v9045_v25 = vmul.f32 %v10635_v13, %v9044_v8  ;;  %10660 = vlog2.f32 %v9049_v57  ;;  %v9053_v38 = vadd.f32 1.0, %v9052_v37 }
 0x691   :  { %16496 = vst [vmem:[#allocation5_spill] sm:$0xff] %v15135_v36  ;;  %v15144_v49 = vpop.f32.mrb[101].mxu1  ;;  %v9058_v36 = vadd.f32 1.0, %v15121_v63  ;;  %v9055_v14 = vand.u32 2147483647, %v15118_v11  ;;  %v9373_v58 = vadd.f32 1.0, %v15137_v20 }
 0x692   :  { %16499 = vst [vmem:[#allocation35_spill] sm:$0xff] %v15144_v49  ;;  %v10647_v30 = vpop.eup %10646  ;;  %v15148_v61 = vpop.f32.mrb[102].mxu1  ;;  %v9061_v49 = vmul.f32 -0.5, %v15121_v63  ;;  %vm15155_vm14 = vcmp.lt.f32.partialorder %v9361_v46, 0.0004427343  ;;  %vm8700_vm10 = vcmp.gt.f32.partialorder %v14790_v47, 20.0 }
 0x693   :  { %16500 = vst [vmem:[#allocation32_spill] sm:$0xff] %v15148_v61  ;;  %v15150_v41 = vpop.eup %10648  ;;  %v9348_v53 = vmul.f32 0.6931472, %v10647_v30  ;;  %10662 = vlog2.f32 %v9058_v36  ;;  %v9064_v13 = vand.u32 2147483647, %v15121_v63  ;;  %v15161_v8 = vpop.f32.mrb[103].mxu1  ;;  %v9360_v30 = vmul.f32 %v10637_v39, %v9359_v60 }
 0x694   :  { %16503 = vst [vmem:[#allocation42_spill] sm:$0xff] %v15161_v8  ;;  %v15163_v57 = vpop.eup %10650  ;;  %v9369_v61 = vmul.f32 %v10639_v42, %v9368_v44  ;;  %vm15168_vm3 = vcmp.lt.f32.partialorder %v9370_v1, 0.0004427343  ;;  %10664 = vlog2.f32 %v9373_v58  ;;  %v9376_v28 = vmul.f32 -0.5, %v15137_v20 }
 0x695   :  { %v9354_v37 = vsel %vm15123_vm15, %v9351_v19, %v9348_v53  ;;  %v15172_v36 = vpop.f32.mrb[104].mxu0  ;;  %v10653_v27 = vpop.eup %10652  ;;  %v9382_v19 = vadd.f32 1.0, %v15150_v41  ;;  %vm8665_vm2 = vcmp.gt.f32.partialorder %v14815_v50, 20.0  ;;  %v9054_v42 = vmul.f32 %v15118_v11, %v9053_v38 }
 0x696   :  { %v9634_v8 = vsel %vm8698_vm11, %v14736_v56, %v9354_v37  ;;  %v15179_v39 = vpop.f32.mrb[105].mxu0  ;;  %v10655_v40 = vpop.eup %10654  ;;  %v9033_v1 = vmul.f32 0.6931472, %v10653_v27  ;;  %vm15186_vm5 = vcmp.lt.f32.partialorder %v9055_v14, 0.0004427343  ;;  %v9062_v56 = vadd.f32 1.0, %v9061_v49 }
 0x697   :  { %9706 = vst [vmem:[%s15906_s6 + $0x168] sm:$0xff] %v9634_v8  ;;  %v10657_v60 = vpop.eup %10656  ;;  %v9042_v53 = vmul.f32 0.6931472, %v10655_v40  ;;  %vm15190_vm6 = vcmp.lt.f32.partialorder %v9064_v13, 0.0004427343  ;;  %10666 = vlog2.f32 %v9382_v19  ;;  %v9067_v37 = vadd.f32 1.0, %v15163_v57 }
 0x698   :  { %v15195_v8 = vpop.f32.mrb[106].mxu0  ;;  %v9039_v27 = vsel %vm15129_vm0, %v9036_v3, %v9033_v1  ;;  %v9357_v11 = vmul.f32 0.6931472, %v10657_v60  ;;  %vm8666_vm12 = vcmp.gt.f32.partialorder %v14820_v9, 20.0  ;;  %v9379_v38 = vand.u32 2147483647, %v15137_v20  ;;  %v10659_v13 = vpop.eup %10658 }
 0x699   :  { %16510 = vst [vmem:[#allocation13_spill] sm:$0xff] %v15195_v8  ;;  %v9385_v49 = vmul.f32 -0.5, %v15150_v41  ;;  %v15202_v14 = vpop.f32.mrb[107].mxu0  ;;  %v9599_v19 = vsel %vm8663_vm1, %v14758_v24, %v9039_v27  ;;  %v9048_v40 = vsel %vm15140_vm7, %v9045_v25, %v9042_v53  ;;  %v9377_v8 = vadd.f32 1.0, %v9376_v28 }
 0x69a   :  { %10668 = vlog2.f32 %v9067_v37  ;;  %9671 = vst [vmem:[%s15906_s6 + $0x50] sm:$0xff] %v9599_v19  ;;  %v9600_v3 = vsel %vm8664_vm8, %v14768_v22, %v9048_v40  ;;  %v9363_v43 = vsel %vm15155_vm14, %v9360_v30, %v9357_v11  ;;  %v9366_v1 = vmul.f32 0.6931472, %v10659_v13  ;;  %v10661_v24 = vpop.eup %10660 }
 0x69b   :  { %v9063_v60 = vmul.f32 %v15121_v63, %v9062_v56  ;;  %vm8701_vm13 = vcmp.gt.f32.partialorder %v14828_v55, 20.0  ;;  %9672 = vst [vmem:[%s15906_s6 + $0x58] sm:$0xff] %v9600_v3  ;;  %v9635_v28 = vsel %vm8699_vm9, %v14779_v15, %v9363_v43  ;;  %v9388_v25 = vand.u32 2147483647, %v15150_v41 }
 0x69c   :  { %v9070_v22 = vmul.f32 -0.5, %v15163_v57  ;;  %v16511_v52 = vmin.f32 %v14861_v4, 20.0  ;;  %9707 = vst [vmem:[%s15906_s6 + $0x170] sm:$0xff] %v9635_v28  ;;  %v9372_v63 = vsel %vm15168_vm3, %v9369_v61, %v9366_v1  ;;  %v9051_v30 = vmul.f32 0.6931472, %v10661_v24  ;;  %v15251_v19 = vpop.f32.mrb[104].mxu1 }
 0x69d   :  { %vm8702_vm4 = vcmp.gt.f32.partialorder %v14839_v45, 20.0  ;;  %v9386_v56 = vadd.f32 1.0, %v9385_v49  ;;  %v16512_v15 = vmin.f32 %v14869_v51, 20.0  ;;  %v10663_v37 = vpop.eup %10662  ;;  %v9636_v27 = vsel %vm8700_vm10, %v14790_v47, %v9372_v63  ;;  %v15261_v44 = vpop.f32.mrb[105].mxu1 }
 0x69e   :  { %v8827_v6 = vmul.f32 1.442695, %v16511_v52  ;;  %v9378_v11 = vmul.f32 %v15137_v20, %v9377_v8  ;;  %vm15241_vm11 = vcmp.lt.f32.partialorder %v9379_v38, 0.0004427343  ;;  %9708 = vst [vmem:[%s15906_s6 + $0x178] sm:$0xff] %v9636_v27  ;;  %v9057_v61 = vsel %vm15186_vm5, %v9054_v42, %v9051_v30  ;;  %v10665_v47 = vpop.eup %10664  ;;  %v15269_v1 = vpop.f32.mrb[106].mxu1 }
 0x69f   :  { %v8897_v53 = vmul.f32 1.442695, %v16512_v15  ;;  %v9060_v46 = vmul.f32 0.6931472, %v10663_v37  ;;  %v8776_v49 = vmin.f32 %v14875_v32, 20.0  ;;  %v9601_v20 = vsel %vm8665_vm2, %v14815_v50, %v9057_v61 }
 0x6a0   :  { %10670 = vpow2.f32 %v8827_v6  ;;  %vm15256_vm15 = vcmp.lt.f32.partialorder %v9388_v25, 0.0004427343  ;;  %v9071_v38 = vadd.f32 1.0, %v9070_v22  ;;  %v8741_v40 = vmin.f32 %v14880_v2, 20.0  ;;  %9673 = vst [vmem:[%s15906_s6 + $0x60] sm:$0xff] %v9601_v20  ;;  %v15282_v6 = vpop.f32.mrb[107].mxu1 }
 0x6a1   :  { %10672 = vpow2.f32 %v8897_v53  ;;  %v9066_v42 = vsel %vm15190_vm6, %v9063_v60, %v9060_v46  ;;  %v9375_v3 = vmul.f32 0.6931472, %v10665_v47  ;;  %v9387_v43 = vmul.f32 %v15150_v41, %v9386_v56  ;;  %v10667_v24 = vpop.eup %10666 }
 0x6a2   :  { %v8899_v50 = vmul.f32 1.442695, %v8776_v49  ;;  %v9602_v28 = vsel %vm8666_vm12, %v14820_v9, %v9066_v42  ;;  %v9073_v25 = vand.u32 2147483647, %v15163_v57  ;;  %v8829_v22 = vmul.f32 1.442695, %v8741_v40 }
 0x6a3   :  { %v8742_v52 = vmin.f32 %v14885_v10, 20.0  ;;  %9674 = vst [vmem:[%s15906_s6 + $0x68] sm:$0xff] %v9602_v28  ;;  %v9381_v41 = vsel %vm15241_vm11, %v9378_v11, %v9375_v3  ;;  %v9384_v58 = vmul.f32 0.6931472, %v10667_v24  ;;  %v8777_v60 = vmin.f32 %v14887_v17, 20.0 }
 0x6a4   :  { %10674 = vpow2.f32 %v8899_v50  ;;  %v10669_v63 = vpop.eup %10668  ;;  %v9637_v9 = vsel %vm8701_vm13, %v14828_v55, %v9381_v41  ;;  %v9072_v30 = vmul.f32 %v15163_v57, %v9071_v38  ;;  %v8778_v27 = vmin.f32 %v14892_v0, 20.0 }
 0x6a5   :  { %10676 = vpow2.f32 %v8829_v22  ;;  %v8831_v56 = vmul.f32 1.442695, %v8742_v52  ;;  %9709 = vst [vmem:[%s15906_s6 + $0x180] sm:$0xff] %v9637_v9  ;;  %v9390_v15 = vsel %vm15256_vm15, %v9387_v43, %v9384_v58  ;;  %v9069_v53 = vmul.f32 0.6931472, %v10669_v63 }
 0x6a6   :  { %v8901_v37 = vmul.f32 1.442695, %v8777_v60  ;;  %v9638_v11 = vsel %vm8702_vm4, %v14839_v45, %v9390_v15  ;;  %vm9074_vm0 = vcmp.lt.f32.partialorder %v9073_v25, 0.0004427343  ;;  %v8743_v55 = vmin.f32 %v14916_v5, 20.0 }
 0x6a7   :  { %10678 = vpow2.f32 %v8831_v56  ;;  %9710 = vst [vmem:[%s15906_s6 + $0x188] sm:$0xff] %v9638_v11  ;;  %vm8667_vm1 = vcmp.gt.f32.partialorder %v14856_v33, 20.0  ;;  %v9075_v57 = vsel %vm9074_vm0, %v9072_v30, %v9069_v53  ;;  %v8903_v13 = vmul.f32 1.442695, %v8778_v27 }
 0x6a8   :  { %10680 = vpow2.f32 %v8901_v37  ;;  %v9603_v46 = vsel %vm8667_vm1, %v14856_v33, %v9075_v57  ;;  %v8833_v49 = vmul.f32 1.442695, %v8743_v55  ;;  %v8744_v47 = vmin.f32 %v14922_v34, 20.0 }
 0x6a9   :  { %9675 = vst [vmem:[%s15906_s6 + $0x70] sm:$0xff] %v9603_v46  ;;  %10682 = vpow2.f32 %v8903_v13  ;;  %v8779_v41 = vmin.f32 %v14927_v26, 20.0  ;;  %vm8668_vm8 = vcmp.gt.f32.partialorder %v14861_v4, 20.0  ;;  %v8780_v9 = vmin.f32 %v14939_v31, 20.0 }
 0x6aa   :  { %v10671_v61 = vpop.eup %10670  ;;  %10684 = vpow2.f32 %v8833_v49  ;;  %v8835_v42 = vmul.f32 1.442695, %v8744_v47  ;;  %vm8703_vm9 = vcmp.gt.f32.partialorder %v14869_v51, 20.0  ;;  %vm8704_vm3 = vcmp.gt.f32.partialorder %v14875_v32, 20.0 }
 0x6ab   :  { %v10673_v45 = vpop.eup %10672  ;;  %v9076_v20 = vadd.f32 1.0, %v10671_v61  ;;  %v9079_v8 = vmul.f32 -0.5, %v10671_v61  ;;  %v9082_v40 = vand.u32 2147483647, %v10671_v61  ;;  %v8905_v49 = vmul.f32 1.442695, %v8779_v41 }
 0x6ac   :  { %v9391_v38 = vadd.f32 1.0, %v10673_v45  ;;  %v9394_v43 = vmul.f32 -0.5, %v10673_v45  ;;  %v9397_v33 = vand.u32 2147483647, %v10673_v45  ;;  %vm8669_vm2 = vcmp.gt.f32.partialorder %v14880_v2, 20.0 }
 0x6ad   :  { %10686 = vlog2.f32 %v9076_v20  ;;  %v9080_v24 = vadd.f32 1.0, %v9079_v8  ;;  %vm15307_vm7 = vcmp.lt.f32.partialorder %v9082_v40, 0.0004427343  ;;  %v8907_v40 = vmul.f32 1.442695, %v8780_v9 }
 0x6ae   :  { %10688 = vlog2.f32 %v9391_v38  ;;  %v10675_v3 = vpop.eup %10674  ;;  %v9395_v56 = vadd.f32 1.0, %v9394_v43  ;;  %vm15315_vm14 = vcmp.lt.f32.partialorder %v9397_v33, 0.0004427343  ;;  %vm8670_vm6 = vcmp.gt.f32.partialorder %v14885_v10, 20.0 }
 0x6af   :  { %10690 = vpow2.f32 %v8835_v42  ;;  %v10677_v50 = vpop.eup %10676  ;;  %v9400_v28 = vadd.f32 1.0, %v10675_v3  ;;  %v9403_v22 = vmul.f32 -0.5, %v10675_v3  ;;  %v9406_v60 = vand.u32 2147483647, %v10675_v3 }
 0x6b0   :  { %v9085_v52 = vadd.f32 1.0, %v10677_v50  ;;  %v9088_v63 = vmul.f32 -0.5, %v10677_v50  ;;  %v9081_v37 = vmul.f32 %v10671_v61, %v9080_v24  ;;  %v9091_v27 = vand.u32 2147483647, %v10677_v50 }
 0x6b1   :  { %v10679_v58 = vpop.eup %10678  ;;  %10692 = vlog2.f32 %v9400_v28  ;;  %v9404_v13 = vadd.f32 1.0, %v9403_v22  ;;  %vm15321_vm10 = vcmp.lt.f32.partialorder %v9406_v60, 0.0004427343  ;;  %v9396_v61 = vmul.f32 %v10673_v45, %v9395_v56 }
 0x6b2   :  { %v10681_v30 = vpop.eup %10680  ;;  %10694 = vlog2.f32 %v9085_v52  ;;  %v9094_v53 = vadd.f32 1.0, %v10679_v58  ;;  %v9097_v11 = vmul.f32 -0.5, %v10679_v58  ;;  %v9089_v8 = vadd.f32 1.0, %v9088_v63 }
 0x6b3   :  { %v9409_v55 = vadd.f32 1.0, %v10681_v30  ;;  %v10683_v57 = vpop.eup %10682  ;;  %v9412_v46 = vmul.f32 -0.5, %v10681_v30  ;;  %v9100_v43 = vand.u32 2147483647, %v10679_v58  ;;  %v9415_v33 = vand.u32 2147483647, %v10681_v30 }
 0x6b4   :  { %10696 = vlog2.f32 %v9094_v53  ;;  %v15319_v47 = vpop.eup %10684  ;;  %v9418_v38 = vadd.f32 1.0, %v10683_v57  ;;  %v9421_v24 = vmul.f32 -0.5, %v10683_v57  ;;  %v9098_v52 = vadd.f32 1.0, %v9097_v11 }
 0x6b5   :  { %10698 = vlog2.f32 %v9409_v55  ;;  %v9103_v41 = vadd.f32 1.0, %v15319_v47  ;;  %v9405_v53 = vmul.f32 %v10675_v3, %v9404_v13  ;;  %vm15330_vm5 = vcmp.lt.f32.partialorder %v9091_v27, 0.0004427343 }
 0x6b6   :  { %10700 = vlog2.f32 %v9418_v38  ;;  %v9413_v45 = vadd.f32 1.0, %v9412_v46  ;;  %v9090_v55 = vmul.f32 %v10677_v50, %v9089_v8  ;;  %vm8705_vm12 = vcmp.gt.f32.partialorder %v14887_v17, 20.0 }
 0x6b7   :  { %v10687_v42 = vpop.eup %10686  ;;  %10702 = vlog2.f32 %v9103_v41  ;;  %v9422_v27 = vadd.f32 1.0, %v9421_v24  ;;  %v9099_v25 = vmul.f32 %v10679_v58, %v9098_v52  ;;  %vm15350_vm13 = vcmp.lt.f32.partialorder %v9100_v43, 0.0004427343 }
 0x6b8   :  { %v10689_v28 = vpop.eup %10688  ;;  %v9078_v22 = vmul.f32 0.6931472, %v10687_v42  ;;  %v9424_v42 = vand.u32 2147483647, %v10683_v57  ;;  %vm15354_vm4 = vcmp.lt.f32.partialorder %v9415_v33, 0.0004427343  ;;  %v9414_v38 = vmul.f32 %v10681_v30, %v9413_v45 }
 0x6b9   :  { %v15328_v60 = vpop.eup %10690  ;;  %v9393_v63 = vmul.f32 0.6931472, %v10689_v28  ;;  %vm8706_vm11 = vcmp.gt.f32.partialorder %v14892_v0, 20.0  ;;  %v9109_v43 = vand.u32 2147483647, %v15319_v47  ;;  %v9423_v28 = vmul.f32 %v10683_v57, %v9422_v27 }
 0x6ba   :  { %v9084_v56 = vsel %vm15307_vm7, %v9081_v37, %v9078_v22  ;;  %v9112_v13 = vadd.f32 1.0, %v15328_v60  ;;  %vm15363_vm15 = vcmp.lt.f32.partialorder %v9424_v42, 0.0004427343  ;;  %v8745_v30 = vmin.f32 %v14952_v7, 20.0 }
 0x6bb   :  { %v9604_v11 = vsel %vm8668_vm8, %v14861_v4, %v9084_v56  ;;  %v9399_v3 = vsel %vm15315_vm14, %v9396_v61, %v9393_v63  ;;  %v10693_v46 = vpop.eup %10692  ;;  %v9115_v45 = vmul.f32 -0.5, %v15328_v60  ;;  %v9118_v9 = vand.u32 2147483647, %v15328_v60 }
 0x6bc   :  { %9676 = vst [vmem:[%s15906_s6 + $0x78] sm:$0xff] %v9604_v11  ;;  %v9639_v50 = vsel %vm8703_vm9, %v14869_v51, %v9399_v3  ;;  %v10695_v37 = vpop.eup %10694  ;;  %v9402_v8 = vmul.f32 0.6931472, %v10693_v46  ;;  %v9106_v51 = vmul.f32 -0.5, %v15319_v47  ;;  %10704 = vlog2.f32 %v9112_v13 }
 0x6bd   :  { %9711 = vst [vmem:[%s15906_s6 + $0x190] sm:$0xff] %v9639_v50  ;;  %v9087_v58 = vmul.f32 0.6931472, %v10695_v37  ;;  %10706 = vpow2.f32 %v8905_v49  ;;  %v8746_v56 = vmin.f32 %v14959_v48, 20.0  ;;  %v9116_v13 = vadd.f32 1.0, %v9115_v45 }
 0x6be   :  { %v10697_v33 = vpop.eup %10696  ;;  %v9408_v24 = vsel %vm15321_vm10, %v9405_v53, %v9402_v8  ;;  %10708 = vpow2.f32 %v8907_v40  ;;  %v9107_v20 = vadd.f32 1.0, %v9106_v51  ;;  %v8837_v40 = vmul.f32 1.442695, %v8745_v30 }
 0x6bf   :  { %v10699_v22 = vpop.eup %10698  ;;  %v9640_v52 = vsel %vm8704_vm3, %v14875_v32, %v9408_v24  ;;  %v9093_v41 = vsel %vm15330_vm5, %v9090_v55, %v9087_v58  ;;  %v9096_v63 = vmul.f32 0.6931472, %v10697_v33  ;;  %v8781_v55 = vmin.f32 %v14972_v29, 20.0 }
 0x6c0   :  { %9712 = vst [vmem:[%s15906_s6 + $0x198] sm:$0xff] %v9640_v52  ;;  %v9605_v57 = vsel %vm8669_vm2, %v14880_v2, %v9093_v41  ;;  %v9411_v49 = vmul.f32 0.6931472, %v10699_v22  ;;  %v10701_v53 = vpop.eup %10700  ;;  %10710 = vpow2.f32 %v8837_v40  ;;  %v8839_v46 = vmul.f32 1.442695, %v8746_v56 }
 0x6c1   :  { %9677 = vst [vmem:[%s15906_s6 + $0x80] sm:$0xff] %v9605_v57  ;;  %v9102_v32 = vsel %vm15350_vm13, %v9099_v25, %v9096_v63  ;;  %v9420_v11 = vmul.f32 0.6931472, %v10701_v53  ;;  %v10703_v3 = vpop.eup %10702  ;;  %v8909_v50 = vmul.f32 1.442695, %v8781_v55  ;;  %v9108_v4 = vmul.f32 %v15319_v47, %v9107_v20 }
 0x6c2   :  { %v9606_v2 = vsel %vm8670_vm6, %v14885_v10, %v9102_v32  ;;  %v9417_v42 = vsel %vm15354_vm4, %v9414_v38, %v9411_v49  ;;  %v9105_v25 = vmul.f32 0.6931472, %v10703_v3  ;;  %v8782_v15 = vmin.f32 %v14989_v16, 20.0 }
 0x6c3   :  { %9678 = vst [vmem:[%s15906_s6 + $0x88] sm:$0xff] %v9606_v2  ;;  %v9641_v27 = vsel %vm8705_vm12, %v14887_v17, %v9417_v42  ;;  %v9426_v10 = vsel %vm15363_vm15, %v9423_v28, %v9420_v11  ;;  %vm9110_vm0 = vcmp.lt.f32.partialorder %v9109_v43, 0.0004427343  ;;  %10712 = vpow2.f32 %v8839_v46  ;;  %v16549_v46 = vld [vmem:[#allocation3_spill] sm:$0xff] }
 0x6c4   :  { %9713 = vst [vmem:[%s15906_s6 + $0x1a0] sm:$0xff] %v9641_v27  ;;  %v9642_v37 = vsel %vm8706_vm11, %v14892_v0, %v9426_v10  ;;  %v8747_v17 = vmin.f32 %v15010_v35, 20.0  ;;  %vm8671_vm1 = vcmp.gt.f32.partialorder %v14916_v5, 20.0  ;;  %v9111_v38 = vsel %vm9110_vm0, %v9108_v4, %v9105_v25 }
 0x6c5   :  { %9714 = vst [vmem:[%s15906_s6 + $0x1a8] sm:$0xff] %v9642_v37  ;;  %10714 = vpow2.f32 %v8909_v50  ;;  %v8911_v47 = vmul.f32 1.442695, %v8782_v15  ;;  %v9607_v58 = vsel %vm8671_vm1, %v14916_v5, %v9111_v38  ;;  %v9117_v0 = vmul.f32 %v15328_v60, %v9116_v13 }
 0x6c6   :  { %v10705_v8 = vpop.eup %10704  ;;  %v8748_v43 = vmin.f32 %v15017_v62, 20.0  ;;  %9679 = vst [vmem:[%s15906_s6 + $0x90] sm:$0xff] %v9607_v58  ;;  %vm9119_vm7 = vcmp.lt.f32.partialorder %v9118_v9, 0.0004427343  ;;  %v8841_v28 = vmul.f32 1.442695, %v8747_v17 }
 0x6c7   :  { %v10707_v51 = vpop.eup %10706  ;;  %v9114_v61 = vmul.f32 0.6931472, %v10705_v8  ;;  %10716 = vpow2.f32 %v8911_v47  ;;  %vm8672_vm8 = vcmp.gt.f32.partialorder %v14922_v34, 20.0  ;;  %v8783_v63 = vmin.f32 %v15027_v18, 20.0 }
 0x6c8   :  { %v10709_v33 = vpop.eup %10708  ;;  %v9427_v24 = vadd.f32 1.0, %v10707_v51  ;;  %v9430_v60 = vmul.f32 -0.5, %v10707_v51  ;;  %v8843_v52 = vmul.f32 1.442695, %v8748_v43  ;;  %v9433_v45 = vand.u32 2147483647, %v10707_v51 }
 0x6c9   :  { %v9120_v30 = vsel %vm9119_vm7, %v9117_v0, %v9114_v61  ;;  %v9436_v22 = vadd.f32 1.0, %v10709_v33  ;;  %v9439_v57 = vmul.f32 -0.5, %v10709_v33  ;;  %v9442_v20 = vand.u32 2147483647, %v10709_v33 }
 0x6ca   :  { %v9608_v5 = vsel %vm8672_vm8, %v14922_v34, %v9120_v30  ;;  %10718 = vlog2.f32 %v9427_v24  ;;  %v15428_v41 = vpop.eup %10710  ;;  %v8913_v34 = vmul.f32 1.442695, %v8783_v63  ;;  %v8784_v40 = vmin.f32 %v15036_v59, 20.0 }
 0x6cb   :  { %9680 = vst [vmem:[%s15906_s6 + $0x98] sm:$0xff] %v9608_v5  ;;  %10720 = vlog2.f32 %v9436_v22  ;;  %v9121_v49 = vadd.f32 1.0, %v15428_v41  ;;  %vm8707_vm9 = vcmp.gt.f32.partialorder %v14927_v26, 20.0  ;;  %v9431_v32 = vadd.f32 1.0, %v9430_v60 }
 0x6cc   :  { %10722 = vpow2.f32 %v8841_v28  ;;  %v9124_v56 = vmul.f32 -0.5, %v15428_v41  ;;  %v9127_v55 = vand.u32 2147483647, %v15428_v41  ;;  %vm15438_vm14 = vcmp.lt.f32.partialorder %v9433_v45, 0.0004427343 }
 0x6cd   :  { %10724 = vpow2.f32 %v8843_v52  ;;  %v10713_v53 = vpop.eup %10712  ;;  %vm8708_vm10 = vcmp.gt.f32.partialorder %v14939_v31, 20.0  ;;  %v8749_v3 = vmin.f32 %v15054_v23, 20.0  ;;  %v9440_v13 = vadd.f32 1.0, %v9439_v57 }
 0x6ce   :  { %10726 = vlog2.f32 %v9121_v49  ;;  %v9130_v2 = vadd.f32 1.0, %v10713_v53  ;;  %vm15447_vm3 = vcmp.lt.f32.partialorder %v9442_v20, 0.0004427343  ;;  %v8915_v50 = vmul.f32 1.442695, %v8784_v40 }
 0x6cf   :  { %v15434_v9 = vpop.eup %10714  ;;  %10728 = vpow2.f32 %v8913_v34  ;;  %v9133_v10 = vmul.f32 -0.5, %v10713_v53  ;;  %v9432_v37 = vmul.f32 %v10707_v51, %v9431_v32  ;;  %vm8673_vm2 = vcmp.gt.f32.partialorder %v14952_v7, 20.0 }
 0x6d0   :  { %v9445_v11 = vadd.f32 1.0, %v15434_v9  ;;  %10730 = vlog2.f32 %v9130_v2  ;;  %v9448_v25 = vmul.f32 -0.5, %v15434_v9  ;;  %v9125_v17 = vadd.f32 1.0, %v9124_v56 }
 0x6d1   :  { %v15445_v27 = vpop.eup %10716  ;;  %vm15454_vm5 = vcmp.lt.f32.partialorder %v9127_v55, 0.0004427343  ;;  %v9136_v58 = vand.u32 2147483647, %v10713_v53  ;;  %v8845_v61 = vmul.f32 1.442695, %v8749_v3  ;;  %v9441_v24 = vmul.f32 %v10709_v33, %v9440_v13 }
 0x6d2   :  { %10732 = vlog2.f32 %v9445_v11  ;;  %v9454_v4 = vadd.f32 1.0, %v15445_v27  ;;  %v9451_v28 = vand.u32 2147483647, %v15434_v9  ;;  %v9457_v51 = vmul.f32 -0.5, %v15445_v27 }
 0x6d3   :  { %10734 = vpow2.f32 %v8915_v50  ;;  %vm8674_vm6 = vcmp.gt.f32.partialorder %v14959_v48, 20.0  ;;  %v9134_v22 = vadd.f32 1.0, %v9133_v10  ;;  %v9449_v5 = vadd.f32 1.0, %v9448_v25 }
 0x6d4   :  { %v10719_v15 = vpop.eup %10718  ;;  %10736 = vlog2.f32 %v9454_v4  ;;  %vm8709_vm12 = vcmp.gt.f32.partialorder %v14972_v29, 20.0  ;;  %v9460_v45 = vand.u32 2147483647, %v15445_v27  ;;  %v9126_v20 = vmul.f32 %v15428_v41, %v9125_v17 }
 0x6d5   :  { %v10721_v38 = vpop.eup %10720  ;;  %v9429_v47 = vmul.f32 0.6931472, %v10719_v15  ;;  %10738 = vpow2.f32 %v8845_v61  ;;  %vm15482_vm13 = vcmp.lt.f32.partialorder %v9136_v58, 0.0004427343  ;;  %vm15491_vm4 = vcmp.lt.f32.partialorder %v9451_v28, 0.0004427343 }
 0x6d6   :  { %v15458_v0 = vpop.eup %10722  ;;  %v9438_v43 = vmul.f32 0.6931472, %v10721_v38  ;;  %vm8710_vm11 = vcmp.gt.f32.partialorder %v14989_v16, 20.0  ;;  %v9135_v56 = vmul.f32 %v10713_v53, %v9134_v22  ;;  %v9450_v13 = vmul.f32 %v15434_v9, %v9449_v5 }
 0x6d7   :  { %v9435_v30 = vsel %vm15438_vm14, %v9432_v37, %v9429_v47  ;;  %v9139_v60 = vadd.f32 1.0, %v15458_v0  ;;  %v15466_v52 = vpop.eup %10724  ;;  %v9142_v55 = vmul.f32 -0.5, %v15458_v0  ;;  %v9145_v2 = vand.u32 2147483647, %v15458_v0 }
 0x6d8   :  { %v9643_v63 = vsel %vm8707_vm9, %v14927_v26, %v9435_v30  ;;  %v9444_v33 = vsel %vm15447_vm3, %v9441_v24, %v9438_v43  ;;  %v10727_v57 = vpop.eup %10726  ;;  %v9148_v41 = vadd.f32 1.0, %v15466_v52  ;;  %vm15503_vm15 = vcmp.lt.f32.partialorder %v9460_v45, 0.0004427343 }
 0x6d9   :  { %9715 = vst [vmem:[%s15906_s6 + $0x1b0] sm:$0xff] %v9643_v63  ;;  %v9644_v49 = vsel %vm8708_vm10, %v14939_v31, %v9444_v33  ;;  %10740 = vlog2.f32 %v9139_v60  ;;  %v15486_v34 = vpop.eup %10728  ;;  %v9123_v40 = vmul.f32 0.6931472, %v10727_v57  ;;  %v9458_v31 = vadd.f32 1.0, %v9457_v51 }
 0x6da   :  { %9716 = vst [vmem:[%s15906_s6 + $0x1b8] sm:$0xff] %v9644_v49  ;;  %v9463_v42 = vadd.f32 1.0, %v15486_v34  ;;  %v10731_v11 = vpop.eup %10730  ;;  %10742 = vlog2.f32 %v9148_v41  ;;  %v9151_v25 = vmul.f32 -0.5, %v15466_v52  ;;  %vm8675_vm0 = vcmp.gt.f32.partialorder %v15010_v35, 20.0 }
 0x6db   :  { %v9129_v3 = vsel %vm15454_vm5, %v9126_v20, %v9123_v40  ;;  %v9132_v10 = vmul.f32 0.6931472, %v10731_v11  ;;  %v9459_v15 = vmul.f32 %v15445_v27, %v9458_v31  ;;  %v9466_v37 = vmul.f32 -0.5, %v15486_v34 }
 0x6dc   :  { %v10733_v50 = vpop.eup %10732  ;;  %v9609_v53 = vsel %vm8673_vm2, %v14952_v7, %v9129_v3  ;;  %10744 = vlog2.f32 %v9463_v42  ;;  %v8750_v17 = vmin.f32 %v15064_v12, 20.0  ;;  %v9143_v38 = vadd.f32 1.0, %v9142_v55 }
 0x6dd   :  { %v15511_v4 = vpop.eup %10734  ;;  %9681 = vst [vmem:[%s15906_s6 + $0xa0] sm:$0xff] %v9609_v53  ;;  %v9447_v9 = vmul.f32 0.6931472, %v10733_v50  ;;  %v9138_v8 = vsel %vm15482_vm13, %v9135_v56, %v9132_v10  ;;  %vm15522_vm1 = vcmp.lt.f32.partialorder %v9145_v2, 0.0004427343  ;;  %vm8676_vm7 = vcmp.gt.f32.partialorder %v15017_v62, 20.0 }
 0x6de   :  { %v10737_v7 = vpop.eup %10736  ;;  %v9472_v58 = vadd.f32 1.0, %v15511_v4  ;;  %v9610_v27 = vsel %vm8674_vm6, %v14959_v48, %v9138_v8  ;;  %v9154_v24 = vand.u32 2147483647, %v15466_v52  ;;  %v9152_v51 = vadd.f32 1.0, %v9151_v25  ;;  %v16550_v53 = vld [vmem:[#allocation7_spill] sm:$0xff] }
 0x6df   :  { %v9453_v61 = vsel %vm15491_vm4, %v9450_v13, %v9447_v9  ;;  %v9456_v43 = vmul.f32 0.6931472, %v10737_v7  ;;  %9682 = vst [vmem:[%s15906_s6 + $0xa8] sm:$0xff] %v9610_v27  ;;  %v8847_v30 = vmul.f32 1.442695, %v8750_v17  ;;  %v15540_v48 = vpop.eup %10738  ;;  %vm8711_vm8 = vcmp.gt.f32.partialorder %v15027_v18, 20.0 }
 0x6e0   :  { %v9645_v28 = vsel %vm8709_vm12, %v14972_v29, %v9453_v61  ;;  %10746 = vlog2.f32 %v9472_v58  ;;  %v9467_v5 = vadd.f32 1.0, %v9466_v37  ;;  %v9469_v60 = vand.u32 2147483647, %v15486_v34  ;;  %v16554_v61 = vld [vmem:[#allocation33_spill] sm:$0xff] }
 0x6e1   :  { %9717 = vst [vmem:[%s15906_s6 + $0x1c0] sm:$0xff] %v9645_v28  ;;  %v9462_v22 = vsel %vm15503_vm15, %v9459_v15, %v9456_v43  ;;  %v8785_v29 = vmin.f32 %v15071_v54, 20.0  ;;  %v9144_v45 = vmul.f32 %v15458_v0, %v9143_v38  ;;  %v9475_v57 = vmul.f32 -0.5, %v15511_v4  ;;  %v16555_v28 = vld [vmem:[#allocation14_spill] sm:$0xff] }
 0x6e2   :  { %v9646_v33 = vsel %vm8710_vm11, %v14989_v16, %v9462_v22  ;;  %v9157_v49 = vadd.f32 1.0, %v15540_v48  ;;  %vm15559_vm9 = vcmp.lt.f32.partialorder %v9154_v24, 0.0004427343  ;;  %10748 = vpow2.f32 %v8847_v30 }
 0x6e3   :  { %v10741_v63 = vpop.eup %10740  ;;  %9718 = vst [vmem:[%s15906_s6 + $0x1c8] sm:$0xff] %v9646_v33  ;;  %v8917_v40 = vmul.f32 1.442695, %v8785_v29  ;;  %v9153_v32 = vmul.f32 %v15466_v52, %v9152_v51  ;;  %v9478_v16 = vand.u32 2147483647, %v15511_v4  ;;  %v8786_v0 = vmin.f32 %v15073_v21, 20.0 }
 0x6e4   :  { %v9141_v20 = vmul.f32 0.6931472, %v10741_v63  ;;  %10750 = vlog2.f32 %v9157_v49  ;;  %v10743_v31 = vpop.eup %10742  ;;  %v9468_v56 = vmul.f32 %v15486_v34, %v9467_v5  ;;  %vm15569_vm14 = vcmp.lt.f32.partialorder %v9469_v60, 0.0004427343  ;;  %v16556_v5 = vld [vmem:[#allocation41_spill] sm:$0xff] }
 0x6e5   :  { %10752 = vpow2.f32 %v8917_v40  ;;  %v9150_v42 = vmul.f32 0.6931472, %v10743_v31  ;;  %v9476_v11 = vadd.f32 1.0, %v9475_v57  ;;  %v8919_v3 = vmul.f32 1.442695, %v8786_v0 }
 0x6e6   :  { %v9147_v41 = vsel %vm15522_vm1, %v9144_v45, %v9141_v20  ;;  %v10745_v2 = vpop.eup %10744  ;;  %v9160_v34 = vmul.f32 -0.5, %v15540_v48  ;;  %v8751_v50 = vmin.f32 %v16549_v46, 20.0  ;;  %v8752_v10 = vmin.f32 %v16550_v53, 20.0 }
 0x6e7   :  { %v9611_v52 = vsel %vm8675_vm0, %v15010_v35, %v9147_v41  ;;  %v9465_v13 = vmul.f32 0.6931472, %v10745_v2  ;;  %v9156_v25 = vsel %vm15559_vm9, %v9153_v32, %v9150_v42  ;;  %vm15584_vm10 = vcmp.lt.f32.partialorder %v9478_v16, 0.0004427343  ;;  %v16553_v35 = vld [vmem:[#allocation11_spill] sm:$0xff] }
 0x6e8   :  { %9683 = vst [vmem:[%s15906_s6 + $0xb0] sm:$0xff] %v9611_v52  ;;  %10754 = vpow2.f32 %v8919_v3  ;;  %v8787_v15 = vmin.f32 %v16553_v35, 20.0  ;;  %v9612_v37 = vsel %vm8676_vm7, %v15017_v62, %v9156_v25  ;;  %v8849_v7 = vmul.f32 1.442695, %v8751_v50  ;;  %v16557_v52 = vld [vmem:[#allocation23_spill] sm:$0xff] }
 0x6e9   :  { %v9471_v17 = vsel %vm15569_vm14, %v9468_v56, %v9465_v13  ;;  %v8851_v8 = vmul.f32 1.442695, %v8752_v10  ;;  %9684 = vst [vmem:[%s15906_s6 + $0xb8] sm:$0xff] %v9612_v37  ;;  %v9477_v58 = vmul.f32 %v15511_v4, %v9476_v11  ;;  %v8788_v43 = vmin.f32 %v16554_v61, 20.0 }
 0x6ea   :  { %v10747_v38 = vpop.eup %10746  ;;  %v9647_v47 = vsel %vm8711_vm8, %v15027_v18, %v9471_v17  ;;  %v8921_v27 = vmul.f32 1.442695, %v8787_v15  ;;  %v9161_v24 = vadd.f32 1.0, %v9160_v34  ;;  %10756 = vpow2.f32 %v8849_v7 }
 0x6eb   :  { %9719 = vst [vmem:[%s15906_s6 + $0x1d0] sm:$0xff] %v9647_v47  ;;  %v9474_v62 = vmul.f32 0.6931472, %v10747_v38  ;;  %v8753_v51 = vmin.f32 %v16555_v28, 20.0  ;;  %v9163_v30 = vand.u32 2147483647, %v15540_v48  ;;  %10758 = vpow2.f32 %v8851_v8 }
 0x6ec   :  { %v8923_v22 = vmul.f32 1.442695, %v8788_v43  ;;  %v8754_v18 = vmin.f32 %v16556_v5, 20.0  ;;  %v10749_v60 = vpop.eup %10748  ;;  %vm8712_vm3 = vcmp.gt.f32.partialorder %v15036_v59, 20.0  ;;  %10760 = vpow2.f32 %v8921_v27 }
 0x6ed   :  { %v9480_v4 = vsel %vm15584_vm10, %v9477_v58, %v9474_v62  ;;  %v8853_v29 = vmul.f32 1.442695, %v8753_v51  ;;  %v9166_v45 = vadd.f32 1.0, %v10749_v60  ;;  %v9169_v57 = vmul.f32 -0.5, %v10749_v60  ;;  %v16562_v62 = vld [vmem:[#allocation34_spill] sm:$0xff] }
 0x6ee   :  { %v10751_v63 = vpop.eup %10750  ;;  %v9648_v33 = vsel %vm8712_vm3, %v15036_v59, %v9480_v4  ;;  %vm8677_vm2 = vcmp.gt.f32.partialorder %v15054_v23, 20.0  ;;  %v9162_v26 = vmul.f32 %v15540_v48, %v9161_v24  ;;  %10762 = vpow2.f32 %v8923_v22  ;;  %v16574_v22 = vld [vmem:[#allocation35_spill] sm:$0xff] }
 0x6ef   :  { %v10753_v49 = vpop.eup %10752  ;;  %9720 = vst [vmem:[%s15906_s6 + $0x1d8] sm:$0xff] %v9648_v33  ;;  %v9159_v20 = vmul.f32 0.6931472, %v10751_v63  ;;  %vm9164_vm5 = vcmp.lt.f32.partialorder %v9163_v30, 0.0004427343  ;;  %10764 = vlog2.f32 %v9166_v45  ;;  %v9170_v56 = vadd.f32 1.0, %v9169_v57 }
 0x6f0   :  { %v9481_v40 = vadd.f32 1.0, %v10753_v49  ;;  %v8855_v32 = vmul.f32 1.442695, %v8754_v18  ;;  %v9172_v0 = vand.u32 2147483647, %v10749_v60  ;;  %v9484_v59 = vmul.f32 -0.5, %v10753_v49 }
 0x6f1   :  { %v9165_v16 = vsel %vm9164_vm5, %v9162_v26, %v9159_v20  ;;  %10766 = vpow2.f32 %v8853_v29  ;;  %v9487_v55 = vand.u32 2147483647, %v10753_v49  ;;  %v8789_v42 = vmin.f32 %v16557_v52, 20.0 }
 0x6f2   :  { %v10755_v31 = vpop.eup %10754  ;;  %v9613_v41 = vsel %vm8677_vm2, %v15054_v23, %v9165_v16  ;;  %10768 = vlog2.f32 %v9481_v40  ;;  %vm8678_vm6 = vcmp.gt.f32.partialorder %v15064_v12, 20.0  ;;  %vm15623_vm12 = vcmp.lt.f32.partialorder %v9172_v0, 0.0004427343 }
 0x6f3   :  { %9685 = vst [vmem:[%s15906_s6 + $0xc0] sm:$0xff] %v9613_v41  ;;  %v9490_v48 = vadd.f32 1.0, %v10755_v31  ;;  %v9493_v2 = vmul.f32 -0.5, %v10755_v31  ;;  %10770 = vpow2.f32 %v8855_v32  ;;  %v9485_v23 = vadd.f32 1.0, %v9484_v59 }
 0x6f4   :  { %v10757_v11 = vpop.eup %10756  ;;  %v9171_v34 = vmul.f32 %v10749_v60, %v9170_v56  ;;  %v9496_v10 = vand.u32 2147483647, %v10755_v31  ;;  %vm8713_vm13 = vcmp.gt.f32.partialorder %v15071_v54, 20.0  ;;  %vm15628_vm4 = vcmp.lt.f32.partialorder %v9487_v55, 0.0004427343 }
 0x6f5   :  { %10772 = vlog2.f32 %v9490_v48  ;;  %v10759_v13 = vpop.eup %10758  ;;  %v9494_v50 = vadd.f32 1.0, %v9493_v2  ;;  %v9175_v25 = vadd.f32 1.0, %v10757_v11  ;;  %v9178_v37 = vmul.f32 -0.5, %v10757_v11 }
 0x6f6   :  { %v10761_v9 = vpop.eup %10760  ;;  %v9184_v17 = vadd.f32 1.0, %v10759_v13  ;;  %v8925_v7 = vmul.f32 1.442695, %v8789_v42  ;;  %v9181_v8 = vand.u32 2147483647, %v10757_v11  ;;  %v9187_v38 = vmul.f32 -0.5, %v10759_v13 }
 0x6f7   :  { %10774 = vlog2.f32 %v9175_v25  ;;  %v9499_v47 = vadd.f32 1.0, %v10761_v9  ;;  %v9486_v27 = vmul.f32 %v10753_v49, %v9485_v23  ;;  %v9502_v43 = vmul.f32 -0.5, %v10761_v9 }
 0x6f8   :  { %v10763_v58 = vpop.eup %10762  ;;  %10776 = vlog2.f32 %v9184_v17  ;;  %v8790_v24 = vmin.f32 %v16562_v62, 20.0  ;;  %vm8714_vm11 = vcmp.gt.f32.partialorder %v15073_v21, 20.0  ;;  %v9495_v30 = vmul.f32 %v10755_v31, %v9494_v50 }
 0x6f9   :  { %v10765_v51 = vpop.eup %10764  ;;  %vm15634_vm15 = vcmp.lt.f32.partialorder %v9496_v10, 0.0004427343  ;;  %10778 = vlog2.f32 %v9499_v47  ;;  %v9508_v18 = vadd.f32 1.0, %v10763_v58  ;;  %v9179_v29 = vadd.f32 1.0, %v9178_v37 }
 0x6fa   :  { %v9168_v4 = vmul.f32 0.6931472, %v10765_v51  ;;  %v9190_v63 = vand.u32 2147483647, %v10759_v13  ;;  %v9511_v33 = vmul.f32 -0.5, %v10763_v58  ;;  %v9188_v49 = vadd.f32 1.0, %v9187_v38 }
 0x6fb   :  { %v15638_v60 = vpop.eup %10766  ;;  %vm15640_vm0 = vcmp.lt.f32.partialorder %v9181_v8, 0.0004427343  ;;  %v9505_v20 = vand.u32 2147483647, %v10761_v9  ;;  %10780 = vlog2.f32 %v9508_v18  ;;  %vm8679_vm1 = vcmp.gt.f32.partialorder %v16549_v46, 20.0 }
 0x6fc   :  { %v10769_v45 = vpop.eup %10768  ;;  %v9193_v26 = vadd.f32 1.0, %v15638_v60  ;;  %v9174_v40 = vsel %vm15623_vm12, %v9171_v34, %v9168_v4  ;;  %v9503_v16 = vadd.f32 1.0, %v9502_v43  ;;  %v9514_v0 = vand.u32 2147483647, %v10763_v58 }
 0x6fd   :  { %v9483_v32 = vmul.f32 0.6931472, %v10769_v45  ;;  %v15648_v59 = vpop.eup %10770  ;;  %v9614_v31 = vsel %vm8678_vm6, %v15064_v12, %v9174_v40  ;;  %vm8680_vm7 = vcmp.gt.f32.partialorder %v16550_v53, 20.0  ;;  %v9512_v41 = vadd.f32 1.0, %v9511_v33  ;;  %v16575_v45 = vld [vmem:[#allocation32_spill] sm:$0xff] }
 0x6fe   :  { %10782 = vlog2.f32 %v9193_v26  ;;  %v9196_v56 = vmul.f32 -0.5, %v15638_v60  ;;  %9686 = vst [vmem:[%s15906_s6 + $0xc8] sm:$0xff] %v9614_v31  ;;  %v9180_v2 = vmul.f32 %v10757_v11, %v9179_v29  ;;  %vm15660_vm8 = vcmp.lt.f32.partialorder %v9190_v63, 0.0004427343  ;;  %v16576_v31 = vld [vmem:[#allocation42_spill] sm:$0xff] }
 0x6ff   :  { %v10773_v55 = vpop.eup %10772  ;;  %v9489_v48 = vsel %vm15628_vm4, %v9486_v27, %v9483_v32  ;;  %vm8715_vm9 = vcmp.gt.f32.partialorder %v16553_v35, 20.0  ;;  %v9202_v12 = vadd.f32 1.0, %v15648_v59  ;;  %v9189_v34 = vmul.f32 %v10759_v13, %v9188_v49 }
 0x700   :  { %v9649_v3 = vsel %vm8713_vm13, %v15071_v54, %v9489_v48  ;;  %v9492_v23 = vmul.f32 0.6931472, %v10773_v55  ;;  %vm15669_vm14 = vcmp.lt.f32.partialorder %v9505_v20, 0.0004427343  ;;  %v9504_v11 = vmul.f32 %v10761_v9, %v9503_v16 }
 0x701   :  { %9721 = vst [vmem:[%s15906_s6 + $0x1e0] sm:$0xff] %v9649_v3  ;;  %vm8716_vm10 = vcmp.gt.f32.partialorder %v16554_v61, 20.0  ;;  %v9197_v10 = vadd.f32 1.0, %v9196_v56  ;;  %10784 = vlog2.f32 %v9202_v12  ;;  %v8927_v25 = vmul.f32 1.442695, %v8790_v24  ;;  %v10775_v15 = vpop.eup %10774 }
 0x702   :  { %v9498_v54 = vsel %vm15634_vm15, %v9495_v30, %v9492_v23  ;;  %v9513_v37 = vmul.f32 %v10763_v58, %v9512_v41  ;;  %vm15679_vm3 = vcmp.lt.f32.partialorder %v9514_v0, 0.0004427343  ;;  %10786 = vpow2.f32 %v8925_v7  ;;  %v10777_v17 = vpop.eup %10776  ;;  %v16573_v7 = vld [vmem:[#allocation5_spill] sm:$0xff] }
 0x703   :  { %v9650_v9 = vsel %vm8714_vm11, %v15073_v21, %v9498_v54  ;;  %v9177_v8 = vmul.f32 0.6931472, %v10775_v15  ;;  %v9199_v38 = vand.u32 2147483647, %v15638_v60  ;;  %10788 = vpow2.f32 %v8927_v25  ;;  %v10779_v47 = vpop.eup %10778 }
 0x704   :  { %9722 = vst [vmem:[%s15906_s6 + $0x1e8] sm:$0xff] %v9650_v9  ;;  %v9186_v58 = vmul.f32 0.6931472, %v10777_v17  ;;  %v9205_v27 = vmul.f32 -0.5, %v15648_v59  ;;  %v9208_v43 = vand.u32 2147483647, %v15648_v59  ;;  %v9198_v30 = vmul.f32 %v15638_v60, %v9197_v10 }
 0x705   :  { %v8755_v24 = vmin.f32 %v16573_v7, 20.0  ;;  %v9183_v51 = vsel %vm15640_vm0, %v9180_v2, %v9177_v8  ;;  %v9501_v21 = vmul.f32 0.6931472, %v10779_v47  ;;  %v8756_v18 = vmin.f32 %v16574_v22, 20.0  ;;  %v10781_v4 = vpop.eup %10780 }
 0x706   :  { %v9615_v29 = vsel %vm8679_vm1, %v16549_v46, %v9183_v51  ;;  %v9192_v63 = vsel %vm15660_vm8, %v9189_v34, %v9186_v58  ;;  %v8791_v49 = vmin.f32 %v16575_v45, 20.0  ;;  %v9510_v20 = vmul.f32 0.6931472, %v10781_v4 }
 0x707   :  { %v8857_v33 = vmul.f32 1.442695, %v8755_v24  ;;  %9687 = vst [vmem:[%s15906_s6 + $0xd0] sm:$0xff] %v9615_v29  ;;  %v9616_v60 = vsel %vm8680_vm7, %v16550_v53, %v9192_v63  ;;  %v9507_v57 = vsel %vm15669_vm14, %v9504_v11, %v9501_v21  ;;  %v8859_v26 = vmul.f32 1.442695, %v8756_v18 }
 0x708   :  { %v10783_v46 = vpop.eup %10782  ;;  %9688 = vst [vmem:[%s15906_s6 + $0xd8] sm:$0xff] %v9616_v60  ;;  %v9651_v40 = vsel %vm8715_vm9, %v16553_v35, %v9507_v57  ;;  %v9206_v32 = vadd.f32 1.0, %v9205_v27  ;;  %v8929_v16 = vmul.f32 1.442695, %v8791_v49  ;;  %v9516_v53 = vsel %vm15679_vm3, %v9513_v37, %v9510_v20  ;;  %v16577_v37 = vld [vmem:[#allocation13_spill] sm:$0xff] }
 0x709   :  { %10790 = vpow2.f32 %v8857_v33  ;;  %9723 = vst [vmem:[%s15906_s6 + $0x1f0] sm:$0xff] %v9651_v40  ;;  %v9195_v0 = vmul.f32 0.6931472, %v10783_v46  ;;  %v8792_v41 = vmin.f32 %v16576_v31, 20.0  ;;  %v9652_v56 = vsel %vm8716_vm10, %v16554_v61, %v9516_v53 }
 0x70a   :  { %10792 = vpow2.f32 %v8859_v26  ;;  %vm9200_vm2 = vcmp.lt.f32.partialorder %v9199_v38, 0.0004427343  ;;  %v8757_v35 = vmin.f32 %v15172_v36, 20.0  ;;  %9724 = vst [vmem:[%s15906_s6 + $0x1f8] sm:$0xff] %v9652_v56  ;;  %vm8681_vm5 = vcmp.gt.f32.partialorder %v16555_v28, 20.0 }
 0x70b   :  { %10794 = vpow2.f32 %v8929_v16  ;;  %v10785_v55 = vpop.eup %10784  ;;  %v9201_v48 = vsel %vm9200_vm2, %v9198_v30, %v9195_v0  ;;  %v8931_v2 = vmul.f32 1.442695, %v8792_v41  ;;  %v9207_v23 = vmul.f32 %v15648_v59, %v9206_v32 }
 0x70c   :  { %v10787_v42 = vpop.eup %10786  ;;  %v9617_v12 = vsel %vm8681_vm5, %v16555_v28, %v9201_v48  ;;  %v9204_v3 = vmul.f32 0.6931472, %v10785_v55  ;;  %v8758_v61 = vmin.f32 %v15179_v39, 20.0  ;;  %vm9209_vm6 = vcmp.lt.f32.partialorder %v9208_v43, 0.0004427343 }
 0x70d   :  { %v10789_v34 = vpop.eup %10788  ;;  %9689 = vst [vmem:[%s15906_s6 + $0xe0] sm:$0xff] %v9617_v12  ;;  %v9517_v50 = vadd.f32 1.0, %v10787_v42  ;;  %10796 = vpow2.f32 %v8931_v2  ;;  %v8861_v11 = vmul.f32 1.442695, %v8757_v35  ;;  %vm8682_vm12 = vcmp.gt.f32.partialorder %v16556_v5, 20.0 }
 0x70e   :  { %v9210_v10 = vsel %vm9209_vm6, %v9207_v23, %v9204_v3  ;;  %v9526_v25 = vadd.f32 1.0, %v10789_v34  ;;  %v9520_v59 = vmul.f32 -0.5, %v10787_v42  ;;  %v8863_v15 = vmul.f32 1.442695, %v8758_v61 }
 0x70f   :  { %v9618_v28 = vsel %vm8682_vm12, %v16556_v5, %v9210_v10  ;;  %10798 = vlog2.f32 %v9517_v50  ;;  %v9529_v54 = vmul.f32 -0.5, %v10789_v34  ;;  %v8793_v13 = vmin.f32 %v16577_v37, 20.0 }
 0x710   :  { %9690 = vst [vmem:[%s15906_s6 + $0xe8] sm:$0xff] %v9618_v28  ;;  %10800 = vlog2.f32 %v9526_v25  ;;  %v9523_v8 = vand.u32 2147483647, %v10787_v42  ;;  %v8794_v47 = vmin.f32 %v15202_v14, 20.0  ;;  %vm8717_vm13 = vcmp.gt.f32.partialorder %v16557_v52, 20.0 }
 0x711   :  { %10802 = vpow2.f32 %v8861_v11  ;;  %v9521_v58 = vadd.f32 1.0, %v9520_v59  ;;  %v9532_v27 = vand.u32 2147483647, %v10789_v34  ;;  %v9530_v24 = vadd.f32 1.0, %v9529_v54 }
 0x712   :  { %10804 = vpow2.f32 %v8863_v15  ;;  %v8933_v21 = vmul.f32 1.442695, %v8793_v13  ;;  %vm8718_vm4 = vcmp.gt.f32.partialorder %v16562_v62, 20.0  ;;  %vm15751_vm11 = vcmp.lt.f32.partialorder %v9523_v8, 0.0004427343 }
 0x713   :  { %v10791_v17 = vpop.eup %10790  ;;  %v8935_v33 = vmul.f32 1.442695, %v8794_v47  ;;  %v9522_v49 = vmul.f32 %v10787_v42, %v9521_v58  ;;  %vm15755_vm15 = vcmp.lt.f32.partialorder %v9532_v27, 0.0004427343  ;;  %v8759_v20 = vmin.f32 %v15251_v19, 20.0 }
 0x714   :  { %v10793_v9 = vpop.eup %10792  ;;  %v9211_v38 = vadd.f32 1.0, %v10791_v17  ;;  %v9214_v30 = vmul.f32 -0.5, %v10791_v17  ;;  %v9217_v18 = vand.u32 2147483647, %v10791_v17  ;;  %v9531_v46 = vmul.f32 %v10789_v34, %v9530_v24 }
 0x715   :  { %v15744_v5 = vpop.eup %10794  ;;  %v9220_v43 = vadd.f32 1.0, %v10793_v9  ;;  %v9223_v63 = vmul.f32 -0.5, %v10793_v9  ;;  %v9226_v40 = vand.u32 2147483647, %v10793_v9  ;;  %vm8683_vm0 = vcmp.gt.f32.partialorder %v16573_v7, 20.0 }
 0x716   :  { %10806 = vlog2.f32 %v9211_v38  ;;  %v9535_v51 = vadd.f32 1.0, %v15744_v5  ;;  %v9538_v32 = vmul.f32 -0.5, %v15744_v5  ;;  %v9215_v0 = vadd.f32 1.0, %v9214_v30 }
 0x717   :  { %10808 = vlog2.f32 %v9220_v43  ;;  %v15749_v4 = vpop.eup %10796  ;;  %vm15763_vm1 = vcmp.lt.f32.partialorder %v9217_v18, 0.0004427343  ;;  %vm8684_vm7 = vcmp.gt.f32.partialorder %v16574_v22, 20.0  ;;  %v9224_v55 = vadd.f32 1.0, %v9223_v63 }
 0x718   :  { %10810 = vlog2.f32 %v9535_v51  ;;  %v9544_v57 = vadd.f32 1.0, %v15749_v4  ;;  %v9541_v48 = vand.u32 2147483647, %v15744_v5  ;;  %vm8719_vm8 = vcmp.gt.f32.partialorder %v16575_v45, 20.0 }
 0x719   :  { %v10799_v26 = vpop.eup %10798  ;;  %10812 = vpow2.f32 %v8933_v21  ;;  %v9547_v12 = vmul.f32 -0.5, %v15749_v4  ;;  %v8865_v23 = vmul.f32 1.442695, %v8759_v20  ;;  %v9539_v50 = vadd.f32 1.0, %v9538_v32 }
 0x71a   :  { %v10801_v16 = vpop.eup %10800  ;;  %v9519_v53 = vmul.f32 0.6931472, %v10799_v26  ;;  %10814 = vlog2.f32 %v9544_v57  ;;  %vm15790_vm9 = vcmp.lt.f32.partialorder %v9226_v40, 0.0004427343  ;;  %v9216_v59 = vmul.f32 %v10791_v17, %v9215_v0 }
 0x71b   :  { %v15767_v56 = vpop.eup %10802  ;;  %v9528_v35 = vmul.f32 0.6931472, %v10801_v16  ;;  %10816 = vpow2.f32 %v8935_v33  ;;  %v9225_v15 = vmul.f32 %v10793_v9, %v9224_v55  ;;  %v8760_v54 = vmin.f32 %v15261_v44, 20.0 }
 0x71c   :  { %v15771_v2 = vpop.eup %10804  ;;  %v9525_v42 = vsel %vm15751_vm11, %v9522_v49, %v9519_v53  ;;  %v9229_v3 = vadd.f32 1.0, %v15767_v56  ;;  %vm15799_vm14 = vcmp.lt.f32.partialorder %v9541_v48, 0.0004427343  ;;  %v9548_v38 = vadd.f32 1.0, %v9547_v12 }
 0x71d   :  { %v9653_v61 = vsel %vm8717_vm13, %v16557_v52, %v9525_v42  ;;  %v9534_v34 = vsel %vm15755_vm15, %v9531_v46, %v9528_v35  ;;  %v9238_v11 = vadd.f32 1.0, %v15771_v2  ;;  %v9550_v52 = vand.u32 2147483647, %v15749_v4 }
 0x71e   :  { %9725 = vst [vmem:[%s15906_s6 + $0x200] sm:$0xff] %v9653_v61  ;;  %v9654_v10 = vsel %vm8718_vm4, %v16562_v62, %v9534_v34  ;;  %10818 = vlog2.f32 %v9229_v3  ;;  %v9540_v27 = vmul.f32 %v15744_v5, %v9539_v50  ;;  %v9232_v43 = vmul.f32 -0.5, %v15767_v56 }
 0x71f   :  { %9726 = vst [vmem:[%s15906_s6 + $0x208] sm:$0xff] %v9654_v10  ;;  %10820 = vlog2.f32 %v9238_v11  ;;  %v8867_v24 = vmul.f32 1.442695, %v8760_v54  ;;  %vm15807_vm10 = vcmp.lt.f32.partialorder %v9550_v52, 0.0004427343  ;;  %v9241_v21 = vmul.f32 -0.5, %v15771_v2 }
 0x720   :  { %v10807_v28 = vpop.eup %10806  ;;  %10822 = vpow2.f32 %v8865_v23  ;;  %v8795_v29 = vmin.f32 %v15269_v1, 20.0  ;;  %v9233_v46 = vadd.f32 1.0, %v9232_v43  ;;  %vm8720_vm3 = vcmp.gt.f32.partialorder %v16576_v31, 20.0 }
 0x721   :  { %v10809_v13 = vpop.eup %10808  ;;  %v9213_v8 = vmul.f32 0.6931472, %v10807_v28  ;;  %10824 = vpow2.f32 %v8867_v24  ;;  %v9242_v40 = vadd.f32 1.0, %v9241_v21  ;;  %v8796_v42 = vmin.f32 %v15282_v6, 20.0 }
 0x722   :  { %v10811_v47 = vpop.eup %10810  ;;  %v9222_v58 = vmul.f32 0.6931472, %v10809_v13  ;;  %v9234_v55 = vmul.f32 %v15767_v56, %v9233_v46  ;;  %vm8685_vm2 = vcmp.gt.f32.partialorder %v15172_v36, 20.0  ;;  %vm8686_vm12 = vcmp.gt.f32.partialorder %v15179_v39, 20.0 }
 0x723   :  { %v9219_v17 = vsel %vm15763_vm1, %v9216_v59, %v9213_v8  ;;  %v9537_v9 = vmul.f32 0.6931472, %v10811_v47  ;;  %v15812_v30 = vpop.eup %10812  ;;  %v8939_v11 = vmul.f32 1.442695, %v8796_v42  ;;  %vm8721_vm4 = vcmp.gt.f32.partialorder %v16577_v37, 20.0 }
 0x724   :  { %v9619_v18 = vsel %vm8683_vm0, %v16573_v7, %v9219_v17  ;;  %v9228_v5 = vsel %vm15790_vm9, %v9225_v15, %v9222_v58  ;;  %v10815_v63 = vpop.eup %10814  ;;  %v9549_v7 = vmul.f32 %v15749_v4, %v9548_v38  ;;  %v9553_v60 = vadd.f32 1.0, %v15812_v30 }
 0x725   :  { %9691 = vst [vmem:[%s15906_s6 + $0xf0] sm:$0xff] %v9619_v18  ;;  %v9620_v33 = vsel %vm8684_vm7, %v16574_v22, %v9228_v5  ;;  %v9543_v49 = vsel %vm15799_vm14, %v9540_v27, %v9537_v9  ;;  %v15830_v57 = vpop.eup %10816  ;;  %v9546_v26 = vmul.f32 0.6931472, %v10815_v63  ;;  %v8937_v22 = vmul.f32 1.442695, %v8795_v29 }
 0x726   :  { %9692 = vst [vmem:[%s15906_s6 + $0xf8] sm:$0xff] %v9620_v33  ;;  %v9655_v20 = vsel %vm8719_vm8, %v16575_v45, %v9543_v49  ;;  %v9235_v4 = vand.u32 2147483647, %v15767_v56  ;;  %10826 = vlog2.f32 %v9553_v60  ;;  %v9562_v32 = vadd.f32 1.0, %v15830_v57 }
 0x727   :  { %9727 = vst [vmem:[%s15906_s6 + $0x210] sm:$0xff] %v9655_v20  ;;  %v9552_v16 = vsel %vm15807_vm10, %v9549_v7, %v9546_v26  ;;  %v9244_v45 = vand.u32 2147483647, %v15771_v2  ;;  %10828 = vpow2.f32 %v8937_v22  ;;  %v9556_v48 = vmul.f32 -0.5, %v15812_v30 }
 0x728   :  { %v10819_v53 = vpop.eup %10818  ;;  %v9656_v0 = vsel %vm8720_vm3, %v16576_v31, %v9552_v16  ;;  %10830 = vlog2.f32 %v9562_v32  ;;  %vm9236_vm5 = vcmp.lt.f32.partialorder %v9235_v4, 0.0004427343  ;;  %v9243_v31 = vmul.f32 %v15771_v2, %v9242_v40 }
 0x729   :  { %v10821_v41 = vpop.eup %10820  ;;  %9728 = vst [vmem:[%s15906_s6 + $0x218] sm:$0xff] %v9656_v0  ;;  %v9231_v35 = vmul.f32 0.6931472, %v10819_v53  ;;  %vm9245_vm6 = vcmp.lt.f32.partialorder %v9244_v45, 0.0004427343  ;;  %v9565_v61 = vmul.f32 -0.5, %v15830_v57 }
 0x72a   :  { %v10823_v12 = vpop.eup %10822  ;;  %v9240_v3 = vmul.f32 0.6931472, %v10821_v41  ;;  %v9557_v52 = vadd.f32 1.0, %v9556_v48  ;;  %v9559_v2 = vand.u32 2147483647, %v15812_v30  ;;  %vm8722_vm15 = vcmp.gt.f32.partialorder %v15202_v14, 20.0 }
 0x72b   :  { %v9237_v23 = vsel %vm9236_vm5, %v9234_v55, %v9231_v35  ;;  %v9247_v34 = vadd.f32 1.0, %v10823_v12  ;;  %v10825_v10 = vpop.eup %10824  ;;  %v9566_v28 = vadd.f32 1.0, %v9565_v61  ;;  %v9568_v15 = vand.u32 2147483647, %v15830_v57 }
 0x72c   :  { %v9621_v50 = vsel %vm8685_vm2, %v15172_v36, %v9237_v23  ;;  %v9246_v56 = vsel %vm9245_vm6, %v9243_v31, %v9240_v3  ;;  %v9256_v36 = vadd.f32 1.0, %v10825_v10  ;;  %v9250_v54 = vmul.f32 -0.5, %v10823_v12 }
 0x72d   :  { %9693 = vst [vmem:[%s15906_s6 + $0x100] sm:$0xff] %v9621_v50  ;;  %v9622_v25 = vsel %vm8686_vm12, %v15179_v39, %v9246_v56  ;;  %10832 = vlog2.f32 %v9247_v34  ;;  %v9558_v39 = vmul.f32 %v15812_v30, %v9557_v52  ;;  %vm9560_vm13 = vcmp.lt.f32.partialorder %v9559_v2, 0.0004427343 }
 0x72e   :  { %9694 = vst [vmem:[%s15906_s6 + $0x108] sm:$0xff] %v9622_v25  ;;  %10834 = vpow2.f32 %v8939_v11  ;;  %v9259_v38 = vmul.f32 -0.5, %v10825_v10  ;;  %v9567_v43 = vmul.f32 %v15830_v57, %v9566_v28  ;;  %vm9569_vm11 = vcmp.lt.f32.partialorder %v9568_v15, 0.0004427343 }
 0x72f   :  { %10836 = vlog2.f32 %v9256_v36  ;;  %v9251_v17 = vadd.f32 1.0, %v9250_v54  ;;  %v9253_v51 = vand.u32 2147483647, %v10823_v12  ;;  %v9262_v33 = vand.u32 2147483647, %v10825_v10 }
 0x730   :  { %v10827_v59 = vpop.eup %10826  ;;  %v9260_v30 = vadd.f32 1.0, %v9259_v38  ;;  %vm8687_vm1 = vcmp.gt.f32.partialorder %v15251_v19, 20.0  ;;  %vm8688_vm8 = vcmp.gt.f32.partialorder %v15261_v44, 20.0  ;;  %vm8723_vm14 = vcmp.gt.f32.partialorder %v15269_v1, 20.0 }
 0x731   :  { %v10829_v13 = vpop.eup %10828  ;;  %v9555_v8 = vmul.f32 0.6931472, %v10827_v59  ;;  %v9252_v63 = vmul.f32 %v10823_v12, %v9251_v17  ;;  %vm9254_vm0 = vcmp.lt.f32.partialorder %v9253_v51, 0.0004427343  ;;  %vm9263_vm7 = vcmp.lt.f32.partialorder %v9262_v33, 0.0004427343 }
 0x732   :  { %v10831_v62 = vpop.eup %10830  ;;  %v9571_v47 = vadd.f32 1.0, %v10829_v13  ;;  %v9261_v57 = vmul.f32 %v10825_v10, %v9260_v30  ;;  %v9577_v46 = vand.u32 2147483647, %v10829_v13  ;;  %vm8724_vm3 = vcmp.gt.f32.partialorder %v15282_v6, 20.0 }
 0x733   :  { %v9561_v58 = vsel %vm9560_vm13, %v9558_v39, %v9555_v8  ;;  %v9564_v27 = vmul.f32 0.6931472, %v10831_v62 }
 0x734   :  { %v9657_v24 = vsel %vm8721_vm4, %v16577_v37, %v9561_v58  ;;  %10838 = vlog2.f32 %v9571_v47  ;;  %v9574_v37 = vmul.f32 -0.5, %v10829_v13  ;;  %vm9578_vm9 = vcmp.lt.f32.partialorder %v9577_v46, 0.0004427343 }
 0x735   :  { %9729 = vst [vmem:[%s15906_s6 + $0x220] sm:$0xff] %v9657_v24  ;;  %v9570_v9 = vsel %vm9569_vm11, %v9567_v43, %v9564_v27 }
 0x736   :  { %v9658_v21 = vsel %vm8722_vm15, %v15202_v14, %v9570_v9  ;;  %v9575_v26 = vadd.f32 1.0, %v9574_v37 }
 0x737   :  { %v10833_v18 = vpop.eup %10832  ;;  %9730 = vst [vmem:[%s15906_s6 + $0x228] sm:$0xff] %v9658_v21 }
 0x738   :  { %v10835_v5 = vpop.eup %10834  ;;  %v9249_v29 = vmul.f32 0.6931472, %v10833_v18  ;;  %v9576_v16 = vmul.f32 %v10829_v13, %v9575_v26 }
 0x739   :  { %v9580_v49 = vadd.f32 1.0, %v10835_v5  ;;  %v10837_v7 = vpop.eup %10836  ;;  %v9583_v32 = vmul.f32 -0.5, %v10835_v5  ;;  %v9586_v41 = vand.u32 2147483647, %v10835_v5 }
 0x73a   :  { %v9255_v60 = vsel %vm9254_vm0, %v9252_v63, %v9249_v29  ;;  %v9258_v20 = vmul.f32 0.6931472, %v10837_v7 }
 0x73b   :  { %v9623_v14 = vsel %vm8687_vm1, %v15251_v19, %v9255_v60  ;;  %10840 = vlog2.f32 %v9580_v49  ;;  %v9584_v0 = vadd.f32 1.0, %v9583_v32  ;;  %vm9587_vm10 = vcmp.lt.f32.partialorder %v9586_v41, 0.0004427343 }
 0x73c   :  { %9695 = vst [vmem:[%s15906_s6 + $0x110] sm:$0xff] %v9623_v14  ;;  %v9264_v22 = vsel %vm9263_vm7, %v9261_v57, %v9258_v20 }
 0x73d   :  { %v9624_v40 = vsel %vm8688_vm8, %v15261_v44, %v9264_v22  ;;  %v9585_v55 = vmul.f32 %v10835_v5, %v9584_v0 }
 0x73e   :  { %v10839_v4 = vpop.eup %10838  ;;  %9696 = vst [vmem:[%s15906_s6 + $0x118] sm:$0xff] %v9624_v40 }
 0x73f   :  { %v9573_v19 = vmul.f32 0.6931472, %v10839_v4 }
 0x741   :  { %v9579_v45 = vsel %vm9578_vm9, %v9576_v16, %v9573_v19 }
 0x742   :  { %v9659_v53 = vsel %vm8723_vm14, %v15269_v1, %v9579_v45 }
 0x743   :  { %9731 = vst [vmem:[%s15906_s6 + $0x230] sm:$0xff] %v9659_v53 }
 0x745   :  { %v10841_v44 = vpop.eup %10840 }
 0x746   :  { %v9582_v35 = vmul.f32 0.6931472, %v10841_v44 }
 0x748   :  { %v9588_v48 = vsel %vm9587_vm10, %v9585_v55, %v9582_v35 }
 0x749   :  { %v9660_v42 = vsel %vm8724_vm3, %v15282_v6, %v9588_v48 }
 0x74a   :  { %9732 = vst [vmem:[%s15906_s6 + $0x238] sm:$0xff] %v9660_v42 }

</bundles_post_ra>
